<compile_context>
chip_gen: v7x
topology: tpu7x:2x2x1
jax: 0.10.0
libtpu: 0.0.40
codegen_flags: <defaults>
</compile_context>

<pallas_src>
import functools
import math

import jax
import jax.numpy as jnp
from jax import lax
from jax.experimental import pallas as pl
from jax.experimental.pallas import tpu as pltpu


def _round_up(x, m):
    return (x + m - 1) // m * m


def _pick_tm(m, kp):
    """Adaptive M row-tile: ~4 MiB bf16 A tile, >=256 rows, prefer divisors."""
    m8 = _round_up(m, 8)
    cap = (4 * 1024 * 1024) // (2 * kp)
    cap = min(4096, max(256, (cap // 256) * 256))
    if m8 <= cap:
        return m8
    for t in range(cap, 255, -256):
        if m8 % t == 0:
            return t
    return cap


def _vmem_limit(a_bytes, w_bytes, o_bytes):
    """VMEM budget from actual tile sizes (double-buffered) + slack; clamped so
    it stays well under v7x's 64 MiB per-TC VMEM."""
    total = 2 * (a_bytes + o_bytes) + 2 * w_bytes + (6 << 20)
    return int(min(max(total, 16 << 20), 44 << 20))


# ----------------------------------------------------------------------------
# Pallas kernels
# ----------------------------------------------------------------------------
def _conv_act_kernel(a_ref, w_ref, b_ref, o_ref, *, act):
    """(1,TM,Kp) @ (Kp,Np) + bias (+ReLU/tanh), bf16 in / f32 accum."""
    acc = jnp.dot(a_ref[0], w_ref[...], preferred_element_type=jnp.float32)
    acc = acc + b_ref[...]
    if act == "relu":
        acc = jnp.maximum(acc, 0.0)
    elif act == "tanh":
        acc = jnp.tanh(acc)
    o_ref[0] = acc.astype(o_ref.dtype)


def _conv_stats_kernel(a_ref, w_ref, b_ref, o_ref, sum_ref, sq_ref, *,
                       tm, m_valid, need_mask):
    """Conv matmul + bias with per-(sample, channel) sum / sum^2 accumulated in
    the epilogue across the M grid axis (fused InstanceNorm statistics)."""
    i = pl.program_id(1)
    acc = jnp.dot(a_ref[0], w_ref[...], preferred_element_type=jnp.float32)
    acc = acc + b_ref[...]
    o_ref[0] = acc.astype(o_ref.dtype)

    if need_mask:  # mask padded (invalid) M rows out of the statistics
        row = i * tm + lax.broadcasted_iota(jnp.int32, (tm, 1), 0)
        accm = jnp.where(row < m_valid, acc, 0.0)
    else:
        accm = acc

    @pl.when(i == 0)
    def _():
        sum_ref[...] = jnp.zeros_like(sum_ref)
        sq_ref[...] = jnp.zeros_like(sq_ref)

    sum_ref[...] += jnp.sum(accm, axis=0)[None, None, :]
    sq_ref[...] += jnp.sum(accm * accm, axis=0)[None, None, :]


def _small_n_kernel(w_ref, a_ref, b_ref, o_ref, *, act):
    """Tiny-Cout conv in transposed form: (CoutP,Kp) @ (Kp,TM) + bias (+act)."""
    acc = jnp.dot(w_ref[...], a_ref[...], preferred_element_type=jnp.float32)
    acc = acc + b_ref[...]
    if act == "relu":
        acc = jnp.maximum(acc, 0.0)
    elif act == "tanh":
        acc = jnp.tanh(acc)
    o_ref[...] = acc.astype(o_ref.dtype)


def _in_apply_kernel(x_ref, sum_ref, sq_ref, o_ref, *, inv_count, act):
    """InstanceNorm2d (affine=False, eps=1e-5) normalize + optional ReLU."""
    x = x_ref[0].astype(jnp.float32)                   # (T, C)
    mean = sum_ref[0, 0] * inv_count                   # (C,)
    var = jnp.maximum(sq_ref[0, 0] * inv_count - mean * mean, 0.0)
    y = (x - mean) * lax.rsqrt(var + 1e-5)
    if act == "relu":
        y = jnp.maximum(y, 0.0)
    o_ref[0] = y.astype(o_ref.dtype)


# ----------------------------------------------------------------------------
# Conv glue (padding / im2col) — plain JAX
# ----------------------------------------------------------------------------
def _im2col_batched(x, kh, kw, stride):
    # TODO(synk): fold the kh*kw window into the matmul kernel (halo'd blocks /
    # manual DMA) to avoid materializing the im2col matrix in HBM.
    N, H, W, C = x.shape
    Ho = (H - kh) // stride + 1
    Wo = (W - kw) // stride + 1
    cols = []
    for di in range(kh):
        for dj in range(kw):
            cols.append(lax.slice(
                x, (0, di, dj, 0),
                (N, di + (Ho - 1) * stride + 1, dj + (Wo - 1) * stride + 1, C),
                (1, stride, stride, 1)))
    patches = jnp.stack(cols, axis=3)                  # (N, Ho, Wo, kh*kw, C)
    return patches.reshape(N, Ho * Wo, kh * kw * C), Ho, Wo


def conv2d_pallas(x, pw, *, stride=1, padding=0, pad_mode="constant",
                  act="none", with_stats=False):
    """Conv2d via per-sample im2col + one Pallas MXU matmul.
    with_stats=True additionally returns fused per-(n,c) sum / sum^2."""
    kh, kw, k = pw["kh"], pw["kw"], pw["k"]
    assert x.shape[-1] == pw["cin"]
    if padding:
        x = jnp.pad(x, ((0, 0), (padding, padding), (padding, padding), (0, 0)),
                    mode=pad_mode)
    N = x.shape[0]
    patches, Ho, Wo = _im2col_batched(x.astype(jnp.bfloat16), kh, kw, stride)
    M = Ho * Wo
    kp, np_ = pw["w"].shape
    tm = _pick_tm(M, kp)
    mp = _round_up(M, tm)
    if (mp, kp) != (M, k):
        patches = jnp.pad(patches, ((0, 0), (0, mp - M), (0, kp - k)))
    grid = (N, mp // tm)
    vmem = _vmem_limit(tm * kp * 2, kp * np_ * 2, tm * np_ * 2)

    in_specs = [pl.BlockSpec((1, tm, kp), lambda n, i: (n, i, 0)),
                pl.BlockSpec((kp, np_), lambda n, i: (0, 0)),   # resident weight
                pl.BlockSpec((1, np_), lambda n, i: (0, 0))]    # resident bias

    if with_stats:
        out, sums, sqs = pl.pallas_call(
            functools.partial(_conv_stats_kernel, tm=tm, m_valid=M,
                              need_mask=(mp != M)),
            out_shape=(jax.ShapeDtypeStruct((N, mp, np_), jnp.bfloat16),
                       jax.ShapeDtypeStruct((N, 1, np_), jnp.float32),
                       jax.ShapeDtypeStruct((N, 1, np_), jnp.float32)),
            grid=grid,
            in_specs=in_specs,
            out_specs=(pl.BlockSpec((1, tm, np_), lambda n, i: (n, i, 0)),
                       pl.BlockSpec((1, 1, np_), lambda n, i: (n, 0, 0)),
                       pl.BlockSpec((1, 1, np_), lambda n, i: (n, 0, 0))),
            compiler_params=pltpu.CompilerParams(
                dimension_semantics=("parallel", "arbitrary"),
                vmem_limit_bytes=vmem),
        )(patches, pw["w"], pw["b"])
        return out, sums, sqs, Ho, Wo, tm

    out = pl.pallas_call(
        functools.partial(_conv_act_kernel, act=act),
        out_shape=jax.ShapeDtypeStruct((N, mp, np_), jnp.bfloat16),
        grid=grid,
        in_specs=in_specs,
        out_specs=pl.BlockSpec((1, tm, np_), lambda n, i: (n, i, 0)),
        compiler_params=pltpu.CompilerParams(
            dimension_semantics=("parallel", "parallel"),
            vmem_limit_bytes=vmem),
    )(patches, pw["w"], pw["b"])
    return out, Ho, Wo, tm


def instance_norm_apply(x3, sums, sqs, *, count, act, tile=None):
    """Normalize (N, M, C) with pre-computed per-(n,c) f32 sums (single pass)."""
    N, M, C = x3.shape
    mpp = M
    if tile is None:
        tile = min(2048, _round_up(M, 8))
        mpp = _round_up(M, tile)
        if mpp != M:
            x3 = jnp.pad(x3, ((0, 0), (0, mpp - M), (0, 0)))
    assert mpp % tile == 0
    out = pl.pallas_call(
        functools.partial(_in_apply_kernel, inv_count=1.0 / float(count), act=act),
        out_shape=jax.ShapeDtypeStruct((N, mpp, C), jnp.bfloat16),
        grid=(N, mpp // tile),
        in_specs=[pl.BlockSpec((1, tile, C), lambda n, i: (n, i, 0)),
                  pl.BlockSpec((1, 1, C), lambda n, i: (n, 0, 0)),
                  pl.BlockSpec((1, 1, C), lambda n, i: (n, 0, 0))],
        out_specs=pl.BlockSpec((1, tile, C), lambda n, i: (n, i, 0)),
        compiler_params=pltpu.CompilerParams(
            dimension_semantics=("parallel", "parallel")),
    )(x3, sums, sqs)
    return out[:, :M] if mpp != M else out


# ----------------------------------------------------------------------------
# Layer helpers
# ----------------------------------------------------------------------------
def conv_act(x, pw, *, stride, padding, pad_mode, act):
    N = x.shape[0]
    y, Ho, Wo, _ = conv2d_pallas(x, pw, stride=stride, padding=padding,
                                 pad_mode=pad_mode, act=act, with_stats=False)
    M, cout = Ho * Wo, pw["cout"]
    if y.shape[1] != M or y.shape[2] != cout:
        y = y[:, :M, :cout]
    return y.reshape(N, Ho, Wo, cout)


def conv_in_act(x, pw, *, stride, padding, act):
    N = x.shape[0]
    y, sums, sqs, Ho, Wo, tm = conv2d_pallas(
        x, pw, stride=stride, padding=padding, pad_mode="reflect",
        with_stats=True)
    yn = instance_norm_apply(y, sums, sqs, count=Ho * Wo, act=act, tile=tm)
    M, cout = Ho * Wo, pw["cout"]
    if yn.shape[1] != M or yn.shape[2] != cout:
        yn = yn[:, :M, :cout]
    return yn.reshape(N, Ho, Wo, cout)


def conv_transpose_in_relu(x, pw_t):
    """ConvTranspose2d(k=3,s=2,p=1,op=1) + IN + ReLU via sub-pixel decomposition
    into 4 stride-1 phase convolutions.  Phase outputs are interleaved with
    stack+reshape (no strided scatter); IN stats = sum of per-phase fused stats."""
    phases, cout = pw_t["phases"], pw_t["cout"]
    N, H, W, _ = x.shape
    x_r = jnp.pad(x, ((0, 0), (0, 0), (0, 1), (0, 0)))     # pad right
    x_b = jnp.pad(x, ((0, 0), (0, 1), (0, 0), (0, 0)))     # pad bottom
    x_rb = jnp.pad(x, ((0, 0), (0, 1), (0, 1), (0, 0)))    # pad both

    ys, tot_sum, tot_sq = [], None, None
    for xin, pw in zip((x, x_r, x_b, x_rb), phases):
        y, s, q, Ho, Wo, _ = conv2d_pallas(xin, pw, stride=1, padding=0,
                                           with_stats=True)
        M = Ho * Wo                                        # == H * W per phase
        if y.shape[1] != M or y.shape[2] != cout:
            y = y[:, :M, :cout]
        ys.append(y.reshape(N, H, W, cout))
        tot_sum = s if tot_sum is None else tot_sum + s
        tot_sq = q if tot_sq is None else tot_sq + q

    y00, y01, y10, y11 = ys
    row_e = jnp.stack([y00, y01], axis=3).reshape(N, H, 2 * W, cout)
    row_o = jnp.stack([y10, y11], axis=3).reshape(N, H, 2 * W, cout)
    up = jnp.stack([row_e, row_o], axis=2).reshape(N, 2 * H, 2 * W, cout)

    outn = instance_norm_apply(up.reshape(N, 4 * H * W, cout),
                               tot_sum[:, :, :cout], tot_sq[:, :, :cout],
                               count=4 * H * W, act="relu")
    return outn.reshape(N, 2 * H, 2 * W, cout)


def conv_small_n(x, pwT, *, padding, act):
    """Conv with tiny Cout (dec3: Cout=3) in transposed orientation
    O^T = W^T @ P^T : tiny dim pads 3->8 sublanes, spatial M fills the lanes."""
    kh, kw, k, cout = pwT["kh"], pwT["kw"], pwT["k"], pwT["cout"]
    assert x.shape[-1] == pwT["cin"]
    if padding:  # dec3 uses PyTorch-default zero padding
        x = jnp.pad(x, ((0, 0), (padding, padding), (padding, padding), (0, 0)))
    x = x.astype(jnp.bfloat16)
    N, Hp, Wp, C = x.shape
    Ho, Wo = Hp - kh + 1, Wp - kw + 1
    M = N * Ho * Wo
    cols = []
    for di in range(kh):
        for dj in range(kw):
            s = lax.slice(x, (0, di, dj, 0), (N, di + Ho, dj + Wo, C))
            cols.append(jnp.transpose(s.reshape(M, C)))
    pt = jnp.concatenate(cols, axis=0)                  # (K, M) bf16, K-major
    coutp, kp = pwT["wT"].shape
    tm = min(512, _round_up(M, 128))
    mp = _round_up(M, tm)
    if (kp, mp) != (k, M):
        pt = jnp.pad(pt, ((0, kp - k), (0, mp - M)))
    vmem = _vmem_limit(kp * tm * 2, coutp * kp * 2, coutp * tm * 2)
    out = pl.pallas_call(
        functools.partial(_small_n_kernel, act=act),
        out_shape=jax.ShapeDtypeStruct((coutp, mp), jnp.bfloat16),
        grid=(mp // tm,),
        in_specs=[pl.BlockSpec((coutp, kp), lambda i: (0, 0)),   # resident W^T
                  pl.BlockSpec((kp, tm), lambda i: (0, i)),
                  pl.BlockSpec((coutp, 1), lambda i: (0, 0))],
        out_specs=pl.BlockSpec((coutp, tm), lambda i: (0, i)),
        compiler_params=pltpu.CompilerParams(
            dimension_semantics=("parallel",),
            vmem_limit_bytes=vmem),
    )(pwT["wT"], pt, pwT["bT"])
    out = out[:cout, :M]
    return jnp.transpose(out.reshape(cout, N, Ho, Wo), (1, 2, 3, 0))


# ----------------------------------------------------------------------------
# Parameter init (deterministic, PyTorch-default-style uniform) + pre-packing
# ----------------------------------------------------------------------------
def _init_conv(key, cout, cin, kh, kw=None):
    kw = kh if kw is None else kw
    k1, k2 = jax.random.split(key)
    bound = 1.0 / math.sqrt(cin * kh * kw)
    w = jax.random.uniform(k1, (cout, cin, kh, kw), jnp.float32, -bound, bound)
    b = jax.random.uniform(k2, (cout,), jnp.float32, -bound, bound)
    return w, b


def _init_convT(key, cin, cout, k):
    k1, k2 = jax.random.split(key)
    bound = 1.0 / math.sqrt(cout * k * k)
    w = jax.random.uniform(k1, (cin, cout, k, k), jnp.float32, -bound, bound)
    b = jax.random.uniform(k2, (cout,), jnp.float32, -bound, bound)
    return w, b


def _pack_conv(w, b):
    """Pre-pack a Conv2d weight ONCE at init: (kh*kw*Cin, Cout) bf16 padded to
    128-multiples + padded f32 bias row."""
    cout, cin, kh, kw = w.shape
    k = kh * kw * cin
    kp, np_ = _round_up(k, 128), _round_up(cout, 128)
    wmat = jnp.transpose(w, (2, 3, 1, 0)).reshape(k, cout)
    wmat = jnp.pad(wmat, ((0, kp - k), (0, np_ - cout))).astype(jnp.bfloat16)
    bias = jnp.pad(b.astype(jnp.float32).reshape(1, cout),
                   ((0, 0), (0, np_ - cout)))
    return dict(w=wmat, b=bias, kh=kh, kw=kw, cin=cin, cout=cout, k=k)


def _pack_conv_T(w, b):
    """Transposed packing for tiny-Cout convs (dec3): (CoutP, Kp) + (CoutP, 1)."""
    cout, cin, kh, kw = w.shape
    k = kh * kw * cin
    kp, coutp = _round_up(k, 128), _round_up(cout, 8)
    wT = jnp.transpose(w, (0, 2, 3, 1)).reshape(cout, k)
    wT = jnp.pad(wT, ((0, coutp - cout), (0, kp - k))).astype(jnp.bfloat16)
    bT = jnp.pad(b.astype(jnp.float32).reshape(cout, 1),
                 ((0, coutp - cout), (0, 0)))
    return dict(wT=wT, bT=bT, kh=kh, kw=kw, cin=cin, cout=cout, k=k)


def _pack_convT_phases(w, b):
    """Sub-pixel decomposition of ConvTranspose2d(k=3, s=2, p=1, op=1):
    flipped + channel-transposed kernel, then the 4 parity-phase taps."""
    cout = w.shape[1]
    w_conv = jnp.transpose(w[:, :, ::-1, ::-1], (1, 0, 2, 3))   # (Cout,Cin,3,3)
    taps = (w_conv[:, :, 1:2, 1:2],     # even row, even col (1x1)
            w_conv[:, :, 1:2, 0::2],    # even row, odd  col (1x2)
            w_conv[:, :, 0::2, 1:2],    # odd  row, even col (2x1)
            w_conv[:, :, 0::2, 0::2])   # odd  row, odd  col (2x2)
    return dict(phases=[_pack_conv(t, b) for t in taps], cout=cout)


def init_generator_params(key):
    keys = jax.random.split(key, 18)
    p = {}
    p["enc1"] = _pack_conv(*_init_conv(keys[0], 64, 3, 7))
    p["enc2"] = _pack_conv(*_init_conv(keys[1], 128, 64, 3))
    p["enc3"] = _pack_conv(*_init_conv(keys[2], 256, 128, 3))
    for i in range(6):
        p[f"res{i}_c1"] = _pack_conv(*_init_conv(keys[3 + 2 * i], 256, 256, 3))
        p[f"res{i}_c2"] = _pack_conv(*_init_conv(keys[4 + 2 * i], 256, 256, 3))
    p["dec1"] = _pack_convT_phases(*_init_convT(keys[15], 256, 128, 3))
    p["dec2"] = _pack_convT_phases(*_init_convT(keys[16], 128, 64, 3))
    p["dec3"] = _pack_conv_T(*_init_conv(keys[17], 3, 64, 7))
    return p


# ----------------------------------------------------------------------------
# Generator forward == CycleGAN.forward (only generatorS is used)
# ----------------------------------------------------------------------------
def generator_forward(params, x_nchw):
    x = jnp.transpose(x_nchw, (0, 2, 3, 1)).astype(jnp.bfloat16)  # NCHW -> NHWC

    e1 = conv_act(x, params["enc1"], stride=1, padding=3,
                  pad_mode="reflect", act="relu")                 # ReLU fused
    e2 = conv_in_act(e1, params["enc2"], stride=2, padding=1, act="relu")
    e3 = conv_in_act(e2, params["enc3"], stride=2, padding=1, act="relu")

    r = e3
    for i in range(6):
        # NOTE: the reference residual_block has NO skip connection — it is a
        # plain Sequential(conv, IN, ReLU, conv, IN); reproduced exactly.
        h = conv_in_act(r, params[f"res{i}_c1"], stride=1, padding=1, act="relu")
        r = conv_in_act(h, params[f"res{i}_c2"], stride=1, padding=1, act="none")

    d1 = conv_transpose_in_relu(r, params["dec1"])
    d2 = conv_transpose_in_relu(d1, params["dec2"])
    out = conv_small_n(d2, params["dec3"], padding=3, act="tanh")  # tanh fused

    return jnp.transpose(out.astype(jnp.float32), (0, 3, 1, 2))    # NHWC -> NCHW


class CycleGANPallas:
    """CycleGAN(device).forward(x) == generatorS(x)."""

    def __init__(self, key):
        kS, _kP = jax.random.split(key)
        # generatorP / discriminators exist in the torch module but are unused
        # in forward(); we only materialize generatorS here.
        self.generatorS = init_generator_params(kS)
        params = self.generatorS
        # Close over the pre-packed params: weight arrays become jit constants
        # and layer metadata (kh/kw/cin/cout/k) stays static Python ints.
        self._fwd = jax.jit(lambda x: generator_forward(params, x))

    def __call__(self, x_nchw):
        return self._fwd(x_nchw)


if __name__ == "__main__":
    key = jax.random.PRNGKey(0)
    k_params, k_x = jax.random.split(key)
    x = jax.random.normal(k_x, (2, 3, 16, 16), dtype=jnp.float32)   # NCHW

    model = CycleGANPallas(k_params)
    y = jax.block_until_ready(model(x))

    assert y.shape == (2, 3, 16, 16), y.shape
    assert bool(jnp.all(jnp.isfinite(y)))
    assert bool(jnp.all(jnp.abs(y) <= 1.0 + 1e-6))   # tanh output range
    print("KERNEL_OK")
</pallas_src>

<mosaic_0001>
module attributes {stable_mosaic.version = 11 : i64} {
  func.func @_conv_act_kernel(%arg0: i32, %arg1: i32, %arg2: memref<1x256x256xbf16, #tpu.memory_space<vmem>>, %arg3: memref<256x128xbf16, #tpu.memory_space<vmem>>, %arg4: memref<1x128xf32, #tpu.memory_space<vmem>>, %arg5: memref<1x256x128xbf16, #tpu.memory_space<vmem>>) attributes {dimension_semantics = [#tpu.dimension_semantics<parallel>, #tpu.dimension_semantics<parallel>], iteration_bounds = array<i64: 2, 1>, scalar_prefetch = 0 : i64, scratch_operands = 0 : i64, tpu.core_type = #tpu.core_type<tc>, window_params = [{transform_indices = @transform_0, window_bounds = array<i64: 1, 256, 256>}, {pipeline_mode = #tpu.pipeline_mode<synchronous>, transform_indices = @transform_1, window_bounds = array<i64: 256, 128>}, {pipeline_mode = #tpu.pipeline_mode<synchronous>, transform_indices = @transform_2, window_bounds = array<i64: 1, 128>}, {transform_indices = @transform_3, window_bounds = array<i64: 1, 256, 128>}]} {
    %c0 = arith.constant 0 : index
    %c0_0 = arith.constant 0 : index
    %c0_1 = arith.constant 0 : index
    %0 = vector.load %arg2[%c0, %c0_0, %c0_1] : memref<1x256x256xbf16, #tpu.memory_space<vmem>>, vector<1x256x256xbf16>
    %1 = vector.shape_cast %0 : vector<1x256x256xbf16> to vector<256x256xbf16>
    %c0_2 = arith.constant 0 : index
    %c0_3 = arith.constant 0 : index
    %2 = vector.load %arg3[%c0_2, %c0_3] : memref<256x128xbf16, #tpu.memory_space<vmem>>, vector<256x128xbf16>
    %cst = arith.constant dense<0.000000e+00> : vector<256x128xf32>
    %3 = tpu.matmul %1, %2, %cst {dimension_numbers = #tpu.dot_dimension_numbers<[1], [0], [0], [1], [0, 0, 1, 1], [], []>} : vector<256x256xbf16>, vector<256x128xbf16>, vector<256x128xf32> -> vector<256x128xf32>
    %c0_4 = arith.constant 0 : index
    %c0_5 = arith.constant 0 : index
    %4 = vector.load %arg4[%c0_4, %c0_5] : memref<1x128xf32, #tpu.memory_space<vmem>>, vector<1x128xf32>
    %5 = vector.broadcast %4 : vector<1x128xf32> to vector<256x128xf32>
    %6 = arith.addf %3, %5 : vector<256x128xf32>
    %cst_6 = arith.constant 0.000000e+00 : f32
    %7 = vector.broadcast %cst_6 : f32 to vector<256x128xf32>
    %8 = arith.maximumf %6, %7 : vector<256x128xf32>
    %9 = arith.truncf %8 : vector<256x128xf32> to vector<256x128xbf16>
    %c0_7 = arith.constant 0 : index
    %c0_8 = arith.constant 0 : index
    %c0_9 = arith.constant 0 : index
    %10 = vector.load %arg5[%c0_7, %c0_8, %c0_9] : memref<1x256x128xbf16, #tpu.memory_space<vmem>>, vector<1x256x128xbf16>
    %11 = vector.shape_cast %10 : vector<1x256x128xbf16> to vector<256x128xbf16>
    %12 = vector.shape_cast %9 : vector<256x128xbf16> to vector<1x256x128xbf16>
    tpu.vector_store %arg5[%c0_7, %c0_8, %c0_9], %12 {strides = array<i32>} : memref<1x256x128xbf16, #tpu.memory_space<vmem>>, vector<1x256x128xbf16>,
    return
  }
  func.func @transform_0(%arg0: i32, %arg1: i32) -> (i32, i32, i32) {
    %c0_i32 = arith.constant 0 : i32
    %c0_i32_0 = arith.constant 0 : i32
    return %arg0, %arg1, %c0_i32 : i32, i32, i32
  }
  func.func @transform_1(%arg0: i32, %arg1: i32) -> (i32, i32) {
    %c0_i32 = arith.constant 0 : i32
    %c0_i32_0 = arith.constant 0 : i32
    %c0_i32_1 = arith.constant 0 : i32
    return %c0_i32, %c0_i32_0 : i32, i32
  }
  func.func @transform_2(%arg0: i32, %arg1: i32) -> (i32, i32) {
    %c0_i32 = arith.constant 0 : i32
    %c0_i32_0 = arith.constant 0 : i32
    %c0_i32_1 = arith.constant 0 : i32
    return %c0_i32, %c0_i32_0 : i32, i32
  }
  func.func @transform_3(%arg0: i32, %arg1: i32) -> (i32, i32, i32) {
    %c0_i32 = arith.constant 0 : i32
    %c0_i32_0 = arith.constant 0 : i32
    return %arg0, %arg1, %c0_i32 : i32, i32, i32
  }
}

module attributes {stable_mosaic.version = 11 : i64} {
  func.func @_conv_stats_kernel(%arg0: i32, %arg1: i32, %arg2: memref<1x64x640xbf16, #tpu.memory_space<vmem>>, %arg3: memref<640x128xbf16, #tpu.memory_space<vmem>>, %arg4: memref<1x128xf32, #tpu.memory_space<vmem>>, %arg5: memref<1x64x128xbf16, #tpu.memory_space<vmem>>, %arg6: memref<1x1x128xf32, #tpu.memory_space<vmem>>, %arg7: memref<1x1x128xf32, #tpu.memory_space<vmem>>) attributes {dimension_semantics = [#tpu.dimension_semantics<parallel>, #tpu.dimension_semantics<arbitrary>], iteration_bounds = array<i64: 2, 1>, scalar_prefetch = 0 : i64, scratch_operands = 0 : i64, tpu.core_type = #tpu.core_type<tc>, window_params = [{transform_indices = @transform_0, window_bounds = array<i64: 1, 64, 640>}, {pipeline_mode = #tpu.pipeline_mode<synchronous>, transform_indices = @transform_1, window_bounds = array<i64: 640, 128>}, {pipeline_mode = #tpu.pipeline_mode<synchronous>, transform_indices = @transform_2, window_bounds = array<i64: 1, 128>}, {transform_indices = @transform_3, window_bounds = array<i64: 1, 64, 128>}, {transform_indices = @transform_4, window_bounds = array<i64: 1, 1, 128>}, {transform_indices = @transform_5, window_bounds = array<i64: 1, 1, 128>}]} {
    %c0 = arith.constant 0 : index
    %c0_0 = arith.constant 0 : index
    %c0_1 = arith.constant 0 : index
    %0 = vector.load %arg2[%c0, %c0_0, %c0_1] : memref<1x64x640xbf16, #tpu.memory_space<vmem>>, vector<1x64x640xbf16>
    %1 = vector.shape_cast %0 : vector<1x64x640xbf16> to vector<64x640xbf16>
    %c0_2 = arith.constant 0 : index
    %c0_3 = arith.constant 0 : index
    %2 = vector.load %arg3[%c0_2, %c0_3] : memref<640x128xbf16, #tpu.memory_space<vmem>>, vector<640x128xbf16>
    %cst = arith.constant dense<0.000000e+00> : vector<64x128xf32>
    %3 = tpu.matmul %1, %2, %cst {dimension_numbers = #tpu.dot_dimension_numbers<[1], [0], [0], [1], [0, 0, 1, 1], [], []>} : vector<64x640xbf16>, vector<640x128xbf16>, vector<64x128xf32> -> vector<64x128xf32>
    %c0_4 = arith.constant 0 : index
    %c0_5 = arith.constant 0 : index
    %4 = vector.load %arg4[%c0_4, %c0_5] : memref<1x128xf32, #tpu.memory_space<vmem>>, vector<1x128xf32>
    %5 = vector.broadcast %4 : vector<1x128xf32> to vector<64x128xf32>
    %6 = arith.addf %3, %5 : vector<64x128xf32>
    %7 = arith.truncf %6 : vector<64x128xf32> to vector<64x128xbf16>
    %c0_6 = arith.constant 0 : index
    %c0_7 = arith.constant 0 : index
    %c0_8 = arith.constant 0 : index
    %8 = vector.load %arg5[%c0_6, %c0_7, %c0_8] : memref<1x64x128xbf16, #tpu.memory_space<vmem>>, vector<1x64x128xbf16>
    %9 = vector.shape_cast %8 : vector<1x64x128xbf16> to vector<64x128xbf16>
    %10 = vector.shape_cast %7 : vector<64x128xbf16> to vector<1x64x128xbf16>
    tpu.vector_store %arg5[%c0_6, %c0_7, %c0_8], %10 {strides = array<i32>} : memref<1x64x128xbf16, #tpu.memory_space<vmem>>, vector<1x64x128xbf16>,
    %c0_i32 = arith.constant 0 : i32
    %11 = arith.cmpi eq, %arg1, %c0_i32 : i32
    %12 = arith.extui %11 : i1 to i32
    %c0_i32_9 = arith.constant 0 : i32
    %13 = arith.cmpi ne, %12, %c0_i32_9 : i32
    scf.if %13 {
      %cst_24 = arith.constant 0.000000e+00 : f32
      %25 = vector.broadcast %cst_24 : f32 to vector<1x1x128xf32>
      %c0_25 = arith.constant 0 : index
      %c0_26 = arith.constant 0 : index
      %c0_27 = arith.constant 0 : index
      %26 = vector.load %arg6[%c0_25, %c0_26, %c0_27] : memref<1x1x128xf32, #tpu.memory_space<vmem>>, vector<1x1x128xf32>
      tpu.vector_store %arg6[%c0_25, %c0_26, %c0_27], %25 {strides = array<i32>} : memref<1x1x128xf32, #tpu.memory_space<vmem>>, vector<1x1x128xf32>,
      %cst_28 = arith.constant 0.000000e+00 : f32
      %27 = vector.broadcast %cst_28 : f32 to vector<1x1x128xf32>
      %c0_29 = arith.constant 0 : index
      %c0_30 = arith.constant 0 : index
      %c0_31 = arith.constant 0 : index
      %28 = vector.load %arg7[%c0_29, %c0_30, %c0_31] : memref<1x1x128xf32, #tpu.memory_space<vmem>>, vector<1x1x128xf32>
      tpu.vector_store %arg7[%c0_29, %c0_30, %c0_31], %27 {strides = array<i32>} : memref<1x1x128xf32, #tpu.memory_space<vmem>>, vector<1x1x128xf32>,
    } else {
    }
    %c0_10 = arith.constant 0 : index
    %c0_11 = arith.constant 0 : index
    %c0_12 = arith.constant 0 : index
    %14 = vector.load %arg6[%c0_10, %c0_11, %c0_12] : memref<1x1x128xf32, #tpu.memory_space<vmem>>, vector<1x1x128xf32>
    %cst_13 = arith.constant dense<0.000000e+00> : vector<128xf32>
    %15 = vector.multi_reduction <add>, %6, %cst_13 [0] : vector<64x128xf32> to vector<128xf32>
    %16 = vector.shape_cast %15 : vector<128xf32> to vector<1x1x128xf32>
    %17 = arith.addf %14, %16 : vector<1x1x128xf32>
    %c0_14 = arith.constant 0 : index
    %c0_15 = arith.constant 0 : index
    %c0_16 = arith.constant 0 : index
    %18 = vector.load %arg6[%c0_14, %c0_15, %c0_16] : memref<1x1x128xf32, #tpu.memory_space<vmem>>, vector<1x1x128xf32>
    tpu.vector_store %arg6[%c0_14, %c0_15, %c0_16], %17 {strides = array<i32>} : memref<1x1x128xf32, #tpu.memory_space<vmem>>, vector<1x1x128xf32>,
    %c0_17 = arith.constant 0 : index
    %c0_18 = arith.constant 0 : index
    %c0_19 = arith.constant 0 : index
    %19 = vector.load %arg7[%c0_17, %c0_18, %c0_19] : memref<1x1x128xf32, #tpu.memory_space<vmem>>, vector<1x1x128xf32>
    %20 = arith.mulf %6, %6 : vector<64x128xf32>
    %cst_20 = arith.constant dense<0.000000e+00> : vector<128xf32>
    %21 = vector.multi_reduction <add>, %20, %cst_20 [0] : vector<64x128xf32> to vector<128xf32>
    %22 = vector.shape_cast %21 : vector<128xf32> to vector<1x1x128xf32>
    %23 = arith.addf %19, %22 : vector<1x1x128xf32>
    %c0_21 = arith.constant 0 : index
    %c0_22 = arith.constant 0 : index
    %c0_23 = arith.constant 0 : index
    %24 = vector.load %arg7[%c0_21, %c0_22, %c0_23] : memref<1x1x128xf32, #tpu.memory_space<vmem>>, vector<1x1x128xf32>
    tpu.vector_store %arg7[%c0_21, %c0_22, %c0_23], %23 {strides = array<i32>} : memref<1x1x128xf32, #tpu.memory_space<vmem>>, vector<1x1x128xf32>,
    return
  }
  func.func @transform_0(%arg0: i32, %arg1: i32) -> (i32, i32, i32) {
    %c0_i32 = arith.constant 0 : i32
    %c0_i32_0 = arith.constant 0 : i32
    return %arg0, %arg1, %c0_i32 : i32, i32, i32
  }
  func.func @transform_1(%arg0: i32, %arg1: i32) -> (i32, i32) {
    %c0_i32 = arith.constant 0 : i32
    %c0_i32_0 = arith.constant 0 : i32
    %c0_i32_1 = arith.constant 0 : i32
    return %c0_i32, %c0_i32_0 : i32, i32
  }
  func.func @transform_2(%arg0: i32, %arg1: i32) -> (i32, i32) {
    %c0_i32 = arith.constant 0 : i32
    %c0_i32_0 = arith.constant 0 : i32
    %c0_i32_1 = arith.constant 0 : i32
    return %c0_i32, %c0_i32_0 : i32, i32
  }
  func.func @transform_3(%arg0: i32, %arg1: i32) -> (i32, i32, i32) {
    %c0_i32 = arith.constant 0 : i32
    %c0_i32_0 = arith.constant 0 : i32
    return %arg0, %arg1, %c0_i32 : i32, i32, i32
  }
  func.func @transform_4(%arg0: i32, %arg1: i32) -> (i32, i32, i32) {
    %c0_i32 = arith.constant 0 : i32
    %c0_i32_0 = arith.constant 0 : i32
    %c0_i32_1 = arith.constant 0 : i32
    return %arg0, %c0_i32, %c0_i32_0 : i32, i32, i32
  }
  func.func @transform_5(%arg0: i32, %arg1: i32) -> (i32, i32, i32) {
    %c0_i32 = arith.constant 0 : i32
    %c0_i32_0 = arith.constant 0 : i32
    %c0_i32_1 = arith.constant 0 : i32
    return %arg0, %c0_i32, %c0_i32_0 : i32, i32, i32
  }
}

module attributes {stable_mosaic.version = 11 : i64} {
  func.func @_in_apply_kernel(%arg0: i32, %arg1: i32, %arg2: memref<1x64x128xbf16, #tpu.memory_space<vmem>>, %arg3: memref<1x1x128xf32, #tpu.memory_space<vmem>>, %arg4: memref<1x1x128xf32, #tpu.memory_space<vmem>>, %arg5: memref<1x64x128xbf16, #tpu.memory_space<vmem>>) attributes {dimension_semantics = [#tpu.dimension_semantics<parallel>, #tpu.dimension_semantics<parallel>], iteration_bounds = array<i64: 2, 1>, scalar_prefetch = 0 : i64, scratch_operands = 0 : i64, tpu.core_type = #tpu.core_type<tc>, window_params = [{transform_indices = @transform_0, window_bounds = array<i64: 1, 64, 128>}, {transform_indices = @transform_1, window_bounds = array<i64: 1, 1, 128>}, {transform_indices = @transform_2, window_bounds = array<i64: 1, 1, 128>}, {transform_indices = @transform_3, window_bounds = array<i64: 1, 64, 128>}]} {
    %c0 = arith.constant 0 : index
    %c0_0 = arith.constant 0 : index
    %c0_1 = arith.constant 0 : index
    %0 = vector.load %arg2[%c0, %c0_0, %c0_1] : memref<1x64x128xbf16, #tpu.memory_space<vmem>>, vector<1x64x128xbf16>
    %1 = vector.shape_cast %0 : vector<1x64x128xbf16> to vector<64x128xbf16>
    %2 = arith.extf %1 : vector<64x128xbf16> to vector<64x128xf32>
    %c0_2 = arith.constant 0 : index
    %c0_3 = arith.constant 0 : index
    %c0_4 = arith.constant 0 : index
    %3 = vector.load %arg3[%c0_2, %c0_3, %c0_4] : memref<1x1x128xf32, #tpu.memory_space<vmem>>, vector<1x1x128xf32>
    %4 = vector.shape_cast %3 : vector<1x1x128xf32> to vector<128xf32>
    %cst = arith.constant 1.562500e-02 : f32
    %5 = vector.broadcast %cst : f32 to vector<128xf32>
    %6 = arith.mulf %4, %5 : vector<128xf32>
    %c0_5 = arith.constant 0 : index
    %c0_6 = arith.constant 0 : index
    %c0_7 = arith.constant 0 : index
    %7 = vector.load %arg4[%c0_5, %c0_6, %c0_7] : memref<1x1x128xf32, #tpu.memory_space<vmem>>, vector<1x1x128xf32>
    %8 = vector.shape_cast %7 : vector<1x1x128xf32> to vector<128xf32>
    %cst_8 = arith.constant 1.562500e-02 : f32
    %9 = vector.broadcast %cst_8 : f32 to vector<128xf32>
    %10 = arith.mulf %8, %9 : vector<128xf32>
    %11 = arith.mulf %6, %6 : vector<128xf32>
    %12 = arith.subf %10, %11 : vector<128xf32>
    %cst_9 = arith.constant 0.000000e+00 : f32
    %13 = vector.broadcast %cst_9 : f32 to vector<128xf32>
    %14 = arith.maximumf %12, %13 : vector<128xf32>
    %15 = vector.shape_cast %6 : vector<128xf32> to vector<1x128xf32>
    %16 = vector.broadcast %15 : vector<1x128xf32> to vector<64x128xf32>
    %17 = arith.subf %2, %16 : vector<64x128xf32>
    %cst_10 = arith.constant 9.99999974E-6 : f32
    %18 = vector.broadcast %cst_10 : f32 to vector<128xf32>
    %19 = arith.addf %14, %18 : vector<128xf32>
    %20 = math.rsqrt %19 : vector<128xf32>
    %21 = vector.shape_cast %20 : vector<128xf32> to vector<1x128xf32>
    %22 = vector.broadcast %21 : vector<1x128xf32> to vector<64x128xf32>
    %23 = arith.mulf %17, %22 : vector<64x128xf32>
    %cst_11 = arith.constant 0.000000e+00 : f32
    %24 = vector.broadcast %cst_11 : f32 to vector<64x128xf32>
    %25 = arith.maximumf %23, %24 : vector<64x128xf32>
    %26 = arith.truncf %25 : vector<64x128xf32> to vector<64x128xbf16>
    %c0_12 = arith.constant 0 : index
    %c0_13 = arith.constant 0 : index
    %c0_14 = arith.constant 0 : index
    %27 = vector.load %arg5[%c0_12, %c0_13, %c0_14] : memref<1x64x128xbf16, #tpu.memory_space<vmem>>, vector<1x64x128xbf16>
    %28 = vector.shape_cast %27 : vector<1x64x128xbf16> to vector<64x128xbf16>
    %29 = vector.shape_cast %26 : vector<64x128xbf16> to vector<1x64x128xbf16>
    tpu.vector_store %arg5[%c0_12, %c0_13, %c0_14], %29 {strides = array<i32>} : memref<1x64x128xbf16, #tpu.memory_space<vmem>>, vector<1x64x128xbf16>,
    return
  }
  func.func @transform_0(%arg0: i32, %arg1: i32) -> (i32, i32, i32) {
    %c0_i32 = arith.constant 0 : i32
    %c0_i32_0 = arith.constant 0 : i32
    return %arg0, %arg1, %c0_i32 : i32, i32, i32
  }
  func.func @transform_1(%arg0: i32, %arg1: i32) -> (i32, i32, i32) {
    %c0_i32 = arith.constant 0 : i32
    %c0_i32_0 = arith.constant 0 : i32
    %c0_i32_1 = arith.constant 0 : i32
    return %arg0, %c0_i32, %c0_i32_0 : i32, i32, i32
  }
  func.func @transform_2(%arg0: i32, %arg1: i32) -> (i32, i32, i32) {
    %c0_i32 = arith.constant 0 : i32
    %c0_i32_0 = arith.constant 0 : i32
    %c0_i32_1 = arith.constant 0 : i32
    return %arg0, %c0_i32, %c0_i32_0 : i32, i32, i32
  }
  func.func @transform_3(%arg0: i32, %arg1: i32) -> (i32, i32, i32) {
    %c0_i32 = arith.constant 0 : i32
    %c0_i32_0 = arith.constant 0 : i32
    return %arg0, %arg1, %c0_i32 : i32, i32, i32
  }
}

module attributes {stable_mosaic.version = 11 : i64} {
  func.func @_in_apply_kernel(%arg0: i32, %arg1: i32, %arg2: memref<1x16x256xbf16, #tpu.memory_space<vmem>>, %arg3: memref<1x1x256xf32, #tpu.memory_space<vmem>>, %arg4: memref<1x1x256xf32, #tpu.memory_space<vmem>>, %arg5: memref<1x16x256xbf16, #tpu.memory_space<vmem>>) attributes {dimension_semantics = [#tpu.dimension_semantics<parallel>, #tpu.dimension_semantics<parallel>], iteration_bounds = array<i64: 2, 1>, scalar_prefetch = 0 : i64, scratch_operands = 0 : i64, tpu.core_type = #tpu.core_type<tc>, window_params = [{transform_indices = @transform_0, window_bounds = array<i64: 1, 16, 256>}, {transform_indices = @transform_1, window_bounds = array<i64: 1, 1, 256>}, {transform_indices = @transform_2, window_bounds = array<i64: 1, 1, 256>}, {transform_indices = @transform_3, window_bounds = array<i64: 1, 16, 256>}]} {
    %c0 = arith.constant 0 : index
    %c0_0 = arith.constant 0 : index
    %c0_1 = arith.constant 0 : index
    %0 = vector.load %arg2[%c0, %c0_0, %c0_1] : memref<1x16x256xbf16, #tpu.memory_space<vmem>>, vector<1x16x256xbf16>
    %1 = vector.shape_cast %0 : vector<1x16x256xbf16> to vector<16x256xbf16>
    %2 = arith.extf %1 : vector<16x256xbf16> to vector<16x256xf32>
    %c0_2 = arith.constant 0 : index
    %c0_3 = arith.constant 0 : index
    %c0_4 = arith.constant 0 : index
    %3 = vector.load %arg3[%c0_2, %c0_3, %c0_4] : memref<1x1x256xf32, #tpu.memory_space<vmem>>, vector<1x1x256xf32>
    %4 = vector.shape_cast %3 : vector<1x1x256xf32> to vector<256xf32>
    %cst = arith.constant 6.250000e-02 : f32
    %5 = vector.broadcast %cst : f32 to vector<256xf32>
    %6 = arith.mulf %4, %5 : vector<256xf32>
    %c0_5 = arith.constant 0 : index
    %c0_6 = arith.constant 0 : index
    %c0_7 = arith.constant 0 : index
    %7 = vector.load %arg4[%c0_5, %c0_6, %c0_7] : memref<1x1x256xf32, #tpu.memory_space<vmem>>, vector<1x1x256xf32>
    %8 = vector.shape_cast %7 : vector<1x1x256xf32> to vector<256xf32>
    %cst_8 = arith.constant 6.250000e-02 : f32
    %9 = vector.broadcast %cst_8 : f32 to vector<256xf32>
    %10 = arith.mulf %8, %9 : vector<256xf32>
    %11 = arith.mulf %6, %6 : vector<256xf32>
    %12 = arith.subf %10, %11 : vector<256xf32>
    %cst_9 = arith.constant 0.000000e+00 : f32
    %13 = vector.broadcast %cst_9 : f32 to vector<256xf32>
    %14 = arith.maximumf %12, %13 : vector<256xf32>
    %15 = vector.shape_cast %6 : vector<256xf32> to vector<1x256xf32>
    %16 = vector.broadcast %15 : vector<1x256xf32> to vector<16x256xf32>
    %17 = arith.subf %2, %16 : vector<16x256xf32>
    %cst_10 = arith.constant 9.99999974E-6 : f32
    %18 = vector.broadcast %cst_10 : f32 to vector<256xf32>
    %19 = arith.addf %14, %18 : vector<256xf32>
    %20 = math.rsqrt %19 : vector<256xf32>
    %21 = vector.shape_cast %20 : vector<256xf32> to vector<1x256xf32>
    %22 = vector.broadcast %21 : vector<1x256xf32> to vector<16x256xf32>
    %23 = arith.mulf %17, %22 : vector<16x256xf32>
    %cst_11 = arith.constant 0.000000e+00 : f32
    %24 = vector.broadcast %cst_11 : f32 to vector<16x256xf32>
    %25 = arith.maximumf %23, %24 : vector<16x256xf32>
    %26 = arith.truncf %25 : vector<16x256xf32> to vector<16x256xbf16>
    %c0_12 = arith.constant 0 : index
    %c0_13 = arith.constant 0 : index
    %c0_14 = arith.constant 0 : index
    %27 = vector.load %arg5[%c0_12, %c0_13, %c0_14] : memref<1x16x256xbf16, #tpu.memory_space<vmem>>, vector<1x16x256xbf16>
    %28 = vector.shape_cast %27 : vector<1x16x256xbf16> to vector<16x256xbf16>
    %29 = vector.shape_cast %26 : vector<16x256xbf16> to vector<1x16x256xbf16>
    tpu.vector_store %arg5[%c0_12, %c0_13, %c0_14], %29 {strides = array<i32>} : memref<1x16x256xbf16, #tpu.memory_space<vmem>>, vector<1x16x256xbf16>,
    return
  }
  func.func @transform_0(%arg0: i32, %arg1: i32) -> (i32, i32, i32) {
    %c0_i32 = arith.constant 0 : i32
    %c0_i32_0 = arith.constant 0 : i32
    return %arg0, %arg1, %c0_i32 : i32, i32, i32
  }
  func.func @transform_1(%arg0: i32, %arg1: i32) -> (i32, i32, i32) {
    %c0_i32 = arith.constant 0 : i32
    %c0_i32_0 = arith.constant 0 : i32
    %c0_i32_1 = arith.constant 0 : i32
    return %arg0, %c0_i32, %c0_i32_0 : i32, i32, i32
  }
  func.func @transform_2(%arg0: i32, %arg1: i32) -> (i32, i32, i32) {
    %c0_i32 = arith.constant 0 : i32
    %c0_i32_0 = arith.constant 0 : i32
    %c0_i32_1 = arith.constant 0 : i32
    return %arg0, %c0_i32, %c0_i32_0 : i32, i32, i32
  }
  func.func @transform_3(%arg0: i32, %arg1: i32) -> (i32, i32, i32) {
    %c0_i32 = arith.constant 0 : i32
    %c0_i32_0 = arith.constant 0 : i32
    return %arg0, %arg1, %c0_i32 : i32, i32, i32
  }
}

module attributes {stable_mosaic.version = 11 : i64} {
  func.func @_conv_stats_kernel(%arg0: i32, %arg1: i32, %arg2: memref<1x16x1152xbf16, #tpu.memory_space<vmem>>, %arg3: memref<1152x256xbf16, #tpu.memory_space<vmem>>, %arg4: memref<1x256xf32, #tpu.memory_space<vmem>>, %arg5: memref<1x16x256xbf16, #tpu.memory_space<vmem>>, %arg6: memref<1x1x256xf32, #tpu.memory_space<vmem>>, %arg7: memref<1x1x256xf32, #tpu.memory_space<vmem>>) attributes {dimension_semantics = [#tpu.dimension_semantics<parallel>, #tpu.dimension_semantics<arbitrary>], iteration_bounds = array<i64: 2, 1>, scalar_prefetch = 0 : i64, scratch_operands = 0 : i64, tpu.core_type = #tpu.core_type<tc>, window_params = [{transform_indices = @transform_0, window_bounds = array<i64: 1, 16, 1152>}, {pipeline_mode = #tpu.pipeline_mode<synchronous>, transform_indices = @transform_1, window_bounds = array<i64: 1152, 256>}, {pipeline_mode = #tpu.pipeline_mode<synchronous>, transform_indices = @transform_2, window_bounds = array<i64: 1, 256>}, {transform_indices = @transform_3, window_bounds = array<i64: 1, 16, 256>}, {transform_indices = @transform_4, window_bounds = array<i64: 1, 1, 256>}, {transform_indices = @transform_5, window_bounds = array<i64: 1, 1, 256>}]} {
    %c0 = arith.constant 0 : index
    %c0_0 = arith.constant 0 : index
    %c0_1 = arith.constant 0 : index
    %0 = vector.load %arg2[%c0, %c0_0, %c0_1] : memref<1x16x1152xbf16, #tpu.memory_space<vmem>>, vector<1x16x1152xbf16>
    %1 = vector.shape_cast %0 : vector<1x16x1152xbf16> to vector<16x1152xbf16>
    %c0_2 = arith.constant 0 : index
    %c0_3 = arith.constant 0 : index
    %2 = vector.load %arg3[%c0_2, %c0_3] : memref<1152x256xbf16, #tpu.memory_space<vmem>>, vector<1152x256xbf16>
    %cst = arith.constant dense<0.000000e+00> : vector<16x256xf32>
    %3 = tpu.matmul %1, %2, %cst {dimension_numbers = #tpu.dot_dimension_numbers<[1], [0], [0], [1], [0, 0, 1, 1], [], []>} : vector<16x1152xbf16>, vector<1152x256xbf16>, vector<16x256xf32> -> vector<16x256xf32>
    %c0_4 = arith.constant 0 : index
    %c0_5 = arith.constant 0 : index
    %4 = vector.load %arg4[%c0_4, %c0_5] : memref<1x256xf32, #tpu.memory_space<vmem>>, vector<1x256xf32>
    %5 = vector.broadcast %4 : vector<1x256xf32> to vector<16x256xf32>
    %6 = arith.addf %3, %5 : vector<16x256xf32>
    %7 = arith.truncf %6 : vector<16x256xf32> to vector<16x256xbf16>
    %c0_6 = arith.constant 0 : index
    %c0_7 = arith.constant 0 : index
    %c0_8 = arith.constant 0 : index
    %8 = vector.load %arg5[%c0_6, %c0_7, %c0_8] : memref<1x16x256xbf16, #tpu.memory_space<vmem>>, vector<1x16x256xbf16>
    %9 = vector.shape_cast %8 : vector<1x16x256xbf16> to vector<16x256xbf16>
    %10 = vector.shape_cast %7 : vector<16x256xbf16> to vector<1x16x256xbf16>
    tpu.vector_store %arg5[%c0_6, %c0_7, %c0_8], %10 {strides = array<i32>} : memref<1x16x256xbf16, #tpu.memory_space<vmem>>, vector<1x16x256xbf16>,
    %c0_i32 = arith.constant 0 : i32
    %11 = arith.cmpi eq, %arg1, %c0_i32 : i32
    %12 = arith.extui %11 : i1 to i32
    %c0_i32_9 = arith.constant 0 : i32
    %13 = arith.cmpi ne, %12, %c0_i32_9 : i32
    scf.if %13 {
      %cst_24 = arith.constant 0.000000e+00 : f32
      %25 = vector.broadcast %cst_24 : f32 to vector<1x1x256xf32>
      %c0_25 = arith.constant 0 : index
      %c0_26 = arith.constant 0 : index
      %c0_27 = arith.constant 0 : index
      %26 = vector.load %arg6[%c0_25, %c0_26, %c0_27] : memref<1x1x256xf32, #tpu.memory_space<vmem>>, vector<1x1x256xf32>
      tpu.vector_store %arg6[%c0_25, %c0_26, %c0_27], %25 {strides = array<i32>} : memref<1x1x256xf32, #tpu.memory_space<vmem>>, vector<1x1x256xf32>,
      %cst_28 = arith.constant 0.000000e+00 : f32
      %27 = vector.broadcast %cst_28 : f32 to vector<1x1x256xf32>
      %c0_29 = arith.constant 0 : index
      %c0_30 = arith.constant 0 : index
      %c0_31 = arith.constant 0 : index
      %28 = vector.load %arg7[%c0_29, %c0_30, %c0_31] : memref<1x1x256xf32, #tpu.memory_space<vmem>>, vector<1x1x256xf32>
      tpu.vector_store %arg7[%c0_29, %c0_30, %c0_31], %27 {strides = array<i32>} : memref<1x1x256xf32, #tpu.memory_space<vmem>>, vector<1x1x256xf32>,
    } else {
    }
    %c0_10 = arith.constant 0 : index
    %c0_11 = arith.constant 0 : index
    %c0_12 = arith.constant 0 : index
    %14 = vector.load %arg6[%c0_10, %c0_11, %c0_12] : memref<1x1x256xf32, #tpu.memory_space<vmem>>, vector<1x1x256xf32>
    %cst_13 = arith.constant dense<0.000000e+00> : vector<256xf32>
    %15 = vector.multi_reduction <add>, %6, %cst_13 [0] : vector<16x256xf32> to vector<256xf32>
    %16 = vector.shape_cast %15 : vector<256xf32> to vector<1x1x256xf32>
    %17 = arith.addf %14, %16 : vector<1x1x256xf32>
    %c0_14 = arith.constant 0 : index
    %c0_15 = arith.constant 0 : index
    %c0_16 = arith.constant 0 : index
    %18 = vector.load %arg6[%c0_14, %c0_15, %c0_16] : memref<1x1x256xf32, #tpu.memory_space<vmem>>, vector<1x1x256xf32>
    tpu.vector_store %arg6[%c0_14, %c0_15, %c0_16], %17 {strides = array<i32>} : memref<1x1x256xf32, #tpu.memory_space<vmem>>, vector<1x1x256xf32>,
    %c0_17 = arith.constant 0 : index
    %c0_18 = arith.constant 0 : index
    %c0_19 = arith.constant 0 : index
    %19 = vector.load %arg7[%c0_17, %c0_18, %c0_19] : memref<1x1x256xf32, #tpu.memory_space<vmem>>, vector<1x1x256xf32>
    %20 = arith.mulf %6, %6 : vector<16x256xf32>
    %cst_20 = arith.constant dense<0.000000e+00> : vector<256xf32>
    %21 = vector.multi_reduction <add>, %20, %cst_20 [0] : vector<16x256xf32> to vector<256xf32>
    %22 = vector.shape_cast %21 : vector<256xf32> to vector<1x1x256xf32>
    %23 = arith.addf %19, %22 : vector<1x1x256xf32>
    %c0_21 = arith.constant 0 : index
    %c0_22 = arith.constant 0 : index
    %c0_23 = arith.constant 0 : index
    %24 = vector.load %arg7[%c0_21, %c0_22, %c0_23] : memref<1x1x256xf32, #tpu.memory_space<vmem>>, vector<1x1x256xf32>
    tpu.vector_store %arg7[%c0_21, %c0_22, %c0_23], %23 {strides = array<i32>} : memref<1x1x256xf32, #tpu.memory_space<vmem>>, vector<1x1x256xf32>,
    return
  }
  func.func @transform_0(%arg0: i32, %arg1: i32) -> (i32, i32, i32) {
    %c0_i32 = arith.constant 0 : i32
    %c0_i32_0 = arith.constant 0 : i32
    return %arg0, %arg1, %c0_i32 : i32, i32, i32
  }
  func.func @transform_1(%arg0: i32, %arg1: i32) -> (i32, i32) {
    %c0_i32 = arith.constant 0 : i32
    %c0_i32_0 = arith.constant 0 : i32
    %c0_i32_1 = arith.constant 0 : i32
    return %c0_i32, %c0_i32_0 : i32, i32
  }
  func.func @transform_2(%arg0: i32, %arg1: i32) -> (i32, i32) {
    %c0_i32 = arith.constant 0 : i32
    %c0_i32_0 = arith.constant 0 : i32
    %c0_i32_1 = arith.constant 0 : i32
    return %c0_i32, %c0_i32_0 : i32, i32
  }
  func.func @transform_3(%arg0: i32, %arg1: i32) -> (i32, i32, i32) {
    %c0_i32 = arith.constant 0 : i32
    %c0_i32_0 = arith.constant 0 : i32
    return %arg0, %arg1, %c0_i32 : i32, i32, i32
  }
  func.func @transform_4(%arg0: i32, %arg1: i32) -> (i32, i32, i32) {
    %c0_i32 = arith.constant 0 : i32
    %c0_i32_0 = arith.constant 0 : i32
    %c0_i32_1 = arith.constant 0 : i32
    return %arg0, %c0_i32, %c0_i32_0 : i32, i32, i32
  }
  func.func @transform_5(%arg0: i32, %arg1: i32) -> (i32, i32, i32) {
    %c0_i32 = arith.constant 0 : i32
    %c0_i32_0 = arith.constant 0 : i32
    %c0_i32_1 = arith.constant 0 : i32
    return %arg0, %c0_i32, %c0_i32_0 : i32, i32, i32
  }
}

module attributes {stable_mosaic.version = 11 : i64} {
  func.func @_conv_stats_kernel(%arg0: i32, %arg1: i32, %arg2: memref<1x16x2304xbf16, #tpu.memory_space<vmem>>, %arg3: memref<2304x256xbf16, #tpu.memory_space<vmem>>, %arg4: memref<1x256xf32, #tpu.memory_space<vmem>>, %arg5: memref<1x16x256xbf16, #tpu.memory_space<vmem>>, %arg6: memref<1x1x256xf32, #tpu.memory_space<vmem>>, %arg7: memref<1x1x256xf32, #tpu.memory_space<vmem>>) attributes {dimension_semantics = [#tpu.dimension_semantics<parallel>, #tpu.dimension_semantics<arbitrary>], iteration_bounds = array<i64: 2, 1>, scalar_prefetch = 0 : i64, scratch_operands = 0 : i64, tpu.core_type = #tpu.core_type<tc>, window_params = [{transform_indices = @transform_0, window_bounds = array<i64: 1, 16, 2304>}, {pipeline_mode = #tpu.pipeline_mode<synchronous>, transform_indices = @transform_1, window_bounds = array<i64: 2304, 256>}, {pipeline_mode = #tpu.pipeline_mode<synchronous>, transform_indices = @transform_2, window_bounds = array<i64: 1, 256>}, {transform_indices = @transform_3, window_bounds = array<i64: 1, 16, 256>}, {transform_indices = @transform_4, window_bounds = array<i64: 1, 1, 256>}, {transform_indices = @transform_5, window_bounds = array<i64: 1, 1, 256>}]} {
    %c0 = arith.constant 0 : index
    %c0_0 = arith.constant 0 : index
    %c0_1 = arith.constant 0 : index
    %0 = vector.load %arg2[%c0, %c0_0, %c0_1] : memref<1x16x2304xbf16, #tpu.memory_space<vmem>>, vector<1x16x2304xbf16>
    %1 = vector.shape_cast %0 : vector<1x16x2304xbf16> to vector<16x2304xbf16>
    %c0_2 = arith.constant 0 : index
    %c0_3 = arith.constant 0 : index
    %2 = vector.load %arg3[%c0_2, %c0_3] : memref<2304x256xbf16, #tpu.memory_space<vmem>>, vector<2304x256xbf16>
    %cst = arith.constant dense<0.000000e+00> : vector<16x256xf32>
    %3 = tpu.matmul %1, %2, %cst {dimension_numbers = #tpu.dot_dimension_numbers<[1], [0], [0], [1], [0, 0, 1, 1], [], []>} : vector<16x2304xbf16>, vector<2304x256xbf16>, vector<16x256xf32> -> vector<16x256xf32>
    %c0_4 = arith.constant 0 : index
    %c0_5 = arith.constant 0 : index
    %4 = vector.load %arg4[%c0_4, %c0_5] : memref<1x256xf32, #tpu.memory_space<vmem>>, vector<1x256xf32>
    %5 = vector.broadcast %4 : vector<1x256xf32> to vector<16x256xf32>
    %6 = arith.addf %3, %5 : vector<16x256xf32>
    %7 = arith.truncf %6 : vector<16x256xf32> to vector<16x256xbf16>
    %c0_6 = arith.constant 0 : index
    %c0_7 = arith.constant 0 : index
    %c0_8 = arith.constant 0 : index
    %8 = vector.load %arg5[%c0_6, %c0_7, %c0_8] : memref<1x16x256xbf16, #tpu.memory_space<vmem>>, vector<1x16x256xbf16>
    %9 = vector.shape_cast %8 : vector<1x16x256xbf16> to vector<16x256xbf16>
    %10 = vector.shape_cast %7 : vector<16x256xbf16> to vector<1x16x256xbf16>
    tpu.vector_store %arg5[%c0_6, %c0_7, %c0_8], %10 {strides = array<i32>} : memref<1x16x256xbf16, #tpu.memory_space<vmem>>, vector<1x16x256xbf16>,
    %c0_i32 = arith.constant 0 : i32
    %11 = arith.cmpi eq, %arg1, %c0_i32 : i32
    %12 = arith.extui %11 : i1 to i32
    %c0_i32_9 = arith.constant 0 : i32
    %13 = arith.cmpi ne, %12, %c0_i32_9 : i32
    scf.if %13 {
      %cst_24 = arith.constant 0.000000e+00 : f32
      %25 = vector.broadcast %cst_24 : f32 to vector<1x1x256xf32>
      %c0_25 = arith.constant 0 : index
      %c0_26 = arith.constant 0 : index
      %c0_27 = arith.constant 0 : index
      %26 = vector.load %arg6[%c0_25, %c0_26, %c0_27] : memref<1x1x256xf32, #tpu.memory_space<vmem>>, vector<1x1x256xf32>
      tpu.vector_store %arg6[%c0_25, %c0_26, %c0_27], %25 {strides = array<i32>} : memref<1x1x256xf32, #tpu.memory_space<vmem>>, vector<1x1x256xf32>,
      %cst_28 = arith.constant 0.000000e+00 : f32
      %27 = vector.broadcast %cst_28 : f32 to vector<1x1x256xf32>
      %c0_29 = arith.constant 0 : index
      %c0_30 = arith.constant 0 : index
      %c0_31 = arith.constant 0 : index
      %28 = vector.load %arg7[%c0_29, %c0_30, %c0_31] : memref<1x1x256xf32, #tpu.memory_space<vmem>>, vector<1x1x256xf32>
      tpu.vector_store %arg7[%c0_29, %c0_30, %c0_31], %27 {strides = array<i32>} : memref<1x1x256xf32, #tpu.memory_space<vmem>>, vector<1x1x256xf32>,
    } else {
    }
    %c0_10 = arith.constant 0 : index
    %c0_11 = arith.constant 0 : index
    %c0_12 = arith.constant 0 : index
    %14 = vector.load %arg6[%c0_10, %c0_11, %c0_12] : memref<1x1x256xf32, #tpu.memory_space<vmem>>, vector<1x1x256xf32>
    %cst_13 = arith.constant dense<0.000000e+00> : vector<256xf32>
    %15 = vector.multi_reduction <add>, %6, %cst_13 [0] : vector<16x256xf32> to vector<256xf32>
    %16 = vector.shape_cast %15 : vector<256xf32> to vector<1x1x256xf32>
    %17 = arith.addf %14, %16 : vector<1x1x256xf32>
    %c0_14 = arith.constant 0 : index
    %c0_15 = arith.constant 0 : index
    %c0_16 = arith.constant 0 : index
    %18 = vector.load %arg6[%c0_14, %c0_15, %c0_16] : memref<1x1x256xf32, #tpu.memory_space<vmem>>, vector<1x1x256xf32>
    tpu.vector_store %arg6[%c0_14, %c0_15, %c0_16], %17 {strides = array<i32>} : memref<1x1x256xf32, #tpu.memory_space<vmem>>, vector<1x1x256xf32>,
    %c0_17 = arith.constant 0 : index
    %c0_18 = arith.constant 0 : index
    %c0_19 = arith.constant 0 : index
    %19 = vector.load %arg7[%c0_17, %c0_18, %c0_19] : memref<1x1x256xf32, #tpu.memory_space<vmem>>, vector<1x1x256xf32>
    %20 = arith.mulf %6, %6 : vector<16x256xf32>
    %cst_20 = arith.constant dense<0.000000e+00> : vector<256xf32>
    %21 = vector.multi_reduction <add>, %20, %cst_20 [0] : vector<16x256xf32> to vector<256xf32>
    %22 = vector.shape_cast %21 : vector<256xf32> to vector<1x1x256xf32>
    %23 = arith.addf %19, %22 : vector<1x1x256xf32>
    %c0_21 = arith.constant 0 : index
    %c0_22 = arith.constant 0 : index
    %c0_23 = arith.constant 0 : index
    %24 = vector.load %arg7[%c0_21, %c0_22, %c0_23] : memref<1x1x256xf32, #tpu.memory_space<vmem>>, vector<1x1x256xf32>
    tpu.vector_store %arg7[%c0_21, %c0_22, %c0_23], %23 {strides = array<i32>} : memref<1x1x256xf32, #tpu.memory_space<vmem>>, vector<1x1x256xf32>,
    return
  }
  func.func @transform_0(%arg0: i32, %arg1: i32) -> (i32, i32, i32) {
    %c0_i32 = arith.constant 0 : i32
    %c0_i32_0 = arith.constant 0 : i32
    return %arg0, %arg1, %c0_i32 : i32, i32, i32
  }
  func.func @transform_1(%arg0: i32, %arg1: i32) -> (i32, i32) {
    %c0_i32 = arith.constant 0 : i32
    %c0_i32_0 = arith.constant 0 : i32
    %c0_i32_1 = arith.constant 0 : i32
    return %c0_i32, %c0_i32_0 : i32, i32
  }
  func.func @transform_2(%arg0: i32, %arg1: i32) -> (i32, i32) {
    %c0_i32 = arith.constant 0 : i32
    %c0_i32_0 = arith.constant 0 : i32
    %c0_i32_1 = arith.constant 0 : i32
    return %c0_i32, %c0_i32_0 : i32, i32
  }
  func.func @transform_3(%arg0: i32, %arg1: i32) -> (i32, i32, i32) {
    %c0_i32 = arith.constant 0 : i32
    %c0_i32_0 = arith.constant 0 : i32
    return %arg0, %arg1, %c0_i32 : i32, i32, i32
  }
  func.func @transform_4(%arg0: i32, %arg1: i32) -> (i32, i32, i32) {
    %c0_i32 = arith.constant 0 : i32
    %c0_i32_0 = arith.constant 0 : i32
    %c0_i32_1 = arith.constant 0 : i32
    return %arg0, %c0_i32, %c0_i32_0 : i32, i32, i32
  }
  func.func @transform_5(%arg0: i32, %arg1: i32) -> (i32, i32, i32) {
    %c0_i32 = arith.constant 0 : i32
    %c0_i32_0 = arith.constant 0 : i32
    %c0_i32_1 = arith.constant 0 : i32
    return %arg0, %c0_i32, %c0_i32_0 : i32, i32, i32
  }
}

module attributes {stable_mosaic.version = 11 : i64} {
  func.func @_in_apply_kernel(%arg0: i32, %arg1: i32, %arg2: memref<1x16x256xbf16, #tpu.memory_space<vmem>>, %arg3: memref<1x1x256xf32, #tpu.memory_space<vmem>>, %arg4: memref<1x1x256xf32, #tpu.memory_space<vmem>>, %arg5: memref<1x16x256xbf16, #tpu.memory_space<vmem>>) attributes {dimension_semantics = [#tpu.dimension_semantics<parallel>, #tpu.dimension_semantics<parallel>], iteration_bounds = array<i64: 2, 1>, scalar_prefetch = 0 : i64, scratch_operands = 0 : i64, tpu.core_type = #tpu.core_type<tc>, window_params = [{transform_indices = @transform_0, window_bounds = array<i64: 1, 16, 256>}, {transform_indices = @transform_1, window_bounds = array<i64: 1, 1, 256>}, {transform_indices = @transform_2, window_bounds = array<i64: 1, 1, 256>}, {transform_indices = @transform_3, window_bounds = array<i64: 1, 16, 256>}]} {
    %c0 = arith.constant 0 : index
    %c0_0 = arith.constant 0 : index
    %c0_1 = arith.constant 0 : index
    %0 = vector.load %arg2[%c0, %c0_0, %c0_1] : memref<1x16x256xbf16, #tpu.memory_space<vmem>>, vector<1x16x256xbf16>
    %1 = vector.shape_cast %0 : vector<1x16x256xbf16> to vector<16x256xbf16>
    %2 = arith.extf %1 : vector<16x256xbf16> to vector<16x256xf32>
    %c0_2 = arith.constant 0 : index
    %c0_3 = arith.constant 0 : index
    %c0_4 = arith.constant 0 : index
    %3 = vector.load %arg3[%c0_2, %c0_3, %c0_4] : memref<1x1x256xf32, #tpu.memory_space<vmem>>, vector<1x1x256xf32>
    %4 = vector.shape_cast %3 : vector<1x1x256xf32> to vector<256xf32>
    %cst = arith.constant 6.250000e-02 : f32
    %5 = vector.broadcast %cst : f32 to vector<256xf32>
    %6 = arith.mulf %4, %5 : vector<256xf32>
    %c0_5 = arith.constant 0 : index
    %c0_6 = arith.constant 0 : index
    %c0_7 = arith.constant 0 : index
    %7 = vector.load %arg4[%c0_5, %c0_6, %c0_7] : memref<1x1x256xf32, #tpu.memory_space<vmem>>, vector<1x1x256xf32>
    %8 = vector.shape_cast %7 : vector<1x1x256xf32> to vector<256xf32>
    %cst_8 = arith.constant 6.250000e-02 : f32
    %9 = vector.broadcast %cst_8 : f32 to vector<256xf32>
    %10 = arith.mulf %8, %9 : vector<256xf32>
    %11 = arith.mulf %6, %6 : vector<256xf32>
    %12 = arith.subf %10, %11 : vector<256xf32>
    %cst_9 = arith.constant 0.000000e+00 : f32
    %13 = vector.broadcast %cst_9 : f32 to vector<256xf32>
    %14 = arith.maximumf %12, %13 : vector<256xf32>
    %15 = vector.shape_cast %6 : vector<256xf32> to vector<1x256xf32>
    %16 = vector.broadcast %15 : vector<1x256xf32> to vector<16x256xf32>
    %17 = arith.subf %2, %16 : vector<16x256xf32>
    %cst_10 = arith.constant 9.99999974E-6 : f32
    %18 = vector.broadcast %cst_10 : f32 to vector<256xf32>
    %19 = arith.addf %14, %18 : vector<256xf32>
    %20 = math.rsqrt %19 : vector<256xf32>
    %21 = vector.shape_cast %20 : vector<256xf32> to vector<1x256xf32>
    %22 = vector.broadcast %21 : vector<1x256xf32> to vector<16x256xf32>
    %23 = arith.mulf %17, %22 : vector<16x256xf32>
    %24 = arith.truncf %23 : vector<16x256xf32> to vector<16x256xbf16>
    %c0_11 = arith.constant 0 : index
    %c0_12 = arith.constant 0 : index
    %c0_13 = arith.constant 0 : index
    %25 = vector.load %arg5[%c0_11, %c0_12, %c0_13] : memref<1x16x256xbf16, #tpu.memory_space<vmem>>, vector<1x16x256xbf16>
    %26 = vector.shape_cast %25 : vector<1x16x256xbf16> to vector<16x256xbf16>
    %27 = vector.shape_cast %24 : vector<16x256xbf16> to vector<1x16x256xbf16>
    tpu.vector_store %arg5[%c0_11, %c0_12, %c0_13], %27 {strides = array<i32>} : memref<1x16x256xbf16, #tpu.memory_space<vmem>>, vector<1x16x256xbf16>,
    return
  }
  func.func @transform_0(%arg0: i32, %arg1: i32) -> (i32, i32, i32) {
    %c0_i32 = arith.constant 0 : i32
    %c0_i32_0 = arith.constant 0 : i32
    return %arg0, %arg1, %c0_i32 : i32, i32, i32
  }
  func.func @transform_1(%arg0: i32, %arg1: i32) -> (i32, i32, i32) {
    %c0_i32 = arith.constant 0 : i32
    %c0_i32_0 = arith.constant 0 : i32
    %c0_i32_1 = arith.constant 0 : i32
    return %arg0, %c0_i32, %c0_i32_0 : i32, i32, i32
  }
  func.func @transform_2(%arg0: i32, %arg1: i32) -> (i32, i32, i32) {
    %c0_i32 = arith.constant 0 : i32
    %c0_i32_0 = arith.constant 0 : i32
    %c0_i32_1 = arith.constant 0 : i32
    return %arg0, %c0_i32, %c0_i32_0 : i32, i32, i32
  }
  func.func @transform_3(%arg0: i32, %arg1: i32) -> (i32, i32, i32) {
    %c0_i32 = arith.constant 0 : i32
    %c0_i32_0 = arith.constant 0 : i32
    return %arg0, %arg1, %c0_i32 : i32, i32, i32
  }
}

module attributes {stable_mosaic.version = 11 : i64} {
  func.func @_conv_stats_kernel(%arg0: i32, %arg1: i32, %arg2: memref<1x16x512xbf16, #tpu.memory_space<vmem>>, %arg3: memref<512x128xbf16, #tpu.memory_space<vmem>>, %arg4: memref<1x128xf32, #tpu.memory_space<vmem>>, %arg5: memref<1x16x128xbf16, #tpu.memory_space<vmem>>, %arg6: memref<1x1x128xf32, #tpu.memory_space<vmem>>, %arg7: memref<1x1x128xf32, #tpu.memory_space<vmem>>) attributes {dimension_semantics = [#tpu.dimension_semantics<parallel>, #tpu.dimension_semantics<arbitrary>], iteration_bounds = array<i64: 2, 1>, scalar_prefetch = 0 : i64, scratch_operands = 0 : i64, tpu.core_type = #tpu.core_type<tc>, window_params = [{transform_indices = @transform_0, window_bounds = array<i64: 1, 16, 512>}, {pipeline_mode = #tpu.pipeline_mode<synchronous>, transform_indices = @transform_1, window_bounds = array<i64: 512, 128>}, {pipeline_mode = #tpu.pipeline_mode<synchronous>, transform_indices = @transform_2, window_bounds = array<i64: 1, 128>}, {transform_indices = @transform_3, window_bounds = array<i64: 1, 16, 128>}, {transform_indices = @transform_4, window_bounds = array<i64: 1, 1, 128>}, {transform_indices = @transform_5, window_bounds = array<i64: 1, 1, 128>}]} {
    %c0 = arith.constant 0 : index
    %c0_0 = arith.constant 0 : index
    %c0_1 = arith.constant 0 : index
    %0 = vector.load %arg2[%c0, %c0_0, %c0_1] : memref<1x16x512xbf16, #tpu.memory_space<vmem>>, vector<1x16x512xbf16>
    %1 = vector.shape_cast %0 : vector<1x16x512xbf16> to vector<16x512xbf16>
    %c0_2 = arith.constant 0 : index
    %c0_3 = arith.constant 0 : index
    %2 = vector.load %arg3[%c0_2, %c0_3] : memref<512x128xbf16, #tpu.memory_space<vmem>>, vector<512x128xbf16>
    %cst = arith.constant dense<0.000000e+00> : vector<16x128xf32>
    %3 = tpu.matmul %1, %2, %cst {dimension_numbers = #tpu.dot_dimension_numbers<[1], [0], [0], [1], [0, 0, 1, 1], [], []>} : vector<16x512xbf16>, vector<512x128xbf16>, vector<16x128xf32> -> vector<16x128xf32>
    %c0_4 = arith.constant 0 : index
    %c0_5 = arith.constant 0 : index
    %4 = vector.load %arg4[%c0_4, %c0_5] : memref<1x128xf32, #tpu.memory_space<vmem>>, vector<1x128xf32>
    %5 = vector.broadcast %4 : vector<1x128xf32> to vector<16x128xf32>
    %6 = arith.addf %3, %5 : vector<16x128xf32>
    %7 = arith.truncf %6 : vector<16x128xf32> to vector<16x128xbf16>
    %c0_6 = arith.constant 0 : index
    %c0_7 = arith.constant 0 : index
    %c0_8 = arith.constant 0 : index
    %8 = vector.load %arg5[%c0_6, %c0_7, %c0_8] : memref<1x16x128xbf16, #tpu.memory_space<vmem>>, vector<1x16x128xbf16>
    %9 = vector.shape_cast %8 : vector<1x16x128xbf16> to vector<16x128xbf16>
    %10 = vector.shape_cast %7 : vector<16x128xbf16> to vector<1x16x128xbf16>
    tpu.vector_store %arg5[%c0_6, %c0_7, %c0_8], %10 {strides = array<i32>} : memref<1x16x128xbf16, #tpu.memory_space<vmem>>, vector<1x16x128xbf16>,
    %c0_i32 = arith.constant 0 : i32
    %11 = arith.cmpi eq, %arg1, %c0_i32 : i32
    %12 = arith.extui %11 : i1 to i32
    %c0_i32_9 = arith.constant 0 : i32
    %13 = arith.cmpi ne, %12, %c0_i32_9 : i32
    scf.if %13 {
      %cst_24 = arith.constant 0.000000e+00 : f32
      %25 = vector.broadcast %cst_24 : f32 to vector<1x1x128xf32>
      %c0_25 = arith.constant 0 : index
      %c0_26 = arith.constant 0 : index
      %c0_27 = arith.constant 0 : index
      %26 = vector.load %arg6[%c0_25, %c0_26, %c0_27] : memref<1x1x128xf32, #tpu.memory_space<vmem>>, vector<1x1x128xf32>
      tpu.vector_store %arg6[%c0_25, %c0_26, %c0_27], %25 {strides = array<i32>} : memref<1x1x128xf32, #tpu.memory_space<vmem>>, vector<1x1x128xf32>,
      %cst_28 = arith.constant 0.000000e+00 : f32
      %27 = vector.broadcast %cst_28 : f32 to vector<1x1x128xf32>
      %c0_29 = arith.constant 0 : index
      %c0_30 = arith.constant 0 : index
      %c0_31 = arith.constant 0 : index
      %28 = vector.load %arg7[%c0_29, %c0_30, %c0_31] : memref<1x1x128xf32, #tpu.memory_space<vmem>>, vector<1x1x128xf32>
      tpu.vector_store %arg7[%c0_29, %c0_30, %c0_31], %27 {strides = array<i32>} : memref<1x1x128xf32, #tpu.memory_space<vmem>>, vector<1x1x128xf32>,
    } else {
    }
    %c0_10 = arith.constant 0 : index
    %c0_11 = arith.constant 0 : index
    %c0_12 = arith.constant 0 : index
    %14 = vector.load %arg6[%c0_10, %c0_11, %c0_12] : memref<1x1x128xf32, #tpu.memory_space<vmem>>, vector<1x1x128xf32>
    %cst_13 = arith.constant dense<0.000000e+00> : vector<128xf32>
    %15 = vector.multi_reduction <add>, %6, %cst_13 [0] : vector<16x128xf32> to vector<128xf32>
    %16 = vector.shape_cast %15 : vector<128xf32> to vector<1x1x128xf32>
    %17 = arith.addf %14, %16 : vector<1x1x128xf32>
    %c0_14 = arith.constant 0 : index
    %c0_15 = arith.constant 0 : index
    %c0_16 = arith.constant 0 : index
    %18 = vector.load %arg6[%c0_14, %c0_15, %c0_16] : memref<1x1x128xf32, #tpu.memory_space<vmem>>, vector<1x1x128xf32>
    tpu.vector_store %arg6[%c0_14, %c0_15, %c0_16], %17 {strides = array<i32>} : memref<1x1x128xf32, #tpu.memory_space<vmem>>, vector<1x1x128xf32>,
    %c0_17 = arith.constant 0 : index
    %c0_18 = arith.constant 0 : index
    %c0_19 = arith.constant 0 : index
    %19 = vector.load %arg7[%c0_17, %c0_18, %c0_19] : memref<1x1x128xf32, #tpu.memory_space<vmem>>, vector<1x1x128xf32>
    %20 = arith.mulf %6, %6 : vector<16x128xf32>
    %cst_20 = arith.constant dense<0.000000e+00> : vector<128xf32>
    %21 = vector.multi_reduction <add>, %20, %cst_20 [0] : vector<16x128xf32> to vector<128xf32>
    %22 = vector.shape_cast %21 : vector<128xf32> to vector<1x1x128xf32>
    %23 = arith.addf %19, %22 : vector<1x1x128xf32>
    %c0_21 = arith.constant 0 : index
    %c0_22 = arith.constant 0 : index
    %c0_23 = arith.constant 0 : index
    %24 = vector.load %arg7[%c0_21, %c0_22, %c0_23] : memref<1x1x128xf32, #tpu.memory_space<vmem>>, vector<1x1x128xf32>
    tpu.vector_store %arg7[%c0_21, %c0_22, %c0_23], %23 {strides = array<i32>} : memref<1x1x128xf32, #tpu.memory_space<vmem>>, vector<1x1x128xf32>,
    return
  }
  func.func @transform_0(%arg0: i32, %arg1: i32) -> (i32, i32, i32) {
    %c0_i32 = arith.constant 0 : i32
    %c0_i32_0 = arith.constant 0 : i32
    return %arg0, %arg1, %c0_i32 : i32, i32, i32
  }
  func.func @transform_1(%arg0: i32, %arg1: i32) -> (i32, i32) {
    %c0_i32 = arith.constant 0 : i32
    %c0_i32_0 = arith.constant 0 : i32
    %c0_i32_1 = arith.constant 0 : i32
    return %c0_i32, %c0_i32_0 : i32, i32
  }
  func.func @transform_2(%arg0: i32, %arg1: i32) -> (i32, i32) {
    %c0_i32 = arith.constant 0 : i32
    %c0_i32_0 = arith.constant 0 : i32
    %c0_i32_1 = arith.constant 0 : i32
    return %c0_i32, %c0_i32_0 : i32, i32
  }
  func.func @transform_3(%arg0: i32, %arg1: i32) -> (i32, i32, i32) {
    %c0_i32 = arith.constant 0 : i32
    %c0_i32_0 = arith.constant 0 : i32
    return %arg0, %arg1, %c0_i32 : i32, i32, i32
  }
  func.func @transform_4(%arg0: i32, %arg1: i32) -> (i32, i32, i32) {
    %c0_i32 = arith.constant 0 : i32
    %c0_i32_0 = arith.constant 0 : i32
    %c0_i32_1 = arith.constant 0 : i32
    return %arg0, %c0_i32, %c0_i32_0 : i32, i32, i32
  }
  func.func @transform_5(%arg0: i32, %arg1: i32) -> (i32, i32, i32) {
    %c0_i32 = arith.constant 0 : i32
    %c0_i32_0 = arith.constant 0 : i32
    %c0_i32_1 = arith.constant 0 : i32
    return %arg0, %c0_i32, %c0_i32_0 : i32, i32, i32
  }
}

module attributes {stable_mosaic.version = 11 : i64} {
  func.func @_conv_stats_kernel(%arg0: i32, %arg1: i32, %arg2: memref<1x16x1024xbf16, #tpu.memory_space<vmem>>, %arg3: memref<1024x128xbf16, #tpu.memory_space<vmem>>, %arg4: memref<1x128xf32, #tpu.memory_space<vmem>>, %arg5: memref<1x16x128xbf16, #tpu.memory_space<vmem>>, %arg6: memref<1x1x128xf32, #tpu.memory_space<vmem>>, %arg7: memref<1x1x128xf32, #tpu.memory_space<vmem>>) attributes {dimension_semantics = [#tpu.dimension_semantics<parallel>, #tpu.dimension_semantics<arbitrary>], iteration_bounds = array<i64: 2, 1>, scalar_prefetch = 0 : i64, scratch_operands = 0 : i64, tpu.core_type = #tpu.core_type<tc>, window_params = [{transform_indices = @transform_0, window_bounds = array<i64: 1, 16, 1024>}, {pipeline_mode = #tpu.pipeline_mode<synchronous>, transform_indices = @transform_1, window_bounds = array<i64: 1024, 128>}, {pipeline_mode = #tpu.pipeline_mode<synchronous>, transform_indices = @transform_2, window_bounds = array<i64: 1, 128>}, {transform_indices = @transform_3, window_bounds = array<i64: 1, 16, 128>}, {transform_indices = @transform_4, window_bounds = array<i64: 1, 1, 128>}, {transform_indices = @transform_5, window_bounds = array<i64: 1, 1, 128>}]} {
    %c0 = arith.constant 0 : index
    %c0_0 = arith.constant 0 : index
    %c0_1 = arith.constant 0 : index
    %0 = vector.load %arg2[%c0, %c0_0, %c0_1] : memref<1x16x1024xbf16, #tpu.memory_space<vmem>>, vector<1x16x1024xbf16>
    %1 = vector.shape_cast %0 : vector<1x16x1024xbf16> to vector<16x1024xbf16>
    %c0_2 = arith.constant 0 : index
    %c0_3 = arith.constant 0 : index
    %2 = vector.load %arg3[%c0_2, %c0_3] : memref<1024x128xbf16, #tpu.memory_space<vmem>>, vector<1024x128xbf16>
    %cst = arith.constant dense<0.000000e+00> : vector<16x128xf32>
    %3 = tpu.matmul %1, %2, %cst {dimension_numbers = #tpu.dot_dimension_numbers<[1], [0], [0], [1], [0, 0, 1, 1], [], []>} : vector<16x1024xbf16>, vector<1024x128xbf16>, vector<16x128xf32> -> vector<16x128xf32>
    %c0_4 = arith.constant 0 : index
    %c0_5 = arith.constant 0 : index
    %4 = vector.load %arg4[%c0_4, %c0_5] : memref<1x128xf32, #tpu.memory_space<vmem>>, vector<1x128xf32>
    %5 = vector.broadcast %4 : vector<1x128xf32> to vector<16x128xf32>
    %6 = arith.addf %3, %5 : vector<16x128xf32>
    %7 = arith.truncf %6 : vector<16x128xf32> to vector<16x128xbf16>
    %c0_6 = arith.constant 0 : index
    %c0_7 = arith.constant 0 : index
    %c0_8 = arith.constant 0 : index
    %8 = vector.load %arg5[%c0_6, %c0_7, %c0_8] : memref<1x16x128xbf16, #tpu.memory_space<vmem>>, vector<1x16x128xbf16>
    %9 = vector.shape_cast %8 : vector<1x16x128xbf16> to vector<16x128xbf16>
    %10 = vector.shape_cast %7 : vector<16x128xbf16> to vector<1x16x128xbf16>
    tpu.vector_store %arg5[%c0_6, %c0_7, %c0_8], %10 {strides = array<i32>} : memref<1x16x128xbf16, #tpu.memory_space<vmem>>, vector<1x16x128xbf16>,
    %c0_i32 = arith.constant 0 : i32
    %11 = arith.cmpi eq, %arg1, %c0_i32 : i32
    %12 = arith.extui %11 : i1 to i32
    %c0_i32_9 = arith.constant 0 : i32
    %13 = arith.cmpi ne, %12, %c0_i32_9 : i32
    scf.if %13 {
      %cst_24 = arith.constant 0.000000e+00 : f32
      %25 = vector.broadcast %cst_24 : f32 to vector<1x1x128xf32>
      %c0_25 = arith.constant 0 : index
      %c0_26 = arith.constant 0 : index
      %c0_27 = arith.constant 0 : index
      %26 = vector.load %arg6[%c0_25, %c0_26, %c0_27] : memref<1x1x128xf32, #tpu.memory_space<vmem>>, vector<1x1x128xf32>
      tpu.vector_store %arg6[%c0_25, %c0_26, %c0_27], %25 {strides = array<i32>} : memref<1x1x128xf32, #tpu.memory_space<vmem>>, vector<1x1x128xf32>,
      %cst_28 = arith.constant 0.000000e+00 : f32
      %27 = vector.broadcast %cst_28 : f32 to vector<1x1x128xf32>
      %c0_29 = arith.constant 0 : index
      %c0_30 = arith.constant 0 : index
      %c0_31 = arith.constant 0 : index
      %28 = vector.load %arg7[%c0_29, %c0_30, %c0_31] : memref<1x1x128xf32, #tpu.memory_space<vmem>>, vector<1x1x128xf32>
      tpu.vector_store %arg7[%c0_29, %c0_30, %c0_31], %27 {strides = array<i32>} : memref<1x1x128xf32, #tpu.memory_space<vmem>>, vector<1x1x128xf32>,
    } else {
    }
    %c0_10 = arith.constant 0 : index
    %c0_11 = arith.constant 0 : index
    %c0_12 = arith.constant 0 : index
    %14 = vector.load %arg6[%c0_10, %c0_11, %c0_12] : memref<1x1x128xf32, #tpu.memory_space<vmem>>, vector<1x1x128xf32>
    %cst_13 = arith.constant dense<0.000000e+00> : vector<128xf32>
    %15 = vector.multi_reduction <add>, %6, %cst_13 [0] : vector<16x128xf32> to vector<128xf32>
    %16 = vector.shape_cast %15 : vector<128xf32> to vector<1x1x128xf32>
    %17 = arith.addf %14, %16 : vector<1x1x128xf32>
    %c0_14 = arith.constant 0 : index
    %c0_15 = arith.constant 0 : index
    %c0_16 = arith.constant 0 : index
    %18 = vector.load %arg6[%c0_14, %c0_15, %c0_16] : memref<1x1x128xf32, #tpu.memory_space<vmem>>, vector<1x1x128xf32>
    tpu.vector_store %arg6[%c0_14, %c0_15, %c0_16], %17 {strides = array<i32>} : memref<1x1x128xf32, #tpu.memory_space<vmem>>, vector<1x1x128xf32>,
    %c0_17 = arith.constant 0 : index
    %c0_18 = arith.constant 0 : index
    %c0_19 = arith.constant 0 : index
    %19 = vector.load %arg7[%c0_17, %c0_18, %c0_19] : memref<1x1x128xf32, #tpu.memory_space<vmem>>, vector<1x1x128xf32>
    %20 = arith.mulf %6, %6 : vector<16x128xf32>
    %cst_20 = arith.constant dense<0.000000e+00> : vector<128xf32>
    %21 = vector.multi_reduction <add>, %20, %cst_20 [0] : vector<16x128xf32> to vector<128xf32>
    %22 = vector.shape_cast %21 : vector<128xf32> to vector<1x1x128xf32>
    %23 = arith.addf %19, %22 : vector<1x1x128xf32>
    %c0_21 = arith.constant 0 : index
    %c0_22 = arith.constant 0 : index
    %c0_23 = arith.constant 0 : index
    %24 = vector.load %arg7[%c0_21, %c0_22, %c0_23] : memref<1x1x128xf32, #tpu.memory_space<vmem>>, vector<1x1x128xf32>
    tpu.vector_store %arg7[%c0_21, %c0_22, %c0_23], %23 {strides = array<i32>} : memref<1x1x128xf32, #tpu.memory_space<vmem>>, vector<1x1x128xf32>,
    return
  }
  func.func @transform_0(%arg0: i32, %arg1: i32) -> (i32, i32, i32) {
    %c0_i32 = arith.constant 0 : i32
    %c0_i32_0 = arith.constant 0 : i32
    return %arg0, %arg1, %c0_i32 : i32, i32, i32
  }
  func.func @transform_1(%arg0: i32, %arg1: i32) -> (i32, i32) {
    %c0_i32 = arith.constant 0 : i32
    %c0_i32_0 = arith.constant 0 : i32
    %c0_i32_1 = arith.constant 0 : i32
    return %c0_i32, %c0_i32_0 : i32, i32
  }
  func.func @transform_2(%arg0: i32, %arg1: i32) -> (i32, i32) {
    %c0_i32 = arith.constant 0 : i32
    %c0_i32_0 = arith.constant 0 : i32
    %c0_i32_1 = arith.constant 0 : i32
    return %c0_i32, %c0_i32_0 : i32, i32
  }
  func.func @transform_3(%arg0: i32, %arg1: i32) -> (i32, i32, i32) {
    %c0_i32 = arith.constant 0 : i32
    %c0_i32_0 = arith.constant 0 : i32
    return %arg0, %arg1, %c0_i32 : i32, i32, i32
  }
  func.func @transform_4(%arg0: i32, %arg1: i32) -> (i32, i32, i32) {
    %c0_i32 = arith.constant 0 : i32
    %c0_i32_0 = arith.constant 0 : i32
    %c0_i32_1 = arith.constant 0 : i32
    return %arg0, %c0_i32, %c0_i32_0 : i32, i32, i32
  }
  func.func @transform_5(%arg0: i32, %arg1: i32) -> (i32, i32, i32) {
    %c0_i32 = arith.constant 0 : i32
    %c0_i32_0 = arith.constant 0 : i32
    %c0_i32_1 = arith.constant 0 : i32
    return %arg0, %c0_i32, %c0_i32_0 : i32, i32, i32
  }
}

module attributes {stable_mosaic.version = 11 : i64} {
  func.func @_conv_stats_kernel(%arg0: i32, %arg1: i32, %arg2: memref<1x16x256xbf16, #tpu.memory_space<vmem>>, %arg3: memref<256x128xbf16, #tpu.memory_space<vmem>>, %arg4: memref<1x128xf32, #tpu.memory_space<vmem>>, %arg5: memref<1x16x128xbf16, #tpu.memory_space<vmem>>, %arg6: memref<1x1x128xf32, #tpu.memory_space<vmem>>, %arg7: memref<1x1x128xf32, #tpu.memory_space<vmem>>) attributes {dimension_semantics = [#tpu.dimension_semantics<parallel>, #tpu.dimension_semantics<arbitrary>], iteration_bounds = array<i64: 2, 1>, scalar_prefetch = 0 : i64, scratch_operands = 0 : i64, tpu.core_type = #tpu.core_type<tc>, window_params = [{transform_indices = @transform_0, window_bounds = array<i64: 1, 16, 256>}, {pipeline_mode = #tpu.pipeline_mode<synchronous>, transform_indices = @transform_1, window_bounds = array<i64: 256, 128>}, {pipeline_mode = #tpu.pipeline_mode<synchronous>, transform_indices = @transform_2, window_bounds = array<i64: 1, 128>}, {transform_indices = @transform_3, window_bounds = array<i64: 1, 16, 128>}, {transform_indices = @transform_4, window_bounds = array<i64: 1, 1, 128>}, {transform_indices = @transform_5, window_bounds = array<i64: 1, 1, 128>}]} {
    %c0 = arith.constant 0 : index
    %c0_0 = arith.constant 0 : index
    %c0_1 = arith.constant 0 : index
    %0 = vector.load %arg2[%c0, %c0_0, %c0_1] : memref<1x16x256xbf16, #tpu.memory_space<vmem>>, vector<1x16x256xbf16>
    %1 = vector.shape_cast %0 : vector<1x16x256xbf16> to vector<16x256xbf16>
    %c0_2 = arith.constant 0 : index
    %c0_3 = arith.constant 0 : index
    %2 = vector.load %arg3[%c0_2, %c0_3] : memref<256x128xbf16, #tpu.memory_space<vmem>>, vector<256x128xbf16>
    %cst = arith.constant dense<0.000000e+00> : vector<16x128xf32>
    %3 = tpu.matmul %1, %2, %cst {dimension_numbers = #tpu.dot_dimension_numbers<[1], [0], [0], [1], [0, 0, 1, 1], [], []>} : vector<16x256xbf16>, vector<256x128xbf16>, vector<16x128xf32> -> vector<16x128xf32>
    %c0_4 = arith.constant 0 : index
    %c0_5 = arith.constant 0 : index
    %4 = vector.load %arg4[%c0_4, %c0_5] : memref<1x128xf32, #tpu.memory_space<vmem>>, vector<1x128xf32>
    %5 = vector.broadcast %4 : vector<1x128xf32> to vector<16x128xf32>
    %6 = arith.addf %3, %5 : vector<16x128xf32>
    %7 = arith.truncf %6 : vector<16x128xf32> to vector<16x128xbf16>
    %c0_6 = arith.constant 0 : index
    %c0_7 = arith.constant 0 : index
    %c0_8 = arith.constant 0 : index
    %8 = vector.load %arg5[%c0_6, %c0_7, %c0_8] : memref<1x16x128xbf16, #tpu.memory_space<vmem>>, vector<1x16x128xbf16>
    %9 = vector.shape_cast %8 : vector<1x16x128xbf16> to vector<16x128xbf16>
    %10 = vector.shape_cast %7 : vector<16x128xbf16> to vector<1x16x128xbf16>
    tpu.vector_store %arg5[%c0_6, %c0_7, %c0_8], %10 {strides = array<i32>} : memref<1x16x128xbf16, #tpu.memory_space<vmem>>, vector<1x16x128xbf16>,
    %c0_i32 = arith.constant 0 : i32
    %11 = arith.cmpi eq, %arg1, %c0_i32 : i32
    %12 = arith.extui %11 : i1 to i32
    %c0_i32_9 = arith.constant 0 : i32
    %13 = arith.cmpi ne, %12, %c0_i32_9 : i32
    scf.if %13 {
      %cst_24 = arith.constant 0.000000e+00 : f32
      %25 = vector.broadcast %cst_24 : f32 to vector<1x1x128xf32>
      %c0_25 = arith.constant 0 : index
      %c0_26 = arith.constant 0 : index
      %c0_27 = arith.constant 0 : index
      %26 = vector.load %arg6[%c0_25, %c0_26, %c0_27] : memref<1x1x128xf32, #tpu.memory_space<vmem>>, vector<1x1x128xf32>
      tpu.vector_store %arg6[%c0_25, %c0_26, %c0_27], %25 {strides = array<i32>} : memref<1x1x128xf32, #tpu.memory_space<vmem>>, vector<1x1x128xf32>,
      %cst_28 = arith.constant 0.000000e+00 : f32
      %27 = vector.broadcast %cst_28 : f32 to vector<1x1x128xf32>
      %c0_29 = arith.constant 0 : index
      %c0_30 = arith.constant 0 : index
      %c0_31 = arith.constant 0 : index
      %28 = vector.load %arg7[%c0_29, %c0_30, %c0_31] : memref<1x1x128xf32, #tpu.memory_space<vmem>>, vector<1x1x128xf32>
      tpu.vector_store %arg7[%c0_29, %c0_30, %c0_31], %27 {strides = array<i32>} : memref<1x1x128xf32, #tpu.memory_space<vmem>>, vector<1x1x128xf32>,
    } else {
    }
    %c0_10 = arith.constant 0 : index
    %c0_11 = arith.constant 0 : index
    %c0_12 = arith.constant 0 : index
    %14 = vector.load %arg6[%c0_10, %c0_11, %c0_12] : memref<1x1x128xf32, #tpu.memory_space<vmem>>, vector<1x1x128xf32>
    %cst_13 = arith.constant dense<0.000000e+00> : vector<128xf32>
    %15 = vector.multi_reduction <add>, %6, %cst_13 [0] : vector<16x128xf32> to vector<128xf32>
    %16 = vector.shape_cast %15 : vector<128xf32> to vector<1x1x128xf32>
    %17 = arith.addf %14, %16 : vector<1x1x128xf32>
    %c0_14 = arith.constant 0 : index
    %c0_15 = arith.constant 0 : index
    %c0_16 = arith.constant 0 : index
    %18 = vector.load %arg6[%c0_14, %c0_15, %c0_16] : memref<1x1x128xf32, #tpu.memory_space<vmem>>, vector<1x1x128xf32>
    tpu.vector_store %arg6[%c0_14, %c0_15, %c0_16], %17 {strides = array<i32>} : memref<1x1x128xf32, #tpu.memory_space<vmem>>, vector<1x1x128xf32>,
    %c0_17 = arith.constant 0 : index
    %c0_18 = arith.constant 0 : index
    %c0_19 = arith.constant 0 : index
    %19 = vector.load %arg7[%c0_17, %c0_18, %c0_19] : memref<1x1x128xf32, #tpu.memory_space<vmem>>, vector<1x1x128xf32>
    %20 = arith.mulf %6, %6 : vector<16x128xf32>
    %cst_20 = arith.constant dense<0.000000e+00> : vector<128xf32>
    %21 = vector.multi_reduction <add>, %20, %cst_20 [0] : vector<16x128xf32> to vector<128xf32>
    %22 = vector.shape_cast %21 : vector<128xf32> to vector<1x1x128xf32>
    %23 = arith.addf %19, %22 : vector<1x1x128xf32>
    %c0_21 = arith.constant 0 : index
    %c0_22 = arith.constant 0 : index
    %c0_23 = arith.constant 0 : index
    %24 = vector.load %arg7[%c0_21, %c0_22, %c0_23] : memref<1x1x128xf32, #tpu.memory_space<vmem>>, vector<1x1x128xf32>
    tpu.vector_store %arg7[%c0_21, %c0_22, %c0_23], %23 {strides = array<i32>} : memref<1x1x128xf32, #tpu.memory_space<vmem>>, vector<1x1x128xf32>,
    return
  }
  func.func @transform_0(%arg0: i32, %arg1: i32) -> (i32, i32, i32) {
    %c0_i32 = arith.constant 0 : i32
    %c0_i32_0 = arith.constant 0 : i32
    return %arg0, %arg1, %c0_i32 : i32, i32, i32
  }
  func.func @transform_1(%arg0: i32, %arg1: i32) -> (i32, i32) {
    %c0_i32 = arith.constant 0 : i32
    %c0_i32_0 = arith.constant 0 : i32
    %c0_i32_1 = arith.constant 0 : i32
    return %c0_i32, %c0_i32_0 : i32, i32
  }
  func.func @transform_2(%arg0: i32, %arg1: i32) -> (i32, i32) {
    %c0_i32 = arith.constant 0 : i32
    %c0_i32_0 = arith.constant 0 : i32
    %c0_i32_1 = arith.constant 0 : i32
    return %c0_i32, %c0_i32_0 : i32, i32
  }
  func.func @transform_3(%arg0: i32, %arg1: i32) -> (i32, i32, i32) {
    %c0_i32 = arith.constant 0 : i32
    %c0_i32_0 = arith.constant 0 : i32
    return %arg0, %arg1, %c0_i32 : i32, i32, i32
  }
  func.func @transform_4(%arg0: i32, %arg1: i32) -> (i32, i32, i32) {
    %c0_i32 = arith.constant 0 : i32
    %c0_i32_0 = arith.constant 0 : i32
    %c0_i32_1 = arith.constant 0 : i32
    return %arg0, %c0_i32, %c0_i32_0 : i32, i32, i32
  }
  func.func @transform_5(%arg0: i32, %arg1: i32) -> (i32, i32, i32) {
    %c0_i32 = arith.constant 0 : i32
    %c0_i32_0 = arith.constant 0 : i32
    %c0_i32_1 = arith.constant 0 : i32
    return %arg0, %c0_i32, %c0_i32_0 : i32, i32, i32
  }
}

module attributes {stable_mosaic.version = 11 : i64} {
  func.func @_conv_stats_kernel(%arg0: i32, %arg1: i32, %arg2: memref<1x64x512xbf16, #tpu.memory_space<vmem>>, %arg3: memref<512x128xbf16, #tpu.memory_space<vmem>>, %arg4: memref<1x128xf32, #tpu.memory_space<vmem>>, %arg5: memref<1x64x128xbf16, #tpu.memory_space<vmem>>, %arg6: memref<1x1x128xf32, #tpu.memory_space<vmem>>, %arg7: memref<1x1x128xf32, #tpu.memory_space<vmem>>) attributes {dimension_semantics = [#tpu.dimension_semantics<parallel>, #tpu.dimension_semantics<arbitrary>], iteration_bounds = array<i64: 2, 1>, scalar_prefetch = 0 : i64, scratch_operands = 0 : i64, tpu.core_type = #tpu.core_type<tc>, window_params = [{transform_indices = @transform_0, window_bounds = array<i64: 1, 64, 512>}, {pipeline_mode = #tpu.pipeline_mode<synchronous>, transform_indices = @transform_1, window_bounds = array<i64: 512, 128>}, {pipeline_mode = #tpu.pipeline_mode<synchronous>, transform_indices = @transform_2, window_bounds = array<i64: 1, 128>}, {transform_indices = @transform_3, window_bounds = array<i64: 1, 64, 128>}, {transform_indices = @transform_4, window_bounds = array<i64: 1, 1, 128>}, {transform_indices = @transform_5, window_bounds = array<i64: 1, 1, 128>}]} {
    %c0 = arith.constant 0 : index
    %c0_0 = arith.constant 0 : index
    %c0_1 = arith.constant 0 : index
    %0 = vector.load %arg2[%c0, %c0_0, %c0_1] : memref<1x64x512xbf16, #tpu.memory_space<vmem>>, vector<1x64x512xbf16>
    %1 = vector.shape_cast %0 : vector<1x64x512xbf16> to vector<64x512xbf16>
    %c0_2 = arith.constant 0 : index
    %c0_3 = arith.constant 0 : index
    %2 = vector.load %arg3[%c0_2, %c0_3] : memref<512x128xbf16, #tpu.memory_space<vmem>>, vector<512x128xbf16>
    %cst = arith.constant dense<0.000000e+00> : vector<64x128xf32>
    %3 = tpu.matmul %1, %2, %cst {dimension_numbers = #tpu.dot_dimension_numbers<[1], [0], [0], [1], [0, 0, 1, 1], [], []>} : vector<64x512xbf16>, vector<512x128xbf16>, vector<64x128xf32> -> vector<64x128xf32>
    %c0_4 = arith.constant 0 : index
    %c0_5 = arith.constant 0 : index
    %4 = vector.load %arg4[%c0_4, %c0_5] : memref<1x128xf32, #tpu.memory_space<vmem>>, vector<1x128xf32>
    %5 = vector.broadcast %4 : vector<1x128xf32> to vector<64x128xf32>
    %6 = arith.addf %3, %5 : vector<64x128xf32>
    %7 = arith.truncf %6 : vector<64x128xf32> to vector<64x128xbf16>
    %c0_6 = arith.constant 0 : index
    %c0_7 = arith.constant 0 : index
    %c0_8 = arith.constant 0 : index
    %8 = vector.load %arg5[%c0_6, %c0_7, %c0_8] : memref<1x64x128xbf16, #tpu.memory_space<vmem>>, vector<1x64x128xbf16>
    %9 = vector.shape_cast %8 : vector<1x64x128xbf16> to vector<64x128xbf16>
    %10 = vector.shape_cast %7 : vector<64x128xbf16> to vector<1x64x128xbf16>
    tpu.vector_store %arg5[%c0_6, %c0_7, %c0_8], %10 {strides = array<i32>} : memref<1x64x128xbf16, #tpu.memory_space<vmem>>, vector<1x64x128xbf16>,
    %c0_i32 = arith.constant 0 : i32
    %11 = arith.cmpi eq, %arg1, %c0_i32 : i32
    %12 = arith.extui %11 : i1 to i32
    %c0_i32_9 = arith.constant 0 : i32
    %13 = arith.cmpi ne, %12, %c0_i32_9 : i32
    scf.if %13 {
      %cst_24 = arith.constant 0.000000e+00 : f32
      %25 = vector.broadcast %cst_24 : f32 to vector<1x1x128xf32>
      %c0_25 = arith.constant 0 : index
      %c0_26 = arith.constant 0 : index
      %c0_27 = arith.constant 0 : index
      %26 = vector.load %arg6[%c0_25, %c0_26, %c0_27] : memref<1x1x128xf32, #tpu.memory_space<vmem>>, vector<1x1x128xf32>
      tpu.vector_store %arg6[%c0_25, %c0_26, %c0_27], %25 {strides = array<i32>} : memref<1x1x128xf32, #tpu.memory_space<vmem>>, vector<1x1x128xf32>,
      %cst_28 = arith.constant 0.000000e+00 : f32
      %27 = vector.broadcast %cst_28 : f32 to vector<1x1x128xf32>
      %c0_29 = arith.constant 0 : index
      %c0_30 = arith.constant 0 : index
      %c0_31 = arith.constant 0 : index
      %28 = vector.load %arg7[%c0_29, %c0_30, %c0_31] : memref<1x1x128xf32, #tpu.memory_space<vmem>>, vector<1x1x128xf32>
      tpu.vector_store %arg7[%c0_29, %c0_30, %c0_31], %27 {strides = array<i32>} : memref<1x1x128xf32, #tpu.memory_space<vmem>>, vector<1x1x128xf32>,
    } else {
    }
    %c0_10 = arith.constant 0 : index
    %c0_11 = arith.constant 0 : index
    %c0_12 = arith.constant 0 : index
    %14 = vector.load %arg6[%c0_10, %c0_11, %c0_12] : memref<1x1x128xf32, #tpu.memory_space<vmem>>, vector<1x1x128xf32>
    %cst_13 = arith.constant dense<0.000000e+00> : vector<128xf32>
    %15 = vector.multi_reduction <add>, %6, %cst_13 [0] : vector<64x128xf32> to vector<128xf32>
    %16 = vector.shape_cast %15 : vector<128xf32> to vector<1x1x128xf32>
    %17 = arith.addf %14, %16 : vector<1x1x128xf32>
    %c0_14 = arith.constant 0 : index
    %c0_15 = arith.constant 0 : index
    %c0_16 = arith.constant 0 : index
    %18 = vector.load %arg6[%c0_14, %c0_15, %c0_16] : memref<1x1x128xf32, #tpu.memory_space<vmem>>, vector<1x1x128xf32>
    tpu.vector_store %arg6[%c0_14, %c0_15, %c0_16], %17 {strides = array<i32>} : memref<1x1x128xf32, #tpu.memory_space<vmem>>, vector<1x1x128xf32>,
    %c0_17 = arith.constant 0 : index
    %c0_18 = arith.constant 0 : index
    %c0_19 = arith.constant 0 : index
    %19 = vector.load %arg7[%c0_17, %c0_18, %c0_19] : memref<1x1x128xf32, #tpu.memory_space<vmem>>, vector<1x1x128xf32>
    %20 = arith.mulf %6, %6 : vector<64x128xf32>
    %cst_20 = arith.constant dense<0.000000e+00> : vector<128xf32>
    %21 = vector.multi_reduction <add>, %20, %cst_20 [0] : vector<64x128xf32> to vector<128xf32>
    %22 = vector.shape_cast %21 : vector<128xf32> to vector<1x1x128xf32>
    %23 = arith.addf %19, %22 : vector<1x1x128xf32>
    %c0_21 = arith.constant 0 : index
    %c0_22 = arith.constant 0 : index
    %c0_23 = arith.constant 0 : index
    %24 = vector.load %arg7[%c0_21, %c0_22, %c0_23] : memref<1x1x128xf32, #tpu.memory_space<vmem>>, vector<1x1x128xf32>
    tpu.vector_store %arg7[%c0_21, %c0_22, %c0_23], %23 {strides = array<i32>} : memref<1x1x128xf32, #tpu.memory_space<vmem>>, vector<1x1x128xf32>,
    return
  }
  func.func @transform_0(%arg0: i32, %arg1: i32) -> (i32, i32, i32) {
    %c0_i32 = arith.constant 0 : i32
    %c0_i32_0 = arith.constant 0 : i32
    return %arg0, %arg1, %c0_i32 : i32, i32, i32
  }
  func.func @transform_1(%arg0: i32, %arg1: i32) -> (i32, i32) {
    %c0_i32 = arith.constant 0 : i32
    %c0_i32_0 = arith.constant 0 : i32
    %c0_i32_1 = arith.constant 0 : i32
    return %c0_i32, %c0_i32_0 : i32, i32
  }
  func.func @transform_2(%arg0: i32, %arg1: i32) -> (i32, i32) {
    %c0_i32 = arith.constant 0 : i32
    %c0_i32_0 = arith.constant 0 : i32
    %c0_i32_1 = arith.constant 0 : i32
    return %c0_i32, %c0_i32_0 : i32, i32
  }
  func.func @transform_3(%arg0: i32, %arg1: i32) -> (i32, i32, i32) {
    %c0_i32 = arith.constant 0 : i32
    %c0_i32_0 = arith.constant 0 : i32
    return %arg0, %arg1, %c0_i32 : i32, i32, i32
  }
  func.func @transform_4(%arg0: i32, %arg1: i32) -> (i32, i32, i32) {
    %c0_i32 = arith.constant 0 : i32
    %c0_i32_0 = arith.constant 0 : i32
    %c0_i32_1 = arith.constant 0 : i32
    return %arg0, %c0_i32, %c0_i32_0 : i32, i32, i32
  }
  func.func @transform_5(%arg0: i32, %arg1: i32) -> (i32, i32, i32) {
    %c0_i32 = arith.constant 0 : i32
    %c0_i32_0 = arith.constant 0 : i32
    %c0_i32_1 = arith.constant 0 : i32
    return %arg0, %c0_i32, %c0_i32_0 : i32, i32, i32
  }
}

module attributes {stable_mosaic.version = 11 : i64} {
  func.func @_conv_stats_kernel(%arg0: i32, %arg1: i32, %arg2: memref<1x64x256xbf16, #tpu.memory_space<vmem>>, %arg3: memref<256x128xbf16, #tpu.memory_space<vmem>>, %arg4: memref<1x128xf32, #tpu.memory_space<vmem>>, %arg5: memref<1x64x128xbf16, #tpu.memory_space<vmem>>, %arg6: memref<1x1x128xf32, #tpu.memory_space<vmem>>, %arg7: memref<1x1x128xf32, #tpu.memory_space<vmem>>) attributes {dimension_semantics = [#tpu.dimension_semantics<parallel>, #tpu.dimension_semantics<arbitrary>], iteration_bounds = array<i64: 2, 1>, scalar_prefetch = 0 : i64, scratch_operands = 0 : i64, tpu.core_type = #tpu.core_type<tc>, window_params = [{transform_indices = @transform_0, window_bounds = array<i64: 1, 64, 256>}, {pipeline_mode = #tpu.pipeline_mode<synchronous>, transform_indices = @transform_1, window_bounds = array<i64: 256, 128>}, {pipeline_mode = #tpu.pipeline_mode<synchronous>, transform_indices = @transform_2, window_bounds = array<i64: 1, 128>}, {transform_indices = @transform_3, window_bounds = array<i64: 1, 64, 128>}, {transform_indices = @transform_4, window_bounds = array<i64: 1, 1, 128>}, {transform_indices = @transform_5, window_bounds = array<i64: 1, 1, 128>}]} {
    %c0 = arith.constant 0 : index
    %c0_0 = arith.constant 0 : index
    %c0_1 = arith.constant 0 : index
    %0 = vector.load %arg2[%c0, %c0_0, %c0_1] : memref<1x64x256xbf16, #tpu.memory_space<vmem>>, vector<1x64x256xbf16>
    %1 = vector.shape_cast %0 : vector<1x64x256xbf16> to vector<64x256xbf16>
    %c0_2 = arith.constant 0 : index
    %c0_3 = arith.constant 0 : index
    %2 = vector.load %arg3[%c0_2, %c0_3] : memref<256x128xbf16, #tpu.memory_space<vmem>>, vector<256x128xbf16>
    %cst = arith.constant dense<0.000000e+00> : vector<64x128xf32>
    %3 = tpu.matmul %1, %2, %cst {dimension_numbers = #tpu.dot_dimension_numbers<[1], [0], [0], [1], [0, 0, 1, 1], [], []>} : vector<64x256xbf16>, vector<256x128xbf16>, vector<64x128xf32> -> vector<64x128xf32>
    %c0_4 = arith.constant 0 : index
    %c0_5 = arith.constant 0 : index
    %4 = vector.load %arg4[%c0_4, %c0_5] : memref<1x128xf32, #tpu.memory_space<vmem>>, vector<1x128xf32>
    %5 = vector.broadcast %4 : vector<1x128xf32> to vector<64x128xf32>
    %6 = arith.addf %3, %5 : vector<64x128xf32>
    %7 = arith.truncf %6 : vector<64x128xf32> to vector<64x128xbf16>
    %c0_6 = arith.constant 0 : index
    %c0_7 = arith.constant 0 : index
    %c0_8 = arith.constant 0 : index
    %8 = vector.load %arg5[%c0_6, %c0_7, %c0_8] : memref<1x64x128xbf16, #tpu.memory_space<vmem>>, vector<1x64x128xbf16>
    %9 = vector.shape_cast %8 : vector<1x64x128xbf16> to vector<64x128xbf16>
    %10 = vector.shape_cast %7 : vector<64x128xbf16> to vector<1x64x128xbf16>
    tpu.vector_store %arg5[%c0_6, %c0_7, %c0_8], %10 {strides = array<i32>} : memref<1x64x128xbf16, #tpu.memory_space<vmem>>, vector<1x64x128xbf16>,
    %c0_i32 = arith.constant 0 : i32
    %11 = arith.cmpi eq, %arg1, %c0_i32 : i32
    %12 = arith.extui %11 : i1 to i32
    %c0_i32_9 = arith.constant 0 : i32
    %13 = arith.cmpi ne, %12, %c0_i32_9 : i32
    scf.if %13 {
      %cst_24 = arith.constant 0.000000e+00 : f32
      %25 = vector.broadcast %cst_24 : f32 to vector<1x1x128xf32>
      %c0_25 = arith.constant 0 : index
      %c0_26 = arith.constant 0 : index
      %c0_27 = arith.constant 0 : index
      %26 = vector.load %arg6[%c0_25, %c0_26, %c0_27] : memref<1x1x128xf32, #tpu.memory_space<vmem>>, vector<1x1x128xf32>
      tpu.vector_store %arg6[%c0_25, %c0_26, %c0_27], %25 {strides = array<i32>} : memref<1x1x128xf32, #tpu.memory_space<vmem>>, vector<1x1x128xf32>,
      %cst_28 = arith.constant 0.000000e+00 : f32
      %27 = vector.broadcast %cst_28 : f32 to vector<1x1x128xf32>
      %c0_29 = arith.constant 0 : index
      %c0_30 = arith.constant 0 : index
      %c0_31 = arith.constant 0 : index
      %28 = vector.load %arg7[%c0_29, %c0_30, %c0_31] : memref<1x1x128xf32, #tpu.memory_space<vmem>>, vector<1x1x128xf32>
      tpu.vector_store %arg7[%c0_29, %c0_30, %c0_31], %27 {strides = array<i32>} : memref<1x1x128xf32, #tpu.memory_space<vmem>>, vector<1x1x128xf32>,
    } else {
    }
    %c0_10 = arith.constant 0 : index
    %c0_11 = arith.constant 0 : index
    %c0_12 = arith.constant 0 : index
    %14 = vector.load %arg6[%c0_10, %c0_11, %c0_12] : memref<1x1x128xf32, #tpu.memory_space<vmem>>, vector<1x1x128xf32>
    %cst_13 = arith.constant dense<0.000000e+00> : vector<128xf32>
    %15 = vector.multi_reduction <add>, %6, %cst_13 [0] : vector<64x128xf32> to vector<128xf32>
    %16 = vector.shape_cast %15 : vector<128xf32> to vector<1x1x128xf32>
    %17 = arith.addf %14, %16 : vector<1x1x128xf32>
    %c0_14 = arith.constant 0 : index
    %c0_15 = arith.constant 0 : index
    %c0_16 = arith.constant 0 : index
    %18 = vector.load %arg6[%c0_14, %c0_15, %c0_16] : memref<1x1x128xf32, #tpu.memory_space<vmem>>, vector<1x1x128xf32>
    tpu.vector_store %arg6[%c0_14, %c0_15, %c0_16], %17 {strides = array<i32>} : memref<1x1x128xf32, #tpu.memory_space<vmem>>, vector<1x1x128xf32>,
    %c0_17 = arith.constant 0 : index
    %c0_18 = arith.constant 0 : index
    %c0_19 = arith.constant 0 : index
    %19 = vector.load %arg7[%c0_17, %c0_18, %c0_19] : memref<1x1x128xf32, #tpu.memory_space<vmem>>, vector<1x1x128xf32>
    %20 = arith.mulf %6, %6 : vector<64x128xf32>
    %cst_20 = arith.constant dense<0.000000e+00> : vector<128xf32>
    %21 = vector.multi_reduction <add>, %20, %cst_20 [0] : vector<64x128xf32> to vector<128xf32>
    %22 = vector.shape_cast %21 : vector<128xf32> to vector<1x1x128xf32>
    %23 = arith.addf %19, %22 : vector<1x1x128xf32>
    %c0_21 = arith.constant 0 : index
    %c0_22 = arith.constant 0 : index
    %c0_23 = arith.constant 0 : index
    %24 = vector.load %arg7[%c0_21, %c0_22, %c0_23] : memref<1x1x128xf32, #tpu.memory_space<vmem>>, vector<1x1x128xf32>
    tpu.vector_store %arg7[%c0_21, %c0_22, %c0_23], %23 {strides = array<i32>} : memref<1x1x128xf32, #tpu.memory_space<vmem>>, vector<1x1x128xf32>,
    return
  }
  func.func @transform_0(%arg0: i32, %arg1: i32) -> (i32, i32, i32) {
    %c0_i32 = arith.constant 0 : i32
    %c0_i32_0 = arith.constant 0 : i32
    return %arg0, %arg1, %c0_i32 : i32, i32, i32
  }
  func.func @transform_1(%arg0: i32, %arg1: i32) -> (i32, i32) {
    %c0_i32 = arith.constant 0 : i32
    %c0_i32_0 = arith.constant 0 : i32
    %c0_i32_1 = arith.constant 0 : i32
    return %c0_i32, %c0_i32_0 : i32, i32
  }
  func.func @transform_2(%arg0: i32, %arg1: i32) -> (i32, i32) {
    %c0_i32 = arith.constant 0 : i32
    %c0_i32_0 = arith.constant 0 : i32
    %c0_i32_1 = arith.constant 0 : i32
    return %c0_i32, %c0_i32_0 : i32, i32
  }
  func.func @transform_3(%arg0: i32, %arg1: i32) -> (i32, i32, i32) {
    %c0_i32 = arith.constant 0 : i32
    %c0_i32_0 = arith.constant 0 : i32
    return %arg0, %arg1, %c0_i32 : i32, i32, i32
  }
  func.func @transform_4(%arg0: i32, %arg1: i32) -> (i32, i32, i32) {
    %c0_i32 = arith.constant 0 : i32
    %c0_i32_0 = arith.constant 0 : i32
    %c0_i32_1 = arith.constant 0 : i32
    return %arg0, %c0_i32, %c0_i32_0 : i32, i32, i32
  }
  func.func @transform_5(%arg0: i32, %arg1: i32) -> (i32, i32, i32) {
    %c0_i32 = arith.constant 0 : i32
    %c0_i32_0 = arith.constant 0 : i32
    %c0_i32_1 = arith.constant 0 : i32
    return %arg0, %c0_i32, %c0_i32_0 : i32, i32, i32
  }
}

module attributes {stable_mosaic.version = 11 : i64} {
  func.func @_conv_stats_kernel(%arg0: i32, %arg1: i32, %arg2: memref<1x64x128xbf16, #tpu.memory_space<vmem>>, %arg3: memref<128x128xbf16, #tpu.memory_space<vmem>>, %arg4: memref<1x128xf32, #tpu.memory_space<vmem>>, %arg5: memref<1x64x128xbf16, #tpu.memory_space<vmem>>, %arg6: memref<1x1x128xf32, #tpu.memory_space<vmem>>, %arg7: memref<1x1x128xf32, #tpu.memory_space<vmem>>) attributes {dimension_semantics = [#tpu.dimension_semantics<parallel>, #tpu.dimension_semantics<arbitrary>], iteration_bounds = array<i64: 2, 1>, scalar_prefetch = 0 : i64, scratch_operands = 0 : i64, tpu.core_type = #tpu.core_type<tc>, window_params = [{transform_indices = @transform_0, window_bounds = array<i64: 1, 64, 128>}, {pipeline_mode = #tpu.pipeline_mode<synchronous>, transform_indices = @transform_1, window_bounds = array<i64: 128, 128>}, {pipeline_mode = #tpu.pipeline_mode<synchronous>, transform_indices = @transform_2, window_bounds = array<i64: 1, 128>}, {transform_indices = @transform_3, window_bounds = array<i64: 1, 64, 128>}, {transform_indices = @transform_4, window_bounds = array<i64: 1, 1, 128>}, {transform_indices = @transform_5, window_bounds = array<i64: 1, 1, 128>}]} {
    %c0 = arith.constant 0 : index
    %c0_0 = arith.constant 0 : index
    %c0_1 = arith.constant 0 : index
    %0 = vector.load %arg2[%c0, %c0_0, %c0_1] : memref<1x64x128xbf16, #tpu.memory_space<vmem>>, vector<1x64x128xbf16>
    %1 = vector.shape_cast %0 : vector<1x64x128xbf16> to vector<64x128xbf16>
    %c0_2 = arith.constant 0 : index
    %c0_3 = arith.constant 0 : index
    %2 = vector.load %arg3[%c0_2, %c0_3] : memref<128x128xbf16, #tpu.memory_space<vmem>>, vector<128x128xbf16>
    %cst = arith.constant dense<0.000000e+00> : vector<64x128xf32>
    %3 = tpu.matmul %1, %2, %cst {dimension_numbers = #tpu.dot_dimension_numbers<[1], [0], [0], [1], [0, 0, 1, 1], [], []>} : vector<64x128xbf16>, vector<128x128xbf16>, vector<64x128xf32> -> vector<64x128xf32>
    %c0_4 = arith.constant 0 : index
    %c0_5 = arith.constant 0 : index
    %4 = vector.load %arg4[%c0_4, %c0_5] : memref<1x128xf32, #tpu.memory_space<vmem>>, vector<1x128xf32>
    %5 = vector.broadcast %4 : vector<1x128xf32> to vector<64x128xf32>
    %6 = arith.addf %3, %5 : vector<64x128xf32>
    %7 = arith.truncf %6 : vector<64x128xf32> to vector<64x128xbf16>
    %c0_6 = arith.constant 0 : index
    %c0_7 = arith.constant 0 : index
    %c0_8 = arith.constant 0 : index
    %8 = vector.load %arg5[%c0_6, %c0_7, %c0_8] : memref<1x64x128xbf16, #tpu.memory_space<vmem>>, vector<1x64x128xbf16>
    %9 = vector.shape_cast %8 : vector<1x64x128xbf16> to vector<64x128xbf16>
    %10 = vector.shape_cast %7 : vector<64x128xbf16> to vector<1x64x128xbf16>
    tpu.vector_store %arg5[%c0_6, %c0_7, %c0_8], %10 {strides = array<i32>} : memref<1x64x128xbf16, #tpu.memory_space<vmem>>, vector<1x64x128xbf16>,
    %c0_i32 = arith.constant 0 : i32
    %11 = arith.cmpi eq, %arg1, %c0_i32 : i32
    %12 = arith.extui %11 : i1 to i32
    %c0_i32_9 = arith.constant 0 : i32
    %13 = arith.cmpi ne, %12, %c0_i32_9 : i32
    scf.if %13 {
      %cst_24 = arith.constant 0.000000e+00 : f32
      %25 = vector.broadcast %cst_24 : f32 to vector<1x1x128xf32>
      %c0_25 = arith.constant 0 : index
      %c0_26 = arith.constant 0 : index
      %c0_27 = arith.constant 0 : index
      %26 = vector.load %arg6[%c0_25, %c0_26, %c0_27] : memref<1x1x128xf32, #tpu.memory_space<vmem>>, vector<1x1x128xf32>
      tpu.vector_store %arg6[%c0_25, %c0_26, %c0_27], %25 {strides = array<i32>} : memref<1x1x128xf32, #tpu.memory_space<vmem>>, vector<1x1x128xf32>,
      %cst_28 = arith.constant 0.000000e+00 : f32
      %27 = vector.broadcast %cst_28 : f32 to vector<1x1x128xf32>
      %c0_29 = arith.constant 0 : index
      %c0_30 = arith.constant 0 : index
      %c0_31 = arith.constant 0 : index
      %28 = vector.load %arg7[%c0_29, %c0_30, %c0_31] : memref<1x1x128xf32, #tpu.memory_space<vmem>>, vector<1x1x128xf32>
      tpu.vector_store %arg7[%c0_29, %c0_30, %c0_31], %27 {strides = array<i32>} : memref<1x1x128xf32, #tpu.memory_space<vmem>>, vector<1x1x128xf32>,
    } else {
    }
    %c0_10 = arith.constant 0 : index
    %c0_11 = arith.constant 0 : index
    %c0_12 = arith.constant 0 : index
    %14 = vector.load %arg6[%c0_10, %c0_11, %c0_12] : memref<1x1x128xf32, #tpu.memory_space<vmem>>, vector<1x1x128xf32>
    %cst_13 = arith.constant dense<0.000000e+00> : vector<128xf32>
    %15 = vector.multi_reduction <add>, %6, %cst_13 [0] : vector<64x128xf32> to vector<128xf32>
    %16 = vector.shape_cast %15 : vector<128xf32> to vector<1x1x128xf32>
    %17 = arith.addf %14, %16 : vector<1x1x128xf32>
    %c0_14 = arith.constant 0 : index
    %c0_15 = arith.constant 0 : index
    %c0_16 = arith.constant 0 : index
    %18 = vector.load %arg6[%c0_14, %c0_15, %c0_16] : memref<1x1x128xf32, #tpu.memory_space<vmem>>, vector<1x1x128xf32>
    tpu.vector_store %arg6[%c0_14, %c0_15, %c0_16], %17 {strides = array<i32>} : memref<1x1x128xf32, #tpu.memory_space<vmem>>, vector<1x1x128xf32>,
    %c0_17 = arith.constant 0 : index
    %c0_18 = arith.constant 0 : index
    %c0_19 = arith.constant 0 : index
    %19 = vector.load %arg7[%c0_17, %c0_18, %c0_19] : memref<1x1x128xf32, #tpu.memory_space<vmem>>, vector<1x1x128xf32>
    %20 = arith.mulf %6, %6 : vector<64x128xf32>
    %cst_20 = arith.constant dense<0.000000e+00> : vector<128xf32>
    %21 = vector.multi_reduction <add>, %20, %cst_20 [0] : vector<64x128xf32> to vector<128xf32>
    %22 = vector.shape_cast %21 : vector<128xf32> to vector<1x1x128xf32>
    %23 = arith.addf %19, %22 : vector<1x1x128xf32>
    %c0_21 = arith.constant 0 : index
    %c0_22 = arith.constant 0 : index
    %c0_23 = arith.constant 0 : index
    %24 = vector.load %arg7[%c0_21, %c0_22, %c0_23] : memref<1x1x128xf32, #tpu.memory_space<vmem>>, vector<1x1x128xf32>
    tpu.vector_store %arg7[%c0_21, %c0_22, %c0_23], %23 {strides = array<i32>} : memref<1x1x128xf32, #tpu.memory_space<vmem>>, vector<1x1x128xf32>,
    return
  }
  func.func @transform_0(%arg0: i32, %arg1: i32) -> (i32, i32, i32) {
    %c0_i32 = arith.constant 0 : i32
    %c0_i32_0 = arith.constant 0 : i32
    return %arg0, %arg1, %c0_i32 : i32, i32, i32
  }
  func.func @transform_1(%arg0: i32, %arg1: i32) -> (i32, i32) {
    %c0_i32 = arith.constant 0 : i32
    %c0_i32_0 = arith.constant 0 : i32
    %c0_i32_1 = arith.constant 0 : i32
    return %c0_i32, %c0_i32_0 : i32, i32
  }
  func.func @transform_2(%arg0: i32, %arg1: i32) -> (i32, i32) {
    %c0_i32 = arith.constant 0 : i32
    %c0_i32_0 = arith.constant 0 : i32
    %c0_i32_1 = arith.constant 0 : i32
    return %c0_i32, %c0_i32_0 : i32, i32
  }
  func.func @transform_3(%arg0: i32, %arg1: i32) -> (i32, i32, i32) {
    %c0_i32 = arith.constant 0 : i32
    %c0_i32_0 = arith.constant 0 : i32
    return %arg0, %arg1, %c0_i32 : i32, i32, i32
  }
  func.func @transform_4(%arg0: i32, %arg1: i32) -> (i32, i32, i32) {
    %c0_i32 = arith.constant 0 : i32
    %c0_i32_0 = arith.constant 0 : i32
    %c0_i32_1 = arith.constant 0 : i32
    return %arg0, %c0_i32, %c0_i32_0 : i32, i32, i32
  }
  func.func @transform_5(%arg0: i32, %arg1: i32) -> (i32, i32, i32) {
    %c0_i32 = arith.constant 0 : i32
    %c0_i32_0 = arith.constant 0 : i32
    %c0_i32_1 = arith.constant 0 : i32
    return %arg0, %c0_i32, %c0_i32_0 : i32, i32, i32
  }
}

module attributes {stable_mosaic.version = 11 : i64} {
  func.func @_in_apply_kernel(%arg0: i32, %arg1: i32, %arg2: memref<1x256x64xbf16, #tpu.memory_space<vmem>>, %arg3: memref<1x1x64xf32, #tpu.memory_space<vmem>>, %arg4: memref<1x1x64xf32, #tpu.memory_space<vmem>>, %arg5: memref<1x256x64xbf16, #tpu.memory_space<vmem>>) attributes {dimension_semantics = [#tpu.dimension_semantics<parallel>, #tpu.dimension_semantics<parallel>], iteration_bounds = array<i64: 2, 1>, scalar_prefetch = 0 : i64, scratch_operands = 0 : i64, tpu.core_type = #tpu.core_type<tc>, window_params = [{transform_indices = @transform_0, window_bounds = array<i64: 1, 256, 64>}, {transform_indices = @transform_1, window_bounds = array<i64: 1, 1, 64>}, {transform_indices = @transform_2, window_bounds = array<i64: 1, 1, 64>}, {transform_indices = @transform_3, window_bounds = array<i64: 1, 256, 64>}]} {
    %c0 = arith.constant 0 : index
    %c0_0 = arith.constant 0 : index
    %c0_1 = arith.constant 0 : index
    %0 = vector.load %arg2[%c0, %c0_0, %c0_1] : memref<1x256x64xbf16, #tpu.memory_space<vmem>>, vector<1x256x64xbf16>
    %1 = vector.shape_cast %0 : vector<1x256x64xbf16> to vector<256x64xbf16>
    %2 = arith.extf %1 : vector<256x64xbf16> to vector<256x64xf32>
    %c0_2 = arith.constant 0 : index
    %c0_3 = arith.constant 0 : index
    %c0_4 = arith.constant 0 : index
    %3 = vector.load %arg3[%c0_2, %c0_3, %c0_4] : memref<1x1x64xf32, #tpu.memory_space<vmem>>, vector<1x1x64xf32>
    %4 = vector.shape_cast %3 : vector<1x1x64xf32> to vector<64xf32>
    %cst = arith.constant 3.906250e-03 : f32
    %5 = vector.broadcast %cst : f32 to vector<64xf32>
    %6 = arith.mulf %4, %5 : vector<64xf32>
    %c0_5 = arith.constant 0 : index
    %c0_6 = arith.constant 0 : index
    %c0_7 = arith.constant 0 : index
    %7 = vector.load %arg4[%c0_5, %c0_6, %c0_7] : memref<1x1x64xf32, #tpu.memory_space<vmem>>, vector<1x1x64xf32>
    %8 = vector.shape_cast %7 : vector<1x1x64xf32> to vector<64xf32>
    %cst_8 = arith.constant 3.906250e-03 : f32
    %9 = vector.broadcast %cst_8 : f32 to vector<64xf32>
    %10 = arith.mulf %8, %9 : vector<64xf32>
    %11 = arith.mulf %6, %6 : vector<64xf32>
    %12 = arith.subf %10, %11 : vector<64xf32>
    %cst_9 = arith.constant 0.000000e+00 : f32
    %13 = vector.broadcast %cst_9 : f32 to vector<64xf32>
    %14 = arith.maximumf %12, %13 : vector<64xf32>
    %15 = vector.shape_cast %6 : vector<64xf32> to vector<1x64xf32>
    %16 = vector.broadcast %15 : vector<1x64xf32> to vector<256x64xf32>
    %17 = arith.subf %2, %16 : vector<256x64xf32>
    %cst_10 = arith.constant 9.99999974E-6 : f32
    %18 = vector.broadcast %cst_10 : f32 to vector<64xf32>
    %19 = arith.addf %14, %18 : vector<64xf32>
    %20 = math.rsqrt %19 : vector<64xf32>
    %21 = vector.shape_cast %20 : vector<64xf32> to vector<1x64xf32>
    %22 = vector.broadcast %21 : vector<1x64xf32> to vector<256x64xf32>
    %23 = arith.mulf %17, %22 : vector<256x64xf32>
    %cst_11 = arith.constant 0.000000e+00 : f32
    %24 = vector.broadcast %cst_11 : f32 to vector<256x64xf32>
    %25 = arith.maximumf %23, %24 : vector<256x64xf32>
    %26 = arith.truncf %25 : vector<256x64xf32> to vector<256x64xbf16>
    %c0_12 = arith.constant 0 : index
    %c0_13 = arith.constant 0 : index
    %c0_14 = arith.constant 0 : index
    %27 = vector.load %arg5[%c0_12, %c0_13, %c0_14] : memref<1x256x64xbf16, #tpu.memory_space<vmem>>, vector<1x256x64xbf16>
    %28 = vector.shape_cast %27 : vector<1x256x64xbf16> to vector<256x64xbf16>
    %29 = vector.shape_cast %26 : vector<256x64xbf16> to vector<1x256x64xbf16>
    tpu.vector_store %arg5[%c0_12, %c0_13, %c0_14], %29 {strides = array<i32>} : memref<1x256x64xbf16, #tpu.memory_space<vmem>>, vector<1x256x64xbf16>,
    return
  }
  func.func @transform_0(%arg0: i32, %arg1: i32) -> (i32, i32, i32) {
    %c0_i32 = arith.constant 0 : i32
    %c0_i32_0 = arith.constant 0 : i32
    return %arg0, %arg1, %c0_i32 : i32, i32, i32
  }
  func.func @transform_1(%arg0: i32, %arg1: i32) -> (i32, i32, i32) {
    %c0_i32 = arith.constant 0 : i32
    %c0_i32_0 = arith.constant 0 : i32
    %c0_i32_1 = arith.constant 0 : i32
    return %arg0, %c0_i32, %c0_i32_0 : i32, i32, i32
  }
  func.func @transform_2(%arg0: i32, %arg1: i32) -> (i32, i32, i32) {
    %c0_i32 = arith.constant 0 : i32
    %c0_i32_0 = arith.constant 0 : i32
    %c0_i32_1 = arith.constant 0 : i32
    return %arg0, %c0_i32, %c0_i32_0 : i32, i32, i32
  }
  func.func @transform_3(%arg0: i32, %arg1: i32) -> (i32, i32, i32) {
    %c0_i32 = arith.constant 0 : i32
    %c0_i32_0 = arith.constant 0 : i32
    return %arg0, %arg1, %c0_i32 : i32, i32, i32
  }
}

module attributes {stable_mosaic.version = 11 : i64} {
  func.func @_small_n_kernel(%arg0: i32, %arg1: memref<8x3200xbf16, #tpu.memory_space<vmem>>, %arg2: memref<3200x512xbf16, #tpu.memory_space<vmem>>, %arg3: memref<8x1xf32, #tpu.memory_space<vmem>>, %arg4: memref<8x512xbf16, #tpu.memory_space<vmem>>) attributes {dimension_semantics = [#tpu.dimension_semantics<parallel>], iteration_bounds = array<i64: 1>, scalar_prefetch = 0 : i64, scratch_operands = 0 : i64, tpu.core_type = #tpu.core_type<tc>, window_params = [{pipeline_mode = #tpu.pipeline_mode<synchronous>, transform_indices = @transform_0, window_bounds = array<i64: 8, 3200>}, {transform_indices = @transform_1, window_bounds = array<i64: 3200, 512>}, {pipeline_mode = #tpu.pipeline_mode<synchronous>, transform_indices = @transform_2, window_bounds = array<i64: 8, 1>}, {transform_indices = @transform_3, window_bounds = array<i64: 8, 512>}]} {
    %c0 = arith.constant 0 : index
    %c0_0 = arith.constant 0 : index
    %0 = vector.load %arg1[%c0, %c0_0] : memref<8x3200xbf16, #tpu.memory_space<vmem>>, vector<8x3200xbf16>
    %c0_1 = arith.constant 0 : index
    %c0_2 = arith.constant 0 : index
    %1 = vector.load %arg2[%c0_1, %c0_2] : memref<3200x512xbf16, #tpu.memory_space<vmem>>, vector<3200x512xbf16>
    %cst = arith.constant dense<0.000000e+00> : vector<8x512xf32>
    %2 = tpu.matmul %0, %1, %cst {dimension_numbers = #tpu.dot_dimension_numbers<[1], [0], [0], [1], [0, 0, 1, 1], [], []>} : vector<8x3200xbf16>, vector<3200x512xbf16>, vector<8x512xf32> -> vector<8x512xf32>
    %c0_3 = arith.constant 0 : index
    %c0_4 = arith.constant 0 : index
    %3 = vector.load %arg3[%c0_3, %c0_4] : memref<8x1xf32, #tpu.memory_space<vmem>>, vector<8x1xf32>
    %4 = vector.broadcast %3 : vector<8x1xf32> to vector<8x512xf32>
    %5 = arith.addf %2, %4 : vector<8x512xf32>
    %6 = math.tanh %5 : vector<8x512xf32>
    %7 = arith.truncf %6 : vector<8x512xf32> to vector<8x512xbf16>
    %c0_5 = arith.constant 0 : index
    %c0_6 = arith.constant 0 : index
    %8 = vector.load %arg4[%c0_5, %c0_6] : memref<8x512xbf16, #tpu.memory_space<vmem>>, vector<8x512xbf16>
    tpu.vector_store %arg4[%c0_5, %c0_6], %7 {strides = array<i32>} : memref<8x512xbf16, #tpu.memory_space<vmem>>, vector<8x512xbf16>,
    return
  }
  func.func @transform_0(%arg0: i32) -> (i32, i32) {
    %c0_i32 = arith.constant 0 : i32
    %c0_i32_0 = arith.constant 0 : i32
    %c0_i32_1 = arith.constant 0 : i32
    return %c0_i32, %c0_i32_0 : i32, i32
  }
  func.func @transform_1(%arg0: i32) -> (i32, i32) {
    %c0_i32 = arith.constant 0 : i32
    %c0_i32_0 = arith.constant 0 : i32
    return %c0_i32, %arg0 : i32, i32
  }
  func.func @transform_2(%arg0: i32) -> (i32, i32) {
    %c0_i32 = arith.constant 0 : i32
    %c0_i32_0 = arith.constant 0 : i32
    %c0_i32_1 = arith.constant 0 : i32
    return %c0_i32, %c0_i32_0 : i32, i32
  }
  func.func @transform_3(%arg0: i32) -> (i32, i32) {
    %c0_i32 = arith.constant 0 : i32
    %c0_i32_0 = arith.constant 0 : i32
    return %c0_i32, %arg0 : i32, i32
  }
}

</mosaic_0001>

<bundles_post_ra>
// kernel: _lambda_.40
= control target key start
LH: loop header
LB: loop body
LE: loop exit
PB: predicated region body
PF: predicated region fallthrough
CT: control target
= control target key end

     0   :  { %s1465_s12 = smov 0   ;;  %s1467_s13 = smov 0   ;;  %s1639_s0 = inlined_call_operand.vmem [shape: bf16[2,256,256], index: 0, kind: input, shape index: {}]   ;;  %s1640_s1 = inlined_call_operand.vmem [shape: bf16[256,128], index: 1, kind: input, shape index: {}]   ;;  %s1641_s2 = inlined_call_operand.vmem [shape: f32[1,128], index: 2, kind: input, shape index: {}]   ;;  %s1642_s3 = inlined_call_operand.vmem [shape: bf16[2,256,128], index: 3, kind: output, shape index: {}]  }
   0x1   :  { %s1469_s14 = smov 0  }
   0x2 LB: > { %s25_s15 = sadd.s32 1, %s1439_s13  ;;  %p988_p0 = scmp.ge.s32.totalorder %s1443_s14, 1  ;;  %s1443_s14 = sphi %s1469_s14, %s13_s14   ;;  %s1439_s13 = sphi %s1467_s13, %s1644_s13   ;;  %s1435_s12 = sphi %s1465_s12, %s1643_s12  }
   0x3   : > { %p27_p1 = scmp.ge.s32.totalorder %s25_s15, 2  ;;  %p159_p2 = scmp.lt.s32.totalorder %s1443_s14, 3 }
   0x5   : > { %s1646_s15 = smov (%p27_p1, %s25_s15), 0  ;;  %p160_p3 = pnand %p988_p0, %p159_p2 }
   0x6   : > { %v1357_v0 = vld [vmem:[%s1640_s1 + $0x40] sm:$0xff] (!%p160_p3)   ;;  %v1359_v2 = vld [vmem:[%s1640_s1 + $0x48] sm:$0xff] (!%p160_p3)   ;;  %p193_p4 = scmp.lt.s32.totalorder (!%p160_p3), %s1435_s12, 1  ;;  %v1361_v4 = vld [vmem:[%s1640_s1 + $0x50] sm:$0xff] (!%p160_p3)  }
   0x7   : > { %163 = sbr.rel (%p160_p3) target bundleno = 320 (0x140), region = 32  ;;  %v1358_v1 = vld [vmem:[%s1640_s1] sm:$0xff] (!%p160_p3)   ;;  %1205 = vmatprep.subr.bf16.mxu0 (!%p160_p3), %v1357_v0  ;;  %1317 = vmatprep.subr.bf16.mxu1 (!%p160_p3), %v1357_v0  ;;  %v1360_v3 = vld [vmem:[%s1640_s1 + $0x8] sm:$0xff] (!%p160_p3)   ;;  %v1362_v5 = vld [vmem:[%s1640_s1 + $0x10] sm:$0xff] (!%p160_p3)  }
   0x8   : > { %1206 = vmatpush3.bf16.msra.mxu0 (!%p160_p3), %v1358_v1  ;;  %1325 = vmatpush3.bf16.msra.mxu1 (!%p160_p3), %v1358_v1  ;;  %v1363_v6 = vld [vmem:[%s1640_s1 + $0x58] sm:$0xff] (!%p160_p3)   ;;  %v1365_v8 = vld [vmem:[%s1640_s1 + $0x60] sm:$0xff] (!%p160_p3)   ;;  %v1367_v10 = vld [vmem:[%s1640_s1 + $0x68] sm:$0xff] (!%p160_p3)  }
   0x9   : > { %1207 = vmatprep.subr.bf16.mxu0 (!%p160_p3), %v1359_v2  ;;  %1318 = vmatprep.subr.bf16.mxu1 (!%p160_p3), %v1359_v2  ;;  %v1364_v7 = vld [vmem:[%s1640_s1 + $0x18] sm:$0xff] (!%p160_p3)   ;;  %v1366_v9 = vld [vmem:[%s1640_s1 + $0x20] sm:$0xff] (!%p160_p3)   ;;  %v1368_v13 = vld [vmem:[%s1640_s1 + $0x28] sm:$0xff] (!%p160_p3)  }
   0xa   : > { %v1369_v14 = vld [vmem:[%s1640_s1 + $0x70] sm:$0xff] (!%p160_p3)   ;;  %v1371_v16 = vld [vmem:[%s1640_s1 + $0x78] sm:$0xff] (!%p160_p3)   ;;  %v1574_v50 = vld [vmem:[%s1641_s2] ss:$0 sm:$0xff] (!%p160_p3) }
   0xb   : > { %v1370_v15 = vld [vmem:[%s1640_s1 + $0x30] sm:$0xff] (!%p160_p3)   ;;  %v1372_v17 = vld [vmem:[%s1640_s1 + $0x38] sm:$0xff] (!%p160_p3)  }
   0xc   : > { %1208 = vmatpush3.bf16.msra.mxu0 (!%p160_p3), %v1360_v3  ;;  %1326 = vmatpush3.bf16.msra.mxu1 (!%p160_p3), %v1360_v3 }
   0xd   : > { %1209 = vmatprep.subr.bf16.mxu0 (!%p160_p3), %v1361_v4  ;;  %1319 = vmatprep.subr.bf16.mxu1 (!%p160_p3), %v1361_v4 }
   0xe   : > { %s1648_s12 = smov (!%p193_p4, %s1435_s12), 1 }
   0xf   : > { %s1076_s5 = sshll.u32 %s1648_s12, 8  ;;  %s1077_s4 = sshll.u32 %s1648_s12, 7 }
  0x10   : > { %1210 = vmatpush3.bf16.msra.mxu0 %v1362_v5  ;;  %1327 = vmatpush3.bf16.msra.mxu1 %v1362_v5  ;;  %s1516_s10 = scalar_lea.vmem %s1639_s0, %s1076_s5  ;;  %s1584_s7 = scalar_lea.vmem %s1642_s3, %s1077_s4 }
  0x11   : > { %1211 = vmatprep.subr.bf16.mxu0 %v1363_v6  ;;  %1320 = vmatprep.subr.bf16.mxu1 %v1363_v6  ;;  %v1375_v11 = vld [vmem:[%s1516_s10 + $0x4] ss:$8 sps:$4 sm:$0xff]   ;;  %v1373_v18 = vld [vmem:[%s1516_s10] ss:$8 sps:$4 sm:$0xff]   ;;  %v1379_v20 = vld [vmem:[%s1516_s10 + $0x14] ss:$8 sps:$4 sm:$0xff]  }
  0x12   : > { %v1378_v12 = vld [vmem:[%s1516_s10 + $0x84] ss:$8 sps:$4 sm:$0xff]   ;;  %573 = vmatprep.mubr.bf16.mxu0 %v1375_v11  ;;  %v1376_v19 = vld [vmem:[%s1516_s10 + $0x80] ss:$8 sps:$4 sm:$0xff]   ;;  %v1381_v21 = vld [vmem:[%s1516_s10 + $0x94] ss:$8 sps:$4 sm:$0xff]  }
  0x13   : > { %637 = vmatprep.mubr.bf16.mxu1 %v1378_v12  ;;  %v1383_v22 = vld [vmem:[%s1516_s10 + $0x10] ss:$8 sps:$4 sm:$0xff]   ;;  %v1385_v24 = vld [vmem:[%s1516_s10 + $0x24] ss:$8 sps:$4 sm:$0xff]   ;;  %v1389_v26 = vld [vmem:[%s1516_s10 + $0x20] ss:$8 sps:$4 sm:$0xff]  }
  0x14   : > { %1212 = vmatpush3.bf16.msra.mxu0 %v1364_v7  ;;  %1328 = vmatpush3.bf16.msra.mxu1 %v1364_v7  ;;  %v1384_v23 = vld [vmem:[%s1516_s10 + $0x90] ss:$8 sps:$4 sm:$0xff]   ;;  %v1387_v25 = vld [vmem:[%s1516_s10 + $0xa4] ss:$8 sps:$4 sm:$0xff]   ;;  %v1390_v27 = vld [vmem:[%s1516_s10 + $0xa0] ss:$8 sps:$4 sm:$0xff]  }
  0x15   : > { %1213 = vmatprep.subr.bf16.mxu0 %v1365_v8  ;;  %1321 = vmatprep.subr.bf16.mxu1 %v1365_v8  ;;  %v1391_v28 = vld [vmem:[%s1516_s10 + $0x34] ss:$8 sps:$4 sm:$0xff]   ;;  %v1395_v30 = vld [vmem:[%s1516_s10 + $0x30] ss:$8 sps:$4 sm:$0xff]   ;;  %v1397_v32 = vld [vmem:[%s1516_s10 + $0x44] ss:$8 sps:$4 sm:$0xff]  }
  0x16   : > { %v1393_v29 = vld [vmem:[%s1516_s10 + $0xb4] ss:$8 sps:$4 sm:$0xff]   ;;  %v1396_v31 = vld [vmem:[%s1516_s10 + $0xb0] ss:$8 sps:$4 sm:$0xff]   ;;  %v1399_v33 = vld [vmem:[%s1516_s10 + $0xc4] ss:$8 sps:$4 sm:$0xff]  }
  0x17   : > { %v1401_v34 = vld [vmem:[%s1516_s10 + $0x40] ss:$8 sps:$4 sm:$0xff]   ;;  %v1403_v36 = vld [vmem:[%s1516_s10 + $0x54] ss:$8 sps:$4 sm:$0xff]   ;;  %v1407_v38 = vld [vmem:[%s1516_s10 + $0x50] ss:$8 sps:$4 sm:$0xff]  }
  0x18   : > { %1214 = vmatpush3.bf16.msra.mxu0 %v1366_v9  ;;  %1329 = vmatpush3.bf16.msra.mxu1 %v1366_v9  ;;  %v1402_v35 = vld [vmem:[%s1516_s10 + $0xc0] ss:$8 sps:$4 sm:$0xff]   ;;  %v1405_v37 = vld [vmem:[%s1516_s10 + $0xd4] ss:$8 sps:$4 sm:$0xff]   ;;  %v1408_v39 = vld [vmem:[%s1516_s10 + $0xd0] ss:$8 sps:$4 sm:$0xff]  }
  0x19   : > { %1215 = vmatprep.subr.bf16.mxu0 %v1367_v10  ;;  %1322 = vmatprep.subr.bf16.mxu1 %v1367_v10  ;;  %v1409_v40 = vld [vmem:[%s1516_s10 + $0x64] ss:$8 sps:$4 sm:$0xff]   ;;  %v1413_v42 = vld [vmem:[%s1516_s10 + $0x60] ss:$8 sps:$4 sm:$0xff]   ;;  %v1415_v44 = vld [vmem:[%s1516_s10 + $0x74] ss:$8 sps:$4 sm:$0xff]  }
  0x1a   : > { %v1411_v41 = vld [vmem:[%s1516_s10 + $0xe4] ss:$8 sps:$4 sm:$0xff]   ;;  %v1414_v43 = vld [vmem:[%s1516_s10 + $0xe0] ss:$8 sps:$4 sm:$0xff]   ;;  %v1417_v45 = vld [vmem:[%s1516_s10 + $0xf4] ss:$8 sps:$4 sm:$0xff]  }
  0x1b   : > { %v1419_v46 = vld [vmem:[%s1516_s10 + $0x70] ss:$8 sps:$4 sm:$0xff]  }
  0x1c   : > { %1216 = vmatpush3.bf16.msra.mxu0 %v1368_v13  ;;  %1330 = vmatpush3.bf16.msra.mxu1 %v1368_v13  ;;  %v1420_v47 = vld [vmem:[%s1516_s10 + $0xf0] ss:$8 sps:$4 sm:$0xff]  }
  0x1d   : > { %1217 = vmatprep.subr.bf16.mxu0 %v1369_v14  ;;  %1323 = vmatprep.subr.bf16.mxu1 %v1369_v14 }
  0x20   : > { %1218 = vmatpush3.bf16.msra.mxu0 %v1370_v15  ;;  %1331 = vmatpush3.bf16.msra.mxu1 %v1370_v15 }
  0x21   : > { %1219 = vmatprep.subr.bf16.mxu0 %v1371_v16  ;;  %1324 = vmatprep.subr.bf16.mxu1 %v1371_v16 }
  0x24   : > { %1220 = vmatpush3.bf16.msra.mxu0 %v1372_v17  ;;  %1332 = vmatpush3.bf16.msra.mxu1 %v1372_v17 }
  0x27   : > { %574 = vmatmul.mubr.bf16.vlgmr.msra.gmra.mrb[0].mxu0 %v1373_v18  ;;  %638 = vmatmul.mubr.bf16.vlgmr.msra.gmra.mrb[0].mxu1 %v1376_v19 }
  0x28   : > { %581 = vmatprep.mubr.bf16.mxu0 %v1379_v20  ;;  %645 = vmatprep.mubr.bf16.mxu1 %v1381_v21 }
  0x2f   : > { %582 = vmatmul.mubr.bf16.gmra.mrb[4].mxu0 %v1383_v22  ;;  %646 = vmatmul.mubr.bf16.gmra.mrb[4].mxu1 %v1384_v23 }
  0x30   : > { %589 = vmatprep.mubr.bf16.mxu0 %v1385_v24  ;;  %653 = vmatprep.mubr.bf16.mxu1 %v1387_v25 }
  0x37   : > { %590 = vmatmul.mubr.bf16.gmra.mrb[8].mxu0 %v1389_v26  ;;  %654 = vmatmul.mubr.bf16.gmra.mrb[8].mxu1 %v1390_v27 }
  0x38   : > { %597 = vmatprep.mubr.bf16.mxu0 %v1391_v28  ;;  %661 = vmatprep.mubr.bf16.mxu1 %v1393_v29 }
  0x3f   : > { %598 = vmatmul.mubr.bf16.gmra.mrb[12].mxu0 %v1395_v30  ;;  %662 = vmatmul.mubr.bf16.gmra.mrb[12].mxu1 %v1396_v31 }
  0x40   : > { %605 = vmatprep.mubr.bf16.mxu0 %v1397_v32  ;;  %669 = vmatprep.mubr.bf16.mxu1 %v1399_v33 }
  0x47   : > { %606 = vmatmul.mubr.bf16.gmra.mrb[16].mxu0 %v1401_v34  ;;  %670 = vmatmul.mubr.bf16.gmra.mrb[16].mxu1 %v1402_v35 }
  0x48   : > { %613 = vmatprep.mubr.bf16.mxu0 %v1403_v36  ;;  %677 = vmatprep.mubr.bf16.mxu1 %v1405_v37 }
  0x4f   : > { %614 = vmatmul.mubr.bf16.gmra.mrb[20].mxu0 %v1407_v38  ;;  %678 = vmatmul.mubr.bf16.gmra.mrb[20].mxu1 %v1408_v39 }
  0x50   : > { %621 = vmatprep.mubr.bf16.mxu0 %v1409_v40  ;;  %685 = vmatprep.mubr.bf16.mxu1 %v1411_v41 }
  0x57   : > { %622 = vmatmul.mubr.bf16.gmra.mrb[24].mxu0 %v1413_v42  ;;  %686 = vmatmul.mubr.bf16.gmra.mrb[24].mxu1 %v1414_v43 }
  0x58   : > { %629 = vmatprep.mubr.bf16.mxu0 %v1415_v44  ;;  %693 = vmatprep.mubr.bf16.mxu1 %v1417_v45 }
  0x5f   : > { %630 = vmatmul.mubr.bf16.gmra.mrb[28].mxu0 %v1419_v46  ;;  %694 = vmatmul.mubr.bf16.gmra.mrb[28].mxu1 %v1420_v47 }
  0xfa   : > { %v1221_v48 = vpop.f32.mrb[0].mxu0  ;;  %v1269_v49 = vpop.f32.mrb[0].mxu1 }
  0xfb   : > { %v1222_v51 = vpop.f32.mrb[1].mxu0  ;;  %v1270_v52 = vpop.f32.mrb[1].mxu1 }
  0xfc   : > { %v1223_v53 = vadd.f32 %v1222_v51, %v1221_v48  ;;  %v1271_v54 = vadd.f32 %v1270_v52, %v1269_v49  ;;  %v1224_v55 = vpop.f32.mrb[2].mxu0  ;;  %v1272_v56 = vpop.f32.mrb[2].mxu1 }
  0xfd   : > { %v1225_v57 = vpop.f32.mrb[3].mxu0  ;;  %v1273_v58 = vpop.f32.mrb[3].mxu1 }
  0xfe   : > { %v576_v59 = vadd.f32 %v1223_v53, %v1574_v50  ;;  %v640_v60 = vadd.f32 %v1271_v54, %v1574_v50  ;;  %v1226_v61 = vadd.f32 %v1225_v57, %v1224_v55  ;;  %v1274_v62 = vadd.f32 %v1273_v58, %v1272_v56 }
 0x100   : > { %v579_v63 = vadd.f32 %v1226_v61, %v1574_v50  ;;  %v643_v0 = vadd.f32 %v1274_v62, %v1574_v50  ;;  %v702_v1 = vmax.f32 %v576_v59, 0.0  ;;  %v718_v2 = vmax.f32 %v640_v60, 0.0 }
 0x102   : > { %v703_v3 = vmax.f32 %v579_v63, 0.0  ;;  %v719_v4 = vmax.f32 %v643_v0, 0.0  ;;  %v1227_v5 = vpop.f32.mrb[4].mxu0  ;;  %v1275_v6 = vpop.f32.mrb[4].mxu1 }
 0x103   : > { %v1228_v7 = vpop.f32.mrb[5].mxu0  ;;  %v1276_v8 = vpop.f32.mrb[5].mxu1 }
 0x104   : > { %v1113_v9 = vpack.c.bf16 %v703_v3, %v702_v1  ;;  %v1153_v10 = vpack.c.bf16 %v719_v4, %v718_v2  ;;  %v1229_v11 = vadd.f32 %v1228_v7, %v1227_v5  ;;  %v1277_v12 = vadd.f32 %v1276_v8, %v1275_v6  ;;  %v1230_v13 = vpop.f32.mrb[6].mxu0  ;;  %v1278_v14 = vpop.f32.mrb[6].mxu1 }
 0x105   : > { %v1231_v15 = vpop.f32.mrb[7].mxu0  ;;  %v1279_v16 = vpop.f32.mrb[7].mxu1 }
 0x106   : > { %1114 = vst [vmem:[%s1584_s7] sm:$0xff] %v1113_v9   ;;  %1197 = vst [vmem:[%s1584_s7 + $0x40] sm:$0xff] %v1153_v10   ;;  %v584_v17 = vadd.f32 %v1229_v11, %v1574_v50  ;;  %v648_v18 = vadd.f32 %v1277_v12, %v1574_v50  ;;  %v1232_v19 = vadd.f32 %v1231_v15, %v1230_v13 }
 0x107   : > { %v1280_v20 = vadd.f32 %v1279_v16, %v1278_v14 }
 0x108   : > { %v587_v21 = vadd.f32 %v1232_v19, %v1574_v50  ;;  %v704_v23 = vmax.f32 %v584_v17, 0.0  ;;  %v720_v24 = vmax.f32 %v648_v18, 0.0 }
 0x109   : > { %v651_v22 = vadd.f32 %v1280_v20, %v1574_v50 }
 0x10a   : > { %v705_v25 = vmax.f32 %v587_v21, 0.0  ;;  %v1233_v27 = vpop.f32.mrb[8].mxu0  ;;  %v1281_v28 = vpop.f32.mrb[8].mxu1 }
 0x10b   : > { %v721_v26 = vmax.f32 %v651_v22, 0.0  ;;  %v1234_v29 = vpop.f32.mrb[9].mxu0  ;;  %v1282_v30 = vpop.f32.mrb[9].mxu1 }
 0x10c   : > { %v1118_v31 = vpack.c.bf16 %v705_v25, %v704_v23  ;;  %v1235_v33 = vadd.f32 %v1234_v29, %v1233_v27  ;;  %v1283_v34 = vadd.f32 %v1282_v30, %v1281_v28  ;;  %v1236_v35 = vpop.f32.mrb[10].mxu0  ;;  %v1284_v36 = vpop.f32.mrb[10].mxu1 }
 0x10d   : > { %v1158_v32 = vpack.c.bf16 %v721_v26, %v720_v24  ;;  %v1237_v37 = vpop.f32.mrb[11].mxu0  ;;  %v1285_v38 = vpop.f32.mrb[11].mxu1 }
 0x10e   : > { %1190 = vst [vmem:[%s1584_s7 + $0x8] sm:$0xff] %v1118_v31   ;;  %v592_v39 = vadd.f32 %v1235_v33, %v1574_v50  ;;  %v656_v40 = vadd.f32 %v1283_v34, %v1574_v50  ;;  %v1238_v41 = vadd.f32 %v1237_v37, %v1236_v35  ;;  %v1286_v42 = vadd.f32 %v1285_v38, %v1284_v36 }
 0x10f   : > { %1198 = vst [vmem:[%s1584_s7 + $0x48] sm:$0xff] %v1158_v32  }
 0x110   : > { %v595_v43 = vadd.f32 %v1238_v41, %v1574_v50  ;;  %v659_v44 = vadd.f32 %v1286_v42, %v1574_v50  ;;  %v706_v45 = vmax.f32 %v592_v39, 0.0  ;;  %v722_v46 = vmax.f32 %v656_v40, 0.0 }
 0x112   : > { %v707_v47 = vmax.f32 %v595_v43, 0.0  ;;  %v723_v48 = vmax.f32 %v659_v44, 0.0  ;;  %v1239_v49 = vpop.f32.mrb[12].mxu0  ;;  %v1287_v51 = vpop.f32.mrb[12].mxu1 }
 0x113   : > { %v1240_v52 = vpop.f32.mrb[13].mxu0  ;;  %v1288_v53 = vpop.f32.mrb[13].mxu1 }
 0x114   : > { %v1123_v54 = vpack.c.bf16 %v707_v47, %v706_v45  ;;  %v1163_v55 = vpack.c.bf16 %v723_v48, %v722_v46  ;;  %v1241_v56 = vadd.f32 %v1240_v52, %v1239_v49  ;;  %v1289_v57 = vadd.f32 %v1288_v53, %v1287_v51  ;;  %v1242_v58 = vpop.f32.mrb[14].mxu0  ;;  %v1290_v59 = vpop.f32.mrb[14].mxu1 }
 0x115   : > { %v1243_v60 = vpop.f32.mrb[15].mxu0  ;;  %v1291_v61 = vpop.f32.mrb[15].mxu1 }
 0x116   : > { %1191 = vst [vmem:[%s1584_s7 + $0x10] sm:$0xff] %v1123_v54   ;;  %1199 = vst [vmem:[%s1584_s7 + $0x50] sm:$0xff] %v1163_v55   ;;  %v600_v62 = vadd.f32 %v1241_v56, %v1574_v50  ;;  %v664_v63 = vadd.f32 %v1289_v57, %v1574_v50  ;;  %v1244_v0 = vadd.f32 %v1243_v60, %v1242_v58 }
 0x117   : > { %v1292_v1 = vadd.f32 %v1291_v61, %v1290_v59 }
 0x118   : > { %v603_v2 = vadd.f32 %v1244_v0, %v1574_v50  ;;  %v708_v4 = vmax.f32 %v600_v62, 0.0  ;;  %v724_v5 = vmax.f32 %v664_v63, 0.0 }
 0x119   : > { %v667_v3 = vadd.f32 %v1292_v1, %v1574_v50 }
 0x11a   : > { %v709_v6 = vmax.f32 %v603_v2, 0.0  ;;  %v1245_v8 = vpop.f32.mrb[16].mxu0  ;;  %v1293_v9 = vpop.f32.mrb[16].mxu1 }
 0x11b   : > { %v725_v7 = vmax.f32 %v667_v3, 0.0  ;;  %v1246_v10 = vpop.f32.mrb[17].mxu0  ;;  %v1294_v11 = vpop.f32.mrb[17].mxu1 }
 0x11c   : > { %v1128_v12 = vpack.c.bf16 %v709_v6, %v708_v4  ;;  %v1247_v14 = vadd.f32 %v1246_v10, %v1245_v8  ;;  %v1295_v15 = vadd.f32 %v1294_v11, %v1293_v9  ;;  %v1248_v16 = vpop.f32.mrb[18].mxu0  ;;  %v1296_v17 = vpop.f32.mrb[18].mxu1 }
 0x11d   : > { %v1168_v13 = vpack.c.bf16 %v725_v7, %v724_v5  ;;  %v1249_v18 = vpop.f32.mrb[19].mxu0  ;;  %v1297_v19 = vpop.f32.mrb[19].mxu1 }
 0x11e   : > { %1192 = vst [vmem:[%s1584_s7 + $0x18] sm:$0xff] %v1128_v12   ;;  %v608_v20 = vadd.f32 %v1247_v14, %v1574_v50  ;;  %v672_v21 = vadd.f32 %v1295_v15, %v1574_v50  ;;  %v1250_v22 = vadd.f32 %v1249_v18, %v1248_v16  ;;  %v1298_v23 = vadd.f32 %v1297_v19, %v1296_v17 }
 0x11f   : > { %1200 = vst [vmem:[%s1584_s7 + $0x58] sm:$0xff] %v1168_v13  }
 0x120   : > { %v611_v24 = vadd.f32 %v1250_v22, %v1574_v50  ;;  %v675_v25 = vadd.f32 %v1298_v23, %v1574_v50  ;;  %v710_v26 = vmax.f32 %v608_v20, 0.0  ;;  %v726_v27 = vmax.f32 %v672_v21, 0.0 }
 0x122   : > { %v711_v28 = vmax.f32 %v611_v24, 0.0  ;;  %v727_v29 = vmax.f32 %v675_v25, 0.0  ;;  %v1251_v30 = vpop.f32.mrb[20].mxu0  ;;  %v1299_v31 = vpop.f32.mrb[20].mxu1 }
 0x123   : > { %v1252_v32 = vpop.f32.mrb[21].mxu0  ;;  %v1300_v33 = vpop.f32.mrb[21].mxu1 }
 0x124   : > { %v1133_v34 = vpack.c.bf16 %v711_v28, %v710_v26  ;;  %v1173_v35 = vpack.c.bf16 %v727_v29, %v726_v27  ;;  %v1253_v36 = vadd.f32 %v1252_v32, %v1251_v30  ;;  %v1301_v37 = vadd.f32 %v1300_v33, %v1299_v31  ;;  %v1254_v38 = vpop.f32.mrb[22].mxu0  ;;  %v1302_v39 = vpop.f32.mrb[22].mxu1 }
 0x125   : > { %v1255_v40 = vpop.f32.mrb[23].mxu0  ;;  %v1303_v41 = vpop.f32.mrb[23].mxu1 }
 0x126   : > { %1193 = vst [vmem:[%s1584_s7 + $0x20] sm:$0xff] %v1133_v34   ;;  %1201 = vst [vmem:[%s1584_s7 + $0x60] sm:$0xff] %v1173_v35   ;;  %v616_v42 = vadd.f32 %v1253_v36, %v1574_v50  ;;  %v680_v43 = vadd.f32 %v1301_v37, %v1574_v50  ;;  %v1256_v44 = vadd.f32 %v1255_v40, %v1254_v38 }
 0x127   : > { %v1304_v45 = vadd.f32 %v1303_v41, %v1302_v39 }
 0x128   : > { %v619_v46 = vadd.f32 %v1256_v44, %v1574_v50  ;;  %v712_v48 = vmax.f32 %v616_v42, 0.0  ;;  %v728_v49 = vmax.f32 %v680_v43, 0.0 }
 0x129   : > { %v683_v47 = vadd.f32 %v1304_v45, %v1574_v50 }
 0x12a   : > { %v713_v51 = vmax.f32 %v619_v46, 0.0  ;;  %v1257_v53 = vpop.f32.mrb[24].mxu0  ;;  %v1305_v54 = vpop.f32.mrb[24].mxu1 }
 0x12b   : > { %v729_v52 = vmax.f32 %v683_v47, 0.0  ;;  %v1258_v55 = vpop.f32.mrb[25].mxu0  ;;  %v1306_v56 = vpop.f32.mrb[25].mxu1 }
 0x12c   : > { %v1138_v57 = vpack.c.bf16 %v713_v51, %v712_v48  ;;  %v1259_v59 = vadd.f32 %v1258_v55, %v1257_v53  ;;  %v1307_v60 = vadd.f32 %v1306_v56, %v1305_v54  ;;  %v1260_v61 = vpop.f32.mrb[26].mxu0  ;;  %v1308_v62 = vpop.f32.mrb[26].mxu1 }
 0x12d   : > { %v1178_v58 = vpack.c.bf16 %v729_v52, %v728_v49  ;;  %v1261_v63 = vpop.f32.mrb[27].mxu0  ;;  %v1309_v0 = vpop.f32.mrb[27].mxu1 }
 0x12e   : > { %1194 = vst [vmem:[%s1584_s7 + $0x28] sm:$0xff] %v1138_v57   ;;  %v624_v1 = vadd.f32 %v1259_v59, %v1574_v50  ;;  %v688_v2 = vadd.f32 %v1307_v60, %v1574_v50  ;;  %v1262_v3 = vadd.f32 %v1261_v63, %v1260_v61  ;;  %v1310_v4 = vadd.f32 %v1309_v0, %v1308_v62 }
 0x12f   : > { %1202 = vst [vmem:[%s1584_s7 + $0x68] sm:$0xff] %v1178_v58  }
 0x130   : > { %v627_v5 = vadd.f32 %v1262_v3, %v1574_v50  ;;  %v691_v6 = vadd.f32 %v1310_v4, %v1574_v50  ;;  %v714_v7 = vmax.f32 %v624_v1, 0.0  ;;  %v730_v8 = vmax.f32 %v688_v2, 0.0 }
 0x132   : > { %v715_v9 = vmax.f32 %v627_v5, 0.0  ;;  %v731_v10 = vmax.f32 %v691_v6, 0.0  ;;  %v1263_v11 = vpop.f32.mrb[28].mxu0  ;;  %v1311_v12 = vpop.f32.mrb[28].mxu1 }
 0x133   : > { %v1264_v13 = vpop.f32.mrb[29].mxu0  ;;  %v1312_v14 = vpop.f32.mrb[29].mxu1 }
 0x134   : > { %v1143_v15 = vpack.c.bf16 %v715_v9, %v714_v7  ;;  %v1183_v16 = vpack.c.bf16 %v731_v10, %v730_v8  ;;  %v1265_v17 = vadd.f32 %v1264_v13, %v1263_v11  ;;  %v1313_v18 = vadd.f32 %v1312_v14, %v1311_v12  ;;  %v1266_v19 = vpop.f32.mrb[30].mxu0  ;;  %v1314_v20 = vpop.f32.mrb[30].mxu1 }
 0x135   : > { %v1267_v21 = vpop.f32.mrb[31].mxu0  ;;  %v1315_v22 = vpop.f32.mrb[31].mxu1 }
 0x136   : > { %1195 = vst [vmem:[%s1584_s7 + $0x30] sm:$0xff] %v1143_v15   ;;  %1203 = vst [vmem:[%s1584_s7 + $0x70] sm:$0xff] %v1183_v16   ;;  %v632_v23 = vadd.f32 %v1265_v17, %v1574_v50  ;;  %v696_v24 = vadd.f32 %v1313_v18, %v1574_v50  ;;  %v1268_v25 = vadd.f32 %v1267_v21, %v1266_v19 }
 0x137   : > { %v1316_v26 = vadd.f32 %v1315_v22, %v1314_v20 }
 0x138   : > { %v635_v27 = vadd.f32 %v1268_v25, %v1574_v50  ;;  %v716_v29 = vmax.f32 %v632_v23, 0.0  ;;  %v732_v30 = vmax.f32 %v696_v24, 0.0 }
 0x139   : > { %v699_v28 = vadd.f32 %v1316_v26, %v1574_v50 }
 0x13a   : > { %v717_v31 = vmax.f32 %v635_v27, 0.0 }
 0x13b   : > { %v733_v32 = vmax.f32 %v699_v28, 0.0 }
 0x13c   : > { %v1148_v33 = vpack.c.bf16 %v717_v31, %v716_v29 }
 0x13d   : > { %v1188_v34 = vpack.c.bf16 %v733_v32, %v732_v30 }
 0x13e   : > { %1196 = vst [vmem:[%s1584_s7 + $0x38] sm:$0xff] %v1148_v33  }
 0x13f   : > { %1204 = vst [vmem:[%s1584_s7 + $0x78] sm:$0xff] %v1188_v34  }
 0x140 PF: > { %s13_s14 = sadd.s32 1, %s1443_s14   ;;  %s1643_s12 = smov %s1439_s13 }
 0x141   : > { %p10_p5 = scmp.ge.s32.totalorder %s13_s14, 4   ;;  %s1644_s13 = smov %s1646_s15 }
 0x143   :  { %12 = sbr.rel (!%p10_p5) target bundleno = 2 (0x2), region = 62 }

// kernel: _lambda_.41
= control target key start
LH: loop header
LB: loop body
LE: loop exit
PB: predicated region body
PF: predicated region fallthrough
CT: control target
= control target key end

     0   :  { %s1553_s18 = smov 0   ;;  %s1555_s19 = smov 0   ;;  %s1760_s0 = inlined_call_operand.vmem [shape: bf16[2,64,640], index: 0, kind: input, shape index: {}]   ;;  %s1761_s1 = inlined_call_operand.vmem [shape: bf16[640,128], index: 1, kind: input, shape index: {}]   ;;  %s1762_s2 = inlined_call_operand.vmem [shape: f32[1,128], index: 2, kind: input, shape index: {}]   ;;  %s1763_s3 = inlined_call_operand.vmem [shape: bf16[2,64,128], index: 3, kind: output, shape index: {0}]   ;;  %s1764_s4 = inlined_call_operand.vmem [shape: f32[2,1,128], index: 4, kind: output, shape index: {1}]   ;;  %s1765_s5 = inlined_call_operand.vmem [shape: f32[2,1,128], index: 5, kind: output, shape index: {2}]  }
   0x1   :  { %s1557_s20 = smov 0  }
   0x2 LB: > { %s28_s21 = sadd.s32 1, %s1516_s19  ;;  %p1165_p0 = scmp.ge.s32.totalorder %s1520_s20, 1  ;;  %s1520_s20 = sphi %s1557_s20, %s16_s20   ;;  %s1516_s19 = sphi %s1555_s19, %s1767_s19   ;;  %s1512_s18 = sphi %s1553_s18, %s1766_s18  }
   0x3   : > { %p30_p1 = scmp.ge.s32.totalorder %s28_s21, 2  ;;  %p214_p2 = scmp.lt.s32.totalorder %s1520_s20, 3 }
   0x5   : > { %s1769_s21 = smov (%p30_p1, %s28_s21), 0  ;;  %p215_p3 = pnand %p1165_p0, %p214_p2 }
   0x6   : > { %v1430_v0 = vld [vmem:[%s1761_s1 + $0x40] sm:$0xff] (!%p215_p3)   ;;  %v1434_v4 = vld [vmem:[%s1761_s1 + $0x48] sm:$0xff] (!%p215_p3)   ;;  %v1438_v8 = vld [vmem:[%s1761_s1 + $0x50] sm:$0xff] (!%p215_p3)   ;;  %p258_p4 = scmp.lt.s32.totalorder (!%p215_p3), %s1512_s18, 1  ;;  %v1522_v60 = vmov (!%p215_p3), 0.0  }
   0x7   : > { %218 = sbr.rel (%p215_p3) target bundleno = 321 (0x141), region = 32  ;;  %v1431_v1 = vld [vmem:[%s1761_s1 + $0xc0] sm:$0xff] (!%p215_p3)   ;;  %1272 = vmatprep.subr.bf16.mxu0 (!%p215_p3), %v1430_v0  ;;  %v1435_v5 = vld [vmem:[%s1761_s1 + $0xc8] sm:$0xff] (!%p215_p3)   ;;  %v1439_v9 = vld [vmem:[%s1761_s1 + $0xd0] sm:$0xff] (!%p215_p3)  }
   0x8   : > { %v1432_v2 = vld [vmem:[%s1761_s1] sm:$0xff] (!%p215_p3)   ;;  %1312 = vmatprep.subr.bf16.mxu1 (!%p215_p3), %v1431_v1  ;;  %v1436_v6 = vld [vmem:[%s1761_s1 + $0x8] sm:$0xff] (!%p215_p3)   ;;  %v1440_v10 = vld [vmem:[%s1761_s1 + $0x10] sm:$0xff] (!%p215_p3)  }
   0x9   : > { %v1433_v3 = vld [vmem:[%s1761_s1 + $0x80] sm:$0xff] (!%p215_p3)   ;;  %1273 = vmatpush3.bf16.msra.mxu0 (!%p215_p3), %v1432_v2  ;;  %v1437_v7 = vld [vmem:[%s1761_s1 + $0x88] sm:$0xff] (!%p215_p3)   ;;  %v1441_v11 = vld [vmem:[%s1761_s1 + $0x90] sm:$0xff] (!%p215_p3)  }
   0xa   : > { %1313 = vmatpush3.bf16.msra.mxu1 (!%p215_p3), %v1433_v3  ;;  %1274 = vmatprep.subr.bf16.mxu0 (!%p215_p3), %v1434_v4  ;;  %v1442_v12 = vld [vmem:[%s1761_s1 + $0x58] sm:$0xff] (!%p215_p3)   ;;  %v1446_v16 = vld [vmem:[%s1761_s1 + $0x60] sm:$0xff] (!%p215_p3)   ;;  %v1450_v20 = vld [vmem:[%s1761_s1 + $0x68] sm:$0xff] (!%p215_p3)  }
   0xb   : > { %1314 = vmatprep.subr.bf16.mxu1 (!%p215_p3), %v1435_v5  ;;  %v1443_v13 = vld [vmem:[%s1761_s1 + $0xd8] sm:$0xff] (!%p215_p3)   ;;  %v1447_v17 = vld [vmem:[%s1761_s1 + $0xe0] sm:$0xff] (!%p215_p3)   ;;  %v1451_v21 = vld [vmem:[%s1761_s1 + $0xe8] sm:$0xff] (!%p215_p3)  }
   0xc   : > { %v1444_v14 = vld [vmem:[%s1761_s1 + $0x18] sm:$0xff] (!%p215_p3)   ;;  %v1448_v18 = vld [vmem:[%s1761_s1 + $0x20] sm:$0xff] (!%p215_p3)   ;;  %v1452_v22 = vld [vmem:[%s1761_s1 + $0x28] sm:$0xff] (!%p215_p3)  }
   0xd   : > { %1275 = vmatpush3.bf16.msra.mxu0 (!%p215_p3), %v1436_v6  ;;  %v1445_v15 = vld [vmem:[%s1761_s1 + $0x98] sm:$0xff] (!%p215_p3)   ;;  %v1449_v19 = vld [vmem:[%s1761_s1 + $0xa0] sm:$0xff] (!%p215_p3)   ;;  %v1453_v23 = vld [vmem:[%s1761_s1 + $0xa8] sm:$0xff] (!%p215_p3)  }
   0xe   : > { %1315 = vmatpush3.bf16.msra.mxu1 %v1437_v7  ;;  %1276 = vmatprep.subr.bf16.mxu0 %v1438_v8  ;;  %s1771_s18 = smov (!%p258_p4, %s1512_s18), 1  ;;  %v1454_v24 = vld [vmem:[%s1761_s1 + $0x70] sm:$0xff]   ;;  %v1458_v28 = vld [vmem:[%s1761_s1 + $0x78] sm:$0xff]   ;;  %v1468_v36 = vld [vmem:[%s1761_s1 + $0x100] sm:$0xff]  }
   0xf   : > { %1316 = vmatprep.subr.bf16.mxu1 %v1439_v9  ;;  %v1455_v25 = vld [vmem:[%s1761_s1 + $0xf0] sm:$0xff]   ;;  %s1404_s7 = smul.u32 160, %s1771_s18  ;;  %v1459_v29 = vld [vmem:[%s1761_s1 + $0xf8] sm:$0xff]   ;;  %v1469_v37 = vld [vmem:[%s1761_s1 + $0x108] sm:$0xff]   ;;  %s1727_s25 = scalar_lea.vmem %s1764_s4, %s1771_s18 }
  0x10   : > { %v1456_v26 = vld [vmem:[%s1761_s1 + $0x30] sm:$0xff]   ;;  %v1460_v30 = vld [vmem:[%s1761_s1 + $0x38] sm:$0xff]   ;;  %v1484_v46 = vld [vmem:[%s1761_s1 + $0x120] sm:$0xff]   ;;  %s1733_s28 = scalar_lea.vmem %s1765_s5, %s1771_s18  ;;  %979 = vst [vmem:[%s1727_s25] sm:$0x1] %v1522_v60  ;;  %s1240_s30 = sshll.u32 %s1771_s18, 5 }
  0x11   : > { %1277 = vmatpush3.bf16.msra.mxu0 %v1440_v10  ;;  %v1457_v27 = vld [vmem:[%s1761_s1 + $0xb0] sm:$0xff]   ;;  %s1671_s22 = scalar_lea.vmem %s1760_s0, %s1404_s7  ;;  %v1461_v31 = vld [vmem:[%s1761_s1 + $0xb8] sm:$0xff]   ;;  %v1485_v51 = vld [vmem:[%s1761_s1 + $0x128] sm:$0xff]   ;;  %980 = vst [vmem:[%s1733_s28] sm:$0x1] %v1522_v60  ;;  %s276_s8 = scalar_lea.vmem %s1763_s3, %s1240_s30 }
  0x12   : > { %1317 = vmatpush3.bf16.msra.mxu1 %v1441_v11  ;;  %1278 = vmatprep.subr.bf16.mxu0 %v1442_v12  ;;  %v1462_v32 = vld [vmem:[%s1671_s22] ss:$20 sps:$4 sm:$0xff]   ;;  %v1464_v33 = vld [vmem:[%s1671_s22 + $0x4] ss:$20 sps:$4 sm:$0xff]   ;;  %v1465_v34 = vld [vmem:[%s1671_s22 + $0x8] ss:$20 sps:$4 sm:$0xff]  }
  0x13   : > { %1318 = vmatprep.subr.bf16.mxu1 %v1443_v13  ;;  %v1467_v35 = vld [vmem:[%s1671_s22 + $0xc] ss:$20 sps:$4 sm:$0xff]   ;;  %772 = vmatprep.mubr.bf16.mxu0 %v1464_v33  ;;  %v1472_v39 = vld [vmem:[%s1671_s22 + $0x34] ss:$20 sps:$4 sm:$0xff]   ;;  %v1475_v42 = vld [vmem:[%s1671_s22 + $0x30] ss:$20 sps:$4 sm:$0xff]  }
  0x14   : > { %837 = vmatprep.mubr.bf16.mxu1 %v1467_v35  ;;  %v1470_v38 = vld [vmem:[%s1671_s22 + $0x2c] ss:$20 sps:$4 sm:$0xff]   ;;  %v1474_v40 = vld [vmem:[%s1671_s22 + $0x28] ss:$20 sps:$4 sm:$0xff]   ;;  %v1476_v41 = vld [vmem:[%s1761_s1 + $0x110] sm:$0xff]  }
  0x15   : > { %1279 = vmatpush3.bf16.msra.mxu0 %v1444_v14  ;;  %v1478_v43 = vld [vmem:[%s1671_s22 + $0x54] ss:$20 sps:$4 sm:$0xff]   ;;  %v1477_v44 = vld [vmem:[%s1761_s1 + $0x118] sm:$0xff]   ;;  %v1482_v47 = vld [vmem:[%s1671_s22 + $0x50] ss:$20 sps:$4 sm:$0xff]  }
  0x16   : > { %1319 = vmatpush3.bf16.msra.mxu1 %v1445_v15  ;;  %1280 = vmatprep.subr.bf16.mxu0 %v1446_v16  ;;  %v1480_v45 = vld [vmem:[%s1671_s22 + $0x5c] ss:$20 sps:$4 sm:$0xff]   ;;  %v1483_v48 = vld [vmem:[%s1671_s22 + $0x58] ss:$20 sps:$4 sm:$0xff]   ;;  %v1491_v54 = vld [vmem:[%s1671_s22 + $0x80] ss:$20 sps:$4 sm:$0xff]  }
  0x17   : > { %1320 = vmatprep.subr.bf16.mxu1 %v1447_v17  ;;  %v1486_v49 = vld [vmem:[%s1671_s22 + $0x7c] ss:$20 sps:$4 sm:$0xff]   ;;  %v1488_v50 = vld [vmem:[%s1671_s22 + $0x84] ss:$20 sps:$4 sm:$0xff]   ;;  %v1495_v56 = vld [vmem:[%s1671_s22 + $0x60] ss:$20 sps:$4 sm:$0xff]  }
  0x18   : > { %v1492_v52 = vld [vmem:[%s1761_s1 + $0x130] sm:$0xff]   ;;  %v1490_v53 = vld [vmem:[%s1671_s22 + $0x78] ss:$20 sps:$4 sm:$0xff]   ;;  %v1497_v59 = vld [vmem:[%s1671_s22 + $0x88] ss:$20 sps:$4 sm:$0xff]  }
  0x19   : > { %1281 = vmatpush3.bf16.msra.mxu0 %v1448_v18  ;;  %v1494_v55 = vld [vmem:[%s1671_s22 + $0x10] ss:$20 sps:$4 sm:$0xff]   ;;  %v1493_v57 = vld [vmem:[%s1761_s1 + $0x138] sm:$0xff]   ;;  %v1169_v62 = vld [vmem:[%s1762_s2] ss:$0 sm:$0xff] }
  0x1a   : > { %1321 = vmatpush3.bf16.msra.mxu1 %v1449_v19  ;;  %1282 = vmatprep.subr.bf16.mxu0 %v1450_v20  ;;  %v1496_v58 = vld [vmem:[%s1671_s22 + $0x38] ss:$20 sps:$4 sm:$0xff]  }
  0x1b   : > { %1322 = vmatprep.subr.bf16.mxu1 %v1451_v21 }
  0x1d   : > { %1283 = vmatpush3.bf16.msra.mxu0 %v1452_v22 }
  0x1e   : > { %1323 = vmatpush3.bf16.msra.mxu1 %v1453_v23  ;;  %1284 = vmatprep.subr.bf16.mxu0 %v1454_v24 }
  0x1f   : > { %1324 = vmatprep.subr.bf16.mxu1 %v1455_v25 }
  0x21   : > { %1285 = vmatpush3.bf16.msra.mxu0 %v1456_v26 }
  0x22   : > { %1325 = vmatpush3.bf16.msra.mxu1 %v1457_v27  ;;  %1286 = vmatprep.subr.bf16.mxu0 %v1458_v28 }
  0x23   : > { %1326 = vmatprep.subr.bf16.mxu1 %v1459_v29 }
  0x25   : > { %1287 = vmatpush3.bf16.msra.mxu0 %v1460_v30 }
  0x26   : > { %1327 = vmatpush3.bf16.msra.mxu1 %v1461_v31  ;;  %1364 = vmatprep.subr.bf16.mxu0 %v1468_v36 }
  0x27   : > { %1388 = vmatprep.subr.bf16.mxu1 %v1468_v36 }
  0x28   : > { %773 = vmatmul.mubr.bf16.vlgmr.msra.gmra.mrb[0].mxu0 %v1462_v32 }
  0x29   : > { %838 = vmatmul.mubr.bf16.vlgmr.msra.gmra.mrb[0].mxu1 %v1465_v34  ;;  %1365 = vmatpush3.bf16.msra.mxu0 %v1468_v36 }
  0x2a   : > { %1396 = vmatpush3.bf16.msra.mxu1 %v1468_v36  ;;  %1366 = vmatprep.subr.bf16.mxu0 %v1469_v37 }
  0x2b   : > { %1389 = vmatprep.subr.bf16.mxu1 %v1469_v37  ;;  %780 = vmatprep.mubr.bf16.mxu0 %v1470_v38 }
  0x2c   : > { %845 = vmatprep.mubr.bf16.mxu1 %v1472_v39 }
  0x2d   : > { %1367 = vmatpush3.bf16.msra.mxu0 %v1469_v37 }
  0x2e   : > { %1397 = vmatpush3.bf16.msra.mxu1 %v1469_v37  ;;  %1368 = vmatprep.subr.bf16.mxu0 %v1476_v41 }
  0x2f   : > { %1390 = vmatprep.subr.bf16.mxu1 %v1476_v41 }
  0x30   : > { %781 = vmatmul.mubr.bf16.gmra.mrb[4].mxu0 %v1474_v40 }
  0x31   : > { %846 = vmatmul.mubr.bf16.gmra.mrb[4].mxu1 %v1475_v42  ;;  %788 = vmatprep.mubr.bf16.mxu0 %v1478_v43 }
  0x32   : > { %1369 = vmatpush3.bf16.msra.mxu0 %v1476_v41  ;;  %853 = vmatprep.mubr.bf16.mxu1 %v1480_v45 }
  0x33   : > { %1398 = vmatpush3.bf16.msra.mxu1 %v1476_v41  ;;  %1370 = vmatprep.subr.bf16.mxu0 %v1477_v44 }
  0x34   : > { %1391 = vmatprep.subr.bf16.mxu1 %v1477_v44 }
  0x36   : > { %1371 = vmatpush3.bf16.msra.mxu0 %v1477_v44 }
  0x37   : > { %1399 = vmatpush3.bf16.msra.mxu1 %v1477_v44  ;;  %1372 = vmatprep.subr.bf16.mxu0 %v1484_v46 }
  0x38   : > { %789 = vmatmul.mubr.bf16.gmra.mrb[8].mxu0 %v1482_v47  ;;  %1392 = vmatprep.subr.bf16.mxu1 %v1484_v46 }
  0x39   : > { %854 = vmatmul.mubr.bf16.gmra.mrb[8].mxu1 %v1483_v48  ;;  %796 = vmatprep.mubr.bf16.mxu0 %v1486_v49 }
  0x3a   : > { %1373 = vmatpush3.bf16.msra.mxu0 %v1484_v46  ;;  %861 = vmatprep.mubr.bf16.mxu1 %v1488_v50 }
  0x3b   : > { %1400 = vmatpush3.bf16.msra.mxu1 %v1484_v46  ;;  %1374 = vmatprep.subr.bf16.mxu0 %v1485_v51 }
  0x3c   : > { %1393 = vmatprep.subr.bf16.mxu1 %v1485_v51 }
  0x3e   : > { %1375 = vmatpush3.bf16.msra.mxu0 %v1485_v51 }
  0x3f   : > { %1401 = vmatpush3.bf16.msra.mxu1 %v1485_v51  ;;  %1376 = vmatprep.subr.bf16.mxu0 %v1492_v52 }
  0x40   : > { %797 = vmatmul.mubr.bf16.gmra.mrb[12].mxu0 %v1490_v53  ;;  %1394 = vmatprep.subr.bf16.mxu1 %v1492_v52 }
  0x41   : > { %862 = vmatmul.mubr.bf16.gmra.mrb[12].mxu1 %v1491_v54  ;;  %1380 = vmatprep.mubr.bf16.mxu0 %v1494_v55 }
  0x42   : > { %1377 = vmatpush3.bf16.msra.mxu0 %v1492_v52  ;;  %1384 = vmatprep.mubr.bf16.mxu1 %v1495_v56 }
  0x43   : > { %1402 = vmatpush3.bf16.msra.mxu1 %v1492_v52  ;;  %1378 = vmatprep.subr.bf16.mxu0 %v1493_v57 }
  0x44   : > { %1395 = vmatprep.subr.bf16.mxu1 %v1493_v57 }
  0x46   : > { %1379 = vmatpush3.bf16.msra.mxu0 %v1493_v57 }
  0x47   : > { %1403 = vmatpush3.bf16.msra.mxu1 %v1493_v57 }
  0x49   : > { %1381 = vmatmul.mubr.bf16.vlgmr.msra.gmra.mrb[16].mxu0 %v1496_v58 }
  0x4a   : > { %1385 = vmatmul.mubr.bf16.vlgmr.msra.gmra.mrb[16].mxu1 %v1497_v59 }
  0xfb   : > { %v1288_v61 = vpop.f32.mrb[0].mxu0 }
  0xfc   : > { %v1289_v63 = vpop.f32.mrb[1].mxu0  ;;  %v1328_v0 = vpop.f32.mrb[0].mxu1 }
  0xfd   : > { %v1290_v1 = vadd.f32 %v1289_v63, %v1288_v61  ;;  %v1291_v2 = vpop.f32.mrb[2].mxu0  ;;  %v1329_v3 = vpop.f32.mrb[1].mxu1 }
  0xfe   : > { %v1292_v4 = vpop.f32.mrb[3].mxu0  ;;  %v1330_v5 = vadd.f32 %v1329_v3, %v1328_v0  ;;  %v1331_v6 = vpop.f32.mrb[2].mxu1 }
  0xff   : > { %v775_v7 = vadd.f32 %v1290_v1, %v1169_v62  ;;  %v1293_v8 = vadd.f32 %v1292_v4, %v1291_v2  ;;  %v1332_v9 = vpop.f32.mrb[3].mxu1 }
 0x100   : > { %v1333_v10 = vadd.f32 %v1332_v9, %v1331_v6 }
 0x101   : > { %v778_v11 = vadd.f32 %v1293_v8, %v1169_v62  ;;  %v840_v12 = vadd.f32 %v1330_v5, %v775_v7 }
 0x103   : > { %v1294_v13 = vpop.f32.mrb[4].mxu0  ;;  %v1740_v14 = vadd.f32 %v1333_v10, %v778_v11 }
 0x104   : > { %v1295_v15 = vpop.f32.mrb[5].mxu0  ;;  %v1334_v16 = vpop.f32.mrb[4].mxu1 }
 0x105   : > { %v1296_v17 = vadd.f32 %v1295_v15, %v1294_v13  ;;  %v1297_v18 = vpop.f32.mrb[6].mxu0  ;;  %v1335_v19 = vpop.f32.mrb[5].mxu1 }
 0x106   : > { %v1298_v20 = vpop.f32.mrb[7].mxu0  ;;  %v1336_v21 = vadd.f32 %v1335_v19, %v1334_v16  ;;  %v1337_v22 = vpop.f32.mrb[6].mxu1 }
 0x107   : > { %v783_v23 = vadd.f32 %v1296_v17, %v1169_v62  ;;  %v1299_v24 = vadd.f32 %v1298_v20, %v1297_v18  ;;  %v1338_v25 = vpop.f32.mrb[7].mxu1 }
 0x108   : > { %v1339_v26 = vadd.f32 %v1338_v25, %v1337_v22 }
 0x109   : > { %v786_v27 = vadd.f32 %v1299_v24, %v1169_v62  ;;  %v848_v28 = vadd.f32 %v1336_v21, %v783_v23 }
 0x10b   : > { %v1300_v29 = vpop.f32.mrb[8].mxu0  ;;  %v851_v30 = vadd.f32 %v1339_v26, %v786_v27 }
 0x10c   : > { %v1301_v31 = vpop.f32.mrb[9].mxu0  ;;  %v1340_v32 = vpop.f32.mrb[8].mxu1 }
 0x10d   : > { %v1302_v33 = vadd.f32 %v1301_v31, %v1300_v29  ;;  %v1303_v34 = vpop.f32.mrb[10].mxu0  ;;  %v1341_v35 = vpop.f32.mrb[9].mxu1 }
 0x10e   : > { %v1304_v36 = vpop.f32.mrb[11].mxu0  ;;  %v1342_v37 = vadd.f32 %v1341_v35, %v1340_v32  ;;  %v1343_v38 = vpop.f32.mrb[10].mxu1 }
 0x10f   : > { %v791_v39 = vadd.f32 %v1302_v33, %v1169_v62  ;;  %v1305_v40 = vadd.f32 %v1304_v36, %v1303_v34  ;;  %v1344_v41 = vpop.f32.mrb[11].mxu1 }
 0x110   : > { %v1345_v42 = vadd.f32 %v1344_v41, %v1343_v38 }
 0x111   : > { %v794_v43 = vadd.f32 %v1305_v40, %v1169_v62  ;;  %v856_v44 = vadd.f32 %v1342_v37, %v791_v39 }
 0x113   : > { %v1306_v45 = vpop.f32.mrb[12].mxu0  ;;  %v859_v46 = vadd.f32 %v1345_v42, %v794_v43 }
 0x114   : > { %v1307_v47 = vpop.f32.mrb[13].mxu0  ;;  %v1346_v48 = vpop.f32.mrb[12].mxu1 }
 0x115   : > { %v1308_v49 = vadd.f32 %v1307_v47, %v1306_v45  ;;  %v1309_v50 = vpop.f32.mrb[14].mxu0  ;;  %v1347_v51 = vpop.f32.mrb[13].mxu1 }
 0x116   : > { %v1310_v52 = vpop.f32.mrb[15].mxu0  ;;  %v1348_v53 = vadd.f32 %v1347_v51, %v1346_v48  ;;  %v1349_v54 = vpop.f32.mrb[14].mxu1  ;;  %v981_v48 = vld [vmem:[%s1727_s25] sm:$0x1] }
 0x117   : > { %v799_v55 = vadd.f32 %v1308_v49, %v1169_v62  ;;  %v1311_v56 = vadd.f32 %v1310_v52, %v1309_v50  ;;  %v1350_v57 = vpop.f32.mrb[15].mxu1 }
 0x118   : > { %v1351_v58 = vadd.f32 %v1350_v57, %v1349_v54 }
 0x119   : > { %v802_v59 = vadd.f32 %v1311_v56, %v1169_v62  ;;  %v864_v60 = vadd.f32 %v1348_v53, %v799_v55  ;;  %v997_v53 = vld [vmem:[%s1733_s28] sm:$0x1] }
 0x11b   : > { %v867_v61 = vadd.f32 %v1351_v58, %v802_v59 }
 0x11c   : > { %v1382_v63 = vpop.f32.mrb[16].mxu0 }
 0x11d   : > { %v913_v0 = vadd.f32 %v1382_v63, %v848_v28  ;;  %v1386_v1 = vpop.f32.mrb[16].mxu1  ;;  %v904_v2 = vpop.f32.mrb[17].mxu0 }
 0x11e   : > { %v929_v3 = vadd.f32 %v1386_v1, %v864_v60  ;;  %v905_v4 = vadd.f32 %v904_v2, %v840_v12  ;;  %v920_v5 = vpop.f32.mrb[17].mxu1  ;;  %v1383_v6 = vpop.f32.mrb[18].mxu0 }
 0x11f   : > { %v921_v7 = vadd.f32 %v920_v5, %v856_v44  ;;  %v916_v8 = vadd.f32 %v1383_v6, %v851_v30  ;;  %v1387_v9 = vpop.f32.mrb[18].mxu1  ;;  %v907_v10 = vpop.f32.mrb[19].mxu0  ;;  %v1000_v23 = vmul.f32 %v913_v0, %v913_v0 }
 0x120   : > { %v932_v62 = vadd.f32 %v1387_v9, %v867_v61  ;;  %v908_v11 = vadd.f32 %v907_v10, %v1740_v14  ;;  %v923_v13 = vpop.f32.mrb[19].mxu1  ;;  %v998_v12 = vmul.f32 %v905_v4, %v905_v4  ;;  %v1004_v34 = vmul.f32 %v929_v3, %v929_v3 }
 0x121   : > { %v1257_v15 = vpack.c.bf16 %v916_v8, %v913_v0  ;;  %v924_v16 = vadd.f32 %v923_v13, %v859_v46  ;;  %v1001_v26 = vmul.f32 %v916_v8, %v916_v8  ;;  %v1002_v28 = vmul.f32 %v921_v7, %v921_v7 }
 0x122   : > { %v1267_v17 = vpack.c.bf16 %v932_v62, %v929_v3  ;;  %v1252_v18 = vpack.c.bf16 %v908_v11, %v905_v4  ;;  %v982_v19 = vadd.f32 %v908_v11, %v905_v4  ;;  %v999_v20 = vmul.f32 %v908_v11, %v908_v11 }
 0x123   : > { %1269 = vst [vmem:[%s276_s8 + $0x8] sm:$0xff] %v1257_v15   ;;  %v1262_v21 = vpack.c.bf16 %v924_v16, %v921_v7  ;;  %v1003_v31 = vmul.f32 %v924_v16, %v924_v16  ;;  %v1005_v37 = vmul.f32 %v932_v62, %v932_v62 }
 0x124   : > { %1271 = vst [vmem:[%s276_s8 + $0x18] sm:$0xff] %v1267_v17   ;;  %1253 = vst [vmem:[%s276_s8] sm:$0xff] %v1252_v18   ;;  %v983_v22 = vadd.f32 %v982_v19, %v913_v0  ;;  %v1006_v24 = vadd.f32 %v999_v20, %v998_v12 }
 0x125   : > { %1270 = vst [vmem:[%s276_s8 + $0x10] sm:$0xff] %v1262_v21  }
 0x126   : > { %v984_v25 = vadd.f32 %v983_v22, %v916_v8  ;;  %v1007_v27 = vadd.f32 %v1006_v24, %v1000_v23 }
 0x128   : > { %v985_v14 = vadd.f32 %v984_v25, %v921_v7  ;;  %v1008_v29 = vadd.f32 %v1007_v27, %v1001_v26 }
 0x12a   : > { %v986_v30 = vadd.f32 %v985_v14, %v924_v16  ;;  %v1009_v32 = vadd.f32 %v1008_v29, %v1002_v28 }
 0x12c   : > { %v987_v33 = vadd.f32 %v986_v30, %v929_v3  ;;  %v1010_v35 = vadd.f32 %v1009_v32, %v1003_v31 }
 0x12e   : > { %v988_v36 = vadd.f32 %v987_v33, %v932_v62  ;;  %v1011_v38 = vadd.f32 %v1010_v35, %v1004_v34 }
 0x130   : > { %v989_v39 = vrot.slane %v988_v36, 4  ;;  %v1012_v40 = vadd.f32 %v1011_v38, %v1005_v37 }
 0x132   : > { %v990_v41 = vadd.f32 %v989_v39, %v988_v36  ;;  %v1013_v42 = vrot.slane %v1012_v40, 4 }
 0x134   : > { %v991_v43 = vrot.slane %v990_v41, 2  ;;  %v1014_v44 = vadd.f32 %v1013_v42, %v1012_v40 }
 0x136   : > { %v992_v45 = vadd.f32 %v991_v43, %v990_v41  ;;  %v1015_v46 = vrot.slane %v1014_v44, 2 }
 0x138   : > { %v993_v47 = vrot.slane %v992_v45, 1  ;;  %v1016_v49 = vadd.f32 %v1015_v46, %v1014_v44 }
 0x13a   : > { %v994_v50 = vadd.f32 %v993_v47, %v992_v45  ;;  %v1017_v51 = vrot.slane %v1016_v49, 1 }
 0x13c   : > { %v995_v52 = vadd.f32 %v994_v50, %v981_v48  ;;  %v1018_v54 = vadd.f32 %v1017_v51, %v1016_v49 }
 0x13e   : > { %996 = vst [vmem:[%s1727_s25] sm:$0x1] %v995_v52  ;;  %v1019_v55 = vadd.f32 %v1018_v54, %v997_v53 }
 0x140   : > { %1020 = vst [vmem:[%s1733_s28] sm:$0x1] %v1019_v55 }
 0x141 PF: > { %s16_s20 = sadd.s32 1, %s1520_s20   ;;  %s1766_s18 = smov %s1516_s19 }
 0x142   : > { %p13_p5 = scmp.ge.s32.totalorder %s16_s20, 4   ;;  %s1767_s19 = smov %s1769_s21 }
 0x144   :  { %15 = sbr.rel (!%p13_p5) target bundleno = 2 (0x2), region = 90 }

// kernel: _lambda_.42
= control target key start
LH: loop header
LB: loop body
LE: loop exit
PB: predicated region body
PF: predicated region fallthrough
CT: control target
= control target key end

     0   :  { %s585_s12 = smov 0   ;;  %s587_s13 = smov 0   ;;  %s633_s0 = inlined_call_operand.vmem [shape: bf16[2,64,128], index: 0, kind: input, shape index: {}]   ;;  %s634_s1 = inlined_call_operand.vmem [shape: f32[2,1,128], index: 1, kind: input, shape index: {}]   ;;  %s635_s2 = inlined_call_operand.vmem [shape: f32[2,1,128], index: 2, kind: input, shape index: {}]   ;;  %s636_s3 = inlined_call_operand.vmem [shape: bf16[2,64,128], index: 3, kind: output, shape index: {}]  }
   0x1   :  { %s589_s14 = smov 0  }
   0x2 LB: > { %s25_s15 = sadd.s32 1, %s559_s13  ;;  %p448_p0 = scmp.ge.s32.totalorder %s563_s14, 1  ;;  %s563_s14 = sphi %s589_s14, %s13_s14   ;;  %s559_s13 = sphi %s587_s13, %s638_s13   ;;  %s555_s12 = sphi %s585_s12, %s637_s12  }
   0x3   : > { %p27_p1 = scmp.ge.s32.totalorder %s25_s15, 2  ;;  %p174_p2 = scmp.lt.s32.totalorder %s563_s14, 3 }
   0x5   : > { %s640_s15 = smov (%p27_p1, %s25_s15), 0  ;;  %p175_p3 = pnand %p448_p0, %p174_p2 }
   0x6   : > { %p213_p4 = scmp.lt.s32.totalorder (!%p175_p3), %s555_s12, 1  ;;  %v262_v5 = vlaneseq (!%p175_p3) }
   0x7   : > { %178 = sbr.rel (%p175_p3) target bundleno = 48 (0x30), region = 32 }
   0x8   : > { %v263_v8 = vshrl.u32 (!%p175_p3), %v262_v5, 7 }
   0xa   : > { %v264_v11 = vsub.s32 (!%p175_p3), 0, %v263_v8 }
   0xe   : > { %s642_s12 = smov (!%p213_p4, %s555_s12), 1 }
   0xf   : > { %s224_s18 = scalar_lea.vmem %s634_s1, %s642_s12  ;;  %s227_s21 = scalar_lea.vmem %s635_s2, %s642_s12 }
  0x10   : > { %v254_v0 = vld [vmem:[%s224_s18] sm:$0x1]  ;;  %s463_s22 = sshll.u32 %s642_s12, 5 }
  0x11   : > { %v255_v1 = vmul.f32 0.015625, %v254_v0  ;;  %v256_v2 = vld [vmem:[%s227_s21] sm:$0x1]  ;;  %s220_s25 = scalar_lea.vmem %s633_s0, %s463_s22  ;;  %s236_s28 = scalar_lea.vmem %s636_s3, %s463_s22 }
  0x12   : > { %v257_v3 = vmul.f32 0.015625, %v256_v2  ;;  %v474_v10 = vld [vmem:[%s220_s25] sm:$0xff]   ;;  %v509_v12 = vld [vmem:[%s220_s25 + $0x8] sm:$0xff]   ;;  %v510_v13 = vld [vmem:[%s220_s25 + $0x10] sm:$0xff]  }
  0x13   : > { %v258_v4 = vmul.f32 %v255_v1, %v255_v1  ;;  %v511_v14 = vld [vmem:[%s220_s25 + $0x18] sm:$0xff]   ;;  %v475_v15 = vunpack.c.l.bf16 %v474_v10  ;;  %v476_v16 = vunpack.c.h.bf16 %v474_v10  ;;  %v265_v17 = vrot.slane %v255_v1, %v264_v11 }
  0x14   : > { %v479_v18 = vunpack.c.l.bf16 %v509_v12  ;;  %v480_v19 = vunpack.c.h.bf16 %v509_v12  ;;  %v483_v20 = vunpack.c.l.bf16 %v510_v13  ;;  %v484_v21 = vunpack.c.h.bf16 %v510_v13 }
  0x15   : > { %v259_v6 = vsub.f32 %v257_v3, %v258_v4  ;;  %v487_v22 = vunpack.c.l.bf16 %v511_v14  ;;  %v488_v23 = vunpack.c.h.bf16 %v511_v14  ;;  %v267_v24 = vsub.f32 %v475_v15, %v265_v17 }
  0x16   : > { %v268_v25 = vsub.f32 %v476_v16, %v265_v17  ;;  %v269_v26 = vsub.f32 %v479_v18, %v265_v17  ;;  %v270_v27 = vsub.f32 %v480_v19, %v265_v17  ;;  %v271_v29 = vsub.f32 %v483_v20, %v265_v17 }
  0x17   : > { %v260_v7 = vmax.f32 %v259_v6, 0.0  ;;  %v272_v30 = vsub.f32 %v484_v21, %v265_v17  ;;  %v273_v31 = vsub.f32 %v487_v22, %v265_v17  ;;  %v274_v32 = vsub.f32 %v488_v23, %v265_v17 }
  0x19   : > { %v275_v9 = vadd.f32 1e-05, %v260_v7 }
  0x1b   : > { %539 = vrsqrt.f32 %v275_v9 }
  0x25   : > { %v540_v28 = vpop.eup %539 }
  0x26   : > { %v281_v33 = vrot.slane %v540_v28, %v264_v11 }
  0x28   : > { %v283_v34 = vmul.f32 %v281_v33, %v267_v24  ;;  %v284_v35 = vmul.f32 %v281_v33, %v268_v25  ;;  %v285_v36 = vmul.f32 %v281_v33, %v269_v26  ;;  %v286_v37 = vmul.f32 %v281_v33, %v270_v27 }
  0x29   : > { %v287_v38 = vmul.f32 %v281_v33, %v271_v29  ;;  %v288_v39 = vmul.f32 %v281_v33, %v272_v30  ;;  %v289_v40 = vmul.f32 %v281_v33, %v273_v31  ;;  %v290_v41 = vmul.f32 %v281_v33, %v274_v32 }
  0x2a   : > { %v291_v42 = vmax.f32 %v283_v34, 0.0  ;;  %v292_v43 = vmax.f32 %v284_v35, 0.0  ;;  %v293_v44 = vmax.f32 %v285_v36, 0.0  ;;  %v294_v45 = vmax.f32 %v286_v37, 0.0 }
  0x2b   : > { %v295_v46 = vmax.f32 %v287_v38, 0.0  ;;  %v296_v47 = vmax.f32 %v288_v39, 0.0  ;;  %v297_v48 = vmax.f32 %v289_v40, 0.0  ;;  %v298_v49 = vmax.f32 %v290_v41, 0.0 }
  0x2c   : > { %v492_v50 = vpack.c.bf16 %v292_v43, %v291_v42  ;;  %v497_v51 = vpack.c.bf16 %v294_v45, %v293_v44 }
  0x2d   : > { %v502_v52 = vpack.c.bf16 %v296_v47, %v295_v46  ;;  %v507_v53 = vpack.c.bf16 %v298_v49, %v297_v48 }
  0x2e   : > { %493 = vst [vmem:[%s236_s28] sm:$0xff] %v492_v50   ;;  %512 = vst [vmem:[%s236_s28 + $0x8] sm:$0xff] %v497_v51  }
  0x2f   : > { %513 = vst [vmem:[%s236_s28 + $0x10] sm:$0xff] %v502_v52   ;;  %514 = vst [vmem:[%s236_s28 + $0x18] sm:$0xff] %v507_v53  }
  0x30 PF: > { %s13_s14 = sadd.s32 1, %s563_s14   ;;  %s637_s12 = smov %s559_s13 }
  0x31   : > { %p10_p5 = scmp.ge.s32.totalorder %s13_s14, 4   ;;  %s638_s13 = smov %s640_s15 }
  0x33   :  { %12 = sbr.rel (!%p10_p5) target bundleno = 2 (0x2), region = 68 }

// kernel: _lambda_.44
= control target key start
LH: loop header
LB: loop body
LE: loop exit
PB: predicated region body
PF: predicated region fallthrough
CT: control target
= control target key end

     0   :  { %s521_s12 = smov 0   ;;  %s523_s13 = smov 0   ;;  %s568_s0 = inlined_call_operand.vmem [shape: bf16[2,16,256], index: 0, kind: input, shape index: {}]   ;;  %s569_s1 = inlined_call_operand.vmem [shape: f32[2,1,256], index: 1, kind: input, shape index: {}]   ;;  %s570_s2 = inlined_call_operand.vmem [shape: f32[2,1,256], index: 2, kind: input, shape index: {}]   ;;  %s571_s3 = inlined_call_operand.vmem [shape: bf16[2,16,256], index: 3, kind: output, shape index: {}]  }
   0x1   :  { %s525_s14 = smov 0  }
   0x2 LB: > { %s25_s15 = sadd.s32 1, %s495_s13  ;;  %p436_p0 = scmp.ge.s32.totalorder %s499_s14, 1  ;;  %s499_s14 = sphi %s525_s14, %s13_s14   ;;  %s495_s13 = sphi %s523_s13, %s573_s13   ;;  %s491_s12 = sphi %s521_s12, %s572_s12  }
   0x3   : > { %p27_p1 = scmp.ge.s32.totalorder %s25_s15, 2  ;;  %p177_p2 = scmp.lt.s32.totalorder %s499_s14, 3 }
   0x5   : > { %s575_s15 = smov (%p27_p1, %s25_s15), 0  ;;  %p178_p3 = pnand %p436_p0, %p177_p2 }
   0x6   : > { %p220_p4 = scmp.lt.s32.totalorder (!%p178_p3), %s491_s12, 1  ;;  %v263_v5 = vlaneseq (!%p178_p3) }
   0x7   : > { %181 = sbr.rel (%p178_p3) target bundleno = 48 (0x30), region = 32 }
   0x8   : > { %v264_v8 = vshrl.u32 (!%p178_p3), %v263_v5, 7 }
   0xa   : > { %v265_v11 = vsub.s32 (!%p178_p3), 0, %v264_v8  ;;  %v269_v12 = vsub.s32 (!%p178_p3), 1, %v264_v8 }
   0xe   : > { %s577_s12 = smov (!%p220_p4, %s491_s12), 1 }
   0xf   : > { %s439_s16 = sshll.u32 %s577_s12, 1  ;;  %s447_s23 = sshll.u32 %s577_s12, 4 }
  0x10   : > { %s233_s19 = scalar_lea.vmem %s569_s1, %s439_s16  ;;  %s237_s22 = scalar_lea.vmem %s570_s2, %s439_s16 }
  0x11   : > { %v255_v0 = vld [vmem:[%s233_s19] sm:$0x3]  ;;  %s228_s26 = scalar_lea.vmem %s568_s0, %s447_s23  ;;  %s247_s29 = scalar_lea.vmem %s571_s3, %s447_s23 }
  0x12   : > { %v257_v1 = vld [vmem:[%s237_s22] sm:$0x3]  ;;  %v256_v2 = vmul.f32 0.0625, %v255_v0  ;;  %v250_v13 = vld [vmem:[%s228_s26 + $0x8] sm:$0xff] }
  0x13   : > { %v258_v3 = vmul.f32 0.0625, %v257_v1  ;;  %v249_v10 = vld [vmem:[%s228_s26] sm:$0xff]  ;;  %v253_v16 = vunpack.c.l.bf16 %v250_v13  ;;  %v254_v17 = vunpack.c.h.bf16 %v250_v13 }
  0x14   : > { %v259_v4 = vmul.f32 %v256_v2, %v256_v2  ;;  %v251_v14 = vunpack.c.l.bf16 %v249_v10  ;;  %v252_v15 = vunpack.c.h.bf16 %v249_v10  ;;  %v266_v18 = vrot.slane %v256_v2, %v265_v11 }
  0x15   : > { %v270_v19 = vrot.slane %v256_v2, %v269_v12 }
  0x16   : > { %v260_v6 = vsub.f32 %v258_v3, %v259_v4  ;;  %v273_v20 = vsub.f32 %v251_v14, %v266_v18  ;;  %v275_v22 = vsub.f32 %v253_v16, %v266_v18 }
  0x17   : > { %v274_v21 = vsub.f32 %v252_v15, %v270_v19  ;;  %v276_v23 = vsub.f32 %v254_v17, %v270_v19 }
  0x18   : > { %v261_v7 = vmax.f32 %v260_v6, 0.0 }
  0x1a   : > { %v277_v9 = vadd.f32 1e-05, %v261_v7 }
  0x1c   : > { %475 = vrsqrt.f32 %v277_v9 }
  0x26   : > { %v476_v24 = vpop.eup %475 }
  0x27   : > { %v283_v25 = vrot.slane %v476_v24, %v265_v11  ;;  %v287_v26 = vrot.slane %v476_v24, %v269_v12 }
  0x29   : > { %v290_v27 = vmul.f32 %v283_v25, %v273_v20  ;;  %v291_v28 = vmul.f32 %v287_v26, %v274_v21  ;;  %v292_v29 = vmul.f32 %v283_v25, %v275_v22  ;;  %v293_v30 = vmul.f32 %v287_v26, %v276_v23 }
  0x2b   : > { %v294_v31 = vmax.f32 %v290_v27, 0.0  ;;  %v295_v32 = vmax.f32 %v291_v28, 0.0  ;;  %v296_v33 = vmax.f32 %v292_v29, 0.0  ;;  %v297_v34 = vmax.f32 %v293_v30, 0.0 }
  0x2d   : > { %v449_v35 = vpack.c.bf16 %v295_v32, %v294_v31  ;;  %v450_v36 = vpack.c.bf16 %v297_v34, %v296_v33 }
  0x2f   : > { %310 = vst [vmem:[%s247_s29] sm:$0xff] %v449_v35  ;;  %311 = vst [vmem:[%s247_s29 + $0x8] sm:$0xff] %v450_v36 }
  0x30 PF: > { %s13_s14 = sadd.s32 1, %s499_s14   ;;  %s572_s12 = smov %s495_s13 }
  0x31   : > { %p10_p5 = scmp.ge.s32.totalorder %s13_s14, 4   ;;  %s573_s13 = smov %s575_s15 }
  0x33   :  { %12 = sbr.rel (!%p10_p5) target bundleno = 2 (0x2), region = 68 }

// kernel: _lambda_.43
= control target key start
LH: loop header
LB: loop body
LE: loop exit
PB: predicated region body
PF: predicated region fallthrough
CT: control target
= control target key end

     0   :  { %s2202_s18 = smov 0   ;;  %s2204_s19 = smov 0   ;;  %s2718_s0 = inlined_call_operand.vmem [shape: bf16[2,16,1152], index: 0, kind: input, shape index: {}]   ;;  %s2719_s1 = inlined_call_operand.vmem [shape: bf16[1152,256], index: 1, kind: input, shape index: {}]   ;;  %s2720_s2 = inlined_call_operand.vmem [shape: f32[1,256], index: 2, kind: input, shape index: {}]   ;;  %s2721_s3 = inlined_call_operand.vmem [shape: bf16[2,16,256], index: 3, kind: output, shape index: {0}]   ;;  %s2722_s4 = inlined_call_operand.vmem [shape: f32[2,1,256], index: 4, kind: output, shape index: {1}]   ;;  %s2723_s5 = inlined_call_operand.vmem [shape: f32[2,1,256], index: 5, kind: output, shape index: {2}]  }
   0x1   :  { %s2206_s20 = smov 0  }
   0x2 LB: > { %s28_s21 = sadd.s32 1, %s2163_s19  ;;  %p1702_p0 = scmp.ge.s32.totalorder %s2167_s20, 1  ;;  %s2167_s20 = sphi %s2206_s20, %s16_s20   ;;  %s2163_s19 = sphi %s2204_s19, %s2727_s19   ;;  %s2159_s18 = sphi %s2202_s18, %s2726_s18  }
   0x3   : > { %p30_p1 = scmp.ge.s32.totalorder %s28_s21, 2  ;;  %p214_p2 = scmp.lt.s32.totalorder %s2167_s20, 3 }
   0x5   : > { %s2729_s21 = smov (%p30_p1, %s28_s21), 0  ;;  %p215_p3 = pnand %p1702_p0, %p214_p2 }
   0x6   : > { %v1916_v0 = vld [vmem:[%s2719_s1 + $0x4] ss:$8 sps:$4 sm:$0xff] (!%p215_p3)   ;;  %v1920_v2 = vld [vmem:[%s2719_s1] ss:$8 sps:$4 sm:$0xff] (!%p215_p3)   ;;  %v1922_v4 = vld [vmem:[%s2719_s1 + $0x14] ss:$8 sps:$4 sm:$0xff] (!%p215_p3)  }
   0x7   : > { %218 = sbr.rel (%p215_p3) target bundleno = 410 (0x19a), region = 32  ;;  %v1918_v1 = vld [vmem:[%s2719_s1 + $0x204] ss:$8 sps:$4 sm:$0xff] (!%p215_p3)   ;;  %1223 = vmatprep.subr.bf16.mxu1 (!%p215_p3), %v1916_v0  ;;  %v1921_v3 = vld [vmem:[%s2719_s1 + $0x200] ss:$8 sps:$4 sm:$0xff] (!%p215_p3)   ;;  %p261_p4 = scmp.lt.s32.totalorder (!%p215_p3), %s2159_s18, 1 }
   0x8   : > { %1309 = vmatprep.subr.bf16.mxu0 (!%p215_p3), %v1918_v1  ;;  %1224 = vmatpush1.bf16.msra.mxu1 (!%p215_p3), %v1920_v2  ;;  %v1924_v5 = vld [vmem:[%s2719_s1 + $0x214] ss:$8 sps:$4 sm:$0xff] (!%p215_p3)   ;;  %v1926_v6 = vld [vmem:[%s2719_s1 + $0x10] ss:$8 sps:$4 sm:$0xff] (!%p215_p3)   ;;  %v1928_v8 = vld [vmem:[%s2719_s1 + $0x24] ss:$8 sps:$4 sm:$0xff] (!%p215_p3)  }
   0x9   : > { %1310 = vmatpush1.bf16.msra.mxu0 (!%p215_p3), %v1921_v3  ;;  %1225 = vmatprep.subr.bf16.mxu1 (!%p215_p3), %v1922_v4  ;;  %v1927_v7 = vld [vmem:[%s2719_s1 + $0x210] ss:$8 sps:$4 sm:$0xff] (!%p215_p3)   ;;  %v1930_v9 = vld [vmem:[%s2719_s1 + $0x224] ss:$8 sps:$4 sm:$0xff] (!%p215_p3)   ;;  %v1932_v10 = vld [vmem:[%s2719_s1 + $0x20] ss:$8 sps:$4 sm:$0xff] (!%p215_p3)  }
   0xa   : > { %1311 = vmatprep.subr.bf16.mxu0 (!%p215_p3), %v1924_v5  ;;  %v1933_v11 = vld [vmem:[%s2719_s1 + $0x220] ss:$8 sps:$4 sm:$0xff] (!%p215_p3)   ;;  %v1934_v12 = vld [vmem:[%s2719_s1 + $0x34] ss:$8 sps:$4 sm:$0xff] (!%p215_p3)   ;;  %v1938_v14 = vld [vmem:[%s2719_s1 + $0x30] ss:$8 sps:$4 sm:$0xff] (!%p215_p3)  }
   0xb   : > { %v1936_v13 = vld [vmem:[%s2719_s1 + $0x234] ss:$8 sps:$4 sm:$0xff] (!%p215_p3)   ;;  %v1939_v15 = vld [vmem:[%s2719_s1 + $0x230] ss:$8 sps:$4 sm:$0xff] (!%p215_p3)   ;;  %v1940_v16 = vld [vmem:[%s2719_s1 + $0x44] ss:$8 sps:$4 sm:$0xff] (!%p215_p3)  }
   0xc   : > { %1226 = vmatpush1.bf16.msra.mxu1 (!%p215_p3), %v1926_v6  ;;  %v1942_v17 = vld [vmem:[%s2719_s1 + $0x244] ss:$8 sps:$4 sm:$0xff] (!%p215_p3)   ;;  %v1944_v18 = vld [vmem:[%s2719_s1 + $0x40] ss:$8 sps:$4 sm:$0xff] (!%p215_p3)   ;;  %v1946_v20 = vld [vmem:[%s2719_s1 + $0x54] ss:$8 sps:$4 sm:$0xff] (!%p215_p3)  }
   0xd   : > { %1312 = vmatpush1.bf16.msra.mxu0 (!%p215_p3), %v1927_v7  ;;  %1227 = vmatprep.subr.bf16.mxu1 (!%p215_p3), %v1928_v8  ;;  %v1945_v19 = vld [vmem:[%s2719_s1 + $0x240] ss:$8 sps:$4 sm:$0xff] (!%p215_p3)   ;;  %v1948_v21 = vld [vmem:[%s2719_s1 + $0x254] ss:$8 sps:$4 sm:$0xff] (!%p215_p3)   ;;  %v1950_v22 = vld [vmem:[%s2719_s1 + $0x50] ss:$8 sps:$4 sm:$0xff] (!%p215_p3)  }
   0xe   : > { %1313 = vmatprep.subr.bf16.mxu0 %v1930_v9  ;;  %v1951_v23 = vld [vmem:[%s2719_s1 + $0x250] ss:$8 sps:$4 sm:$0xff]   ;;  %v1952_v24 = vld [vmem:[%s2719_s1 + $0x64] ss:$8 sps:$4 sm:$0xff]   ;;  %v1956_v26 = vld [vmem:[%s2719_s1 + $0x60] ss:$8 sps:$4 sm:$0xff]  }
   0xf   : > { %v1954_v25 = vld [vmem:[%s2719_s1 + $0x264] ss:$8 sps:$4 sm:$0xff]   ;;  %v1957_v27 = vld [vmem:[%s2719_s1 + $0x260] ss:$8 sps:$4 sm:$0xff]   ;;  %v1958_v28 = vld [vmem:[%s2719_s1 + $0x74] ss:$8 sps:$4 sm:$0xff]  }
  0x10   : > { %1228 = vmatpush1.bf16.msra.mxu1 %v1932_v10  ;;  %v1960_v29 = vld [vmem:[%s2719_s1 + $0x274] ss:$8 sps:$4 sm:$0xff]   ;;  %v1962_v30 = vld [vmem:[%s2719_s1 + $0x70] ss:$8 sps:$4 sm:$0xff]   ;;  %v1964_v32 = vld [vmem:[%s2719_s1 + $0x84] ss:$8 sps:$4 sm:$0xff]  }
  0x11   : > { %1314 = vmatpush1.bf16.msra.mxu0 %v1933_v11  ;;  %1229 = vmatprep.subr.bf16.mxu1 %v1934_v12  ;;  %v1963_v31 = vld [vmem:[%s2719_s1 + $0x270] ss:$8 sps:$4 sm:$0xff]   ;;  %v1966_v33 = vld [vmem:[%s2719_s1 + $0x284] ss:$8 sps:$4 sm:$0xff]   ;;  %v1968_v34 = vld [vmem:[%s2719_s1 + $0x80] ss:$8 sps:$4 sm:$0xff]  }
  0x12   : > { %1315 = vmatprep.subr.bf16.mxu0 %v1936_v13  ;;  %v1969_v35 = vld [vmem:[%s2719_s1 + $0x280] ss:$8 sps:$4 sm:$0xff]   ;;  %v1970_v36 = vld [vmem:[%s2719_s1 + $0x94] ss:$8 sps:$4 sm:$0xff]   ;;  %s2731_s18 = smov (!%p261_p4, %s2159_s18), 1 }
  0x13   : > { %v1972_v37 = vld [vmem:[%s2719_s1 + $0x294] ss:$8 sps:$4 sm:$0xff]   ;;  %v1974_v38 = vld [vmem:[%s2719_s1 + $0x90] ss:$8 sps:$4 sm:$0xff]   ;;  %v1976_v40 = vld [vmem:[%s2719_s1 + $0xa4] ss:$8 sps:$4 sm:$0xff]  }
  0x14   : > { %1230 = vmatpush1.bf16.msra.mxu1 %v1938_v14  ;;  %v1975_v39 = vld [vmem:[%s2719_s1 + $0x290] ss:$8 sps:$4 sm:$0xff]   ;;  %s1888_s16 = smul.u32 72, %s2731_s18  ;;  %v1978_v41 = vld [vmem:[%s2719_s1 + $0x2a4] ss:$8 sps:$4 sm:$0xff]   ;;  %s1706_s29 = sshll.u32 %s2731_s18, 1 }
  0x15   : > { %1316 = vmatpush1.bf16.msra.mxu0 %v1939_v15  ;;  %1231 = vmatprep.subr.bf16.mxu1 %v1940_v16  ;;  %v1980_v42 = vld [vmem:[%s2719_s1 + $0xa0] ss:$8 sps:$4 sm:$0xff]   ;;  %v1982_v44 = vld [vmem:[%s2719_s1 + $0xb4] ss:$8 sps:$4 sm:$0xff]   ;;  %v1986_v46 = vld [vmem:[%s2719_s1 + $0xb0] ss:$8 sps:$4 sm:$0xff]   ;;  %s2677_s8 = scalar_lea.vmem %s2722_s4, %s1706_s29  ;;  %s2682_s11 = scalar_lea.vmem %s2723_s5, %s1706_s29 }
  0x16   : > { %1317 = vmatprep.subr.bf16.mxu0 %v1942_v17  ;;  %v1981_v43 = vld [vmem:[%s2719_s1 + $0x2a0] ss:$8 sps:$4 sm:$0xff]   ;;  %s2365_s6 = scalar_lea.vmem %s2718_s0, %s1888_s16  ;;  %v1984_v45 = vld [vmem:[%s2719_s1 + $0x2b4] ss:$8 sps:$4 sm:$0xff]   ;;  %v1987_v47 = vld [vmem:[%s2719_s1 + $0x2b0] ss:$8 sps:$4 sm:$0xff]  }
  0x17   : > { %v2014_v48 = vld [vmem:[%s2365_s6 + $0x4] ss:$36 sps:$4 sm:$0xff]   ;;  %v2020_v51 = vld [vmem:[%s2365_s6 + $0x14] ss:$36 sps:$4 sm:$0xff]   ;;  %s1865_s13 = sshll.u32 %s2731_s18, 4 }
  0x18   : > { %1232 = vmatpush1.bf16.msra.mxu1 %v1944_v18  ;;  %v1988_v49 = vld [vmem:[%s2719_s1 + $0xc4] ss:$8 sps:$4 sm:$0xff]   ;;  %1255 = vmatprep.mubr.bf16.mxu1 %v2014_v48  ;;  %v1992_v52 = vld [vmem:[%s2719_s1 + $0xc0] ss:$8 sps:$4 sm:$0xff]   ;;  %v1994_v54 = vld [vmem:[%s2719_s1 + $0xd4] ss:$8 sps:$4 sm:$0xff]   ;;  %s280_s16 = scalar_lea.vmem %s2721_s3, %s1865_s13 }
  0x19   : > { %1318 = vmatpush1.bf16.msra.mxu0 %v1945_v19  ;;  %1233 = vmatprep.subr.bf16.mxu1 %v1946_v20  ;;  %v1990_v50 = vld [vmem:[%s2719_s1 + $0x2c4] ss:$8 sps:$4 sm:$0xff]   ;;  %v1993_v53 = vld [vmem:[%s2719_s1 + $0x2c0] ss:$8 sps:$4 sm:$0xff]   ;;  %v1996_v55 = vld [vmem:[%s2719_s1 + $0x2d4] ss:$8 sps:$4 sm:$0xff]  }
  0x1a   : > { %1319 = vmatprep.subr.bf16.mxu0 %v1948_v21  ;;  %1341 = vmatprep.mubr.bf16.mxu0 %v2020_v51  ;;  %v1998_v56 = vld [vmem:[%s2719_s1 + $0xd0] ss:$8 sps:$4 sm:$0xff]   ;;  %v2000_v58 = vld [vmem:[%s2719_s1 + $0xe4] ss:$8 sps:$4 sm:$0xff]   ;;  %v2004_v60 = vld [vmem:[%s2719_s1 + $0xe0] ss:$8 sps:$4 sm:$0xff]  }
  0x1b   : > { %v1999_v57 = vld [vmem:[%s2719_s1 + $0x2d0] ss:$8 sps:$4 sm:$0xff]   ;;  %v2002_v59 = vld [vmem:[%s2719_s1 + $0x2e4] ss:$8 sps:$4 sm:$0xff]   ;;  %v2005_v61 = vld [vmem:[%s2719_s1 + $0x2e0] ss:$8 sps:$4 sm:$0xff]  }
  0x1c   : > { %1234 = vmatpush1.bf16.msra.mxu1 %v1950_v22  ;;  %v2006_v62 = vld [vmem:[%s2719_s1 + $0xf4] ss:$8 sps:$4 sm:$0xff]   ;;  %v2010_v0 = vld [vmem:[%s2719_s1 + $0xf0] ss:$8 sps:$4 sm:$0xff]   ;;  %v2017_v2 = vld [vmem:[%s2719_s1 + $0x104] ss:$8 sps:$4 sm:$0xff]  }
  0x1d   : > { %1320 = vmatpush1.bf16.msra.mxu0 %v1951_v23  ;;  %1235 = vmatprep.subr.bf16.mxu1 %v1952_v24  ;;  %v2008_v63 = vld [vmem:[%s2719_s1 + $0x2f4] ss:$8 sps:$4 sm:$0xff]   ;;  %v2011_v1 = vld [vmem:[%s2719_s1 + $0x2f0] ss:$8 sps:$4 sm:$0xff]   ;;  %v2023_v3 = vld [vmem:[%s2719_s1 + $0x304] ss:$8 sps:$4 sm:$0xff]  }
  0x1e   : > { %1321 = vmatprep.subr.bf16.mxu0 %v1954_v25  ;;  %v2012_v4 = vld [vmem:[%s2365_s6] ss:$36 sps:$4 sm:$0xff]   ;;  %v2018_v6 = vld [vmem:[%s2365_s6 + $0x10] ss:$36 sps:$4 sm:$0xff]  }
  0x1f   : > { %v2015_v5 = vld [vmem:[%s2719_s1 + $0x100] ss:$8 sps:$4 sm:$0xff]   ;;  %v2026_v8 = vld [vmem:[%s2719_s1 + $0x114] ss:$8 sps:$4 sm:$0xff]   ;;  %v2024_v10 = vld [vmem:[%s2719_s1 + $0x110] ss:$8 sps:$4 sm:$0xff]  }
  0x20   : > { %1236 = vmatpush1.bf16.msra.mxu1 %v1956_v26  ;;  %v2021_v7 = vld [vmem:[%s2719_s1 + $0x300] ss:$8 sps:$4 sm:$0xff]   ;;  %v2029_v9 = vld [vmem:[%s2719_s1 + $0x314] ss:$8 sps:$4 sm:$0xff]   ;;  %v2027_v11 = vld [vmem:[%s2719_s1 + $0x310] ss:$8 sps:$4 sm:$0xff]  }
  0x21   : > { %1322 = vmatpush1.bf16.msra.mxu0 %v1957_v27  ;;  %1237 = vmatprep.subr.bf16.mxu1 %v1958_v28  ;;  %v2032_v12 = vld [vmem:[%s2719_s1 + $0x124] ss:$8 sps:$4 sm:$0xff]   ;;  %v2030_v14 = vld [vmem:[%s2719_s1 + $0x120] ss:$8 sps:$4 sm:$0xff]   ;;  %v2038_v16 = vld [vmem:[%s2719_s1 + $0x134] ss:$8 sps:$4 sm:$0xff]  }
  0x22   : > { %1323 = vmatprep.subr.bf16.mxu0 %v1960_v29  ;;  %v2035_v13 = vld [vmem:[%s2719_s1 + $0x324] ss:$8 sps:$4 sm:$0xff]   ;;  %v2033_v15 = vld [vmem:[%s2719_s1 + $0x320] ss:$8 sps:$4 sm:$0xff]   ;;  %v2041_v17 = vld [vmem:[%s2719_s1 + $0x334] ss:$8 sps:$4 sm:$0xff]  }
  0x23   : > { %v2036_v18 = vld [vmem:[%s2719_s1 + $0x130] ss:$8 sps:$4 sm:$0xff]   ;;  %v2044_v20 = vld [vmem:[%s2719_s1 + $0x144] ss:$8 sps:$4 sm:$0xff]   ;;  %v2042_v22 = vld [vmem:[%s2719_s1 + $0x140] ss:$8 sps:$4 sm:$0xff]  }
  0x24   : > { %1238 = vmatpush1.bf16.msra.mxu1 %v1962_v30  ;;  %v2039_v19 = vld [vmem:[%s2719_s1 + $0x330] ss:$8 sps:$4 sm:$0xff]   ;;  %v2047_v21 = vld [vmem:[%s2719_s1 + $0x344] ss:$8 sps:$4 sm:$0xff]   ;;  %v2045_v23 = vld [vmem:[%s2719_s1 + $0x340] ss:$8 sps:$4 sm:$0xff]  }
  0x25   : > { %1324 = vmatpush1.bf16.msra.mxu0 %v1963_v31  ;;  %1239 = vmatprep.subr.bf16.mxu1 %v1964_v32  ;;  %v2050_v24 = vld [vmem:[%s2719_s1 + $0x154] ss:$8 sps:$4 sm:$0xff]   ;;  %v2048_v26 = vld [vmem:[%s2719_s1 + $0x150] ss:$8 sps:$4 sm:$0xff]   ;;  %v2056_v28 = vld [vmem:[%s2719_s1 + $0x164] ss:$8 sps:$4 sm:$0xff]  }
  0x26   : > { %1325 = vmatprep.subr.bf16.mxu0 %v1966_v33  ;;  %v2053_v25 = vld [vmem:[%s2719_s1 + $0x354] ss:$8 sps:$4 sm:$0xff]   ;;  %v2051_v27 = vld [vmem:[%s2719_s1 + $0x350] ss:$8 sps:$4 sm:$0xff]   ;;  %v2059_v29 = vld [vmem:[%s2719_s1 + $0x364] ss:$8 sps:$4 sm:$0xff]  }
  0x27   : > { %v2054_v30 = vld [vmem:[%s2719_s1 + $0x160] ss:$8 sps:$4 sm:$0xff]   ;;  %v2062_v32 = vld [vmem:[%s2719_s1 + $0x174] ss:$8 sps:$4 sm:$0xff]  }
  0x28   : > { %1240 = vmatpush1.bf16.msra.mxu1 %v1968_v34  ;;  %v2057_v31 = vld [vmem:[%s2719_s1 + $0x360] ss:$8 sps:$4 sm:$0xff]   ;;  %v2065_v33 = vld [vmem:[%s2719_s1 + $0x374] ss:$8 sps:$4 sm:$0xff]   ;;  %v2116_v34 = vld [vmem:[%s2365_s6 + $0xc] ss:$36 sps:$4 sm:$0xff]  }
  0x29   : > { %1326 = vmatpush1.bf16.msra.mxu0 %v1969_v35  ;;  %1241 = vmatprep.subr.bf16.mxu1 %v1970_v36  ;;  %v2119_v35 = vld [vmem:[%s2365_s6 + $0x1c] ss:$36 sps:$4 sm:$0xff]   ;;  %v2060_v36 = vld [vmem:[%s2719_s1 + $0x170] ss:$8 sps:$4 sm:$0xff]  }
  0x2a   : > { %1327 = vmatprep.subr.bf16.mxu0 %v1972_v37  ;;  %v2063_v37 = vld [vmem:[%s2719_s1 + $0x370] ss:$8 sps:$4 sm:$0xff]   ;;  %v2078_v48 = vld [vmem:[%s2719_s1 + $0x1a0] ss:$8 sps:$4 sm:$0xff]   ;;  %v2089_v51 = vld [vmem:[%s2719_s1 + $0x3b4] ss:$8 sps:$4 sm:$0xff]  }
  0x2c   : > { %1242 = vmatpush1.bf16.msra.mxu1 %v1974_v38  ;;  %v2068_v38 = vld [vmem:[%s2719_s1 + $0x184] ss:$8 sps:$4 sm:$0xff]  }
  0x2d   : > { %1328 = vmatpush1.bf16.msra.mxu0 %v1975_v39  ;;  %1243 = vmatprep.subr.bf16.mxu1 %v1976_v40  ;;  %v2071_v39 = vld [vmem:[%s2719_s1 + $0x384] ss:$8 sps:$4 sm:$0xff]   ;;  %v2066_v40 = vld [vmem:[%s2719_s1 + $0x180] ss:$8 sps:$4 sm:$0xff]  }
  0x2e   : > { %1329 = vmatprep.subr.bf16.mxu0 %v1978_v41  ;;  %v2069_v41 = vld [vmem:[%s2719_s1 + $0x380] ss:$8 sps:$4 sm:$0xff]  }
  0x30   : > { %1244 = vmatpush1.bf16.msra.mxu1 %v1980_v42  ;;  %v2074_v42 = vld [vmem:[%s2719_s1 + $0x194] ss:$8 sps:$4 sm:$0xff]  }
  0x31   : > { %1330 = vmatpush1.bf16.msra.mxu0 %v1981_v43  ;;  %1245 = vmatprep.subr.bf16.mxu1 %v1982_v44  ;;  %v2077_v43 = vld [vmem:[%s2719_s1 + $0x394] ss:$8 sps:$4 sm:$0xff]   ;;  %v2072_v44 = vld [vmem:[%s2719_s1 + $0x190] ss:$8 sps:$4 sm:$0xff]  }
  0x32   : > { %1331 = vmatprep.subr.bf16.mxu0 %v1984_v45  ;;  %v2075_v45 = vld [vmem:[%s2719_s1 + $0x390] ss:$8 sps:$4 sm:$0xff]  }
  0x34   : > { %1246 = vmatpush1.bf16.msra.mxu1 %v1986_v46  ;;  %v2080_v46 = vld [vmem:[%s2719_s1 + $0x1a4] ss:$8 sps:$4 sm:$0xff]  }
  0x35   : > { %1332 = vmatpush1.bf16.msra.mxu0 %v1987_v47  ;;  %1247 = vmatprep.subr.bf16.mxu1 %v1988_v49  ;;  %v2083_v47 = vld [vmem:[%s2719_s1 + $0x3a4] ss:$8 sps:$4 sm:$0xff]   ;;  %v2081_v49 = vld [vmem:[%s2719_s1 + $0x3a0] ss:$8 sps:$4 sm:$0xff]  }
  0x36   : > { %1333 = vmatprep.subr.bf16.mxu0 %v1990_v50  ;;  %v2086_v50 = vld [vmem:[%s2719_s1 + $0x1b4] ss:$8 sps:$4 sm:$0xff]  }
  0x38   : > { %1248 = vmatpush1.bf16.msra.mxu1 %v1992_v52  ;;  %v2084_v52 = vld [vmem:[%s2719_s1 + $0x1b0] ss:$8 sps:$4 sm:$0xff]  }
  0x39   : > { %1334 = vmatpush1.bf16.msra.mxu0 %v1993_v53  ;;  %1249 = vmatprep.subr.bf16.mxu1 %v1994_v54  ;;  %v2087_v53 = vld [vmem:[%s2719_s1 + $0x3b0] ss:$8 sps:$4 sm:$0xff]   ;;  %v2092_v54 = vld [vmem:[%s2719_s1 + $0x1c4] ss:$8 sps:$4 sm:$0xff]  }
  0x3a   : > { %1335 = vmatprep.subr.bf16.mxu0 %v1996_v55  ;;  %v2095_v55 = vld [vmem:[%s2719_s1 + $0x3c4] ss:$8 sps:$4 sm:$0xff]  }
  0x3c   : > { %1250 = vmatpush1.bf16.msra.mxu1 %v1998_v56  ;;  %v2090_v56 = vld [vmem:[%s2719_s1 + $0x1c0] ss:$8 sps:$4 sm:$0xff]  }
  0x3d   : > { %1336 = vmatpush1.bf16.msra.mxu0 %v1999_v57  ;;  %1251 = vmatprep.subr.bf16.mxu1 %v2000_v58  ;;  %v2093_v57 = vld [vmem:[%s2719_s1 + $0x3c0] ss:$8 sps:$4 sm:$0xff]   ;;  %v2098_v58 = vld [vmem:[%s2719_s1 + $0x1d4] ss:$8 sps:$4 sm:$0xff]  }
  0x3e   : > { %1337 = vmatprep.subr.bf16.mxu0 %v2002_v59  ;;  %v2101_v59 = vld [vmem:[%s2719_s1 + $0x3d4] ss:$8 sps:$4 sm:$0xff]  }
  0x40   : > { %1252 = vmatpush1.bf16.msra.mxu1 %v2004_v60  ;;  %v2096_v60 = vld [vmem:[%s2719_s1 + $0x1d0] ss:$8 sps:$4 sm:$0xff]  }
  0x41   : > { %1338 = vmatpush1.bf16.msra.mxu0 %v2005_v61  ;;  %1253 = vmatprep.subr.bf16.mxu1 %v2006_v62  ;;  %v2099_v61 = vld [vmem:[%s2719_s1 + $0x3d0] ss:$8 sps:$4 sm:$0xff]   ;;  %v2104_v62 = vld [vmem:[%s2719_s1 + $0x1e4] ss:$8 sps:$4 sm:$0xff]  }
  0x42   : > { %1339 = vmatprep.subr.bf16.mxu0 %v2008_v63  ;;  %v2107_v63 = vld [vmem:[%s2719_s1 + $0x3e4] ss:$8 sps:$4 sm:$0xff]  }
  0x44   : > { %1254 = vmatpush1.bf16.msra.mxu1 %v2010_v0  ;;  %v2102_v0 = vld [vmem:[%s2719_s1 + $0x1e0] ss:$8 sps:$4 sm:$0xff]  }
  0x45   : > { %1340 = vmatpush1.bf16.msra.mxu0 %v2011_v1  ;;  %1266 = vmatprep.subr.bf16.mxu1 %v2017_v2  ;;  %v2105_v1 = vld [vmem:[%s2719_s1 + $0x3e0] ss:$8 sps:$4 sm:$0xff]   ;;  %v2110_v2 = vld [vmem:[%s2719_s1 + $0x1f4] ss:$8 sps:$4 sm:$0xff]  }
  0x46   : > { %1352 = vmatprep.subr.bf16.mxu0 %v2023_v3  ;;  %v2113_v3 = vld [vmem:[%s2719_s1 + $0x3f4] ss:$8 sps:$4 sm:$0xff]  }
  0x47   : > { %1256 = vmatmul.mubr.bf16.vlgmr.msra.gmra.mrb[0].mxu1 %v2012_v4  ;;  %v2108_v4 = vld [vmem:[%s2719_s1 + $0x1f0] ss:$8 sps:$4 sm:$0xff]  }
  0x48   : > { %1342 = vmatmul.mubr.bf16.vlgmr.msra.gmra.mrb[0].mxu0 %v2018_v6  ;;  %1267 = vmatpush1.bf16.msra.mxu1 %v2015_v5  ;;  %v2111_v5 = vld [vmem:[%s2719_s1 + $0x3f0] ss:$8 sps:$4 sm:$0xff]   ;;  %v2122_v6 = vld [vmem:[%s2719_s1 + $0x404] ss:$8 sps:$4 sm:$0xff]  }
  0x49   : > { %1353 = vmatpush1.bf16.msra.mxu0 %v2021_v7  ;;  %1268 = vmatprep.subr.bf16.mxu1 %v2026_v8  ;;  %v2114_v7 = vld [vmem:[%s2365_s6 + $0x8] ss:$36 sps:$4 sm:$0xff]   ;;  %v2117_v8 = vld [vmem:[%s2365_s6 + $0x18] ss:$36 sps:$4 sm:$0xff]  }
  0x4a   : > { %1354 = vmatprep.subr.bf16.mxu0 %v2029_v9  ;;  %1298 = vmatprep.mubr.bf16.mxu1 %v2116_v34  ;;  %v2120_v9 = vld [vmem:[%s2719_s1 + $0x400] ss:$8 sps:$4 sm:$0xff]  }
  0x4b   : > { %1384 = vmatprep.mubr.bf16.mxu0 %v2119_v35  ;;  %v445_v35 = vld [vmem:[%s2720_s2] sm:$0x3] }
  0x4c   : > { %1269 = vmatpush1.bf16.msra.mxu1 %v2024_v10  ;;  %v2125_v10 = vld [vmem:[%s2719_s1 + $0x414] ss:$8 sps:$4 sm:$0xff]  }
  0x4d   : > { %1355 = vmatpush1.bf16.msra.mxu0 %v2027_v11  ;;  %1270 = vmatprep.subr.bf16.mxu1 %v2032_v12  ;;  %v2123_v11 = vld [vmem:[%s2719_s1 + $0x410] ss:$8 sps:$4 sm:$0xff]   ;;  %v2169_v12 = vmov 0  }
  0x4e   : > { %1356 = vmatprep.subr.bf16.mxu0 %v2035_v13  ;;  %v2128_v13 = vld [vmem:[%s2719_s1 + $0x424] ss:$8 sps:$4 sm:$0xff]  }
  0x50   : > { %1271 = vmatpush1.bf16.msra.mxu1 %v2030_v14  ;;  %v2126_v14 = vld [vmem:[%s2719_s1 + $0x420] ss:$8 sps:$4 sm:$0xff]  }
  0x51   : > { %1357 = vmatpush1.bf16.msra.mxu0 %v2033_v15  ;;  %1272 = vmatprep.subr.bf16.mxu1 %v2038_v16  ;;  %v2131_v15 = vld [vmem:[%s2719_s1 + $0x434] ss:$8 sps:$4 sm:$0xff]   ;;  %v2129_v16 = vld [vmem:[%s2719_s1 + $0x430] ss:$8 sps:$4 sm:$0xff]  }
  0x52   : > { %1358 = vmatprep.subr.bf16.mxu0 %v2041_v17  ;;  %v2134_v17 = vld [vmem:[%s2719_s1 + $0x444] ss:$8 sps:$4 sm:$0xff]  }
  0x54   : > { %1273 = vmatpush1.bf16.msra.mxu1 %v2036_v18  ;;  %v2132_v18 = vld [vmem:[%s2719_s1 + $0x440] ss:$8 sps:$4 sm:$0xff]  }
  0x55   : > { %1359 = vmatpush1.bf16.msra.mxu0 %v2039_v19  ;;  %1274 = vmatprep.subr.bf16.mxu1 %v2044_v20  ;;  %v2137_v19 = vld [vmem:[%s2719_s1 + $0x454] ss:$8 sps:$4 sm:$0xff]   ;;  %v2135_v20 = vld [vmem:[%s2719_s1 + $0x450] ss:$8 sps:$4 sm:$0xff]  }
  0x56   : > { %1360 = vmatprep.subr.bf16.mxu0 %v2047_v21  ;;  %v2140_v21 = vld [vmem:[%s2719_s1 + $0x464] ss:$8 sps:$4 sm:$0xff]  }
  0x58   : > { %1275 = vmatpush1.bf16.msra.mxu1 %v2042_v22  ;;  %v2138_v22 = vld [vmem:[%s2719_s1 + $0x460] ss:$8 sps:$4 sm:$0xff]  }
  0x59   : > { %1361 = vmatpush1.bf16.msra.mxu0 %v2045_v23  ;;  %1276 = vmatprep.subr.bf16.mxu1 %v2050_v24  ;;  %v2143_v23 = vld [vmem:[%s2719_s1 + $0x474] ss:$8 sps:$4 sm:$0xff]   ;;  %v2141_v24 = vld [vmem:[%s2719_s1 + $0x470] ss:$8 sps:$4 sm:$0xff]  }
  0x5a   : > { %1362 = vmatprep.subr.bf16.mxu0 %v2053_v25  ;;  %v2144_v25 = vld [vmem:[%s2365_s6 + $0x20] ss:$36 sps:$4 sm:$0xff]  }
  0x5c   : > { %1277 = vmatpush1.bf16.msra.mxu1 %v2048_v26  ;;  %v447_v26 = vlaneseq }
  0x5d   : > { %1363 = vmatpush1.bf16.msra.mxu0 %v2051_v27  ;;  %1278 = vmatprep.subr.bf16.mxu1 %v2056_v28  ;;  %v2170_v28 = vmov 0.0  }
  0x5e   : > { %1364 = vmatprep.subr.bf16.mxu0 %v2059_v29  ;;  %vm2684_vm0 = vcmp.lt.s32.totalorder %v447_v26, 256 }
  0x5f   : > { %1460 = vst.msk [vmem:[%s2677_s8] sm:$0x3] %vm2684_vm0, %v2170_v28  ;;  %1461 = vst.msk [vmem:[%s2682_s11] sm:$0x3] %vm2684_vm0, %v2170_v28 }
  0x60   : > { %1279 = vmatpush1.bf16.msra.mxu1 %v2054_v30 }
  0x61   : > { %1365 = vmatpush1.bf16.msra.mxu0 %v2057_v31  ;;  %1280 = vmatprep.subr.bf16.mxu1 %v2062_v32 }
  0x62   : > { %1366 = vmatprep.subr.bf16.mxu0 %v2065_v33  ;;  %v448_v33 = vshrl.u32 %v447_v26, 7 }
  0x64   : > { %1281 = vmatpush1.bf16.msra.mxu1 %v2060_v36  ;;  %v449_v34 = vsub.s32 0, %v448_v33  ;;  %v453_v36 = vsub.s32 1, %v448_v33 }
  0x65   : > { %1367 = vmatpush1.bf16.msra.mxu0 %v2063_v37  ;;  %1282 = vmatprep.subr.bf16.mxu1 %v2068_v38 }
  0x66   : > { %1368 = vmatprep.subr.bf16.mxu0 %v2071_v39  ;;  %v450_v37 = vrot.slane %v445_v35, %v449_v34  ;;  %v454_v38 = vrot.slane %v445_v35, %v453_v36 }
  0x68   : > { %1283 = vmatpush1.bf16.msra.mxu1 %v2066_v40 }
  0x69   : > { %1369 = vmatpush1.bf16.msra.mxu0 %v2069_v41  ;;  %1284 = vmatprep.subr.bf16.mxu1 %v2074_v42 }
  0x6a   : > { %1370 = vmatprep.subr.bf16.mxu0 %v2077_v43 }
  0x6c   : > { %1285 = vmatpush1.bf16.msra.mxu1 %v2072_v44 }
  0x6d   : > { %1371 = vmatpush1.bf16.msra.mxu0 %v2075_v45  ;;  %1286 = vmatprep.subr.bf16.mxu1 %v2080_v46 }
  0x6e   : > { %1372 = vmatprep.subr.bf16.mxu0 %v2083_v47 }
  0x70   : > { %1287 = vmatpush1.bf16.msra.mxu1 %v2078_v48 }
  0x71   : > { %1373 = vmatpush1.bf16.msra.mxu0 %v2081_v49  ;;  %1288 = vmatprep.subr.bf16.mxu1 %v2086_v50 }
  0x72   : > { %1374 = vmatprep.subr.bf16.mxu0 %v2089_v51 }
  0x74   : > { %1289 = vmatpush1.bf16.msra.mxu1 %v2084_v52 }
  0x75   : > { %1375 = vmatpush1.bf16.msra.mxu0 %v2087_v53  ;;  %1290 = vmatprep.subr.bf16.mxu1 %v2092_v54 }
  0x76   : > { %1376 = vmatprep.subr.bf16.mxu0 %v2095_v55 }
  0x78   : > { %1291 = vmatpush1.bf16.msra.mxu1 %v2090_v56 }
  0x79   : > { %1377 = vmatpush1.bf16.msra.mxu0 %v2093_v57  ;;  %1292 = vmatprep.subr.bf16.mxu1 %v2098_v58 }
  0x7a   : > { %1378 = vmatprep.subr.bf16.mxu0 %v2101_v59 }
  0x7c   : > { %1293 = vmatpush1.bf16.msra.mxu1 %v2096_v60 }
  0x7d   : > { %1379 = vmatpush1.bf16.msra.mxu0 %v2099_v61  ;;  %1294 = vmatprep.subr.bf16.mxu1 %v2104_v62 }
  0x7e   : > { %1380 = vmatprep.subr.bf16.mxu0 %v2107_v63 }
  0x80   : > { %1295 = vmatpush1.bf16.msra.mxu1 %v2102_v0 }
  0x81   : > { %1381 = vmatpush1.bf16.msra.mxu0 %v2105_v1  ;;  %1296 = vmatprep.subr.bf16.mxu1 %v2110_v2  ;;  %v2171_v1 = vmov 1966171168  }
  0x82   : > { %1382 = vmatprep.subr.bf16.mxu0 %v2113_v3  ;;  %v1481_v2 = vunpack.c.l.s4 %v2171_v1 }
  0x84   : > { %1297 = vmatpush1.bf16.msra.mxu1 %v2108_v4 }
  0x85   : > { %1383 = vmatpush1.bf16.msra.mxu0 %v2111_v5 }
  0x86   : > { %1395 = vmatprep.subr.bf16.mxu0 %v2122_v6 }
  0x87   : > { %1299 = vmatmul.mubr.bf16.vlgmr.msra.gmra.mrb[0].mxu1 %v2114_v7 }
  0x88   : > { %1385 = vmatmul.mubr.bf16.vlgmr.msra.gmra.mrb[0].mxu0 %v2117_v8 }
  0x89   : > { %1396 = vmatpush1.bf16.msra.mxu0 %v2120_v9  ;;  %1427 = vmatprep.mubr.bf16.mxu0 %v2169_v12 }
  0x8a   : > { %1397 = vmatprep.subr.bf16.mxu0 %v2125_v10 }
  0x8d   : > { %1398 = vmatpush1.bf16.msra.mxu0 %v2123_v11  ;;  %v1482_v11 = vunpack.c.0.s8 %v1481_v2 }
  0x8e   : > { %1399 = vmatprep.subr.bf16.mxu0 %v2128_v13 }
  0x91   : > { %1400 = vmatpush1.bf16.msra.mxu0 %v2126_v14 }
  0x92   : > { %1401 = vmatprep.subr.bf16.mxu0 %v2131_v15 }
  0x95   : > { %1402 = vmatpush1.bf16.msra.mxu0 %v2129_v16 }
  0x96   : > { %1403 = vmatprep.subr.bf16.mxu0 %v2134_v17 }
  0x99   : > { %1404 = vmatpush1.bf16.msra.mxu0 %v2132_v18 }
  0x9a   : > { %1405 = vmatprep.subr.bf16.mxu0 %v2137_v19 }
  0x9d   : > { %1406 = vmatpush1.bf16.msra.mxu0 %v2135_v20  ;;  %v1485_v20 = vsub.s32 %v1482_v11, %v448_v33 }
  0x9e   : > { %1407 = vmatprep.subr.bf16.mxu0 %v2140_v21 }
  0xa1   : > { %1408 = vmatpush1.bf16.msra.mxu0 %v2138_v22 }
  0xa2   : > { %1409 = vmatprep.subr.bf16.mxu0 %v2143_v23 }
  0xa5   : > { %1410 = vmatpush1.bf16.msra.mxu0 %v2141_v24 }
  0xa8   : > { %1428 = vmatmul.mubr.bf16.vlgmr.msra.gmra.mrb[0].mxu0 %v2144_v25 }
 0x15a   : > { %v1300_v29 = vpop.f32.mrb[0].mxu1 }
 0x15b   : > { %v1302_v30 = vpop.f32.mrb[1].mxu1  ;;  %v1868_v39 = vadd.f32 %v1300_v29, %v450_v37  ;;  %v1462_v29 = vld [vmem:[%s2677_s8] sm:$0x3] }
 0x15c   : > { %v1304_v31 = vpop.f32.mrb[2].mxu1  ;;  %v1870_v40 = vadd.f32 %v1302_v30, %v454_v38 }
 0x15d   : > { %v1306_v32 = vpop.f32.mrb[3].mxu1  ;;  %v1872_v42 = vadd.f32 %v1304_v31, %v450_v37 }
 0x15e   : > { %v1874_v45 = vadd.f32 %v1306_v32, %v454_v38  ;;  %v1501_v32 = vld [vmem:[%s2682_s11] sm:$0x3] }
 0x17b   : > { %v1429_v41 = vpop.f32.mrb[0].mxu0 }
 0x17c   : > { %v1869_v43 = vadd.f32 %v1868_v39, %v1429_v41  ;;  %v1431_v44 = vpop.f32.mrb[1].mxu0 }
 0x17d   : > { %v1871_v46 = vadd.f32 %v1870_v40, %v1431_v44  ;;  %v1433_v47 = vpop.f32.mrb[2].mxu0 }
 0x17e   : > { %v1873_v48 = vadd.f32 %v1872_v42, %v1433_v47  ;;  %v1435_v49 = vpop.f32.mrb[3].mxu0  ;;  %v1502_v52 = vmul.f32 %v1869_v43, %v1869_v43 }
 0x17f   : > { %v1866_v50 = vpack.c.bf16 %v1871_v46, %v1869_v43  ;;  %v1875_v51 = vadd.f32 %v1874_v45, %v1435_v49  ;;  %v1503_v55 = vmul.f32 %v1871_v46, %v1871_v46 }
 0x180   : > { %v1463_v53 = vadd.f32 %v1873_v48, %v1869_v43  ;;  %v1504_v54 = vmul.f32 %v1873_v48, %v1873_v48 }
 0x181   : > { %1450 = vst [vmem:[%s280_s16] sm:$0xff] %v1866_v50  ;;  %v1867_v56 = vpack.c.bf16 %v1875_v51, %v1873_v48  ;;  %v1470_v57 = vadd.f32 %v1875_v51, %v1871_v46  ;;  %v1505_v58 = vmul.f32 %v1875_v51, %v1875_v51 }
 0x182   : > { %v1464_v59 = vrot.slane %v1463_v53, 4  ;;  %v1506_v60 = vadd.f32 %v1504_v54, %v1502_v52 }
 0x183   : > { %1451 = vst [vmem:[%s280_s16 + $0x8] sm:$0xff] %v1867_v56  ;;  %v1471_v61 = vrot.slane %v1470_v57, 4  ;;  %v1513_v62 = vadd.f32 %v1505_v58, %v1503_v55 }
 0x184   : > { %v1465_v63 = vadd.f32 %v1464_v59, %v1463_v53  ;;  %v1507_v0 = vrot.slane %v1506_v60, 4 }
 0x185   : > { %v1472_v3 = vadd.f32 %v1471_v61, %v1470_v57  ;;  %v1514_v4 = vrot.slane %v1513_v62, 4 }
 0x186   : > { %v1466_v5 = vrot.slane %v1465_v63, 2  ;;  %v1508_v6 = vadd.f32 %v1507_v0, %v1506_v60 }
 0x187   : > { %v1473_v7 = vrot.slane %v1472_v3, 2  ;;  %v1515_v8 = vadd.f32 %v1514_v4, %v1513_v62 }
 0x188   : > { %v1467_v9 = vadd.f32 %v1466_v5, %v1465_v63  ;;  %v1509_v10 = vrot.slane %v1508_v6, 2 }
 0x189   : > { %v1474_v12 = vadd.f32 %v1473_v7, %v1472_v3  ;;  %v1516_v13 = vrot.slane %v1515_v8, 2 }
 0x18a   : > { %v1468_v14 = vrot.slane %v1467_v9, 1  ;;  %v1510_v15 = vadd.f32 %v1509_v10, %v1508_v6 }
 0x18b   : > { %v1475_v16 = vrot.slane %v1474_v12, 1  ;;  %v1517_v17 = vadd.f32 %v1516_v13, %v1515_v8 }
 0x18c   : > { %v1469_v18 = vadd.f32 %v1468_v14, %v1467_v9  ;;  %v1511_v19 = vrot.slane %v1510_v15, 1 }
 0x18d   : > { %v1476_v21 = vadd.f32 %v1475_v16, %v1474_v12  ;;  %v1518_v22 = vrot.slane %v1517_v17, 1 }
 0x18e   : > { %v1512_v23 = vadd.f32 %v1511_v19, %v1510_v15 }
 0x18f   : > { %v1479_v24 = vcombine.low %v1469_v18, %v1476_v21  ;;  %v1519_v25 = vadd.f32 %v1518_v22, %v1517_v17 }
 0x191   : > { %v1486_v26 = vrot.slane %v1479_v24, %v1485_v20  ;;  %v1522_v28 = vcombine.low %v1512_v23, %v1519_v25 }
 0x193   : > { %v1493_v30 = vrot.slane %v1486_v26, %v1485_v20  ;;  %v1529_v31 = vrot.slane %v1522_v28, %v1485_v20 }
 0x195   : > { %v1495_v34 = vadd.f32 %v1493_v30, %v1462_v29  ;;  %v1536_v35 = vrot.slane %v1529_v31, %v1485_v20 }
 0x197   : > { %1500 = vst.msk [vmem:[%s2677_s8] sm:$0x3] %vm2684_vm0, %v1495_v34  ;;  %v1538_v36 = vadd.f32 %v1536_v35, %v1501_v32 }
 0x199   : > { %1539 = vst.msk [vmem:[%s2682_s11] sm:$0x3] %vm2684_vm0, %v1538_v36 }
 0x19a PF: > { %s16_s20 = sadd.s32 1, %s2167_s20   ;;  %s2726_s18 = smov %s2163_s19 }
 0x19b   : > { %p13_p5 = scmp.ge.s32.totalorder %s16_s20, 4   ;;  %s2727_s19 = smov %s2729_s21 }
 0x19d   :  { %15 = sbr.rel (!%p13_p5) target bundleno = 2 (0x2), region = 90 }

// kernel: _lambda_.48
= control target key start
LH: loop header
LB: loop body
LE: loop exit
PB: predicated region body
PF: predicated region fallthrough
CT: control target
= control target key end

     0   :  { %s517_s12 = smov 0   ;;  %s519_s13 = smov 0   ;;  %s560_s0 = inlined_call_operand.vmem [shape: bf16[2,16,256], index: 0, kind: input, shape index: {}]   ;;  %s561_s1 = inlined_call_operand.vmem [shape: f32[2,1,256], index: 1, kind: input, shape index: {}]   ;;  %s562_s2 = inlined_call_operand.vmem [shape: f32[2,1,256], index: 2, kind: input, shape index: {}]   ;;  %s563_s3 = inlined_call_operand.vmem [shape: bf16[2,16,256], index: 3, kind: output, shape index: {}]  }
   0x1   :  { %s521_s14 = smov 0  }
   0x2 LB: > { %s25_s15 = sadd.s32 1, %s491_s13  ;;  %p432_p0 = scmp.ge.s32.totalorder %s495_s14, 1  ;;  %s495_s14 = sphi %s521_s14, %s13_s14   ;;  %s491_s13 = sphi %s519_s13, %s565_s13   ;;  %s487_s12 = sphi %s517_s12, %s564_s12  }
   0x3   : > { %p27_p1 = scmp.ge.s32.totalorder %s25_s15, 2  ;;  %p177_p2 = scmp.lt.s32.totalorder %s495_s14, 3 }
   0x5   : > { %s567_s15 = smov (%p27_p1, %s25_s15), 0  ;;  %p178_p3 = pnand %p432_p0, %p177_p2 }
   0x6   : > { %p220_p4 = scmp.lt.s32.totalorder (!%p178_p3), %s487_s12, 1  ;;  %v263_v5 = vlaneseq (!%p178_p3) }
   0x7   : > { %181 = sbr.rel (%p178_p3) target bundleno = 46 (0x2e), region = 32 }
   0x8   : > { %v264_v8 = vshrl.u32 (!%p178_p3), %v263_v5, 7 }
   0xa   : > { %v265_v11 = vsub.s32 (!%p178_p3), 0, %v264_v8  ;;  %v269_v12 = vsub.s32 (!%p178_p3), 1, %v264_v8 }
   0xe   : > { %s569_s12 = smov (!%p220_p4, %s487_s12), 1 }
   0xf   : > { %s435_s16 = sshll.u32 %s569_s12, 1  ;;  %s443_s23 = sshll.u32 %s569_s12, 4 }
  0x10   : > { %s233_s19 = scalar_lea.vmem %s561_s1, %s435_s16  ;;  %s237_s22 = scalar_lea.vmem %s562_s2, %s435_s16 }
  0x11   : > { %v255_v0 = vld [vmem:[%s233_s19] sm:$0x3]  ;;  %s228_s26 = scalar_lea.vmem %s560_s0, %s443_s23  ;;  %s247_s29 = scalar_lea.vmem %s563_s3, %s443_s23 }
  0x12   : > { %v257_v1 = vld [vmem:[%s237_s22] sm:$0x3]  ;;  %v256_v2 = vmul.f32 0.0625, %v255_v0  ;;  %v250_v13 = vld [vmem:[%s228_s26 + $0x8] sm:$0xff] }
  0x13   : > { %v258_v3 = vmul.f32 0.0625, %v257_v1  ;;  %v249_v10 = vld [vmem:[%s228_s26] sm:$0xff]  ;;  %v253_v16 = vunpack.c.l.bf16 %v250_v13  ;;  %v254_v17 = vunpack.c.h.bf16 %v250_v13 }
  0x14   : > { %v259_v4 = vmul.f32 %v256_v2, %v256_v2  ;;  %v251_v14 = vunpack.c.l.bf16 %v249_v10  ;;  %v252_v15 = vunpack.c.h.bf16 %v249_v10  ;;  %v266_v18 = vrot.slane %v256_v2, %v265_v11 }
  0x15   : > { %v270_v19 = vrot.slane %v256_v2, %v269_v12 }
  0x16   : > { %v260_v6 = vsub.f32 %v258_v3, %v259_v4  ;;  %v273_v20 = vsub.f32 %v251_v14, %v266_v18  ;;  %v275_v22 = vsub.f32 %v253_v16, %v266_v18 }
  0x17   : > { %v274_v21 = vsub.f32 %v252_v15, %v270_v19  ;;  %v276_v23 = vsub.f32 %v254_v17, %v270_v19 }
  0x18   : > { %v261_v7 = vmax.f32 %v260_v6, 0.0 }
  0x1a   : > { %v277_v9 = vadd.f32 1e-05, %v261_v7 }
  0x1c   : > { %471 = vrsqrt.f32 %v277_v9 }
  0x26   : > { %v472_v24 = vpop.eup %471 }
  0x27   : > { %v283_v25 = vrot.slane %v472_v24, %v265_v11  ;;  %v287_v26 = vrot.slane %v472_v24, %v269_v12 }
  0x29   : > { %v290_v27 = vmul.f32 %v283_v25, %v273_v20  ;;  %v291_v28 = vmul.f32 %v287_v26, %v274_v21  ;;  %v292_v29 = vmul.f32 %v283_v25, %v275_v22  ;;  %v293_v30 = vmul.f32 %v287_v26, %v276_v23 }
  0x2b   : > { %v445_v31 = vpack.c.bf16 %v291_v28, %v290_v27  ;;  %v446_v32 = vpack.c.bf16 %v293_v30, %v292_v29 }
  0x2d   : > { %306 = vst [vmem:[%s247_s29] sm:$0xff] %v445_v31  ;;  %307 = vst [vmem:[%s247_s29 + $0x8] sm:$0xff] %v446_v32 }
  0x2e PF: > { %s13_s14 = sadd.s32 1, %s495_s14   ;;  %s564_s12 = smov %s491_s13 }
  0x2f   : > { %p10_p5 = scmp.ge.s32.totalorder %s13_s14, 4   ;;  %s565_s13 = smov %s567_s15 }
  0x31   :  { %12 = sbr.rel (!%p10_p5) target bundleno = 2 (0x2), region = 68 }

// kernel: _lambda_.45
= control target key start
LH: loop header
LB: loop body
LE: loop exit
PB: predicated region body
PF: predicated region fallthrough
CT: control target
= control target key end

     0   :  { %s3686_s18 = smov 0   ;;  %s3688_s19 = smov 0   ;;  %s4643_s0 = inlined_call_operand.vmem [shape: bf16[2,16,2304], index: 0, kind: input, shape index: {}]   ;;  %s4644_s1 = inlined_call_operand.vmem [shape: bf16[2304,256], index: 1, kind: input, shape index: {}]   ;;  %s4645_s2 = inlined_call_operand.vmem [shape: f32[1,256], index: 2, kind: input, shape index: {}]   ;;  %s4646_s3 = inlined_call_operand.vmem [shape: bf16[2,16,256], index: 3, kind: output, shape index: {0}]   ;;  %s4647_s4 = inlined_call_operand.vmem [shape: f32[2,1,256], index: 4, kind: output, shape index: {1}]   ;;  %s4648_s5 = inlined_call_operand.vmem [shape: f32[2,1,256], index: 5, kind: output, shape index: {2}]  }
   0x1   :  { %s3690_s20 = smov 0  }
   0x2 LB: > { %s28_s21 = sadd.s32 1, %s3648_s19  ;;  %p2789_p0 = scmp.ge.s32.totalorder %s3652_s20, 1  ;;  %s3652_s20 = sphi %s3690_s20, %s16_s20   ;;  %s3648_s19 = sphi %s3688_s19, %s4652_s19   ;;  %s3644_s18 = sphi %s3686_s18, %s4651_s18  }
   0x3   : > { %p30_p1 = scmp.ge.s32.totalorder %s28_s21, 2  ;;  %p214_p2 = scmp.lt.s32.totalorder %s3652_s20, 3 }
   0x5   : > { %s4654_s21 = smov (%p30_p1, %s28_s21), 0  ;;  %p215_p3 = pnand %p2789_p0, %p214_p2 }
   0x6   : > { %v3171_v0 = vld [vmem:[%s4644_s1 + $0x4] ss:$8 sps:$4 sm:$0xff] (!%p215_p3)   ;;  %v3175_v2 = vld [vmem:[%s4644_s1] ss:$8 sps:$4 sm:$0xff] (!%p215_p3)   ;;  %v3177_v4 = vld [vmem:[%s4644_s1 + $0x14] ss:$8 sps:$4 sm:$0xff] (!%p215_p3)  }
   0x7   : > { %218 = sbr.rel (%p215_p3) target bundleno = 570 (0x23a), region = 32  ;;  %v3173_v1 = vld [vmem:[%s4644_s1 + $0x404] ss:$8 sps:$4 sm:$0xff] (!%p215_p3)   ;;  %2138 = vmatprep.subr.bf16.mxu1 (!%p215_p3), %v3171_v0  ;;  %v3176_v3 = vld [vmem:[%s4644_s1 + $0x400] ss:$8 sps:$4 sm:$0xff] (!%p215_p3)   ;;  %p261_p4 = scmp.lt.s32.totalorder (!%p215_p3), %s3644_s18, 1 }
   0x8   : > { %2310 = vmatprep.subr.bf16.mxu0 (!%p215_p3), %v3173_v1  ;;  %2139 = vmatpush1.bf16.msra.mxu1 (!%p215_p3), %v3175_v2  ;;  %v3179_v5 = vld [vmem:[%s4644_s1 + $0x414] ss:$8 sps:$4 sm:$0xff] (!%p215_p3)   ;;  %v3181_v6 = vld [vmem:[%s4644_s1 + $0x10] ss:$8 sps:$4 sm:$0xff] (!%p215_p3)   ;;  %v3183_v8 = vld [vmem:[%s4644_s1 + $0x24] ss:$8 sps:$4 sm:$0xff] (!%p215_p3)  }
   0x9   : > { %2311 = vmatpush1.bf16.msra.mxu0 (!%p215_p3), %v3176_v3  ;;  %2140 = vmatprep.subr.bf16.mxu1 (!%p215_p3), %v3177_v4  ;;  %v3182_v7 = vld [vmem:[%s4644_s1 + $0x410] ss:$8 sps:$4 sm:$0xff] (!%p215_p3)   ;;  %v3185_v9 = vld [vmem:[%s4644_s1 + $0x424] ss:$8 sps:$4 sm:$0xff] (!%p215_p3)   ;;  %v3187_v10 = vld [vmem:[%s4644_s1 + $0x20] ss:$8 sps:$4 sm:$0xff] (!%p215_p3)  }
   0xa   : > { %2312 = vmatprep.subr.bf16.mxu0 (!%p215_p3), %v3179_v5  ;;  %v3188_v11 = vld [vmem:[%s4644_s1 + $0x420] ss:$8 sps:$4 sm:$0xff] (!%p215_p3)   ;;  %v3189_v12 = vld [vmem:[%s4644_s1 + $0x34] ss:$8 sps:$4 sm:$0xff] (!%p215_p3)   ;;  %v3193_v14 = vld [vmem:[%s4644_s1 + $0x30] ss:$8 sps:$4 sm:$0xff] (!%p215_p3)  }
   0xb   : > { %v3191_v13 = vld [vmem:[%s4644_s1 + $0x434] ss:$8 sps:$4 sm:$0xff] (!%p215_p3)   ;;  %v3194_v15 = vld [vmem:[%s4644_s1 + $0x430] ss:$8 sps:$4 sm:$0xff] (!%p215_p3)   ;;  %v3195_v16 = vld [vmem:[%s4644_s1 + $0x44] ss:$8 sps:$4 sm:$0xff] (!%p215_p3)  }
   0xc   : > { %2141 = vmatpush1.bf16.msra.mxu1 (!%p215_p3), %v3181_v6  ;;  %v3197_v17 = vld [vmem:[%s4644_s1 + $0x444] ss:$8 sps:$4 sm:$0xff] (!%p215_p3)   ;;  %v3199_v18 = vld [vmem:[%s4644_s1 + $0x40] ss:$8 sps:$4 sm:$0xff] (!%p215_p3)   ;;  %v3201_v20 = vld [vmem:[%s4644_s1 + $0x54] ss:$8 sps:$4 sm:$0xff] (!%p215_p3)  }
   0xd   : > { %2313 = vmatpush1.bf16.msra.mxu0 (!%p215_p3), %v3182_v7  ;;  %2142 = vmatprep.subr.bf16.mxu1 (!%p215_p3), %v3183_v8  ;;  %v3200_v19 = vld [vmem:[%s4644_s1 + $0x440] ss:$8 sps:$4 sm:$0xff] (!%p215_p3)   ;;  %v3203_v21 = vld [vmem:[%s4644_s1 + $0x454] ss:$8 sps:$4 sm:$0xff] (!%p215_p3)   ;;  %v3205_v22 = vld [vmem:[%s4644_s1 + $0x50] ss:$8 sps:$4 sm:$0xff] (!%p215_p3)  }
   0xe   : > { %2314 = vmatprep.subr.bf16.mxu0 %v3185_v9  ;;  %v3206_v23 = vld [vmem:[%s4644_s1 + $0x450] ss:$8 sps:$4 sm:$0xff]   ;;  %v3207_v24 = vld [vmem:[%s4644_s1 + $0x64] ss:$8 sps:$4 sm:$0xff]   ;;  %v3211_v26 = vld [vmem:[%s4644_s1 + $0x60] ss:$8 sps:$4 sm:$0xff]  }
   0xf   : > { %v3209_v25 = vld [vmem:[%s4644_s1 + $0x464] ss:$8 sps:$4 sm:$0xff]   ;;  %v3212_v27 = vld [vmem:[%s4644_s1 + $0x460] ss:$8 sps:$4 sm:$0xff]   ;;  %v3213_v28 = vld [vmem:[%s4644_s1 + $0x74] ss:$8 sps:$4 sm:$0xff]  }
  0x10   : > { %2143 = vmatpush1.bf16.msra.mxu1 %v3187_v10  ;;  %v3215_v29 = vld [vmem:[%s4644_s1 + $0x474] ss:$8 sps:$4 sm:$0xff]   ;;  %v3217_v30 = vld [vmem:[%s4644_s1 + $0x70] ss:$8 sps:$4 sm:$0xff]   ;;  %v3219_v32 = vld [vmem:[%s4644_s1 + $0x84] ss:$8 sps:$4 sm:$0xff]  }
  0x11   : > { %2315 = vmatpush1.bf16.msra.mxu0 %v3188_v11  ;;  %2144 = vmatprep.subr.bf16.mxu1 %v3189_v12  ;;  %v3218_v31 = vld [vmem:[%s4644_s1 + $0x470] ss:$8 sps:$4 sm:$0xff]   ;;  %v3221_v33 = vld [vmem:[%s4644_s1 + $0x484] ss:$8 sps:$4 sm:$0xff]   ;;  %v3223_v34 = vld [vmem:[%s4644_s1 + $0x80] ss:$8 sps:$4 sm:$0xff]  }
  0x12   : > { %2316 = vmatprep.subr.bf16.mxu0 %v3191_v13  ;;  %v3224_v35 = vld [vmem:[%s4644_s1 + $0x480] ss:$8 sps:$4 sm:$0xff]   ;;  %v3225_v36 = vld [vmem:[%s4644_s1 + $0x94] ss:$8 sps:$4 sm:$0xff]   ;;  %s4656_s18 = smov (!%p261_p4, %s3644_s18), 1 }
  0x13   : > { %v3227_v37 = vld [vmem:[%s4644_s1 + $0x494] ss:$8 sps:$4 sm:$0xff]   ;;  %v3229_v38 = vld [vmem:[%s4644_s1 + $0x90] ss:$8 sps:$4 sm:$0xff]   ;;  %v3231_v40 = vld [vmem:[%s4644_s1 + $0xa4] ss:$8 sps:$4 sm:$0xff]  }
  0x14   : > { %2145 = vmatpush1.bf16.msra.mxu1 %v3193_v14  ;;  %v3230_v39 = vld [vmem:[%s4644_s1 + $0x490] ss:$8 sps:$4 sm:$0xff]   ;;  %s3144_s16 = smul.u32 144, %s4656_s18  ;;  %v3233_v41 = vld [vmem:[%s4644_s1 + $0x4a4] ss:$8 sps:$4 sm:$0xff]   ;;  %s2793_s13 = sshll.u32 %s4656_s18, 1 }
  0x15   : > { %2317 = vmatpush1.bf16.msra.mxu0 %v3194_v15  ;;  %2146 = vmatprep.subr.bf16.mxu1 %v3195_v16  ;;  %v3235_v42 = vld [vmem:[%s4644_s1 + $0xa0] ss:$8 sps:$4 sm:$0xff]   ;;  %v3237_v44 = vld [vmem:[%s4644_s1 + $0xb4] ss:$8 sps:$4 sm:$0xff]   ;;  %v3241_v46 = vld [vmem:[%s4644_s1 + $0xb0] ss:$8 sps:$4 sm:$0xff]   ;;  %s4607_s23 = scalar_lea.vmem %s4648_s5, %s2793_s13 }
  0x16   : > { %2318 = vmatprep.subr.bf16.mxu0 %v3197_v17  ;;  %v3236_v43 = vld [vmem:[%s4644_s1 + $0x4a0] ss:$8 sps:$4 sm:$0xff]   ;;  %s3849_s6 = scalar_lea.vmem %s4643_s0, %s3144_s16  ;;  %v3239_v45 = vld [vmem:[%s4644_s1 + $0x4b4] ss:$8 sps:$4 sm:$0xff]   ;;  %v3242_v47 = vld [vmem:[%s4644_s1 + $0x4b0] ss:$8 sps:$4 sm:$0xff]   ;;  %s4602_s16 = scalar_lea.vmem %s4647_s4, %s2793_s13 }
  0x17   : > { %v3269_v48 = vld [vmem:[%s3849_s6 + $0x4] ss:$72 sps:$4 sm:$0xff]   ;;  %v3247_v52 = vld [vmem:[%s4644_s1 + $0xc0] ss:$8 sps:$4 sm:$0xff]   ;;  %v3249_v54 = vld [vmem:[%s4644_s1 + $0xd4] ss:$8 sps:$4 sm:$0xff]  }
  0x18   : > { %2147 = vmatpush1.bf16.msra.mxu1 %v3199_v18  ;;  %v3243_v49 = vld [vmem:[%s4644_s1 + $0xc4] ss:$8 sps:$4 sm:$0xff]   ;;  %2170 = vmatprep.mubr.bf16.mxu1 %v3269_v48  ;;  %v3248_v53 = vld [vmem:[%s4644_s1 + $0x4c0] ss:$8 sps:$4 sm:$0xff]   ;;  %v3251_v55 = vld [vmem:[%s4644_s1 + $0x4d4] ss:$8 sps:$4 sm:$0xff]  }
  0x19   : > { %2319 = vmatpush1.bf16.msra.mxu0 %v3200_v19  ;;  %2148 = vmatprep.subr.bf16.mxu1 %v3201_v20  ;;  %v3245_v50 = vld [vmem:[%s4644_s1 + $0x4c4] ss:$8 sps:$4 sm:$0xff]   ;;  %v3253_v56 = vld [vmem:[%s4644_s1 + $0xd0] ss:$8 sps:$4 sm:$0xff]   ;;  %v3259_v60 = vld [vmem:[%s4644_s1 + $0xe0] ss:$8 sps:$4 sm:$0xff]  }
  0x1a   : > { %2320 = vmatprep.subr.bf16.mxu0 %v3203_v21  ;;  %v3275_v51 = vld [vmem:[%s3849_s6 + $0x24] ss:$72 sps:$4 sm:$0xff]   ;;  %v3254_v57 = vld [vmem:[%s4644_s1 + $0x4d0] ss:$8 sps:$4 sm:$0xff]   ;;  %v3260_v61 = vld [vmem:[%s4644_s1 + $0x4e0] ss:$8 sps:$4 sm:$0xff]  }
  0x1b   : > { %2342 = vmatprep.mubr.bf16.mxu0 %v3275_v51  ;;  %v3255_v58 = vld [vmem:[%s4644_s1 + $0xe4] ss:$8 sps:$4 sm:$0xff]   ;;  %v3261_v62 = vld [vmem:[%s4644_s1 + $0xf4] ss:$8 sps:$4 sm:$0xff]   ;;  %v3265_v0 = vld [vmem:[%s4644_s1 + $0xf0] ss:$8 sps:$4 sm:$0xff]  }
  0x1c   : > { %2149 = vmatpush1.bf16.msra.mxu1 %v3205_v22  ;;  %v3257_v59 = vld [vmem:[%s4644_s1 + $0x4e4] ss:$8 sps:$4 sm:$0xff]   ;;  %v3263_v63 = vld [vmem:[%s4644_s1 + $0x4f4] ss:$8 sps:$4 sm:$0xff]   ;;  %v3266_v1 = vld [vmem:[%s4644_s1 + $0x4f0] ss:$8 sps:$4 sm:$0xff]  }
  0x1d   : > { %2321 = vmatpush1.bf16.msra.mxu0 %v3206_v23  ;;  %2150 = vmatprep.subr.bf16.mxu1 %v3207_v24  ;;  %v3272_v2 = vld [vmem:[%s4644_s1 + $0x104] ss:$8 sps:$4 sm:$0xff]   ;;  %v3267_v4 = vld [vmem:[%s3849_s6] ss:$72 sps:$4 sm:$0xff]   ;;  %v3281_v8 = vld [vmem:[%s4644_s1 + $0x114] ss:$8 sps:$4 sm:$0xff]  }
  0x1e   : > { %2322 = vmatprep.subr.bf16.mxu0 %v3209_v25  ;;  %v3278_v3 = vld [vmem:[%s4644_s1 + $0x504] ss:$8 sps:$4 sm:$0xff]   ;;  %v3270_v5 = vld [vmem:[%s4644_s1 + $0x100] ss:$8 sps:$4 sm:$0xff]   ;;  %v3284_v9 = vld [vmem:[%s4644_s1 + $0x514] ss:$8 sps:$4 sm:$0xff]  }
  0x1f   : > { %v3273_v6 = vld [vmem:[%s3849_s6 + $0x20] ss:$72 sps:$4 sm:$0xff]   ;;  %v3279_v10 = vld [vmem:[%s4644_s1 + $0x110] ss:$8 sps:$4 sm:$0xff]   ;;  %v3287_v12 = vld [vmem:[%s4644_s1 + $0x124] ss:$8 sps:$4 sm:$0xff]  }
  0x20   : > { %2151 = vmatpush1.bf16.msra.mxu1 %v3211_v26  ;;  %v3276_v7 = vld [vmem:[%s4644_s1 + $0x500] ss:$8 sps:$4 sm:$0xff]   ;;  %v3282_v11 = vld [vmem:[%s4644_s1 + $0x510] ss:$8 sps:$4 sm:$0xff]   ;;  %v3290_v13 = vld [vmem:[%s4644_s1 + $0x524] ss:$8 sps:$4 sm:$0xff]  }
  0x21   : > { %2323 = vmatpush1.bf16.msra.mxu0 %v3212_v27  ;;  %2152 = vmatprep.subr.bf16.mxu1 %v3213_v28  ;;  %v3285_v14 = vld [vmem:[%s4644_s1 + $0x120] ss:$8 sps:$4 sm:$0xff]   ;;  %v3293_v16 = vld [vmem:[%s4644_s1 + $0x134] ss:$8 sps:$4 sm:$0xff]   ;;  %v3291_v18 = vld [vmem:[%s4644_s1 + $0x130] ss:$8 sps:$4 sm:$0xff]  }
  0x22   : > { %2324 = vmatprep.subr.bf16.mxu0 %v3215_v29  ;;  %v3288_v15 = vld [vmem:[%s4644_s1 + $0x520] ss:$8 sps:$4 sm:$0xff]   ;;  %v3296_v17 = vld [vmem:[%s4644_s1 + $0x534] ss:$8 sps:$4 sm:$0xff]   ;;  %v3294_v19 = vld [vmem:[%s4644_s1 + $0x530] ss:$8 sps:$4 sm:$0xff]  }
  0x23   : > { %v3299_v20 = vld [vmem:[%s4644_s1 + $0x144] ss:$8 sps:$4 sm:$0xff]   ;;  %v3297_v22 = vld [vmem:[%s4644_s1 + $0x140] ss:$8 sps:$4 sm:$0xff]   ;;  %v3305_v24 = vld [vmem:[%s4644_s1 + $0x154] ss:$8 sps:$4 sm:$0xff]  }
  0x24   : > { %2153 = vmatpush1.bf16.msra.mxu1 %v3217_v30  ;;  %v3302_v21 = vld [vmem:[%s4644_s1 + $0x544] ss:$8 sps:$4 sm:$0xff]   ;;  %v3300_v23 = vld [vmem:[%s4644_s1 + $0x540] ss:$8 sps:$4 sm:$0xff]   ;;  %v3308_v25 = vld [vmem:[%s4644_s1 + $0x554] ss:$8 sps:$4 sm:$0xff]  }
  0x25   : > { %2325 = vmatpush1.bf16.msra.mxu0 %v3218_v31  ;;  %2154 = vmatprep.subr.bf16.mxu1 %v3219_v32  ;;  %v3303_v26 = vld [vmem:[%s4644_s1 + $0x150] ss:$8 sps:$4 sm:$0xff]   ;;  %v3311_v28 = vld [vmem:[%s4644_s1 + $0x164] ss:$8 sps:$4 sm:$0xff]   ;;  %v3309_v30 = vld [vmem:[%s4644_s1 + $0x160] ss:$8 sps:$4 sm:$0xff]  }
  0x26   : > { %2326 = vmatprep.subr.bf16.mxu0 %v3221_v33  ;;  %v3306_v27 = vld [vmem:[%s4644_s1 + $0x550] ss:$8 sps:$4 sm:$0xff]   ;;  %v3314_v29 = vld [vmem:[%s4644_s1 + $0x564] ss:$8 sps:$4 sm:$0xff]   ;;  %v3312_v31 = vld [vmem:[%s4644_s1 + $0x560] ss:$8 sps:$4 sm:$0xff]  }
  0x27   : > { %v3317_v32 = vld [vmem:[%s4644_s1 + $0x174] ss:$8 sps:$4 sm:$0xff]   ;;  %v3333_v48 = vld [vmem:[%s4644_s1 + $0x1a0] ss:$8 sps:$4 sm:$0xff]   ;;  %s3105_s25 = sshll.u32 %s4656_s18, 4 }
  0x28   : > { %2155 = vmatpush1.bf16.msra.mxu1 %v3223_v34  ;;  %v3320_v33 = vld [vmem:[%s4644_s1 + $0x574] ss:$8 sps:$4 sm:$0xff]   ;;  %s280_s28 = scalar_lea.vmem %s4646_s3, %s3105_s25 }
  0x29   : > { %2327 = vmatpush1.bf16.msra.mxu0 %v3224_v35  ;;  %2156 = vmatprep.subr.bf16.mxu1 %v3225_v36  ;;  %v3371_v34 = vld [vmem:[%s3849_s6 + $0xc] ss:$72 sps:$4 sm:$0xff]   ;;  %v3315_v35 = vld [vmem:[%s4644_s1 + $0x170] ss:$8 sps:$4 sm:$0xff]  }
  0x2a   : > { %2328 = vmatprep.subr.bf16.mxu0 %v3227_v37  ;;  %v3318_v36 = vld [vmem:[%s4644_s1 + $0x570] ss:$8 sps:$4 sm:$0xff]   ;;  %v3377_v37 = vld [vmem:[%s3849_s6 + $0x2c] ss:$72 sps:$4 sm:$0xff]  }
  0x2b   : > { %v3344_v51 = vld [vmem:[%s4644_s1 + $0x5b4] ss:$8 sps:$4 sm:$0xff]  }
  0x2c   : > { %2157 = vmatpush1.bf16.msra.mxu1 %v3229_v38  ;;  %v3323_v38 = vld [vmem:[%s4644_s1 + $0x184] ss:$8 sps:$4 sm:$0xff]  }
  0x2d   : > { %2329 = vmatpush1.bf16.msra.mxu0 %v3230_v39  ;;  %2158 = vmatprep.subr.bf16.mxu1 %v3231_v40  ;;  %v3326_v39 = vld [vmem:[%s4644_s1 + $0x584] ss:$8 sps:$4 sm:$0xff]   ;;  %v3321_v40 = vld [vmem:[%s4644_s1 + $0x180] ss:$8 sps:$4 sm:$0xff]  }
  0x2e   : > { %2330 = vmatprep.subr.bf16.mxu0 %v3233_v41  ;;  %v3324_v41 = vld [vmem:[%s4644_s1 + $0x580] ss:$8 sps:$4 sm:$0xff]  }
  0x30   : > { %2159 = vmatpush1.bf16.msra.mxu1 %v3235_v42  ;;  %v3329_v42 = vld [vmem:[%s4644_s1 + $0x194] ss:$8 sps:$4 sm:$0xff]  }
  0x31   : > { %2331 = vmatpush1.bf16.msra.mxu0 %v3236_v43  ;;  %2160 = vmatprep.subr.bf16.mxu1 %v3237_v44  ;;  %v3332_v43 = vld [vmem:[%s4644_s1 + $0x594] ss:$8 sps:$4 sm:$0xff]   ;;  %v3327_v44 = vld [vmem:[%s4644_s1 + $0x190] ss:$8 sps:$4 sm:$0xff]  }
  0x32   : > { %2332 = vmatprep.subr.bf16.mxu0 %v3239_v45  ;;  %v3330_v45 = vld [vmem:[%s4644_s1 + $0x590] ss:$8 sps:$4 sm:$0xff]  }
  0x34   : > { %2161 = vmatpush1.bf16.msra.mxu1 %v3241_v46  ;;  %v3335_v46 = vld [vmem:[%s4644_s1 + $0x1a4] ss:$8 sps:$4 sm:$0xff]  }
  0x35   : > { %2333 = vmatpush1.bf16.msra.mxu0 %v3242_v47  ;;  %2162 = vmatprep.subr.bf16.mxu1 %v3243_v49  ;;  %v3338_v47 = vld [vmem:[%s4644_s1 + $0x5a4] ss:$8 sps:$4 sm:$0xff]   ;;  %v3336_v49 = vld [vmem:[%s4644_s1 + $0x5a0] ss:$8 sps:$4 sm:$0xff]  }
  0x36   : > { %2334 = vmatprep.subr.bf16.mxu0 %v3245_v50  ;;  %v3341_v50 = vld [vmem:[%s4644_s1 + $0x1b4] ss:$8 sps:$4 sm:$0xff]  }
  0x38   : > { %2163 = vmatpush1.bf16.msra.mxu1 %v3247_v52  ;;  %v3339_v52 = vld [vmem:[%s4644_s1 + $0x1b0] ss:$8 sps:$4 sm:$0xff]  }
  0x39   : > { %2335 = vmatpush1.bf16.msra.mxu0 %v3248_v53  ;;  %2164 = vmatprep.subr.bf16.mxu1 %v3249_v54  ;;  %v3342_v53 = vld [vmem:[%s4644_s1 + $0x5b0] ss:$8 sps:$4 sm:$0xff]   ;;  %v3347_v54 = vld [vmem:[%s4644_s1 + $0x1c4] ss:$8 sps:$4 sm:$0xff]  }
  0x3a   : > { %2336 = vmatprep.subr.bf16.mxu0 %v3251_v55  ;;  %v3350_v55 = vld [vmem:[%s4644_s1 + $0x5c4] ss:$8 sps:$4 sm:$0xff]  }
  0x3c   : > { %2165 = vmatpush1.bf16.msra.mxu1 %v3253_v56  ;;  %v3345_v56 = vld [vmem:[%s4644_s1 + $0x1c0] ss:$8 sps:$4 sm:$0xff]  }
  0x3d   : > { %2337 = vmatpush1.bf16.msra.mxu0 %v3254_v57  ;;  %2166 = vmatprep.subr.bf16.mxu1 %v3255_v58  ;;  %v3348_v57 = vld [vmem:[%s4644_s1 + $0x5c0] ss:$8 sps:$4 sm:$0xff]   ;;  %v3353_v58 = vld [vmem:[%s4644_s1 + $0x1d4] ss:$8 sps:$4 sm:$0xff]  }
  0x3e   : > { %2338 = vmatprep.subr.bf16.mxu0 %v3257_v59  ;;  %v3356_v59 = vld [vmem:[%s4644_s1 + $0x5d4] ss:$8 sps:$4 sm:$0xff]  }
  0x40   : > { %2167 = vmatpush1.bf16.msra.mxu1 %v3259_v60  ;;  %v3351_v60 = vld [vmem:[%s4644_s1 + $0x1d0] ss:$8 sps:$4 sm:$0xff]  }
  0x41   : > { %2339 = vmatpush1.bf16.msra.mxu0 %v3260_v61  ;;  %2168 = vmatprep.subr.bf16.mxu1 %v3261_v62  ;;  %v3354_v61 = vld [vmem:[%s4644_s1 + $0x5d0] ss:$8 sps:$4 sm:$0xff]   ;;  %v3359_v62 = vld [vmem:[%s4644_s1 + $0x1e4] ss:$8 sps:$4 sm:$0xff]  }
  0x42   : > { %2340 = vmatprep.subr.bf16.mxu0 %v3263_v63  ;;  %v3362_v63 = vld [vmem:[%s4644_s1 + $0x5e4] ss:$8 sps:$4 sm:$0xff]  }
  0x44   : > { %2169 = vmatpush1.bf16.msra.mxu1 %v3265_v0  ;;  %v3357_v0 = vld [vmem:[%s4644_s1 + $0x1e0] ss:$8 sps:$4 sm:$0xff]  }
  0x45   : > { %2341 = vmatpush1.bf16.msra.mxu0 %v3266_v1  ;;  %2181 = vmatprep.subr.bf16.mxu1 %v3272_v2  ;;  %v3360_v1 = vld [vmem:[%s4644_s1 + $0x5e0] ss:$8 sps:$4 sm:$0xff]   ;;  %v3365_v2 = vld [vmem:[%s4644_s1 + $0x1f4] ss:$8 sps:$4 sm:$0xff]  }
  0x46   : > { %2353 = vmatprep.subr.bf16.mxu0 %v3278_v3  ;;  %v3368_v3 = vld [vmem:[%s4644_s1 + $0x5f4] ss:$8 sps:$4 sm:$0xff]  }
  0x47   : > { %2171 = vmatmul.mubr.bf16.vlgmr.msra.gmra.mrb[0].mxu1 %v3267_v4  ;;  %v3363_v4 = vld [vmem:[%s4644_s1 + $0x1f0] ss:$8 sps:$4 sm:$0xff]  }
  0x48   : > { %2343 = vmatmul.mubr.bf16.vlgmr.msra.gmra.mrb[0].mxu0 %v3273_v6  ;;  %2182 = vmatpush1.bf16.msra.mxu1 %v3270_v5  ;;  %v3366_v5 = vld [vmem:[%s4644_s1 + $0x5f0] ss:$8 sps:$4 sm:$0xff]   ;;  %v3374_v6 = vld [vmem:[%s4644_s1 + $0x204] ss:$8 sps:$4 sm:$0xff]  }
  0x49   : > { %2354 = vmatpush1.bf16.msra.mxu0 %v3276_v7  ;;  %2183 = vmatprep.subr.bf16.mxu1 %v3281_v8  ;;  %v3380_v7 = vld [vmem:[%s4644_s1 + $0x604] ss:$8 sps:$4 sm:$0xff]   ;;  %v3369_v8 = vld [vmem:[%s3849_s6 + $0x8] ss:$72 sps:$4 sm:$0xff]  }
  0x4a   : > { %2355 = vmatprep.subr.bf16.mxu0 %v3284_v9  ;;  %2213 = vmatprep.mubr.bf16.mxu1 %v3371_v34  ;;  %v3372_v9 = vld [vmem:[%s4644_s1 + $0x200] ss:$8 sps:$4 sm:$0xff]   ;;  %v3413_v34 = vld [vmem:[%s4644_s1 + $0x264] ss:$8 sps:$4 sm:$0xff]  }
  0x4b   : > { %2385 = vmatprep.mubr.bf16.mxu0 %v3377_v37  ;;  %v3414_v37 = vld [vmem:[%s4644_s1 + $0x660] ss:$8 sps:$4 sm:$0xff]  }
  0x4c   : > { %2184 = vmatpush1.bf16.msra.mxu1 %v3279_v10  ;;  %v3375_v10 = vld [vmem:[%s3849_s6 + $0x28] ss:$72 sps:$4 sm:$0xff]  }
  0x4d   : > { %2356 = vmatpush1.bf16.msra.mxu0 %v3282_v11  ;;  %2185 = vmatprep.subr.bf16.mxu1 %v3287_v12  ;;  %v3378_v11 = vld [vmem:[%s4644_s1 + $0x600] ss:$8 sps:$4 sm:$0xff]   ;;  %v3383_v12 = vld [vmem:[%s4644_s1 + $0x214] ss:$8 sps:$4 sm:$0xff]  }
  0x4e   : > { %2357 = vmatprep.subr.bf16.mxu0 %v3290_v13  ;;  %v3386_v13 = vld [vmem:[%s4644_s1 + $0x614] ss:$8 sps:$4 sm:$0xff]  }
  0x50   : > { %2186 = vmatpush1.bf16.msra.mxu1 %v3285_v14  ;;  %v3381_v14 = vld [vmem:[%s4644_s1 + $0x210] ss:$8 sps:$4 sm:$0xff]  }
  0x51   : > { %2358 = vmatpush1.bf16.msra.mxu0 %v3288_v15  ;;  %2187 = vmatprep.subr.bf16.mxu1 %v3293_v16  ;;  %v3384_v15 = vld [vmem:[%s4644_s1 + $0x610] ss:$8 sps:$4 sm:$0xff]   ;;  %v3389_v16 = vld [vmem:[%s4644_s1 + $0x224] ss:$8 sps:$4 sm:$0xff]  }
  0x52   : > { %2359 = vmatprep.subr.bf16.mxu0 %v3296_v17  ;;  %v3392_v17 = vld [vmem:[%s4644_s1 + $0x624] ss:$8 sps:$4 sm:$0xff]  }
  0x54   : > { %2188 = vmatpush1.bf16.msra.mxu1 %v3291_v18  ;;  %v3387_v18 = vld [vmem:[%s4644_s1 + $0x220] ss:$8 sps:$4 sm:$0xff]  }
  0x55   : > { %2360 = vmatpush1.bf16.msra.mxu0 %v3294_v19  ;;  %2189 = vmatprep.subr.bf16.mxu1 %v3299_v20  ;;  %v3473_v19 = vld [vmem:[%s3849_s6 + $0x14] ss:$72 sps:$4 sm:$0xff]   ;;  %v3390_v20 = vld [vmem:[%s4644_s1 + $0x620] ss:$8 sps:$4 sm:$0xff]  }
  0x56   : > { %2361 = vmatprep.subr.bf16.mxu0 %v3302_v21  ;;  %v3395_v21 = vld [vmem:[%s4644_s1 + $0x234] ss:$8 sps:$4 sm:$0xff]  }
  0x58   : > { %2190 = vmatpush1.bf16.msra.mxu1 %v3297_v22  ;;  %v3398_v22 = vld [vmem:[%s4644_s1 + $0x634] ss:$8 sps:$4 sm:$0xff]  }
  0x59   : > { %2362 = vmatpush1.bf16.msra.mxu0 %v3300_v23  ;;  %2191 = vmatprep.subr.bf16.mxu1 %v3305_v24  ;;  %v3479_v23 = vld [vmem:[%s3849_s6 + $0x34] ss:$72 sps:$4 sm:$0xff]   ;;  %v3393_v24 = vld [vmem:[%s4644_s1 + $0x230] ss:$8 sps:$4 sm:$0xff]  }
  0x5a   : > { %2363 = vmatprep.subr.bf16.mxu0 %v3308_v25  ;;  %v3396_v25 = vld [vmem:[%s4644_s1 + $0x630] ss:$8 sps:$4 sm:$0xff]  }
  0x5c   : > { %2192 = vmatpush1.bf16.msra.mxu1 %v3303_v26  ;;  %v3401_v26 = vld [vmem:[%s4644_s1 + $0x244] ss:$8 sps:$4 sm:$0xff]  }
  0x5d   : > { %2364 = vmatpush1.bf16.msra.mxu0 %v3306_v27  ;;  %2193 = vmatprep.subr.bf16.mxu1 %v3311_v28  ;;  %v3404_v27 = vld [vmem:[%s4644_s1 + $0x644] ss:$8 sps:$4 sm:$0xff]   ;;  %v3399_v28 = vld [vmem:[%s4644_s1 + $0x240] ss:$8 sps:$4 sm:$0xff]  }
  0x5e   : > { %2365 = vmatprep.subr.bf16.mxu0 %v3314_v29  ;;  %v3402_v29 = vld [vmem:[%s4644_s1 + $0x640] ss:$8 sps:$4 sm:$0xff]  }
  0x60   : > { %2194 = vmatpush1.bf16.msra.mxu1 %v3309_v30  ;;  %v3407_v30 = vld [vmem:[%s4644_s1 + $0x254] ss:$8 sps:$4 sm:$0xff]  }
  0x61   : > { %2366 = vmatpush1.bf16.msra.mxu0 %v3312_v31  ;;  %2195 = vmatprep.subr.bf16.mxu1 %v3317_v32  ;;  %v3410_v31 = vld [vmem:[%s4644_s1 + $0x654] ss:$8 sps:$4 sm:$0xff]   ;;  %v3405_v32 = vld [vmem:[%s4644_s1 + $0x250] ss:$8 sps:$4 sm:$0xff]  }
  0x62   : > { %2367 = vmatprep.subr.bf16.mxu0 %v3320_v33  ;;  %v3408_v33 = vld [vmem:[%s4644_s1 + $0x650] ss:$8 sps:$4 sm:$0xff]  }
  0x64   : > { %2196 = vmatpush1.bf16.msra.mxu1 %v3315_v35  ;;  %v3416_v35 = vld [vmem:[%s4644_s1 + $0x664] ss:$8 sps:$4 sm:$0xff]  }
  0x65   : > { %2368 = vmatpush1.bf16.msra.mxu0 %v3318_v36  ;;  %2197 = vmatprep.subr.bf16.mxu1 %v3323_v38  ;;  %v3411_v36 = vld [vmem:[%s4644_s1 + $0x260] ss:$8 sps:$4 sm:$0xff]   ;;  %v3419_v38 = vld [vmem:[%s4644_s1 + $0x274] ss:$8 sps:$4 sm:$0xff]  }
  0x66   : > { %2369 = vmatprep.subr.bf16.mxu0 %v3326_v39  ;;  %v3422_v39 = vld [vmem:[%s4644_s1 + $0x674] ss:$8 sps:$4 sm:$0xff]  }
  0x68   : > { %2198 = vmatpush1.bf16.msra.mxu1 %v3321_v40  ;;  %v3417_v40 = vld [vmem:[%s4644_s1 + $0x270] ss:$8 sps:$4 sm:$0xff]  }
  0x69   : > { %2370 = vmatpush1.bf16.msra.mxu0 %v3324_v41  ;;  %2199 = vmatprep.subr.bf16.mxu1 %v3329_v42  ;;  %v3420_v41 = vld [vmem:[%s4644_s1 + $0x670] ss:$8 sps:$4 sm:$0xff]   ;;  %v3425_v42 = vld [vmem:[%s4644_s1 + $0x284] ss:$8 sps:$4 sm:$0xff]  }
  0x6a   : > { %2371 = vmatprep.subr.bf16.mxu0 %v3332_v43  ;;  %v3428_v43 = vld [vmem:[%s4644_s1 + $0x684] ss:$8 sps:$4 sm:$0xff]  }
  0x6c   : > { %2200 = vmatpush1.bf16.msra.mxu1 %v3327_v44  ;;  %v3423_v44 = vld [vmem:[%s4644_s1 + $0x280] ss:$8 sps:$4 sm:$0xff]  }
  0x6d   : > { %2372 = vmatpush1.bf16.msra.mxu0 %v3330_v45  ;;  %2201 = vmatprep.subr.bf16.mxu1 %v3335_v46  ;;  %v3426_v45 = vld [vmem:[%s4644_s1 + $0x680] ss:$8 sps:$4 sm:$0xff]   ;;  %v3431_v46 = vld [vmem:[%s4644_s1 + $0x294] ss:$8 sps:$4 sm:$0xff]  }
  0x6e   : > { %2373 = vmatprep.subr.bf16.mxu0 %v3338_v47  ;;  %v3434_v47 = vld [vmem:[%s4644_s1 + $0x694] ss:$8 sps:$4 sm:$0xff]  }
  0x70   : > { %2202 = vmatpush1.bf16.msra.mxu1 %v3333_v48  ;;  %v3429_v48 = vld [vmem:[%s4644_s1 + $0x290] ss:$8 sps:$4 sm:$0xff]  }
  0x71   : > { %2374 = vmatpush1.bf16.msra.mxu0 %v3336_v49  ;;  %2203 = vmatprep.subr.bf16.mxu1 %v3341_v50  ;;  %v3432_v49 = vld [vmem:[%s4644_s1 + $0x690] ss:$8 sps:$4 sm:$0xff]   ;;  %v3437_v50 = vld [vmem:[%s4644_s1 + $0x2a4] ss:$8 sps:$4 sm:$0xff]  }
  0x72   : > { %2375 = vmatprep.subr.bf16.mxu0 %v3344_v51  ;;  %v3440_v51 = vld [vmem:[%s4644_s1 + $0x6a4] ss:$8 sps:$4 sm:$0xff]  }
  0x74   : > { %2204 = vmatpush1.bf16.msra.mxu1 %v3339_v52  ;;  %v3435_v52 = vld [vmem:[%s4644_s1 + $0x2a0] ss:$8 sps:$4 sm:$0xff]  }
  0x75   : > { %2376 = vmatpush1.bf16.msra.mxu0 %v3342_v53  ;;  %2205 = vmatprep.subr.bf16.mxu1 %v3347_v54  ;;  %v3438_v53 = vld [vmem:[%s4644_s1 + $0x6a0] ss:$8 sps:$4 sm:$0xff]   ;;  %v3443_v54 = vld [vmem:[%s4644_s1 + $0x2b4] ss:$8 sps:$4 sm:$0xff]  }
  0x76   : > { %2377 = vmatprep.subr.bf16.mxu0 %v3350_v55  ;;  %v3446_v55 = vld [vmem:[%s4644_s1 + $0x6b4] ss:$8 sps:$4 sm:$0xff]  }
  0x78   : > { %2206 = vmatpush1.bf16.msra.mxu1 %v3345_v56  ;;  %v3441_v56 = vld [vmem:[%s4644_s1 + $0x2b0] ss:$8 sps:$4 sm:$0xff]  }
  0x79   : > { %2378 = vmatpush1.bf16.msra.mxu0 %v3348_v57  ;;  %2207 = vmatprep.subr.bf16.mxu1 %v3353_v58  ;;  %v3444_v57 = vld [vmem:[%s4644_s1 + $0x6b0] ss:$8 sps:$4 sm:$0xff]   ;;  %v3449_v58 = vld [vmem:[%s4644_s1 + $0x2c4] ss:$8 sps:$4 sm:$0xff]  }
  0x7a   : > { %2379 = vmatprep.subr.bf16.mxu0 %v3356_v59  ;;  %v3452_v59 = vld [vmem:[%s4644_s1 + $0x6c4] ss:$8 sps:$4 sm:$0xff]  }
  0x7c   : > { %2208 = vmatpush1.bf16.msra.mxu1 %v3351_v60  ;;  %v3447_v60 = vld [vmem:[%s4644_s1 + $0x2c0] ss:$8 sps:$4 sm:$0xff]  }
  0x7d   : > { %2380 = vmatpush1.bf16.msra.mxu0 %v3354_v61  ;;  %2209 = vmatprep.subr.bf16.mxu1 %v3359_v62  ;;  %v3450_v61 = vld [vmem:[%s4644_s1 + $0x6c0] ss:$8 sps:$4 sm:$0xff]   ;;  %v3455_v62 = vld [vmem:[%s4644_s1 + $0x2d4] ss:$8 sps:$4 sm:$0xff]  }
  0x7e   : > { %2381 = vmatprep.subr.bf16.mxu0 %v3362_v63  ;;  %v3458_v63 = vld [vmem:[%s4644_s1 + $0x6d4] ss:$8 sps:$4 sm:$0xff]  }
  0x80   : > { %2210 = vmatpush1.bf16.msra.mxu1 %v3357_v0  ;;  %v3453_v0 = vld [vmem:[%s4644_s1 + $0x2d0] ss:$8 sps:$4 sm:$0xff]  }
  0x81   : > { %2382 = vmatpush1.bf16.msra.mxu0 %v3360_v1  ;;  %2211 = vmatprep.subr.bf16.mxu1 %v3365_v2  ;;  %v3456_v1 = vld [vmem:[%s4644_s1 + $0x6d0] ss:$8 sps:$4 sm:$0xff]   ;;  %v3461_v2 = vld [vmem:[%s4644_s1 + $0x2e4] ss:$8 sps:$4 sm:$0xff]  }
  0x82   : > { %2383 = vmatprep.subr.bf16.mxu0 %v3368_v3  ;;  %v3464_v3 = vld [vmem:[%s4644_s1 + $0x6e4] ss:$8 sps:$4 sm:$0xff]  }
  0x84   : > { %2212 = vmatpush1.bf16.msra.mxu1 %v3363_v4  ;;  %v3459_v4 = vld [vmem:[%s4644_s1 + $0x2e0] ss:$8 sps:$4 sm:$0xff]  }
  0x85   : > { %2384 = vmatpush1.bf16.msra.mxu0 %v3366_v5  ;;  %2224 = vmatprep.subr.bf16.mxu1 %v3374_v6  ;;  %v3462_v5 = vld [vmem:[%s4644_s1 + $0x6e0] ss:$8 sps:$4 sm:$0xff]   ;;  %v3467_v6 = vld [vmem:[%s4644_s1 + $0x2f4] ss:$8 sps:$4 sm:$0xff]  }
  0x86   : > { %2396 = vmatprep.subr.bf16.mxu0 %v3380_v7  ;;  %v3470_v7 = vld [vmem:[%s4644_s1 + $0x6f4] ss:$8 sps:$4 sm:$0xff]  }
  0x87   : > { %2214 = vmatmul.mubr.bf16.vlgmr.msra.gmra.mrb[0].mxu1 %v3369_v8  ;;  %v3465_v8 = vld [vmem:[%s4644_s1 + $0x2f0] ss:$8 sps:$4 sm:$0xff]  }
  0x88   : > { %2386 = vmatmul.mubr.bf16.vlgmr.msra.gmra.mrb[0].mxu0 %v3375_v10  ;;  %2225 = vmatpush1.bf16.msra.mxu1 %v3372_v9  ;;  %v3468_v9 = vld [vmem:[%s4644_s1 + $0x6f0] ss:$8 sps:$4 sm:$0xff]   ;;  %v3476_v10 = vld [vmem:[%s4644_s1 + $0x304] ss:$8 sps:$4 sm:$0xff]  }
  0x89   : > { %2397 = vmatpush1.bf16.msra.mxu0 %v3378_v11  ;;  %2226 = vmatprep.subr.bf16.mxu1 %v3383_v12  ;;  %v3482_v11 = vld [vmem:[%s4644_s1 + $0x704] ss:$8 sps:$4 sm:$0xff]   ;;  %v3471_v12 = vld [vmem:[%s3849_s6 + $0x10] ss:$72 sps:$4 sm:$0xff]  }
  0x8a   : > { %2398 = vmatprep.subr.bf16.mxu0 %v3386_v13  ;;  %2256 = vmatprep.mubr.bf16.mxu1 %v3473_v19  ;;  %v3474_v13 = vld [vmem:[%s4644_s1 + $0x300] ss:$8 sps:$4 sm:$0xff]   ;;  %v3578_v19 = vld [vmem:[%s3849_s6 + $0x3c] ss:$72 sps:$4 sm:$0xff]  }
  0x8b   : > { %2428 = vmatprep.mubr.bf16.mxu0 %v3479_v23  ;;  %v3494_v23 = vld [vmem:[%s4644_s1 + $0x724] ss:$8 sps:$4 sm:$0xff]  }
  0x8c   : > { %2227 = vmatpush1.bf16.msra.mxu1 %v3381_v14  ;;  %v3477_v14 = vld [vmem:[%s3849_s6 + $0x30] ss:$72 sps:$4 sm:$0xff]  }
  0x8d   : > { %2399 = vmatpush1.bf16.msra.mxu0 %v3384_v15  ;;  %2228 = vmatprep.subr.bf16.mxu1 %v3389_v16  ;;  %v3480_v15 = vld [vmem:[%s4644_s1 + $0x700] ss:$8 sps:$4 sm:$0xff]   ;;  %v3485_v16 = vld [vmem:[%s4644_s1 + $0x314] ss:$8 sps:$4 sm:$0xff]  }
  0x8e   : > { %2400 = vmatprep.subr.bf16.mxu0 %v3392_v17  ;;  %v3488_v17 = vld [vmem:[%s4644_s1 + $0x714] ss:$8 sps:$4 sm:$0xff]  }
  0x90   : > { %2229 = vmatpush1.bf16.msra.mxu1 %v3387_v18  ;;  %v3575_v18 = vld [vmem:[%s3849_s6 + $0x1c] ss:$72 sps:$4 sm:$0xff]  }
  0x91   : > { %2401 = vmatpush1.bf16.msra.mxu0 %v3390_v20  ;;  %2230 = vmatprep.subr.bf16.mxu1 %v3395_v21  ;;  %v3483_v20 = vld [vmem:[%s4644_s1 + $0x310] ss:$8 sps:$4 sm:$0xff]  }
  0x92   : > { %2402 = vmatprep.subr.bf16.mxu0 %v3398_v22  ;;  %v3486_v21 = vld [vmem:[%s4644_s1 + $0x710] ss:$8 sps:$4 sm:$0xff]   ;;  %v3491_v22 = vld [vmem:[%s4644_s1 + $0x324] ss:$8 sps:$4 sm:$0xff]  }
  0x94   : > { %2231 = vmatpush1.bf16.msra.mxu1 %v3393_v24  ;;  %v3489_v24 = vld [vmem:[%s4644_s1 + $0x320] ss:$8 sps:$4 sm:$0xff]  }
  0x95   : > { %2403 = vmatpush1.bf16.msra.mxu0 %v3396_v25  ;;  %2232 = vmatprep.subr.bf16.mxu1 %v3401_v26  ;;  %v3492_v25 = vld [vmem:[%s4644_s1 + $0x720] ss:$8 sps:$4 sm:$0xff]   ;;  %v3497_v26 = vld [vmem:[%s4644_s1 + $0x334] ss:$8 sps:$4 sm:$0xff]  }
  0x96   : > { %2404 = vmatprep.subr.bf16.mxu0 %v3404_v27  ;;  %v3500_v27 = vld [vmem:[%s4644_s1 + $0x734] ss:$8 sps:$4 sm:$0xff]  }
  0x98   : > { %2233 = vmatpush1.bf16.msra.mxu1 %v3399_v28  ;;  %v3495_v28 = vld [vmem:[%s4644_s1 + $0x330] ss:$8 sps:$4 sm:$0xff]  }
  0x99   : > { %2405 = vmatpush1.bf16.msra.mxu0 %v3402_v29  ;;  %2234 = vmatprep.subr.bf16.mxu1 %v3407_v30  ;;  %v3498_v29 = vld [vmem:[%s4644_s1 + $0x730] ss:$8 sps:$4 sm:$0xff]   ;;  %v3503_v30 = vld [vmem:[%s4644_s1 + $0x344] ss:$8 sps:$4 sm:$0xff]  }
  0x9a   : > { %2406 = vmatprep.subr.bf16.mxu0 %v3410_v31  ;;  %v3506_v31 = vld [vmem:[%s4644_s1 + $0x744] ss:$8 sps:$4 sm:$0xff]  }
  0x9c   : > { %2235 = vmatpush1.bf16.msra.mxu1 %v3405_v32  ;;  %v3501_v32 = vld [vmem:[%s4644_s1 + $0x340] ss:$8 sps:$4 sm:$0xff]  }
  0x9d   : > { %2407 = vmatpush1.bf16.msra.mxu0 %v3408_v33  ;;  %2236 = vmatprep.subr.bf16.mxu1 %v3413_v34  ;;  %v3504_v33 = vld [vmem:[%s4644_s1 + $0x740] ss:$8 sps:$4 sm:$0xff]   ;;  %v3509_v34 = vld [vmem:[%s4644_s1 + $0x354] ss:$8 sps:$4 sm:$0xff]  }
  0x9e   : > { %2408 = vmatprep.subr.bf16.mxu0 %v3416_v35  ;;  %v3512_v35 = vld [vmem:[%s4644_s1 + $0x754] ss:$8 sps:$4 sm:$0xff]  }
  0xa0   : > { %2237 = vmatpush1.bf16.msra.mxu1 %v3411_v36  ;;  %v3507_v36 = vld [vmem:[%s4644_s1 + $0x350] ss:$8 sps:$4 sm:$0xff]  }
  0xa1   : > { %2409 = vmatpush1.bf16.msra.mxu0 %v3414_v37  ;;  %2238 = vmatprep.subr.bf16.mxu1 %v3419_v38  ;;  %v3510_v37 = vld [vmem:[%s4644_s1 + $0x750] ss:$8 sps:$4 sm:$0xff]   ;;  %v3515_v38 = vld [vmem:[%s4644_s1 + $0x364] ss:$8 sps:$4 sm:$0xff]  }
  0xa2   : > { %2410 = vmatprep.subr.bf16.mxu0 %v3422_v39  ;;  %v3518_v39 = vld [vmem:[%s4644_s1 + $0x764] ss:$8 sps:$4 sm:$0xff]  }
  0xa4   : > { %2239 = vmatpush1.bf16.msra.mxu1 %v3417_v40  ;;  %v3513_v40 = vld [vmem:[%s4644_s1 + $0x360] ss:$8 sps:$4 sm:$0xff]  }
  0xa5   : > { %2411 = vmatpush1.bf16.msra.mxu0 %v3420_v41  ;;  %2240 = vmatprep.subr.bf16.mxu1 %v3425_v42  ;;  %v3516_v41 = vld [vmem:[%s4644_s1 + $0x760] ss:$8 sps:$4 sm:$0xff]   ;;  %v3521_v42 = vld [vmem:[%s4644_s1 + $0x374] ss:$8 sps:$4 sm:$0xff]  }
  0xa6   : > { %2412 = vmatprep.subr.bf16.mxu0 %v3428_v43  ;;  %v3524_v43 = vld [vmem:[%s4644_s1 + $0x774] ss:$8 sps:$4 sm:$0xff]  }
  0xa8   : > { %2241 = vmatpush1.bf16.msra.mxu1 %v3423_v44  ;;  %v3519_v44 = vld [vmem:[%s4644_s1 + $0x370] ss:$8 sps:$4 sm:$0xff]  }
  0xa9   : > { %2413 = vmatpush1.bf16.msra.mxu0 %v3426_v45  ;;  %2242 = vmatprep.subr.bf16.mxu1 %v3431_v46  ;;  %v3522_v45 = vld [vmem:[%s4644_s1 + $0x770] ss:$8 sps:$4 sm:$0xff]   ;;  %v3527_v46 = vld [vmem:[%s4644_s1 + $0x384] ss:$8 sps:$4 sm:$0xff]  }
  0xaa   : > { %2414 = vmatprep.subr.bf16.mxu0 %v3434_v47  ;;  %v3530_v47 = vld [vmem:[%s4644_s1 + $0x784] ss:$8 sps:$4 sm:$0xff]  }
  0xac   : > { %2243 = vmatpush1.bf16.msra.mxu1 %v3429_v48  ;;  %v3525_v48 = vld [vmem:[%s4644_s1 + $0x380] ss:$8 sps:$4 sm:$0xff]  }
  0xad   : > { %2415 = vmatpush1.bf16.msra.mxu0 %v3432_v49  ;;  %2244 = vmatprep.subr.bf16.mxu1 %v3437_v50  ;;  %v3528_v49 = vld [vmem:[%s4644_s1 + $0x780] ss:$8 sps:$4 sm:$0xff]   ;;  %v3533_v50 = vld [vmem:[%s4644_s1 + $0x394] ss:$8 sps:$4 sm:$0xff]  }
  0xae   : > { %2416 = vmatprep.subr.bf16.mxu0 %v3440_v51  ;;  %v3536_v51 = vld [vmem:[%s4644_s1 + $0x794] ss:$8 sps:$4 sm:$0xff]  }
  0xb0   : > { %2245 = vmatpush1.bf16.msra.mxu1 %v3435_v52  ;;  %v3531_v52 = vld [vmem:[%s4644_s1 + $0x390] ss:$8 sps:$4 sm:$0xff]  }
  0xb1   : > { %2417 = vmatpush1.bf16.msra.mxu0 %v3438_v53  ;;  %2246 = vmatprep.subr.bf16.mxu1 %v3443_v54  ;;  %v3534_v53 = vld [vmem:[%s4644_s1 + $0x790] ss:$8 sps:$4 sm:$0xff]   ;;  %v3539_v54 = vld [vmem:[%s4644_s1 + $0x3a4] ss:$8 sps:$4 sm:$0xff]  }
  0xb2   : > { %2418 = vmatprep.subr.bf16.mxu0 %v3446_v55  ;;  %v3542_v55 = vld [vmem:[%s4644_s1 + $0x7a4] ss:$8 sps:$4 sm:$0xff]  }
  0xb4   : > { %2247 = vmatpush1.bf16.msra.mxu1 %v3441_v56  ;;  %v3537_v56 = vld [vmem:[%s4644_s1 + $0x3a0] ss:$8 sps:$4 sm:$0xff]  }
  0xb5   : > { %2419 = vmatpush1.bf16.msra.mxu0 %v3444_v57  ;;  %2248 = vmatprep.subr.bf16.mxu1 %v3449_v58  ;;  %v3540_v57 = vld [vmem:[%s4644_s1 + $0x7a0] ss:$8 sps:$4 sm:$0xff]   ;;  %v3545_v58 = vld [vmem:[%s4644_s1 + $0x3b4] ss:$8 sps:$4 sm:$0xff]  }
  0xb6   : > { %2420 = vmatprep.subr.bf16.mxu0 %v3452_v59  ;;  %v3548_v59 = vld [vmem:[%s4644_s1 + $0x7b4] ss:$8 sps:$4 sm:$0xff]  }
  0xb8   : > { %2249 = vmatpush1.bf16.msra.mxu1 %v3447_v60  ;;  %v3543_v60 = vld [vmem:[%s4644_s1 + $0x3b0] ss:$8 sps:$4 sm:$0xff]  }
  0xb9   : > { %2421 = vmatpush1.bf16.msra.mxu0 %v3450_v61  ;;  %2250 = vmatprep.subr.bf16.mxu1 %v3455_v62  ;;  %v3546_v61 = vld [vmem:[%s4644_s1 + $0x7b0] ss:$8 sps:$4 sm:$0xff]   ;;  %v3551_v62 = vld [vmem:[%s4644_s1 + $0x3c4] ss:$8 sps:$4 sm:$0xff]  }
  0xba   : > { %2422 = vmatprep.subr.bf16.mxu0 %v3458_v63  ;;  %v3554_v63 = vld [vmem:[%s4644_s1 + $0x7c4] ss:$8 sps:$4 sm:$0xff]  }
  0xbc   : > { %2251 = vmatpush1.bf16.msra.mxu1 %v3453_v0  ;;  %v3549_v0 = vld [vmem:[%s4644_s1 + $0x3c0] ss:$8 sps:$4 sm:$0xff]  }
  0xbd   : > { %2423 = vmatpush1.bf16.msra.mxu0 %v3456_v1  ;;  %2252 = vmatprep.subr.bf16.mxu1 %v3461_v2  ;;  %v3552_v1 = vld [vmem:[%s4644_s1 + $0x7c0] ss:$8 sps:$4 sm:$0xff]   ;;  %v3557_v2 = vld [vmem:[%s4644_s1 + $0x3d4] ss:$8 sps:$4 sm:$0xff]  }
  0xbe   : > { %2424 = vmatprep.subr.bf16.mxu0 %v3464_v3  ;;  %v3560_v3 = vld [vmem:[%s4644_s1 + $0x7d4] ss:$8 sps:$4 sm:$0xff]  }
  0xc0   : > { %2253 = vmatpush1.bf16.msra.mxu1 %v3459_v4  ;;  %v3555_v4 = vld [vmem:[%s4644_s1 + $0x3d0] ss:$8 sps:$4 sm:$0xff]  }
  0xc1   : > { %2425 = vmatpush1.bf16.msra.mxu0 %v3462_v5  ;;  %2254 = vmatprep.subr.bf16.mxu1 %v3467_v6  ;;  %v3558_v5 = vld [vmem:[%s4644_s1 + $0x7d0] ss:$8 sps:$4 sm:$0xff]   ;;  %v3563_v6 = vld [vmem:[%s4644_s1 + $0x3e4] ss:$8 sps:$4 sm:$0xff]  }
  0xc2   : > { %2426 = vmatprep.subr.bf16.mxu0 %v3470_v7  ;;  %v3566_v7 = vld [vmem:[%s4644_s1 + $0x7e4] ss:$8 sps:$4 sm:$0xff]  }
  0xc4   : > { %2255 = vmatpush1.bf16.msra.mxu1 %v3465_v8  ;;  %v3561_v8 = vld [vmem:[%s4644_s1 + $0x3e0] ss:$8 sps:$4 sm:$0xff]  }
  0xc5   : > { %2427 = vmatpush1.bf16.msra.mxu0 %v3468_v9  ;;  %2267 = vmatprep.subr.bf16.mxu1 %v3476_v10  ;;  %v3564_v9 = vld [vmem:[%s4644_s1 + $0x7e0] ss:$8 sps:$4 sm:$0xff]   ;;  %v3569_v10 = vld [vmem:[%s4644_s1 + $0x3f4] ss:$8 sps:$4 sm:$0xff]  }
  0xc6   : > { %2439 = vmatprep.subr.bf16.mxu0 %v3482_v11  ;;  %v3572_v11 = vld [vmem:[%s4644_s1 + $0x7f4] ss:$8 sps:$4 sm:$0xff]  }
  0xc7   : > { %2257 = vmatmul.mubr.bf16.vlgmr.msra.gmra.mrb[0].mxu1 %v3471_v12  ;;  %v3567_v12 = vld [vmem:[%s4644_s1 + $0x3f0] ss:$8 sps:$4 sm:$0xff]  }
  0xc8   : > { %2429 = vmatmul.mubr.bf16.vlgmr.msra.gmra.mrb[0].mxu0 %v3477_v14  ;;  %2268 = vmatpush1.bf16.msra.mxu1 %v3474_v13  ;;  %v3570_v13 = vld [vmem:[%s4644_s1 + $0x7f0] ss:$8 sps:$4 sm:$0xff]   ;;  %v3581_v14 = vld [vmem:[%s4644_s1 + $0x804] ss:$8 sps:$4 sm:$0xff]  }
  0xc9   : > { %2440 = vmatpush1.bf16.msra.mxu0 %v3480_v15  ;;  %2269 = vmatprep.subr.bf16.mxu1 %v3485_v16  ;;  %v3573_v15 = vld [vmem:[%s3849_s6 + $0x18] ss:$72 sps:$4 sm:$0xff]  }
  0xca   : > { %2441 = vmatprep.subr.bf16.mxu0 %v3488_v17  ;;  %2299 = vmatprep.mubr.bf16.mxu1 %v3575_v18  ;;  %v3576_v16 = vld [vmem:[%s3849_s6 + $0x38] ss:$72 sps:$4 sm:$0xff]   ;;  %v3629_v18 = vld [vmem:[%s3849_s6 + $0x44] ss:$72 sps:$4 sm:$0xff]  }
  0xcb   : > { %2471 = vmatprep.mubr.bf16.mxu0 %v3578_v19  ;;  %v3579_v17 = vld [vmem:[%s4644_s1 + $0x800] ss:$8 sps:$4 sm:$0xff]   ;;  %v3584_v19 = vld [vmem:[%s4644_s1 + $0x814] ss:$8 sps:$4 sm:$0xff]  }
  0xcc   : > { %2270 = vmatpush1.bf16.msra.mxu1 %v3483_v20  ;;  %v3582_v20 = vld [vmem:[%s4644_s1 + $0x810] ss:$8 sps:$4 sm:$0xff]  }
  0xcd   : > { %2442 = vmatpush1.bf16.msra.mxu0 %v3486_v21  ;;  %2271 = vmatprep.subr.bf16.mxu1 %v3491_v22  ;;  %v3587_v21 = vld [vmem:[%s4644_s1 + $0x824] ss:$8 sps:$4 sm:$0xff]   ;;  %v3585_v22 = vld [vmem:[%s4644_s1 + $0x820] ss:$8 sps:$4 sm:$0xff]  }
  0xce   : > { %2443 = vmatprep.subr.bf16.mxu0 %v3494_v23  ;;  %v3590_v23 = vld [vmem:[%s4644_s1 + $0x834] ss:$8 sps:$4 sm:$0xff]  }
  0xd0   : > { %2272 = vmatpush1.bf16.msra.mxu1 %v3489_v24  ;;  %v3588_v24 = vld [vmem:[%s4644_s1 + $0x830] ss:$8 sps:$4 sm:$0xff]  }
  0xd1   : > { %2444 = vmatpush1.bf16.msra.mxu0 %v3492_v25  ;;  %2273 = vmatprep.subr.bf16.mxu1 %v3497_v26  ;;  %v3593_v25 = vld [vmem:[%s4644_s1 + $0x844] ss:$8 sps:$4 sm:$0xff]   ;;  %v3591_v26 = vld [vmem:[%s4644_s1 + $0x840] ss:$8 sps:$4 sm:$0xff]  }
  0xd2   : > { %2445 = vmatprep.subr.bf16.mxu0 %v3500_v27  ;;  %v3596_v27 = vld [vmem:[%s4644_s1 + $0x854] ss:$8 sps:$4 sm:$0xff]  }
  0xd4   : > { %2274 = vmatpush1.bf16.msra.mxu1 %v3495_v28  ;;  %v3594_v28 = vld [vmem:[%s4644_s1 + $0x850] ss:$8 sps:$4 sm:$0xff]  }
  0xd5   : > { %2446 = vmatpush1.bf16.msra.mxu0 %v3498_v29  ;;  %2275 = vmatprep.subr.bf16.mxu1 %v3503_v30  ;;  %v3599_v29 = vld [vmem:[%s4644_s1 + $0x864] ss:$8 sps:$4 sm:$0xff]   ;;  %v3597_v30 = vld [vmem:[%s4644_s1 + $0x860] ss:$8 sps:$4 sm:$0xff]  }
  0xd6   : > { %2447 = vmatprep.subr.bf16.mxu0 %v3506_v31  ;;  %v3602_v31 = vld [vmem:[%s4644_s1 + $0x874] ss:$8 sps:$4 sm:$0xff]  }
  0xd8   : > { %2276 = vmatpush1.bf16.msra.mxu1 %v3501_v32  ;;  %v3600_v32 = vld [vmem:[%s4644_s1 + $0x870] ss:$8 sps:$4 sm:$0xff]  }
  0xd9   : > { %2448 = vmatpush1.bf16.msra.mxu0 %v3504_v33  ;;  %2277 = vmatprep.subr.bf16.mxu1 %v3509_v34  ;;  %v3605_v33 = vld [vmem:[%s4644_s1 + $0x884] ss:$8 sps:$4 sm:$0xff]   ;;  %v3603_v34 = vld [vmem:[%s4644_s1 + $0x880] ss:$8 sps:$4 sm:$0xff]  }
  0xda   : > { %2449 = vmatprep.subr.bf16.mxu0 %v3512_v35  ;;  %v3608_v35 = vld [vmem:[%s4644_s1 + $0x894] ss:$8 sps:$4 sm:$0xff]  }
  0xdc   : > { %2278 = vmatpush1.bf16.msra.mxu1 %v3507_v36  ;;  %v3606_v36 = vld [vmem:[%s4644_s1 + $0x890] ss:$8 sps:$4 sm:$0xff]  }
  0xdd   : > { %2450 = vmatpush1.bf16.msra.mxu0 %v3510_v37  ;;  %2279 = vmatprep.subr.bf16.mxu1 %v3515_v38  ;;  %v3611_v37 = vld [vmem:[%s4644_s1 + $0x8a4] ss:$8 sps:$4 sm:$0xff]   ;;  %v3609_v38 = vld [vmem:[%s4644_s1 + $0x8a0] ss:$8 sps:$4 sm:$0xff]  }
  0xde   : > { %2451 = vmatprep.subr.bf16.mxu0 %v3518_v39  ;;  %v3614_v39 = vld [vmem:[%s4644_s1 + $0x8b4] ss:$8 sps:$4 sm:$0xff]  }
  0xe0   : > { %2280 = vmatpush1.bf16.msra.mxu1 %v3513_v40  ;;  %v3612_v40 = vld [vmem:[%s4644_s1 + $0x8b0] ss:$8 sps:$4 sm:$0xff]  }
  0xe1   : > { %2452 = vmatpush1.bf16.msra.mxu0 %v3516_v41  ;;  %2281 = vmatprep.subr.bf16.mxu1 %v3521_v42  ;;  %v3617_v41 = vld [vmem:[%s4644_s1 + $0x8c4] ss:$8 sps:$4 sm:$0xff]   ;;  %v3615_v42 = vld [vmem:[%s4644_s1 + $0x8c0] ss:$8 sps:$4 sm:$0xff]  }
  0xe2   : > { %2453 = vmatprep.subr.bf16.mxu0 %v3524_v43  ;;  %v3620_v43 = vld [vmem:[%s4644_s1 + $0x8d4] ss:$8 sps:$4 sm:$0xff]  }
  0xe4   : > { %2282 = vmatpush1.bf16.msra.mxu1 %v3519_v44  ;;  %v3618_v44 = vld [vmem:[%s4644_s1 + $0x8d0] ss:$8 sps:$4 sm:$0xff]  }
  0xe5   : > { %2454 = vmatpush1.bf16.msra.mxu0 %v3522_v45  ;;  %2283 = vmatprep.subr.bf16.mxu1 %v3527_v46  ;;  %v3623_v45 = vld [vmem:[%s4644_s1 + $0x8e4] ss:$8 sps:$4 sm:$0xff]   ;;  %v3621_v46 = vld [vmem:[%s4644_s1 + $0x8e0] ss:$8 sps:$4 sm:$0xff]  }
  0xe6   : > { %2455 = vmatprep.subr.bf16.mxu0 %v3530_v47  ;;  %v3626_v47 = vld [vmem:[%s4644_s1 + $0x8f4] ss:$8 sps:$4 sm:$0xff]  }
  0xe8   : > { %2284 = vmatpush1.bf16.msra.mxu1 %v3525_v48  ;;  %v3624_v48 = vld [vmem:[%s4644_s1 + $0x8f0] ss:$8 sps:$4 sm:$0xff]  }
  0xe9   : > { %2456 = vmatpush1.bf16.msra.mxu0 %v3528_v49  ;;  %2285 = vmatprep.subr.bf16.mxu1 %v3533_v50  ;;  %v3627_v49 = vld [vmem:[%s3849_s6 + $0x40] ss:$72 sps:$4 sm:$0xff]   ;;  %v598_v50 = vlaneseq }
  0xea   : > { %2457 = vmatprep.subr.bf16.mxu0 %v3536_v51 }
  0xeb   : > { %vm4609_vm0 = vcmp.lt.s32.totalorder %v598_v50, 256 }
  0xec   : > { %2286 = vmatpush1.bf16.msra.mxu1 %v3531_v52  ;;  %v3654_v52 = vmov 0.0  }
  0xed   : > { %2458 = vmatpush1.bf16.msra.mxu0 %v3534_v53  ;;  %2287 = vmatprep.subr.bf16.mxu1 %v3539_v54  ;;  %2547 = vst.msk [vmem:[%s4602_s16] sm:$0x3] %vm4609_vm0, %v3654_v52  ;;  %2548 = vst.msk [vmem:[%s4607_s23] sm:$0x3] %vm4609_vm0, %v3654_v52 }
  0xee   : > { %2459 = vmatprep.subr.bf16.mxu0 %v3542_v55 }
  0xf0   : > { %2288 = vmatpush1.bf16.msra.mxu1 %v3537_v56 }
  0xf1   : > { %2460 = vmatpush1.bf16.msra.mxu0 %v3540_v57  ;;  %2289 = vmatprep.subr.bf16.mxu1 %v3545_v58  ;;  %v599_v57 = vshrl.u32 %v598_v50, 7 }
  0xf2   : > { %2461 = vmatprep.subr.bf16.mxu0 %v3548_v59  ;;  %v596_v59 = vld [vmem:[%s4645_s2] sm:$0x3] }
  0xf3   : > { %v600_v58 = vsub.s32 0, %v599_v57 }
  0xf4   : > { %2290 = vmatpush1.bf16.msra.mxu1 %v3543_v60  ;;  %v604_v60 = vsub.s32 1, %v599_v57 }
  0xf5   : > { %2462 = vmatpush1.bf16.msra.mxu0 %v3546_v61  ;;  %2291 = vmatprep.subr.bf16.mxu1 %v3551_v62  ;;  %v601_v61 = vrot.slane %v596_v59, %v600_v58 }
  0xf6   : > { %2463 = vmatprep.subr.bf16.mxu0 %v3554_v63  ;;  %v605_v62 = vrot.slane %v596_v59, %v604_v60 }
  0xf8   : > { %2292 = vmatpush1.bf16.msra.mxu1 %v3549_v0 }
  0xf9   : > { %2464 = vmatpush1.bf16.msra.mxu0 %v3552_v1  ;;  %2293 = vmatprep.subr.bf16.mxu1 %v3557_v2 }
  0xfa   : > { %2465 = vmatprep.subr.bf16.mxu0 %v3560_v3 }
  0xfc   : > { %2294 = vmatpush1.bf16.msra.mxu1 %v3555_v4 }
  0xfd   : > { %2466 = vmatpush1.bf16.msra.mxu0 %v3558_v5  ;;  %2295 = vmatprep.subr.bf16.mxu1 %v3563_v6 }
  0xfe   : > { %2467 = vmatprep.subr.bf16.mxu0 %v3566_v7 }
 0x100   : > { %2296 = vmatpush1.bf16.msra.mxu1 %v3561_v8 }
 0x101   : > { %2468 = vmatpush1.bf16.msra.mxu0 %v3564_v9  ;;  %2297 = vmatprep.subr.bf16.mxu1 %v3569_v10 }
 0x102   : > { %2469 = vmatprep.subr.bf16.mxu0 %v3572_v11 }
 0x104   : > { %2298 = vmatpush1.bf16.msra.mxu1 %v3567_v12 }
 0x105   : > { %2470 = vmatpush1.bf16.msra.mxu0 %v3570_v13 }
 0x106   : > { %2482 = vmatprep.subr.bf16.mxu0 %v3581_v14 }
 0x107   : > { %2300 = vmatmul.mubr.bf16.vlgmr.msra.gmra.mrb[0].mxu1 %v3573_v15 }
 0x108   : > { %2472 = vmatmul.mubr.bf16.vlgmr.msra.gmra.mrb[0].mxu0 %v3576_v16 }
 0x109   : > { %2483 = vmatpush1.bf16.msra.mxu0 %v3579_v17  ;;  %2514 = vmatprep.mubr.bf16.mxu0 %v3629_v18 }
 0x10a   : > { %2484 = vmatprep.subr.bf16.mxu0 %v3584_v19 }
 0x10d   : > { %2485 = vmatpush1.bf16.msra.mxu0 %v3582_v20 }
 0x10e   : > { %2486 = vmatprep.subr.bf16.mxu0 %v3587_v21 }
 0x111   : > { %2487 = vmatpush1.bf16.msra.mxu0 %v3585_v22 }
 0x112   : > { %2488 = vmatprep.subr.bf16.mxu0 %v3590_v23 }
 0x115   : > { %2489 = vmatpush1.bf16.msra.mxu0 %v3588_v24 }
 0x116   : > { %2490 = vmatprep.subr.bf16.mxu0 %v3593_v25  ;;  %v3655_v25 = vmov 1966171168  }
 0x119   : > { %2491 = vmatpush1.bf16.msra.mxu0 %v3591_v26  ;;  %v2568_v26 = vunpack.c.l.s4 %v3655_v25 }
 0x11a   : > { %2492 = vmatprep.subr.bf16.mxu0 %v3596_v27 }
 0x11d   : > { %2493 = vmatpush1.bf16.msra.mxu0 %v3594_v28 }
 0x11e   : > { %2494 = vmatprep.subr.bf16.mxu0 %v3599_v29 }
 0x121   : > { %2495 = vmatpush1.bf16.msra.mxu0 %v3597_v30 }
 0x122   : > { %2496 = vmatprep.subr.bf16.mxu0 %v3602_v31 }
 0x125   : > { %2497 = vmatpush1.bf16.msra.mxu0 %v3600_v32 }
 0x126   : > { %2498 = vmatprep.subr.bf16.mxu0 %v3605_v33 }
 0x129   : > { %2499 = vmatpush1.bf16.msra.mxu0 %v3603_v34 }
 0x12a   : > { %2500 = vmatprep.subr.bf16.mxu0 %v3608_v35  ;;  %v2569_v35 = vunpack.c.0.s8 %v2568_v26 }
 0x12d   : > { %2501 = vmatpush1.bf16.msra.mxu0 %v3606_v36 }
 0x12e   : > { %2502 = vmatprep.subr.bf16.mxu0 %v3611_v37 }
 0x131   : > { %2503 = vmatpush1.bf16.msra.mxu0 %v3609_v38 }
 0x132   : > { %2504 = vmatprep.subr.bf16.mxu0 %v3614_v39 }
 0x135   : > { %2505 = vmatpush1.bf16.msra.mxu0 %v3612_v40 }
 0x136   : > { %2506 = vmatprep.subr.bf16.mxu0 %v3617_v41 }
 0x139   : > { %2507 = vmatpush1.bf16.msra.mxu0 %v3615_v42 }
 0x13a   : > { %2508 = vmatprep.subr.bf16.mxu0 %v3620_v43 }
 0x13d   : > { %2509 = vmatpush1.bf16.msra.mxu0 %v3618_v44  ;;  %v2572_v44 = vsub.s32 %v2569_v35, %v599_v57 }
 0x13e   : > { %2510 = vmatprep.subr.bf16.mxu0 %v3623_v45 }
 0x141   : > { %2511 = vmatpush1.bf16.msra.mxu0 %v3621_v46 }
 0x142   : > { %2512 = vmatprep.subr.bf16.mxu0 %v3626_v47 }
 0x145   : > { %2513 = vmatpush1.bf16.msra.mxu0 %v3624_v48 }
 0x148   : > { %2515 = vmatmul.mubr.bf16.vlgmr.msra.gmra.mrb[0].mxu0 %v3627_v49 }
 0x1da   : > { %v2301_v53 = vpop.f32.mrb[0].mxu1 }
 0x1db   : > { %v2303_v54 = vpop.f32.mrb[1].mxu1  ;;  %v3108_v63 = vadd.f32 %v2301_v53, %v601_v61  ;;  %v2549_v53 = vld [vmem:[%s4602_s16] sm:$0x3] }
 0x1dc   : > { %v2305_v55 = vpop.f32.mrb[2].mxu1  ;;  %v3110_v0 = vadd.f32 %v2303_v54, %v605_v62 }
 0x1dd   : > { %v2307_v56 = vpop.f32.mrb[3].mxu1  ;;  %v3112_v2 = vadd.f32 %v2305_v55, %v601_v61 }
 0x1de   : > { %v3114_v5 = vadd.f32 %v2307_v56, %v605_v62  ;;  %v2588_v56 = vld [vmem:[%s4607_s23] sm:$0x3] }
 0x21b   : > { %v2516_v1 = vpop.f32.mrb[0].mxu0 }
 0x21c   : > { %v3109_v3 = vadd.f32 %v3108_v63, %v2516_v1  ;;  %v2518_v4 = vpop.f32.mrb[1].mxu0 }
 0x21d   : > { %v3111_v6 = vadd.f32 %v3110_v0, %v2518_v4  ;;  %v2520_v7 = vpop.f32.mrb[2].mxu0 }
 0x21e   : > { %v3113_v8 = vadd.f32 %v3112_v2, %v2520_v7  ;;  %v2522_v9 = vpop.f32.mrb[3].mxu0  ;;  %v2589_v12 = vmul.f32 %v3109_v3, %v3109_v3 }
 0x21f   : > { %v3106_v10 = vpack.c.bf16 %v3111_v6, %v3109_v3  ;;  %v3115_v11 = vadd.f32 %v3114_v5, %v2522_v9  ;;  %v2590_v15 = vmul.f32 %v3111_v6, %v3111_v6 }
 0x220   : > { %v2550_v13 = vadd.f32 %v3113_v8, %v3109_v3  ;;  %v2591_v14 = vmul.f32 %v3113_v8, %v3113_v8 }
 0x221   : > { %2537 = vst [vmem:[%s280_s28] sm:$0xff] %v3106_v10  ;;  %v3107_v16 = vpack.c.bf16 %v3115_v11, %v3113_v8  ;;  %v2557_v17 = vadd.f32 %v3115_v11, %v3111_v6  ;;  %v2592_v18 = vmul.f32 %v3115_v11, %v3115_v11 }
 0x222   : > { %v2551_v19 = vrot.slane %v2550_v13, 4  ;;  %v2593_v20 = vadd.f32 %v2591_v14, %v2589_v12 }
 0x223   : > { %2538 = vst [vmem:[%s280_s28 + $0x8] sm:$0xff] %v3107_v16  ;;  %v2558_v21 = vrot.slane %v2557_v17, 4  ;;  %v2600_v22 = vadd.f32 %v2592_v18, %v2590_v15 }
 0x224   : > { %v2552_v23 = vadd.f32 %v2551_v19, %v2550_v13  ;;  %v2594_v24 = vrot.slane %v2593_v20, 4 }
 0x225   : > { %v2559_v27 = vadd.f32 %v2558_v21, %v2557_v17  ;;  %v2601_v28 = vrot.slane %v2600_v22, 4 }
 0x226   : > { %v2553_v29 = vrot.slane %v2552_v23, 2  ;;  %v2595_v30 = vadd.f32 %v2594_v24, %v2593_v20 }
 0x227   : > { %v2560_v31 = vrot.slane %v2559_v27, 2  ;;  %v2602_v32 = vadd.f32 %v2601_v28, %v2600_v22 }
 0x228   : > { %v2554_v33 = vadd.f32 %v2553_v29, %v2552_v23  ;;  %v2596_v34 = vrot.slane %v2595_v30, 2 }
 0x229   : > { %v2561_v36 = vadd.f32 %v2560_v31, %v2559_v27  ;;  %v2603_v37 = vrot.slane %v2602_v32, 2 }
 0x22a   : > { %v2555_v38 = vrot.slane %v2554_v33, 1  ;;  %v2597_v39 = vadd.f32 %v2596_v34, %v2595_v30 }
 0x22b   : > { %v2562_v40 = vrot.slane %v2561_v36, 1  ;;  %v2604_v41 = vadd.f32 %v2603_v37, %v2602_v32 }
 0x22c   : > { %v2556_v42 = vadd.f32 %v2555_v38, %v2554_v33  ;;  %v2598_v43 = vrot.slane %v2597_v39, 1 }
 0x22d   : > { %v2563_v45 = vadd.f32 %v2562_v40, %v2561_v36  ;;  %v2605_v46 = vrot.slane %v2604_v41, 1 }
 0x22e   : > { %v2599_v47 = vadd.f32 %v2598_v43, %v2597_v39 }
 0x22f   : > { %v2566_v48 = vcombine.low %v2556_v42, %v2563_v45  ;;  %v2606_v49 = vadd.f32 %v2605_v46, %v2604_v41 }
 0x231   : > { %v2573_v50 = vrot.slane %v2566_v48, %v2572_v44  ;;  %v2609_v52 = vcombine.low %v2599_v47, %v2606_v49 }
 0x233   : > { %v2580_v54 = vrot.slane %v2573_v50, %v2572_v44  ;;  %v2616_v55 = vrot.slane %v2609_v52, %v2572_v44 }
 0x235   : > { %v2582_v58 = vadd.f32 %v2580_v54, %v2549_v53  ;;  %v2623_v59 = vrot.slane %v2616_v55, %v2572_v44 }
 0x237   : > { %2587 = vst.msk [vmem:[%s4602_s16] sm:$0x3] %vm4609_vm0, %v2582_v58  ;;  %v2625_v60 = vadd.f32 %v2623_v59, %v2588_v56 }
 0x239   : > { %2626 = vst.msk [vmem:[%s4607_s23] sm:$0x3] %vm4609_vm0, %v2625_v60 }
 0x23a PF: > { %s16_s20 = sadd.s32 1, %s3652_s20   ;;  %s4651_s18 = smov %s3648_s19 }
 0x23b   : > { %p13_p5 = scmp.ge.s32.totalorder %s16_s20, 4   ;;  %s4652_s19 = smov %s4654_s21 }
 0x23d   :  { %15 = sbr.rel (!%p13_p5) target bundleno = 2 (0x2), region = 90 }

// kernel: _lambda_.70
= control target key start
LH: loop header
LB: loop body
LE: loop exit
PB: predicated region body
PF: predicated region fallthrough
CT: control target
= control target key end

     0   :  { %s1053_s18 = smov 0   ;;  %s1055_s19 = smov 0   ;;  %s1211_s0 = inlined_call_operand.vmem [shape: bf16[2,16,512], index: 0, kind: input, shape index: {}]   ;;  %s1212_s1 = inlined_call_operand.vmem [shape: bf16[512,128], index: 1, kind: input, shape index: {}]   ;;  %s1213_s2 = inlined_call_operand.vmem [shape: f32[1,128], index: 2, kind: input, shape index: {}]   ;;  %s1214_s3 = inlined_call_operand.vmem [shape: bf16[2,16,128], index: 3, kind: output, shape index: {0}]   ;;  %s1215_s4 = inlined_call_operand.vmem [shape: f32[2,1,128], index: 4, kind: output, shape index: {1}]   ;;  %s1216_s5 = inlined_call_operand.vmem [shape: f32[2,1,128], index: 5, kind: output, shape index: {2}]  }
   0x1   :  { %s1057_s20 = smov 0  }
   0x2 LB: > { %s28_s21 = sadd.s32 1, %s1016_s19  ;;  %p836_p0 = scmp.ge.s32.totalorder %s1020_s20, 1  ;;  %s1020_s20 = sphi %s1057_s20, %s16_s20   ;;  %s1016_s19 = sphi %s1055_s19, %s1218_s19   ;;  %s1012_s18 = sphi %s1053_s18, %s1217_s18  }
   0x3   : > { %p30_p1 = scmp.ge.s32.totalorder %s28_s21, 2  ;;  %p214_p2 = scmp.lt.s32.totalorder %s1020_s20, 3 }
   0x5   : > { %s1220_s21 = smov (%p30_p1, %s28_s21), 0  ;;  %p215_p3 = pnand %p836_p0, %p214_p2 }
   0x6   : > { %v960_v0 = vld [vmem:[%s1212_s1 + $0x40] sm:$0xff] (!%p215_p3)   ;;  %v964_v4 = vld [vmem:[%s1212_s1 + $0x48] sm:$0xff] (!%p215_p3)   ;;  %v968_v8 = vld [vmem:[%s1212_s1 + $0x50] sm:$0xff] (!%p215_p3)   ;;  %p258_p4 = scmp.lt.s32.totalorder (!%p215_p3), %s1012_s18, 1  ;;  %v1022_v36 = vmov (!%p215_p3), 0.0  }
   0x7   : > { %218 = sbr.rel (%p215_p3) target bundleno = 280 (0x118), region = 32  ;;  %v961_v1 = vld [vmem:[%s1212_s1 + $0xc0] sm:$0xff] (!%p215_p3)   ;;  %891 = vmatprep.subr.bf16.mxu0 (!%p215_p3), %v960_v0  ;;  %v965_v5 = vld [vmem:[%s1212_s1 + $0xc8] sm:$0xff] (!%p215_p3)   ;;  %v969_v9 = vld [vmem:[%s1212_s1 + $0xd0] sm:$0xff] (!%p215_p3)  }
   0x8   : > { %v962_v2 = vld [vmem:[%s1212_s1] sm:$0xff] (!%p215_p3)   ;;  %913 = vmatprep.subr.bf16.mxu1 (!%p215_p3), %v961_v1  ;;  %v966_v6 = vld [vmem:[%s1212_s1 + $0x8] sm:$0xff] (!%p215_p3)   ;;  %v970_v10 = vld [vmem:[%s1212_s1 + $0x10] sm:$0xff] (!%p215_p3)  }
   0x9   : > { %v963_v3 = vld [vmem:[%s1212_s1 + $0x80] sm:$0xff] (!%p215_p3)   ;;  %892 = vmatpush3.bf16.msra.mxu0 (!%p215_p3), %v962_v2  ;;  %v967_v7 = vld [vmem:[%s1212_s1 + $0x88] sm:$0xff] (!%p215_p3)   ;;  %v971_v11 = vld [vmem:[%s1212_s1 + $0x90] sm:$0xff] (!%p215_p3)  }
   0xa   : > { %914 = vmatpush3.bf16.msra.mxu1 (!%p215_p3), %v963_v3  ;;  %893 = vmatprep.subr.bf16.mxu0 (!%p215_p3), %v964_v4  ;;  %v972_v12 = vld [vmem:[%s1212_s1 + $0x58] sm:$0xff] (!%p215_p3)   ;;  %v976_v16 = vld [vmem:[%s1212_s1 + $0x60] sm:$0xff] (!%p215_p3)   ;;  %v980_v20 = vld [vmem:[%s1212_s1 + $0x68] sm:$0xff] (!%p215_p3)  }
   0xb   : > { %915 = vmatprep.subr.bf16.mxu1 (!%p215_p3), %v965_v5  ;;  %v973_v13 = vld [vmem:[%s1212_s1 + $0xd8] sm:$0xff] (!%p215_p3)   ;;  %v977_v17 = vld [vmem:[%s1212_s1 + $0xe0] sm:$0xff] (!%p215_p3)   ;;  %v981_v21 = vld [vmem:[%s1212_s1 + $0xe8] sm:$0xff] (!%p215_p3)  }
   0xc   : > { %v974_v14 = vld [vmem:[%s1212_s1 + $0x18] sm:$0xff] (!%p215_p3)   ;;  %v978_v18 = vld [vmem:[%s1212_s1 + $0x20] sm:$0xff] (!%p215_p3)   ;;  %v982_v22 = vld [vmem:[%s1212_s1 + $0x28] sm:$0xff] (!%p215_p3)  }
   0xd   : > { %894 = vmatpush3.bf16.msra.mxu0 (!%p215_p3), %v966_v6  ;;  %v975_v15 = vld [vmem:[%s1212_s1 + $0x98] sm:$0xff] (!%p215_p3)   ;;  %v979_v19 = vld [vmem:[%s1212_s1 + $0xa0] sm:$0xff] (!%p215_p3)   ;;  %v983_v23 = vld [vmem:[%s1212_s1 + $0xa8] sm:$0xff] (!%p215_p3)  }
   0xe   : > { %916 = vmatpush3.bf16.msra.mxu1 %v967_v7  ;;  %895 = vmatprep.subr.bf16.mxu0 %v968_v8  ;;  %s1222_s18 = smov (!%p258_p4, %s1012_s18), 1  ;;  %v984_v24 = vld [vmem:[%s1212_s1 + $0x70] sm:$0xff]   ;;  %v988_v28 = vld [vmem:[%s1212_s1 + $0x78] sm:$0xff]   ;;  %v841_v39 = vld [vmem:[%s1213_s2] ss:$0 sm:$0xff] }
   0xf   : > { %917 = vmatprep.subr.bf16.mxu1 %v969_v9  ;;  %v985_v25 = vld [vmem:[%s1212_s1 + $0xf0] sm:$0xff]   ;;  %s882_s9 = sshll.u32 %s1222_s18, 5  ;;  %v989_v29 = vld [vmem:[%s1212_s1 + $0xf8] sm:$0xff]   ;;  %s1181_s29 = scalar_lea.vmem %s1215_s4, %s1222_s18 }
  0x10   : > { %v986_v26 = vld [vmem:[%s1212_s1 + $0x30] sm:$0xff]   ;;  %s266_s22 = scalar_lea.vmem %s1211_s0, %s882_s9  ;;  %v990_v30 = vld [vmem:[%s1212_s1 + $0x38] sm:$0xff]   ;;  %s1187_s7 = scalar_lea.vmem %s1216_s5, %s1222_s18  ;;  %668 = vst [vmem:[%s1181_s29] sm:$0x1] %v1022_v36 }
  0x11   : > { %896 = vmatpush3.bf16.msra.mxu0 %v970_v10  ;;  %v987_v27 = vld [vmem:[%s1212_s1 + $0xb0] sm:$0xff]   ;;  %v991_v31 = vld [vmem:[%s1212_s1 + $0xb8] sm:$0xff]   ;;  %669 = vst [vmem:[%s1187_s7] sm:$0x1] %v1022_v36  ;;  %s883_s10 = sshll.u32 %s1222_s18, 3 }
  0x12   : > { %918 = vmatpush3.bf16.msra.mxu1 %v971_v11  ;;  %897 = vmatprep.subr.bf16.mxu0 %v972_v12  ;;  %v992_v32 = vld [vmem:[%s266_s22] ss:$16 sps:$4 sm:$0xff]   ;;  %v994_v33 = vld [vmem:[%s266_s22 + $0x4] ss:$16 sps:$4 sm:$0xff]   ;;  %v995_v34 = vld [vmem:[%s266_s22 + $0x8] ss:$16 sps:$4 sm:$0xff]   ;;  %s276_s13 = scalar_lea.vmem %s1214_s3, %s883_s10 }
  0x13   : > { %919 = vmatprep.subr.bf16.mxu1 %v973_v13  ;;  %v997_v35 = vld [vmem:[%s266_s22 + $0xc] ss:$16 sps:$4 sm:$0xff]   ;;  %604 = vmatprep.mubr.bf16.mxu0 %v994_v33 }
  0x14   : > { %645 = vmatprep.mubr.bf16.mxu1 %v997_v35 }
  0x15   : > { %898 = vmatpush3.bf16.msra.mxu0 %v974_v14 }
  0x16   : > { %920 = vmatpush3.bf16.msra.mxu1 %v975_v15  ;;  %899 = vmatprep.subr.bf16.mxu0 %v976_v16 }
  0x17   : > { %921 = vmatprep.subr.bf16.mxu1 %v977_v17  ;;  %v670_v4 = vld [vmem:[%s1181_s29] sm:$0x1] }
  0x18   : > { %v680_v7 = vld [vmem:[%s1187_s7] sm:$0x1] }
  0x19   : > { %900 = vmatpush3.bf16.msra.mxu0 %v978_v18 }
  0x1a   : > { %922 = vmatpush3.bf16.msra.mxu1 %v979_v19  ;;  %901 = vmatprep.subr.bf16.mxu0 %v980_v20 }
  0x1b   : > { %923 = vmatprep.subr.bf16.mxu1 %v981_v21 }
  0x1d   : > { %902 = vmatpush3.bf16.msra.mxu0 %v982_v22 }
  0x1e   : > { %924 = vmatpush3.bf16.msra.mxu1 %v983_v23  ;;  %903 = vmatprep.subr.bf16.mxu0 %v984_v24 }
  0x1f   : > { %925 = vmatprep.subr.bf16.mxu1 %v985_v25 }
  0x21   : > { %904 = vmatpush3.bf16.msra.mxu0 %v986_v26 }
  0x22   : > { %926 = vmatpush3.bf16.msra.mxu1 %v987_v27  ;;  %905 = vmatprep.subr.bf16.mxu0 %v988_v28 }
  0x23   : > { %927 = vmatprep.subr.bf16.mxu1 %v989_v29 }
  0x25   : > { %906 = vmatpush3.bf16.msra.mxu0 %v990_v30 }
  0x26   : > { %928 = vmatpush3.bf16.msra.mxu1 %v991_v31 }
  0x28   : > { %605 = vmatmul.mubr.bf16.vlgmr.msra.gmra.mrb[0].mxu0 %v992_v32 }
  0x29   : > { %646 = vmatmul.mubr.bf16.vlgmr.msra.gmra.mrb[0].mxu1 %v995_v34 }
  0xfb   : > { %v907_v37 = vpop.f32.mrb[0].mxu0 }
  0xfc   : > { %v929_v38 = vpop.f32.mrb[0].mxu1  ;;  %v908_v40 = vpop.f32.mrb[1].mxu0 }
  0xfd   : > { %v909_v41 = vadd.f32 %v908_v40, %v907_v37  ;;  %v930_v42 = vpop.f32.mrb[1].mxu1  ;;  %v910_v43 = vpop.f32.mrb[2].mxu0 }
  0xfe   : > { %v931_v44 = vadd.f32 %v930_v42, %v929_v38  ;;  %v932_v45 = vpop.f32.mrb[2].mxu1  ;;  %v911_v46 = vpop.f32.mrb[3].mxu0 }
  0xff   : > { %v607_v47 = vadd.f32 %v909_v41, %v841_v39  ;;  %v912_v48 = vadd.f32 %v911_v46, %v910_v43  ;;  %v933_v49 = vpop.f32.mrb[3].mxu1 }
 0x100   : > { %v934_v50 = vadd.f32 %v933_v49, %v932_v45 }
 0x101   : > { %v648_v51 = vadd.f32 %v931_v44, %v607_v47  ;;  %v610_v52 = vadd.f32 %v912_v48, %v841_v39 }
 0x103   : > { %v651_v53 = vadd.f32 %v934_v50, %v610_v52  ;;  %v681_v54 = vmul.f32 %v648_v51, %v648_v51 }
 0x105   : > { %v889_v55 = vpack.c.bf16 %v651_v53, %v648_v51  ;;  %v671_v56 = vadd.f32 %v651_v53, %v648_v51  ;;  %v682_v57 = vmul.f32 %v651_v53, %v651_v53 }
 0x107   : > { %890 = vst [vmem:[%s276_s13] sm:$0xff] %v889_v55   ;;  %v672_v58 = vrot.slane %v671_v56, 4  ;;  %v683_v59 = vadd.f32 %v682_v57, %v681_v54 }
 0x109   : > { %v673_v60 = vadd.f32 %v672_v58, %v671_v56  ;;  %v684_v61 = vrot.slane %v683_v59, 4 }
 0x10b   : > { %v674_v62 = vrot.slane %v673_v60, 2  ;;  %v685_v63 = vadd.f32 %v684_v61, %v683_v59 }
 0x10d   : > { %v675_v0 = vadd.f32 %v674_v62, %v673_v60  ;;  %v686_v1 = vrot.slane %v685_v63, 2 }
 0x10f   : > { %v676_v2 = vrot.slane %v675_v0, 1  ;;  %v687_v3 = vadd.f32 %v686_v1, %v685_v63 }
 0x111   : > { %v677_v5 = vadd.f32 %v676_v2, %v675_v0  ;;  %v688_v6 = vrot.slane %v687_v3, 1 }
 0x113   : > { %v678_v8 = vadd.f32 %v677_v5, %v670_v4  ;;  %v689_v9 = vadd.f32 %v688_v6, %v687_v3 }
 0x115   : > { %679 = vst [vmem:[%s1181_s29] sm:$0x1] %v678_v8  ;;  %v690_v10 = vadd.f32 %v689_v9, %v680_v7 }
 0x117   : > { %691 = vst [vmem:[%s1187_s7] sm:$0x1] %v690_v10 }
 0x118 PF: > { %s16_s20 = sadd.s32 1, %s1020_s20   ;;  %s1217_s18 = smov %s1016_s19 }
 0x119   : > { %p13_p5 = scmp.ge.s32.totalorder %s16_s20, 4   ;;  %s1218_s19 = smov %s1220_s21 }
 0x11b   :  { %15 = sbr.rel (!%p13_p5) target bundleno = 2 (0x2), region = 90 }

// kernel: _lambda_.72
= control target key start
LH: loop header
LB: loop body
LE: loop exit
PB: predicated region body
PF: predicated region fallthrough
CT: control target
= control target key end

     0   :  { %s1521_s18 = smov 0   ;;  %s1523_s19 = smov 0   ;;  %s1785_s0 = inlined_call_operand.vmem [shape: bf16[2,16,1024], index: 0, kind: input, shape index: {}]   ;;  %s1786_s1 = inlined_call_operand.vmem [shape: bf16[1024,128], index: 1, kind: input, shape index: {}]   ;;  %s1787_s2 = inlined_call_operand.vmem [shape: f32[1,128], index: 2, kind: input, shape index: {}]   ;;  %s1788_s3 = inlined_call_operand.vmem [shape: bf16[2,16,128], index: 3, kind: output, shape index: {0}]   ;;  %s1789_s4 = inlined_call_operand.vmem [shape: f32[2,1,128], index: 4, kind: output, shape index: {1}]   ;;  %s1790_s5 = inlined_call_operand.vmem [shape: f32[2,1,128], index: 5, kind: output, shape index: {2}]  }
   0x1   :  { %s1525_s20 = smov 0  }
   0x2 LB: > { %s28_s21 = sadd.s32 1, %s1484_s19  ;;  %p1198_p0 = scmp.ge.s32.totalorder %s1488_s20, 1  ;;  %s1488_s20 = sphi %s1525_s20, %s16_s20   ;;  %s1484_s19 = sphi %s1523_s19, %s1792_s19   ;;  %s1480_s18 = sphi %s1521_s18, %s1791_s18  }
   0x3   : > { %p30_p1 = scmp.ge.s32.totalorder %s28_s21, 2  ;;  %p214_p2 = scmp.lt.s32.totalorder %s1488_s20, 3 }
   0x5   : > { %s1794_s21 = smov (%p30_p1, %s28_s21), 0  ;;  %p215_p3 = pnand %p1198_p0, %p214_p2 }
   0x6   : > { %v1402_v0 = vld [vmem:[%s1786_s1 + $0x40] sm:$0xff] (!%p215_p3)   ;;  %v1406_v4 = vld [vmem:[%s1786_s1 + $0x48] sm:$0xff] (!%p215_p3)   ;;  %v1410_v8 = vld [vmem:[%s1786_s1 + $0x50] sm:$0xff] (!%p215_p3)   ;;  %p258_p4 = scmp.lt.s32.totalorder (!%p215_p3), %s1480_s18, 1 }
   0x7   : > { %218 = sbr.rel (%p215_p3) target bundleno = 312 (0x138), region = 32  ;;  %v1403_v1 = vld [vmem:[%s1786_s1 + $0xc0] sm:$0xff] (!%p215_p3)   ;;  %1289 = vmatprep.subr.bf16.mxu0 (!%p215_p3), %v1402_v0  ;;  %v1407_v5 = vld [vmem:[%s1786_s1 + $0xc8] sm:$0xff] (!%p215_p3)   ;;  %v1411_v9 = vld [vmem:[%s1786_s1 + $0xd0] sm:$0xff] (!%p215_p3)  }
   0x8   : > { %v1404_v2 = vld [vmem:[%s1786_s1] sm:$0xff] (!%p215_p3)   ;;  %1311 = vmatprep.subr.bf16.mxu1 (!%p215_p3), %v1403_v1  ;;  %v1408_v6 = vld [vmem:[%s1786_s1 + $0x8] sm:$0xff] (!%p215_p3)   ;;  %v1412_v10 = vld [vmem:[%s1786_s1 + $0x10] sm:$0xff] (!%p215_p3)  }
   0x9   : > { %v1405_v3 = vld [vmem:[%s1786_s1 + $0x80] sm:$0xff] (!%p215_p3)   ;;  %1290 = vmatpush3.bf16.msra.mxu0 (!%p215_p3), %v1404_v2  ;;  %v1409_v7 = vld [vmem:[%s1786_s1 + $0x88] sm:$0xff] (!%p215_p3)   ;;  %v1413_v11 = vld [vmem:[%s1786_s1 + $0x90] sm:$0xff] (!%p215_p3)  }
   0xa   : > { %1312 = vmatpush3.bf16.msra.mxu1 (!%p215_p3), %v1405_v3  ;;  %1291 = vmatprep.subr.bf16.mxu0 (!%p215_p3), %v1406_v4  ;;  %v1414_v12 = vld [vmem:[%s1786_s1 + $0x58] sm:$0xff] (!%p215_p3)   ;;  %v1418_v16 = vld [vmem:[%s1786_s1 + $0x60] sm:$0xff] (!%p215_p3)   ;;  %v1422_v20 = vld [vmem:[%s1786_s1 + $0x68] sm:$0xff] (!%p215_p3)  }
   0xb   : > { %1313 = vmatprep.subr.bf16.mxu1 (!%p215_p3), %v1407_v5  ;;  %v1415_v13 = vld [vmem:[%s1786_s1 + $0xd8] sm:$0xff] (!%p215_p3)   ;;  %v1419_v17 = vld [vmem:[%s1786_s1 + $0xe0] sm:$0xff] (!%p215_p3)   ;;  %v1423_v21 = vld [vmem:[%s1786_s1 + $0xe8] sm:$0xff] (!%p215_p3)  }
   0xc   : > { %v1416_v14 = vld [vmem:[%s1786_s1 + $0x18] sm:$0xff] (!%p215_p3)   ;;  %v1420_v18 = vld [vmem:[%s1786_s1 + $0x20] sm:$0xff] (!%p215_p3)   ;;  %v1424_v22 = vld [vmem:[%s1786_s1 + $0x28] sm:$0xff] (!%p215_p3)  }
   0xd   : > { %1292 = vmatpush3.bf16.msra.mxu0 (!%p215_p3), %v1408_v6  ;;  %v1417_v15 = vld [vmem:[%s1786_s1 + $0x98] sm:$0xff] (!%p215_p3)   ;;  %v1421_v19 = vld [vmem:[%s1786_s1 + $0xa0] sm:$0xff] (!%p215_p3)   ;;  %v1425_v23 = vld [vmem:[%s1786_s1 + $0xa8] sm:$0xff] (!%p215_p3)  }
   0xe   : > { %1314 = vmatpush3.bf16.msra.mxu1 %v1409_v7  ;;  %1293 = vmatprep.subr.bf16.mxu0 %v1410_v8  ;;  %s1796_s18 = smov (!%p258_p4, %s1480_s18), 1  ;;  %v1426_v24 = vld [vmem:[%s1786_s1 + $0x70] sm:$0xff]   ;;  %v1430_v28 = vld [vmem:[%s1786_s1 + $0x78] sm:$0xff]   ;;  %v1434_v40 = vld [vmem:[%s1786_s1 + $0x140] sm:$0xff]  }
   0xf   : > { %1315 = vmatprep.subr.bf16.mxu1 %v1411_v9  ;;  %v1427_v25 = vld [vmem:[%s1786_s1 + $0xf0] sm:$0xff]   ;;  %s1280_s9 = sshll.u32 %s1796_s18, 6  ;;  %v1431_v29 = vld [vmem:[%s1786_s1 + $0xf8] sm:$0xff]   ;;  %v1435_v41 = vld [vmem:[%s1786_s1 + $0x1c0] sm:$0xff]   ;;  %s1755_s8 = scalar_lea.vmem %s1789_s4, %s1796_s18 }
  0x10   : > { %v1428_v26 = vld [vmem:[%s1786_s1 + $0x30] sm:$0xff]   ;;  %s1639_s22 = scalar_lea.vmem %s1785_s0, %s1280_s9  ;;  %v1432_v30 = vld [vmem:[%s1786_s1 + $0x38] sm:$0xff]   ;;  %v1436_v42 = vld [vmem:[%s1786_s1 + $0x100] sm:$0xff]   ;;  %s1761_s11 = scalar_lea.vmem %s1790_s5, %s1796_s18 }
  0x11   : > { %1294 = vmatpush3.bf16.msra.mxu0 %v1412_v10  ;;  %v1429_v27 = vld [vmem:[%s1786_s1 + $0xb0] sm:$0xff]   ;;  %v1433_v31 = vld [vmem:[%s1786_s1 + $0xb8] sm:$0xff]   ;;  %v285_v32 = vld [vmem:[%s1639_s22] sm:$0xff]  ;;  %s1281_s13 = sshll.u32 %s1796_s18, 3 }
  0x12   : > { %1316 = vmatpush3.bf16.msra.mxu1 %v1413_v11  ;;  %1295 = vmatprep.subr.bf16.mxu0 %v1414_v12  ;;  %v289_v33 = vld [vmem:[%s1639_s22 + $0x20] sm:$0xff]  ;;  %v286_v34 = vld [vmem:[%s1639_s22 + $0x8] sm:$0xff]  ;;  %v1442_v48 = vld [vmem:[%s1786_s1 + $0x150] sm:$0xff]   ;;  %s276_s16 = scalar_lea.vmem %s1788_s3, %s1281_s13 }
  0x13   : > { %1317 = vmatprep.subr.bf16.mxu1 %v1415_v13  ;;  %v1204_v35 = vcombine.low %v285_v32, %v289_v33  ;;  %v1205_v36 = vcombine.high %v285_v32, %v289_v33  ;;  %v290_v37 = vld [vmem:[%s1639_s22 + $0x28] sm:$0xff]  ;;  %v1437_v43 = vld [vmem:[%s1786_s1 + $0x180] sm:$0xff]   ;;  %v1443_v49 = vld [vmem:[%s1786_s1 + $0x1d0] sm:$0xff]  }
  0x14   : > { %v1206_v38 = vcombine.low %v286_v34, %v290_v37  ;;  %v1207_v39 = vcombine.high %v286_v34, %v290_v37  ;;  %v1438_v44 = vld [vmem:[%s1786_s1 + $0x148] sm:$0xff]   ;;  %v1444_v50 = vld [vmem:[%s1786_s1 + $0x110] sm:$0xff]   ;;  %v1446_v52 = vld [vmem:[%s1786_s1 + $0x158] sm:$0xff]  }
  0x15   : > { %1296 = vmatpush3.bf16.msra.mxu0 %v1416_v14  ;;  %884 = vmatprep.mubr.bf16.mxu0 %v1205_v36  ;;  %v1439_v45 = vld [vmem:[%s1786_s1 + $0x1c8] sm:$0xff]   ;;  %v1445_v51 = vld [vmem:[%s1786_s1 + $0x190] sm:$0xff]   ;;  %v1447_v53 = vld [vmem:[%s1786_s1 + $0x1d8] sm:$0xff]  }
  0x16   : > { %1318 = vmatpush3.bf16.msra.mxu1 %v1417_v15  ;;  %1297 = vmatprep.subr.bf16.mxu0 %v1418_v16  ;;  %v1440_v46 = vld [vmem:[%s1786_s1 + $0x108] sm:$0xff]   ;;  %v1448_v54 = vld [vmem:[%s1786_s1 + $0x118] sm:$0xff]   ;;  %v1450_v56 = vld [vmem:[%s1786_s1 + $0x160] sm:$0xff]   ;;  %v1490_v16 = vmov 0.0  }
  0x17   : > { %1319 = vmatprep.subr.bf16.mxu1 %v1419_v17  ;;  %925 = vmatprep.mubr.bf16.mxu1 %v1207_v39  ;;  %v1441_v47 = vld [vmem:[%s1786_s1 + $0x188] sm:$0xff]   ;;  %v1449_v55 = vld [vmem:[%s1786_s1 + $0x198] sm:$0xff]   ;;  %v1451_v57 = vld [vmem:[%s1786_s1 + $0x1e0] sm:$0xff]   ;;  %1030 = vst [vmem:[%s1755_s8] sm:$0x1] %v1490_v16 }
  0x18   : > { %v1452_v58 = vld [vmem:[%s1786_s1 + $0x120] sm:$0xff]   ;;  %v1454_v60 = vld [vmem:[%s1786_s1 + $0x168] sm:$0xff]   ;;  %v1458_v0 = vld [vmem:[%s1786_s1 + $0x170] sm:$0xff]   ;;  %1031 = vst [vmem:[%s1761_s11] sm:$0x1] %v1490_v16 }
  0x19   : > { %1298 = vmatpush3.bf16.msra.mxu0 %v1420_v18  ;;  %v1453_v59 = vld [vmem:[%s1786_s1 + $0x1a0] sm:$0xff]   ;;  %v1455_v61 = vld [vmem:[%s1786_s1 + $0x1e8] sm:$0xff]   ;;  %v1459_v1 = vld [vmem:[%s1786_s1 + $0x1f0] sm:$0xff]  }
  0x1a   : > { %1320 = vmatpush3.bf16.msra.mxu1 %v1421_v19  ;;  %1299 = vmatprep.subr.bf16.mxu0 %v1422_v20  ;;  %v1456_v62 = vld [vmem:[%s1786_s1 + $0x128] sm:$0xff]   ;;  %v1460_v2 = vld [vmem:[%s1786_s1 + $0x130] sm:$0xff]   ;;  %v1462_v4 = vld [vmem:[%s1786_s1 + $0x178] sm:$0xff]  }
  0x1b   : > { %1321 = vmatprep.subr.bf16.mxu1 %v1423_v21  ;;  %v1457_v63 = vld [vmem:[%s1786_s1 + $0x1a8] sm:$0xff]   ;;  %v1461_v3 = vld [vmem:[%s1786_s1 + $0x1b0] sm:$0xff]   ;;  %v1463_v5 = vld [vmem:[%s1786_s1 + $0x1f8] sm:$0xff]  }
  0x1c   : > { %v1464_v6 = vld [vmem:[%s1786_s1 + $0x138] sm:$0xff]   ;;  %v287_v8 = vld [vmem:[%s1639_s22 + $0x10] sm:$0xff]  ;;  %v1203_v19 = vld [vmem:[%s1787_s2] ss:$0 sm:$0xff] }
  0x1d   : > { %1300 = vmatpush3.bf16.msra.mxu0 %v1424_v22  ;;  %v1465_v7 = vld [vmem:[%s1786_s1 + $0x1b8] sm:$0xff]   ;;  %v291_v9 = vld [vmem:[%s1639_s22 + $0x30] sm:$0xff] }
  0x1e   : > { %1322 = vmatpush3.bf16.msra.mxu1 %v1425_v23  ;;  %1301 = vmatprep.subr.bf16.mxu0 %v1426_v24  ;;  %v1208_v10 = vcombine.low %v287_v8, %v291_v9  ;;  %v1209_v11 = vcombine.high %v287_v8, %v291_v9  ;;  %v288_v12 = vld [vmem:[%s1639_s22 + $0x18] sm:$0xff] }
  0x1f   : > { %1323 = vmatprep.subr.bf16.mxu1 %v1427_v25  ;;  %v292_v13 = vld [vmem:[%s1639_s22 + $0x38] sm:$0xff] }
  0x20   : > { %v1210_v14 = vcombine.low %v288_v12, %v292_v13  ;;  %v1211_v15 = vcombine.high %v288_v12, %v292_v13 }
  0x21   : > { %1302 = vmatpush3.bf16.msra.mxu0 %v1428_v26 }
  0x22   : > { %1324 = vmatpush3.bf16.msra.mxu1 %v1429_v27  ;;  %1303 = vmatprep.subr.bf16.mxu0 %v1430_v28 }
  0x23   : > { %1325 = vmatprep.subr.bf16.mxu1 %v1431_v29 }
  0x25   : > { %1304 = vmatpush3.bf16.msra.mxu0 %v1432_v30 }
  0x26   : > { %1326 = vmatpush3.bf16.msra.mxu1 %v1433_v31  ;;  %1333 = vmatprep.subr.bf16.mxu0 %v1434_v40 }
  0x27   : > { %1355 = vmatprep.subr.bf16.mxu1 %v1435_v41 }
  0x28   : > { %885 = vmatmul.mubr.bf16.vlgmr.msra.gmra.mrb[0].mxu0 %v1204_v35 }
  0x29   : > { %926 = vmatmul.mubr.bf16.vlgmr.msra.gmra.mrb[0].mxu1 %v1206_v38  ;;  %1334 = vmatpush3.bf16.msra.mxu0 %v1436_v42 }
  0x2a   : > { %1356 = vmatpush3.bf16.msra.mxu1 %v1437_v43  ;;  %1335 = vmatprep.subr.bf16.mxu0 %v1438_v44 }
  0x2b   : > { %1357 = vmatprep.subr.bf16.mxu1 %v1439_v45  ;;  %966 = vmatprep.mubr.bf16.mxu0 %v1209_v11 }
  0x2c   : > { %1007 = vmatprep.mubr.bf16.mxu1 %v1211_v15 }
  0x2d   : > { %1336 = vmatpush3.bf16.msra.mxu0 %v1440_v46 }
  0x2e   : > { %1358 = vmatpush3.bf16.msra.mxu1 %v1441_v47  ;;  %1337 = vmatprep.subr.bf16.mxu0 %v1442_v48 }
  0x2f   : > { %1359 = vmatprep.subr.bf16.mxu1 %v1443_v49 }
  0x31   : > { %1338 = vmatpush3.bf16.msra.mxu0 %v1444_v50 }
  0x32   : > { %1360 = vmatpush3.bf16.msra.mxu1 %v1445_v51  ;;  %1339 = vmatprep.subr.bf16.mxu0 %v1446_v52 }
  0x33   : > { %1361 = vmatprep.subr.bf16.mxu1 %v1447_v53 }
  0x35   : > { %1340 = vmatpush3.bf16.msra.mxu0 %v1448_v54 }
  0x36   : > { %1362 = vmatpush3.bf16.msra.mxu1 %v1449_v55  ;;  %1341 = vmatprep.subr.bf16.mxu0 %v1450_v56 }
  0x37   : > { %1363 = vmatprep.subr.bf16.mxu1 %v1451_v57 }
  0x39   : > { %1342 = vmatpush3.bf16.msra.mxu0 %v1452_v58 }
  0x3a   : > { %1364 = vmatpush3.bf16.msra.mxu1 %v1453_v59  ;;  %1343 = vmatprep.subr.bf16.mxu0 %v1454_v60 }
  0x3b   : > { %1365 = vmatprep.subr.bf16.mxu1 %v1455_v61 }
  0x3d   : > { %1344 = vmatpush3.bf16.msra.mxu0 %v1456_v62 }
  0x3e   : > { %1366 = vmatpush3.bf16.msra.mxu1 %v1457_v63  ;;  %1345 = vmatprep.subr.bf16.mxu0 %v1458_v0  ;;  %v1032_v0 = vld [vmem:[%s1755_s8] sm:$0x1] }
  0x3f   : > { %1367 = vmatprep.subr.bf16.mxu1 %v1459_v1 }
  0x41   : > { %1346 = vmatpush3.bf16.msra.mxu0 %v1460_v2 }
  0x42   : > { %1368 = vmatpush3.bf16.msra.mxu1 %v1461_v3  ;;  %1347 = vmatprep.subr.bf16.mxu0 %v1462_v4  ;;  %v1042_v3 = vld [vmem:[%s1761_s11] sm:$0x1] }
  0x43   : > { %1369 = vmatprep.subr.bf16.mxu1 %v1463_v5 }
  0x45   : > { %1348 = vmatpush3.bf16.msra.mxu0 %v1464_v6 }
  0x46   : > { %1370 = vmatpush3.bf16.msra.mxu1 %v1465_v7 }
  0x48   : > { %967 = vmatmul.mubr.bf16.vlgmr.msra.gmra.mrb[4].mxu0 %v1208_v10 }
  0x49   : > { %1008 = vmatmul.mubr.bf16.vlgmr.msra.gmra.mrb[4].mxu1 %v1210_v14 }
  0xfb   : > { %v1305_v17 = vpop.f32.mrb[0].mxu0 }
  0xfc   : > { %v1327_v18 = vpop.f32.mrb[0].mxu1  ;;  %v1306_v20 = vpop.f32.mrb[1].mxu0 }
  0xfd   : > { %v1307_v21 = vadd.f32 %v1306_v20, %v1305_v17  ;;  %v1328_v22 = vpop.f32.mrb[1].mxu1  ;;  %v1308_v23 = vpop.f32.mrb[2].mxu0 }
  0xfe   : > { %v1329_v24 = vadd.f32 %v1328_v22, %v1327_v18  ;;  %v1330_v25 = vpop.f32.mrb[2].mxu1  ;;  %v1309_v26 = vpop.f32.mrb[3].mxu0 }
  0xff   : > { %v887_v27 = vadd.f32 %v1307_v21, %v1203_v19  ;;  %v1310_v28 = vadd.f32 %v1309_v26, %v1308_v23  ;;  %v1331_v29 = vpop.f32.mrb[3].mxu1 }
 0x100   : > { %v1332_v30 = vadd.f32 %v1331_v29, %v1330_v25 }
 0x101   : > { %v928_v31 = vadd.f32 %v1329_v24, %v887_v27  ;;  %v890_v32 = vadd.f32 %v1310_v28, %v1203_v19 }
 0x103   : > { %v931_v33 = vadd.f32 %v1332_v30, %v890_v32 }
 0x11b   : > { %v1349_v34 = vpop.f32.mrb[4].mxu0 }
 0x11c   : > { %v1371_v35 = vpop.f32.mrb[4].mxu1  ;;  %v1350_v36 = vpop.f32.mrb[5].mxu0 }
 0x11d   : > { %v1351_v37 = vadd.f32 %v1350_v36, %v1349_v34  ;;  %v1372_v38 = vpop.f32.mrb[5].mxu1  ;;  %v1352_v39 = vpop.f32.mrb[6].mxu0 }
 0x11e   : > { %v1373_v40 = vadd.f32 %v1372_v38, %v1371_v35  ;;  %v1374_v41 = vpop.f32.mrb[6].mxu1  ;;  %v1353_v42 = vpop.f32.mrb[7].mxu0 }
 0x11f   : > { %v969_v43 = vadd.f32 %v1351_v37, %v928_v31  ;;  %v1354_v44 = vadd.f32 %v1353_v42, %v1352_v39  ;;  %v1375_v45 = vpop.f32.mrb[7].mxu1 }
 0x120   : > { %v1376_v46 = vadd.f32 %v1375_v45, %v1374_v41 }
 0x121   : > { %v1010_v47 = vadd.f32 %v1373_v40, %v969_v43  ;;  %v972_v48 = vadd.f32 %v1354_v44, %v931_v33 }
 0x123   : > { %v1013_v49 = vadd.f32 %v1376_v46, %v972_v48  ;;  %v1043_v50 = vmul.f32 %v1010_v47, %v1010_v47 }
 0x125   : > { %v1287_v51 = vpack.c.bf16 %v1013_v49, %v1010_v47  ;;  %v1033_v52 = vadd.f32 %v1013_v49, %v1010_v47  ;;  %v1044_v53 = vmul.f32 %v1013_v49, %v1013_v49 }
 0x127   : > { %1288 = vst [vmem:[%s276_s16] sm:$0xff] %v1287_v51   ;;  %v1034_v54 = vrot.slane %v1033_v52, 4  ;;  %v1045_v55 = vadd.f32 %v1044_v53, %v1043_v50 }
 0x129   : > { %v1035_v56 = vadd.f32 %v1034_v54, %v1033_v52  ;;  %v1046_v57 = vrot.slane %v1045_v55, 4 }
 0x12b   : > { %v1036_v58 = vrot.slane %v1035_v56, 2  ;;  %v1047_v59 = vadd.f32 %v1046_v57, %v1045_v55 }
 0x12d   : > { %v1037_v60 = vadd.f32 %v1036_v58, %v1035_v56  ;;  %v1048_v61 = vrot.slane %v1047_v59, 2 }
 0x12f   : > { %v1038_v62 = vrot.slane %v1037_v60, 1  ;;  %v1049_v63 = vadd.f32 %v1048_v61, %v1047_v59 }
 0x131   : > { %v1039_v1 = vadd.f32 %v1038_v62, %v1037_v60  ;;  %v1050_v2 = vrot.slane %v1049_v63, 1 }
 0x133   : > { %v1040_v4 = vadd.f32 %v1039_v1, %v1032_v0  ;;  %v1051_v5 = vadd.f32 %v1050_v2, %v1049_v63 }
 0x135   : > { %1041 = vst [vmem:[%s1755_s8] sm:$0x1] %v1040_v4  ;;  %v1052_v6 = vadd.f32 %v1051_v5, %v1042_v3 }
 0x137   : > { %1053 = vst [vmem:[%s1761_s11] sm:$0x1] %v1052_v6 }
 0x138 PF: > { %s16_s20 = sadd.s32 1, %s1488_s20   ;;  %s1791_s18 = smov %s1484_s19 }
 0x139   : > { %p13_p5 = scmp.ge.s32.totalorder %s16_s20, 4   ;;  %s1792_s19 = smov %s1794_s21 }
 0x13b   :  { %15 = sbr.rel (!%p13_p5) target bundleno = 2 (0x2), region = 90 }

// kernel: _lambda_.69
= control target key start
LH: loop header
LB: loop body
LE: loop exit
PB: predicated region body
PF: predicated region fallthrough
CT: control target
= control target key end

     0   :  { %s813_s18 = smov 0   ;;  %s815_s19 = smov 0   ;;  %s919_s0 = inlined_call_operand.vmem [shape: bf16[2,16,256], index: 0, kind: input, shape index: {}]   ;;  %s920_s1 = inlined_call_operand.vmem [shape: bf16[256,128], index: 1, kind: input, shape index: {}]   ;;  %s921_s2 = inlined_call_operand.vmem [shape: f32[1,128], index: 2, kind: input, shape index: {}]   ;;  %s922_s3 = inlined_call_operand.vmem [shape: bf16[2,16,128], index: 3, kind: output, shape index: {0}]   ;;  %s923_s4 = inlined_call_operand.vmem [shape: f32[2,1,128], index: 4, kind: output, shape index: {1}]   ;;  %s924_s5 = inlined_call_operand.vmem [shape: f32[2,1,128], index: 5, kind: output, shape index: {2}]  }
   0x1   :  { %s817_s20 = smov 0  }
   0x2 LB: > { %s28_s21 = sadd.s32 1, %s776_s19  ;;  %p655_p0 = scmp.ge.s32.totalorder %s780_s20, 1  ;;  %s780_s20 = sphi %s817_s20, %s16_s20   ;;  %s776_s19 = sphi %s815_s19, %s926_s19   ;;  %s772_s18 = sphi %s813_s18, %s925_s18  }
   0x3   : > { %p30_p1 = scmp.ge.s32.totalorder %s28_s21, 2  ;;  %p214_p2 = scmp.lt.s32.totalorder %s780_s20, 3 }
   0x5   : > { %s928_s21 = smov (%p30_p1, %s28_s21), 0  ;;  %p215_p3 = pnand %p655_p0, %p214_p2 }
   0x6   : > { %v739_v0 = vld [vmem:[%s920_s1 + $0x40] sm:$0xff] (!%p215_p3)   ;;  %p258_p4 = scmp.lt.s32.totalorder (!%p215_p3), %s772_s18, 1  ;;  %v741_v2 = vld [vmem:[%s920_s1 + $0x48] sm:$0xff] (!%p215_p3)   ;;  %v743_v4 = vld [vmem:[%s920_s1 + $0x50] sm:$0xff] (!%p215_p3)   ;;  %v782_v5 = vmov (!%p215_p3), 0.0  }
   0x7   : > { %218 = sbr.rel (%p215_p3) target bundleno = 277 (0x115), region = 32  ;;  %v740_v1 = vld [vmem:[%s920_s1] sm:$0xff] (!%p215_p3)   ;;  %692 = vmatprep.subr.bf16.mxu0 (!%p215_p3), %v739_v0  ;;  %v742_v3 = vld [vmem:[%s920_s1 + $0x8] sm:$0xff] (!%p215_p3)   ;;  %v744_v6 = vld [vmem:[%s920_s1 + $0x10] sm:$0xff] (!%p215_p3)  }
   0x8   : > { %693 = vmatpush3.bf16.msra.mxu0 (!%p215_p3), %v740_v1  ;;  %v745_v7 = vld [vmem:[%s920_s1 + $0x58] sm:$0xff] (!%p215_p3)   ;;  %v747_v9 = vld [vmem:[%s920_s1 + $0x60] sm:$0xff] (!%p215_p3)   ;;  %v749_v11 = vld [vmem:[%s920_s1 + $0x68] sm:$0xff] (!%p215_p3)  }
   0x9   : > { %694 = vmatprep.subr.bf16.mxu0 (!%p215_p3), %v741_v2  ;;  %v746_v8 = vld [vmem:[%s920_s1 + $0x18] sm:$0xff] (!%p215_p3)   ;;  %v748_v10 = vld [vmem:[%s920_s1 + $0x20] sm:$0xff] (!%p215_p3)   ;;  %v750_v13 = vld [vmem:[%s920_s1 + $0x28] sm:$0xff] (!%p215_p3)  }
   0xa   : > { %v751_v14 = vld [vmem:[%s920_s1 + $0x70] sm:$0xff] (!%p215_p3)   ;;  %v753_v16 = vld [vmem:[%s920_s1 + $0x78] sm:$0xff] (!%p215_p3)   ;;  %v660_v20 = vld [vmem:[%s921_s2] ss:$0 sm:$0xff] (!%p215_p3) }
   0xb   : > { %v752_v15 = vld [vmem:[%s920_s1 + $0x30] sm:$0xff] (!%p215_p3)   ;;  %v754_v17 = vld [vmem:[%s920_s1 + $0x38] sm:$0xff] (!%p215_p3)  }
   0xc   : > { %695 = vmatpush3.bf16.msra.mxu0 (!%p215_p3), %v742_v3 }
   0xd   : > { %696 = vmatprep.subr.bf16.mxu0 (!%p215_p3), %v743_v4 }
   0xe   : > { %s930_s18 = smov (!%p258_p4, %s772_s18), 1 }
   0xf   : > { %s852_s9 = scalar_lea.vmem %s924_s5, %s930_s18  ;;  %s683_s16 = sshll.u32 %s930_s18, 4 }
  0x10   : > { %488 = vst [vmem:[%s852_s9] sm:$0x1] %v782_v5  ;;  %697 = vmatpush3.bf16.msra.mxu0 %v744_v6  ;;  %s266_s25 = scalar_lea.vmem %s919_s0, %s683_s16  ;;  %s896_s22 = scalar_lea.vmem %s923_s4, %s930_s18 }
  0x11   : > { %698 = vmatprep.subr.bf16.mxu0 %v745_v7  ;;  %v757_v12 = vld [vmem:[%s266_s25 + $0x4] ss:$8 sps:$4 sm:$0xff]   ;;  %v755_v18 = vld [vmem:[%s266_s25] ss:$8 sps:$4 sm:$0xff]   ;;  %487 = vst [vmem:[%s896_s22] sm:$0x1] %v782_v5  ;;  %s684_s25 = sshll.u32 %s930_s18, 3 }
  0x12   : > { %464 = vmatprep.mubr.bf16.mxu0 %v757_v12  ;;  %s276_s28 = scalar_lea.vmem %s922_s3, %s684_s25 }
  0x14   : > { %699 = vmatpush3.bf16.msra.mxu0 %v746_v8 }
  0x15   : > { %700 = vmatprep.subr.bf16.mxu0 %v747_v9 }
  0x17   : > { %v499_v45 = vld [vmem:[%s852_s9] sm:$0x1] }
  0x18   : > { %701 = vmatpush3.bf16.msra.mxu0 %v748_v10  ;;  %v489_v42 = vld [vmem:[%s896_s22] sm:$0x1] }
  0x19   : > { %702 = vmatprep.subr.bf16.mxu0 %v749_v11 }
  0x1c   : > { %703 = vmatpush3.bf16.msra.mxu0 %v750_v13 }
  0x1d   : > { %704 = vmatprep.subr.bf16.mxu0 %v751_v14 }
  0x20   : > { %705 = vmatpush3.bf16.msra.mxu0 %v752_v15 }
  0x21   : > { %706 = vmatprep.subr.bf16.mxu0 %v753_v16 }
  0x24   : > { %707 = vmatpush3.bf16.msra.mxu0 %v754_v17 }
  0x27   : > { %465 = vmatmul.mubr.bf16.vlgmr.msra.gmra.mrb[0].mxu0 %v755_v18 }
  0xfa   : > { %v708_v19 = vpop.f32.mrb[0].mxu0 }
  0xfb   : > { %v709_v21 = vpop.f32.mrb[1].mxu0 }
  0xfc   : > { %v710_v22 = vadd.f32 %v709_v21, %v708_v19  ;;  %v711_v23 = vpop.f32.mrb[2].mxu0 }
  0xfd   : > { %v712_v24 = vpop.f32.mrb[3].mxu0 }
  0xfe   : > { %v467_v25 = vadd.f32 %v710_v22, %v660_v20  ;;  %v713_v26 = vadd.f32 %v712_v24, %v711_v23 }
 0x100   : > { %v470_v27 = vadd.f32 %v713_v26, %v660_v20  ;;  %v500_v28 = vmul.f32 %v467_v25, %v467_v25 }
 0x102   : > { %v690_v29 = vpack.c.bf16 %v470_v27, %v467_v25  ;;  %v490_v30 = vadd.f32 %v470_v27, %v467_v25  ;;  %v501_v31 = vmul.f32 %v470_v27, %v470_v27 }
 0x104   : > { %691 = vst [vmem:[%s276_s28] sm:$0xff] %v690_v29   ;;  %v491_v32 = vrot.slane %v490_v30, 4  ;;  %v502_v33 = vadd.f32 %v501_v31, %v500_v28 }
 0x106   : > { %v492_v34 = vadd.f32 %v491_v32, %v490_v30  ;;  %v503_v35 = vrot.slane %v502_v33, 4 }
 0x108   : > { %v493_v36 = vrot.slane %v492_v34, 2  ;;  %v504_v37 = vadd.f32 %v503_v35, %v502_v33 }
 0x10a   : > { %v494_v38 = vadd.f32 %v493_v36, %v492_v34  ;;  %v505_v39 = vrot.slane %v504_v37, 2 }
 0x10c   : > { %v495_v40 = vrot.slane %v494_v38, 1  ;;  %v506_v41 = vadd.f32 %v505_v39, %v504_v37 }
 0x10e   : > { %v496_v43 = vadd.f32 %v495_v40, %v494_v38  ;;  %v507_v44 = vrot.slane %v506_v41, 1 }
 0x110   : > { %v497_v46 = vadd.f32 %v496_v43, %v489_v42  ;;  %v508_v47 = vadd.f32 %v507_v44, %v506_v41 }
 0x112   : > { %498 = vst [vmem:[%s896_s22] sm:$0x1] %v497_v46  ;;  %v509_v48 = vadd.f32 %v508_v47, %v499_v45 }
 0x114   : > { %510 = vst [vmem:[%s852_s9] sm:$0x1] %v509_v48 }
 0x115 PF: > { %s16_s20 = sadd.s32 1, %s780_s20   ;;  %s925_s18 = smov %s776_s19 }
 0x116   : > { %p13_p5 = scmp.ge.s32.totalorder %s16_s20, 4   ;;  %s926_s19 = smov %s928_s21 }
 0x118   :  { %15 = sbr.rel (!%p13_p5) target bundleno = 2 (0x2), region = 90 }

// kernel: _lambda_.77
= control target key start
LH: loop header
LB: loop body
LE: loop exit
PB: predicated region body
PF: predicated region fallthrough
CT: control target
= control target key end

     0   :  { %s1317_s18 = smov 0   ;;  %s1319_s19 = smov 0   ;;  %s1509_s0 = inlined_call_operand.vmem [shape: bf16[2,64,512], index: 0, kind: input, shape index: {}]   ;;  %s1510_s1 = inlined_call_operand.vmem [shape: bf16[512,128], index: 1, kind: input, shape index: {}]   ;;  %s1511_s2 = inlined_call_operand.vmem [shape: f32[1,128], index: 2, kind: input, shape index: {}]   ;;  %s1512_s3 = inlined_call_operand.vmem [shape: bf16[2,64,128], index: 3, kind: output, shape index: {0}]   ;;  %s1513_s4 = inlined_call_operand.vmem [shape: f32[2,1,128], index: 4, kind: output, shape index: {1}]   ;;  %s1514_s5 = inlined_call_operand.vmem [shape: f32[2,1,128], index: 5, kind: output, shape index: {2}]  }
   0x1   :  { %s1321_s20 = smov 0  }
   0x2 LB: > { %s28_s21 = sadd.s32 1, %s1280_s19  ;;  %p1004_p0 = scmp.ge.s32.totalorder %s1284_s20, 1  ;;  %s1284_s20 = sphi %s1321_s20, %s16_s20   ;;  %s1280_s19 = sphi %s1319_s19, %s1516_s19   ;;  %s1276_s18 = sphi %s1317_s18, %s1515_s18  }
   0x3   : > { %p30_p1 = scmp.ge.s32.totalorder %s28_s21, 2  ;;  %p214_p2 = scmp.lt.s32.totalorder %s1284_s20, 3 }
   0x5   : > { %s1518_s21 = smov (%p30_p1, %s28_s21), 0  ;;  %p215_p3 = pnand %p1004_p0, %p214_p2 }
   0x6   : > { %v1206_v0 = vld [vmem:[%s1510_s1 + $0x40] sm:$0xff] (!%p215_p3)   ;;  %v1210_v4 = vld [vmem:[%s1510_s1 + $0x48] sm:$0xff] (!%p215_p3)   ;;  %v1214_v8 = vld [vmem:[%s1510_s1 + $0x50] sm:$0xff] (!%p215_p3)   ;;  %p258_p4 = scmp.lt.s32.totalorder (!%p215_p3), %s1276_s18, 1  ;;  %v1286_v48 = vmov (!%p215_p3), 0.0  }
   0x7   : > { %218 = sbr.rel (%p215_p3) target bundleno = 304 (0x130), region = 32  ;;  %v1207_v1 = vld [vmem:[%s1510_s1 + $0xc0] sm:$0xff] (!%p215_p3)   ;;  %1101 = vmatprep.subr.bf16.mxu0 (!%p215_p3), %v1206_v0  ;;  %v1211_v5 = vld [vmem:[%s1510_s1 + $0xc8] sm:$0xff] (!%p215_p3)   ;;  %v1215_v9 = vld [vmem:[%s1510_s1 + $0xd0] sm:$0xff] (!%p215_p3)  }
   0x8   : > { %v1208_v2 = vld [vmem:[%s1510_s1] sm:$0xff] (!%p215_p3)   ;;  %1141 = vmatprep.subr.bf16.mxu1 (!%p215_p3), %v1207_v1  ;;  %v1212_v6 = vld [vmem:[%s1510_s1 + $0x8] sm:$0xff] (!%p215_p3)   ;;  %v1216_v10 = vld [vmem:[%s1510_s1 + $0x10] sm:$0xff] (!%p215_p3)  }
   0x9   : > { %v1209_v3 = vld [vmem:[%s1510_s1 + $0x80] sm:$0xff] (!%p215_p3)   ;;  %1102 = vmatpush3.bf16.msra.mxu0 (!%p215_p3), %v1208_v2  ;;  %v1213_v7 = vld [vmem:[%s1510_s1 + $0x88] sm:$0xff] (!%p215_p3)   ;;  %v1217_v11 = vld [vmem:[%s1510_s1 + $0x90] sm:$0xff] (!%p215_p3)  }
   0xa   : > { %1142 = vmatpush3.bf16.msra.mxu1 (!%p215_p3), %v1209_v3  ;;  %1103 = vmatprep.subr.bf16.mxu0 (!%p215_p3), %v1210_v4  ;;  %v1218_v12 = vld [vmem:[%s1510_s1 + $0x58] sm:$0xff] (!%p215_p3)   ;;  %v1222_v16 = vld [vmem:[%s1510_s1 + $0x60] sm:$0xff] (!%p215_p3)   ;;  %v1226_v20 = vld [vmem:[%s1510_s1 + $0x68] sm:$0xff] (!%p215_p3)  }
   0xb   : > { %1143 = vmatprep.subr.bf16.mxu1 (!%p215_p3), %v1211_v5  ;;  %v1219_v13 = vld [vmem:[%s1510_s1 + $0xd8] sm:$0xff] (!%p215_p3)   ;;  %v1223_v17 = vld [vmem:[%s1510_s1 + $0xe0] sm:$0xff] (!%p215_p3)   ;;  %v1227_v21 = vld [vmem:[%s1510_s1 + $0xe8] sm:$0xff] (!%p215_p3)  }
   0xc   : > { %v1220_v14 = vld [vmem:[%s1510_s1 + $0x18] sm:$0xff] (!%p215_p3)   ;;  %v1224_v18 = vld [vmem:[%s1510_s1 + $0x20] sm:$0xff] (!%p215_p3)   ;;  %v1228_v22 = vld [vmem:[%s1510_s1 + $0x28] sm:$0xff] (!%p215_p3)  }
   0xd   : > { %1104 = vmatpush3.bf16.msra.mxu0 (!%p215_p3), %v1212_v6  ;;  %v1221_v15 = vld [vmem:[%s1510_s1 + $0x98] sm:$0xff] (!%p215_p3)   ;;  %v1225_v19 = vld [vmem:[%s1510_s1 + $0xa0] sm:$0xff] (!%p215_p3)   ;;  %v1229_v23 = vld [vmem:[%s1510_s1 + $0xa8] sm:$0xff] (!%p215_p3)  }
   0xe   : > { %1144 = vmatpush3.bf16.msra.mxu1 %v1213_v7  ;;  %1105 = vmatprep.subr.bf16.mxu0 %v1214_v8  ;;  %s1520_s18 = smov (!%p258_p4, %s1276_s18), 1  ;;  %v1230_v24 = vld [vmem:[%s1510_s1 + $0x70] sm:$0xff]   ;;  %v1234_v28 = vld [vmem:[%s1510_s1 + $0x78] sm:$0xff]   ;;  %v1476_v51 = vld [vmem:[%s1511_s2] ss:$0 sm:$0xff] }
   0xf   : > { %1145 = vmatprep.subr.bf16.mxu1 %v1215_v9  ;;  %v1231_v25 = vld [vmem:[%s1510_s1 + $0xf0] sm:$0xff]   ;;  %s1068_s9 = sshll.u32 %s1520_s18, 7  ;;  %v1235_v29 = vld [vmem:[%s1510_s1 + $0xf8] sm:$0xff]   ;;  %s1463_s29 = scalar_lea.vmem %s1513_s4, %s1520_s18 }
  0x10   : > { %v1232_v26 = vld [vmem:[%s1510_s1 + $0x30] sm:$0xff]   ;;  %s1435_s22 = scalar_lea.vmem %s1509_s0, %s1068_s9  ;;  %v1236_v30 = vld [vmem:[%s1510_s1 + $0x38] sm:$0xff]   ;;  %s1469_s7 = scalar_lea.vmem %s1514_s5, %s1520_s18  ;;  %818 = vst [vmem:[%s1463_s29] sm:$0x1] %v1286_v48 }
  0x11   : > { %1106 = vmatpush3.bf16.msra.mxu0 %v1216_v10  ;;  %v1233_v27 = vld [vmem:[%s1510_s1 + $0xb0] sm:$0xff]   ;;  %v1237_v31 = vld [vmem:[%s1510_s1 + $0xb8] sm:$0xff]   ;;  %819 = vst [vmem:[%s1469_s7] sm:$0x1] %v1286_v48  ;;  %s1069_s10 = sshll.u32 %s1520_s18, 5 }
  0x12   : > { %1146 = vmatpush3.bf16.msra.mxu1 %v1217_v11  ;;  %1107 = vmatprep.subr.bf16.mxu0 %v1218_v12  ;;  %v1238_v32 = vld [vmem:[%s1435_s22] ss:$16 sps:$4 sm:$0xff]   ;;  %v1240_v33 = vld [vmem:[%s1435_s22 + $0x4] ss:$16 sps:$4 sm:$0xff]   ;;  %v1241_v34 = vld [vmem:[%s1435_s22 + $0x8] ss:$16 sps:$4 sm:$0xff]   ;;  %s1484_s13 = scalar_lea.vmem %s1512_s3, %s1069_s10 }
  0x13   : > { %1147 = vmatprep.subr.bf16.mxu1 %v1219_v13  ;;  %v1243_v35 = vld [vmem:[%s1435_s22 + $0xc] ss:$16 sps:$4 sm:$0xff]   ;;  %676 = vmatprep.mubr.bf16.mxu0 %v1240_v33  ;;  %v1244_v36 = vld [vmem:[%s1435_s22 + $0x24] ss:$16 sps:$4 sm:$0xff]   ;;  %v1248_v38 = vld [vmem:[%s1435_s22 + $0x20] ss:$16 sps:$4 sm:$0xff]  }
  0x14   : > { %741 = vmatprep.mubr.bf16.mxu1 %v1243_v35  ;;  %v1246_v37 = vld [vmem:[%s1435_s22 + $0x2c] ss:$16 sps:$4 sm:$0xff]   ;;  %v1249_v39 = vld [vmem:[%s1435_s22 + $0x28] ss:$16 sps:$4 sm:$0xff]   ;;  %v1250_v40 = vld [vmem:[%s1435_s22 + $0x44] ss:$16 sps:$4 sm:$0xff]  }
  0x15   : > { %1108 = vmatpush3.bf16.msra.mxu0 %v1220_v14  ;;  %v1252_v41 = vld [vmem:[%s1435_s22 + $0x4c] ss:$16 sps:$4 sm:$0xff]   ;;  %v1254_v42 = vld [vmem:[%s1435_s22 + $0x40] ss:$16 sps:$4 sm:$0xff]   ;;  %v1255_v43 = vld [vmem:[%s1435_s22 + $0x48] ss:$16 sps:$4 sm:$0xff]  }
  0x16   : > { %1148 = vmatpush3.bf16.msra.mxu1 %v1221_v15  ;;  %1109 = vmatprep.subr.bf16.mxu0 %v1222_v16  ;;  %v1256_v44 = vld [vmem:[%s1435_s22 + $0x64] ss:$16 sps:$4 sm:$0xff]   ;;  %v1258_v45 = vld [vmem:[%s1435_s22 + $0x6c] ss:$16 sps:$4 sm:$0xff]   ;;  %v1260_v46 = vld [vmem:[%s1435_s22 + $0x60] ss:$16 sps:$4 sm:$0xff]  }
  0x17   : > { %1149 = vmatprep.subr.bf16.mxu1 %v1223_v17  ;;  %v1261_v47 = vld [vmem:[%s1435_s22 + $0x68] ss:$16 sps:$4 sm:$0xff]  }
  0x19   : > { %1110 = vmatpush3.bf16.msra.mxu0 %v1224_v18 }
  0x1a   : > { %1150 = vmatpush3.bf16.msra.mxu1 %v1225_v19  ;;  %1111 = vmatprep.subr.bf16.mxu0 %v1226_v20 }
  0x1b   : > { %1151 = vmatprep.subr.bf16.mxu1 %v1227_v21 }
  0x1d   : > { %1112 = vmatpush3.bf16.msra.mxu0 %v1228_v22 }
  0x1e   : > { %1152 = vmatpush3.bf16.msra.mxu1 %v1229_v23  ;;  %1113 = vmatprep.subr.bf16.mxu0 %v1230_v24 }
  0x1f   : > { %1153 = vmatprep.subr.bf16.mxu1 %v1231_v25 }
  0x21   : > { %1114 = vmatpush3.bf16.msra.mxu0 %v1232_v26 }
  0x22   : > { %1154 = vmatpush3.bf16.msra.mxu1 %v1233_v27  ;;  %1115 = vmatprep.subr.bf16.mxu0 %v1234_v28 }
  0x23   : > { %1155 = vmatprep.subr.bf16.mxu1 %v1235_v29 }
  0x25   : > { %1116 = vmatpush3.bf16.msra.mxu0 %v1236_v30 }
  0x26   : > { %1156 = vmatpush3.bf16.msra.mxu1 %v1237_v31 }
  0x28   : > { %677 = vmatmul.mubr.bf16.vlgmr.msra.gmra.mrb[0].mxu0 %v1238_v32 }
  0x29   : > { %742 = vmatmul.mubr.bf16.vlgmr.msra.gmra.mrb[0].mxu1 %v1241_v34  ;;  %684 = vmatprep.mubr.bf16.mxu0 %v1244_v36 }
  0x2a   : > { %749 = vmatprep.mubr.bf16.mxu1 %v1246_v37 }
  0x30   : > { %685 = vmatmul.mubr.bf16.gmra.mrb[4].mxu0 %v1248_v38 }
  0x31   : > { %750 = vmatmul.mubr.bf16.gmra.mrb[4].mxu1 %v1249_v39  ;;  %692 = vmatprep.mubr.bf16.mxu0 %v1250_v40 }
  0x32   : > { %757 = vmatprep.mubr.bf16.mxu1 %v1252_v41 }
  0x38   : > { %693 = vmatmul.mubr.bf16.gmra.mrb[8].mxu0 %v1254_v42 }
  0x39   : > { %758 = vmatmul.mubr.bf16.gmra.mrb[8].mxu1 %v1255_v43  ;;  %700 = vmatprep.mubr.bf16.mxu0 %v1256_v44 }
  0x3a   : > { %765 = vmatprep.mubr.bf16.mxu1 %v1258_v45 }
  0x40   : > { %701 = vmatmul.mubr.bf16.gmra.mrb[12].mxu0 %v1260_v46 }
  0x41   : > { %766 = vmatmul.mubr.bf16.gmra.mrb[12].mxu1 %v1261_v47 }
  0xfb   : > { %v1117_v49 = vpop.f32.mrb[0].mxu0 }
  0xfc   : > { %v1157_v50 = vpop.f32.mrb[0].mxu1  ;;  %v1118_v52 = vpop.f32.mrb[1].mxu0 }
  0xfd   : > { %v1119_v53 = vadd.f32 %v1118_v52, %v1117_v49  ;;  %v1158_v54 = vpop.f32.mrb[1].mxu1  ;;  %v1120_v55 = vpop.f32.mrb[2].mxu0 }
  0xfe   : > { %v1159_v56 = vadd.f32 %v1158_v54, %v1157_v50  ;;  %v1160_v57 = vpop.f32.mrb[2].mxu1  ;;  %v1121_v58 = vpop.f32.mrb[3].mxu0 }
  0xff   : > { %v679_v59 = vadd.f32 %v1119_v53, %v1476_v51  ;;  %v1122_v60 = vadd.f32 %v1121_v58, %v1120_v55  ;;  %v1161_v61 = vpop.f32.mrb[3].mxu1 }
 0x100   : > { %v1162_v62 = vadd.f32 %v1161_v61, %v1160_v57 }
 0x101   : > { %v744_v63 = vadd.f32 %v1159_v56, %v679_v59  ;;  %v682_v0 = vadd.f32 %v1122_v60, %v1476_v51 }
 0x103   : > { %v747_v1 = vadd.f32 %v1162_v62, %v682_v0  ;;  %v1123_v2 = vpop.f32.mrb[4].mxu0  ;;  %v837_v3 = vmul.f32 %v744_v63, %v744_v63 }
 0x104   : > { %v1163_v4 = vpop.f32.mrb[4].mxu1  ;;  %v1124_v5 = vpop.f32.mrb[5].mxu0 }
 0x105   : > { %v1081_v6 = vpack.c.bf16 %v747_v1, %v744_v63  ;;  %v821_v7 = vadd.f32 %v747_v1, %v744_v63  ;;  %v838_v8 = vmul.f32 %v747_v1, %v747_v1  ;;  %v1125_v9 = vadd.f32 %v1124_v5, %v1123_v2  ;;  %v1164_v10 = vpop.f32.mrb[5].mxu1  ;;  %v1126_v11 = vpop.f32.mrb[6].mxu0 }
 0x106   : > { %v1165_v12 = vadd.f32 %v1164_v10, %v1163_v4  ;;  %v1166_v13 = vpop.f32.mrb[6].mxu1  ;;  %v1127_v14 = vpop.f32.mrb[7].mxu0 }
 0x107   : > { %1082 = vst [vmem:[%s1484_s13] sm:$0xff] %v1081_v6   ;;  %v845_v15 = vadd.f32 %v838_v8, %v837_v3  ;;  %v687_v16 = vadd.f32 %v1125_v9, %v1476_v51  ;;  %v1128_v17 = vadd.f32 %v1127_v14, %v1126_v11  ;;  %v1167_v18 = vpop.f32.mrb[7].mxu1 }
 0x108   : > { %v1168_v19 = vadd.f32 %v1167_v18, %v1166_v13 }
 0x109   : > { %v752_v20 = vadd.f32 %v1165_v12, %v687_v16  ;;  %v690_v21 = vadd.f32 %v1128_v17, %v1476_v51 }
 0x10b   : > { %v822_v22 = vadd.f32 %v821_v7, %v752_v20  ;;  %v839_v23 = vmul.f32 %v752_v20, %v752_v20  ;;  %v755_v24 = vadd.f32 %v1168_v19, %v690_v21  ;;  %v1129_v25 = vpop.f32.mrb[8].mxu0  ;;  %v820_v21 = vld [vmem:[%s1463_s29] sm:$0x1] }
 0x10c   : > { %v1169_v26 = vpop.f32.mrb[8].mxu1  ;;  %v1130_v27 = vpop.f32.mrb[9].mxu0 }
 0x10d   : > { %v846_v28 = vadd.f32 %v845_v15, %v839_v23  ;;  %v1086_v29 = vpack.c.bf16 %v755_v24, %v752_v20  ;;  %v823_v30 = vadd.f32 %v822_v22, %v755_v24  ;;  %v840_v31 = vmul.f32 %v755_v24, %v755_v24  ;;  %v1170_v32 = vpop.f32.mrb[9].mxu1  ;;  %v1132_v33 = vpop.f32.mrb[10].mxu0  ;;  %v836_v24 = vld [vmem:[%s1469_s7] sm:$0x1] }
 0x10e   : > { %v1131_v34 = vadd.f32 %v1130_v27, %v1129_v25  ;;  %v1171_v35 = vadd.f32 %v1170_v32, %v1169_v26  ;;  %v1172_v36 = vpop.f32.mrb[10].mxu1  ;;  %v1133_v37 = vpop.f32.mrb[11].mxu0 }
 0x10f   : > { %1098 = vst [vmem:[%s1484_s13 + $0x8] sm:$0xff] %v1086_v29   ;;  %v847_v38 = vadd.f32 %v846_v28, %v840_v31  ;;  %v1134_v39 = vadd.f32 %v1133_v37, %v1132_v33  ;;  %v1173_v40 = vpop.f32.mrb[11].mxu1 }
 0x110   : > { %v695_v41 = vadd.f32 %v1131_v34, %v1476_v51  ;;  %v1174_v42 = vadd.f32 %v1173_v40, %v1172_v36 }
 0x111   : > { %v698_v43 = vadd.f32 %v1134_v39, %v1476_v51 }
 0x112   : > { %v760_v44 = vadd.f32 %v1171_v35, %v695_v41 }
 0x113   : > { %v763_v45 = vadd.f32 %v1174_v42, %v698_v43  ;;  %v1135_v46 = vpop.f32.mrb[12].mxu0 }
 0x114   : > { %v824_v47 = vadd.f32 %v823_v30, %v760_v44  ;;  %v841_v48 = vmul.f32 %v760_v44, %v760_v44  ;;  %v1175_v49 = vpop.f32.mrb[12].mxu1  ;;  %v1136_v50 = vpop.f32.mrb[13].mxu0 }
 0x115   : > { %v1091_v52 = vpack.c.bf16 %v763_v45, %v760_v44  ;;  %v842_v53 = vmul.f32 %v763_v45, %v763_v45  ;;  %v1137_v54 = vadd.f32 %v1136_v50, %v1135_v46  ;;  %v1176_v55 = vpop.f32.mrb[13].mxu1  ;;  %v1138_v56 = vpop.f32.mrb[14].mxu0 }
 0x116   : > { %v848_v57 = vadd.f32 %v847_v38, %v841_v48  ;;  %v825_v58 = vadd.f32 %v824_v47, %v763_v45  ;;  %v1177_v59 = vadd.f32 %v1176_v55, %v1175_v49  ;;  %v1178_v60 = vpop.f32.mrb[14].mxu1  ;;  %v1139_v61 = vpop.f32.mrb[15].mxu0 }
 0x117   : > { %1099 = vst [vmem:[%s1484_s13 + $0x10] sm:$0xff] %v1091_v52   ;;  %v703_v62 = vadd.f32 %v1137_v54, %v1476_v51  ;;  %v1140_v63 = vadd.f32 %v1139_v61, %v1138_v56  ;;  %v1179_v0 = vpop.f32.mrb[15].mxu1 }
 0x118   : > { %v849_v1 = vadd.f32 %v848_v57, %v842_v53  ;;  %v1180_v2 = vadd.f32 %v1179_v0, %v1178_v60 }
 0x119   : > { %v768_v3 = vadd.f32 %v1177_v59, %v703_v62  ;;  %v706_v4 = vadd.f32 %v1140_v63, %v1476_v51 }
 0x11b   : > { %v826_v5 = vadd.f32 %v825_v58, %v768_v3  ;;  %v843_v6 = vmul.f32 %v768_v3, %v768_v3  ;;  %v771_v7 = vadd.f32 %v1180_v2, %v706_v4 }
 0x11d   : > { %v850_v8 = vadd.f32 %v849_v1, %v843_v6  ;;  %v1096_v9 = vpack.c.bf16 %v771_v7, %v768_v3  ;;  %v827_v10 = vadd.f32 %v826_v5, %v771_v7  ;;  %v844_v11 = vmul.f32 %v771_v7, %v771_v7 }
 0x11f   : > { %1100 = vst [vmem:[%s1484_s13 + $0x18] sm:$0xff] %v1096_v9   ;;  %v828_v12 = vrot.slane %v827_v10, 4  ;;  %v851_v13 = vadd.f32 %v850_v8, %v844_v11 }
 0x121   : > { %v829_v14 = vadd.f32 %v828_v12, %v827_v10  ;;  %v852_v15 = vrot.slane %v851_v13, 4 }
 0x123   : > { %v830_v16 = vrot.slane %v829_v14, 2  ;;  %v853_v17 = vadd.f32 %v852_v15, %v851_v13 }
 0x125   : > { %v831_v18 = vadd.f32 %v830_v16, %v829_v14  ;;  %v854_v51 = vrot.slane %v853_v17, 2 }
 0x127   : > { %v832_v19 = vrot.slane %v831_v18, 1  ;;  %v855_v20 = vadd.f32 %v854_v51, %v853_v17 }
 0x129   : > { %v833_v22 = vadd.f32 %v832_v19, %v831_v18  ;;  %v856_v23 = vrot.slane %v855_v20, 1 }
 0x12b   : > { %v834_v25 = vadd.f32 %v833_v22, %v820_v21  ;;  %v857_v26 = vadd.f32 %v856_v23, %v855_v20 }
 0x12d   : > { %835 = vst [vmem:[%s1463_s29] sm:$0x1] %v834_v25  ;;  %v858_v27 = vadd.f32 %v857_v26, %v836_v24 }
 0x12f   : > { %859 = vst [vmem:[%s1469_s7] sm:$0x1] %v858_v27 }
 0x130 PF: > { %s16_s20 = sadd.s32 1, %s1284_s20   ;;  %s1515_s18 = smov %s1280_s19 }
 0x131   : > { %p13_p5 = scmp.ge.s32.totalorder %s16_s20, 4   ;;  %s1516_s19 = smov %s1518_s21 }
 0x133   :  { %15 = sbr.rel (!%p13_p5) target bundleno = 2 (0x2), region = 90 }

// kernel: _lambda_.75
= control target key start
LH: loop header
LB: loop body
LE: loop exit
PB: predicated region body
PF: predicated region fallthrough
CT: control target
= control target key end

     0   :  { %s1000_s18 = smov 0   ;;  %s1002_s19 = smov 0   ;;  %s1122_s0 = inlined_call_operand.vmem [shape: bf16[2,64,256], index: 0, kind: input, shape index: {}]   ;;  %s1123_s1 = inlined_call_operand.vmem [shape: bf16[256,128], index: 1, kind: input, shape index: {}]   ;;  %s1124_s2 = inlined_call_operand.vmem [shape: f32[1,128], index: 2, kind: input, shape index: {}]   ;;  %s1125_s3 = inlined_call_operand.vmem [shape: bf16[2,64,128], index: 3, kind: output, shape index: {0}]   ;;  %s1126_s4 = inlined_call_operand.vmem [shape: f32[2,1,128], index: 4, kind: output, shape index: {1}]   ;;  %s1127_s5 = inlined_call_operand.vmem [shape: f32[2,1,128], index: 5, kind: output, shape index: {2}]  }
   0x1   :  { %s1004_s20 = smov 0  }
   0x2 LB: > { %s28_s21 = sadd.s32 1, %s963_s19  ;;  %p763_p0 = scmp.ge.s32.totalorder %s967_s20, 1  ;;  %s967_s20 = sphi %s1004_s20, %s16_s20   ;;  %s963_s19 = sphi %s1002_s19, %s1129_s19   ;;  %s959_s18 = sphi %s1000_s18, %s1128_s18  }
   0x3   : > { %p30_p1 = scmp.ge.s32.totalorder %s28_s21, 2  ;;  %p214_p2 = scmp.lt.s32.totalorder %s967_s20, 3 }
   0x5   : > { %s1131_s21 = smov (%p30_p1, %s28_s21), 0  ;;  %p215_p3 = pnand %p763_p0, %p214_p2 }
   0x6   : > { %v917_v0 = vld [vmem:[%s1123_s1 + $0x40] sm:$0xff] (!%p215_p3)   ;;  %v919_v2 = vld [vmem:[%s1123_s1 + $0x48] sm:$0xff] (!%p215_p3)   ;;  %p258_p4 = scmp.lt.s32.totalorder (!%p215_p3), %s959_s18, 1  ;;  %v921_v4 = vld [vmem:[%s1123_s1 + $0x50] sm:$0xff] (!%p215_p3)   ;;  %v969_v24 = vmov (!%p215_p3), 0.0  }
   0x7   : > { %218 = sbr.rel (%p215_p3) target bundleno = 293 (0x125), region = 32  ;;  %v918_v1 = vld [vmem:[%s1123_s1] sm:$0xff] (!%p215_p3)   ;;  %836 = vmatprep.subr.bf16.mxu0 (!%p215_p3), %v917_v0  ;;  %876 = vmatprep.subr.bf16.mxu1 (!%p215_p3), %v917_v0  ;;  %v920_v3 = vld [vmem:[%s1123_s1 + $0x8] sm:$0xff] (!%p215_p3)   ;;  %v922_v5 = vld [vmem:[%s1123_s1 + $0x10] sm:$0xff] (!%p215_p3)  }
   0x8   : > { %837 = vmatpush3.bf16.msra.mxu0 (!%p215_p3), %v918_v1  ;;  %884 = vmatpush3.bf16.msra.mxu1 (!%p215_p3), %v918_v1  ;;  %v923_v6 = vld [vmem:[%s1123_s1 + $0x58] sm:$0xff] (!%p215_p3)   ;;  %v925_v8 = vld [vmem:[%s1123_s1 + $0x60] sm:$0xff] (!%p215_p3)   ;;  %v927_v10 = vld [vmem:[%s1123_s1 + $0x68] sm:$0xff] (!%p215_p3)  }
   0x9   : > { %838 = vmatprep.subr.bf16.mxu0 (!%p215_p3), %v919_v2  ;;  %877 = vmatprep.subr.bf16.mxu1 (!%p215_p3), %v919_v2  ;;  %v924_v7 = vld [vmem:[%s1123_s1 + $0x18] sm:$0xff] (!%p215_p3)   ;;  %v926_v9 = vld [vmem:[%s1123_s1 + $0x20] sm:$0xff] (!%p215_p3)   ;;  %v928_v13 = vld [vmem:[%s1123_s1 + $0x28] sm:$0xff] (!%p215_p3)  }
   0xa   : > { %v929_v14 = vld [vmem:[%s1123_s1 + $0x70] sm:$0xff] (!%p215_p3)   ;;  %v931_v16 = vld [vmem:[%s1123_s1 + $0x78] sm:$0xff] (!%p215_p3)   ;;  %v768_v27 = vld [vmem:[%s1124_s2] ss:$0 sm:$0xff] (!%p215_p3) }
   0xb   : > { %v930_v15 = vld [vmem:[%s1123_s1 + $0x30] sm:$0xff] (!%p215_p3)   ;;  %v932_v17 = vld [vmem:[%s1123_s1 + $0x38] sm:$0xff] (!%p215_p3)  }
   0xc   : > { %839 = vmatpush3.bf16.msra.mxu0 (!%p215_p3), %v920_v3  ;;  %885 = vmatpush3.bf16.msra.mxu1 (!%p215_p3), %v920_v3 }
   0xd   : > { %840 = vmatprep.subr.bf16.mxu0 (!%p215_p3), %v921_v4  ;;  %878 = vmatprep.subr.bf16.mxu1 (!%p215_p3), %v921_v4 }
   0xe   : > { %s1133_s18 = smov (!%p258_p4, %s959_s18), 1 }
   0xf   : > { %s803_s13 = sshll.u32 %s1133_s18, 6  ;;  %s1086_s14 = scalar_lea.vmem %s1126_s4, %s1133_s18 }
  0x10   : > { %841 = vmatpush3.bf16.msra.mxu0 %v922_v5  ;;  %886 = vmatpush3.bf16.msra.mxu1 %v922_v5  ;;  %s1051_s22 = scalar_lea.vmem %s1122_s0, %s803_s13  ;;  %s1092_s17 = scalar_lea.vmem %s1127_s5, %s1133_s18  ;;  %577 = vst [vmem:[%s1086_s14] sm:$0x1] %v969_v24 }
  0x11   : > { %842 = vmatprep.subr.bf16.mxu0 %v923_v6  ;;  %879 = vmatprep.subr.bf16.mxu1 %v923_v6  ;;  %v935_v11 = vld [vmem:[%s1051_s22 + $0x4] ss:$8 sps:$4 sm:$0xff]   ;;  %v933_v18 = vld [vmem:[%s1051_s22] ss:$8 sps:$4 sm:$0xff]   ;;  %v939_v20 = vld [vmem:[%s1051_s22 + $0x14] ss:$8 sps:$4 sm:$0xff]  }
  0x12   : > { %v938_v12 = vld [vmem:[%s1051_s22 + $0x24] ss:$8 sps:$4 sm:$0xff]   ;;  %500 = vmatprep.mubr.bf16.mxu0 %v935_v11  ;;  %v936_v19 = vld [vmem:[%s1051_s22 + $0x20] ss:$8 sps:$4 sm:$0xff]   ;;  %v942_v21 = vld [vmem:[%s1051_s22 + $0x34] ss:$8 sps:$4 sm:$0xff]  }
  0x13   : > { %516 = vmatprep.mubr.bf16.mxu1 %v938_v12  ;;  %v941_v22 = vld [vmem:[%s1051_s22 + $0x10] ss:$8 sps:$4 sm:$0xff]   ;;  %578 = vst [vmem:[%s1092_s17] sm:$0x1] %v969_v24  ;;  %s804_s24 = sshll.u32 %s1133_s18, 5 }
  0x14   : > { %843 = vmatpush3.bf16.msra.mxu0 %v924_v7  ;;  %887 = vmatpush3.bf16.msra.mxu1 %v924_v7  ;;  %v944_v23 = vld [vmem:[%s1051_s22 + $0x30] ss:$8 sps:$4 sm:$0xff]   ;;  %s1103_s27 = scalar_lea.vmem %s1125_s3, %s804_s24 }
  0x15   : > { %844 = vmatprep.subr.bf16.mxu0 %v925_v8  ;;  %880 = vmatprep.subr.bf16.mxu1 %v925_v8 }
  0x18   : > { %845 = vmatpush3.bf16.msra.mxu0 %v926_v9  ;;  %888 = vmatpush3.bf16.msra.mxu1 %v926_v9 }
  0x19   : > { %846 = vmatprep.subr.bf16.mxu0 %v927_v10  ;;  %881 = vmatprep.subr.bf16.mxu1 %v927_v10 }
  0x1c   : > { %847 = vmatpush3.bf16.msra.mxu0 %v928_v13  ;;  %889 = vmatpush3.bf16.msra.mxu1 %v928_v13 }
  0x1d   : > { %848 = vmatprep.subr.bf16.mxu0 %v929_v14  ;;  %882 = vmatprep.subr.bf16.mxu1 %v929_v14 }
  0x20   : > { %849 = vmatpush3.bf16.msra.mxu0 %v930_v15  ;;  %890 = vmatpush3.bf16.msra.mxu1 %v930_v15 }
  0x21   : > { %850 = vmatprep.subr.bf16.mxu0 %v931_v16  ;;  %883 = vmatprep.subr.bf16.mxu1 %v931_v16 }
  0x24   : > { %851 = vmatpush3.bf16.msra.mxu0 %v932_v17  ;;  %891 = vmatpush3.bf16.msra.mxu1 %v932_v17 }
  0x27   : > { %501 = vmatmul.mubr.bf16.vlgmr.msra.gmra.mrb[0].mxu0 %v933_v18  ;;  %517 = vmatmul.mubr.bf16.vlgmr.msra.gmra.mrb[0].mxu1 %v936_v19 }
  0x28   : > { %508 = vmatprep.mubr.bf16.mxu0 %v939_v20  ;;  %524 = vmatprep.mubr.bf16.mxu1 %v942_v21 }
  0x2f   : > { %509 = vmatmul.mubr.bf16.gmra.mrb[4].mxu0 %v941_v22  ;;  %525 = vmatmul.mubr.bf16.gmra.mrb[4].mxu1 %v944_v23 }
  0xfa   : > { %v852_v25 = vpop.f32.mrb[0].mxu0  ;;  %v864_v26 = vpop.f32.mrb[0].mxu1 }
  0xfb   : > { %v853_v28 = vpop.f32.mrb[1].mxu0  ;;  %v865_v29 = vpop.f32.mrb[1].mxu1 }
  0xfc   : > { %v854_v30 = vadd.f32 %v853_v28, %v852_v25  ;;  %v855_v31 = vpop.f32.mrb[2].mxu0  ;;  %v866_v32 = vadd.f32 %v865_v29, %v864_v26  ;;  %v867_v33 = vpop.f32.mrb[2].mxu1  ;;  %v579_v29 = vld [vmem:[%s1086_s14] sm:$0x1] }
  0xfd   : > { %v856_v34 = vpop.f32.mrb[3].mxu0  ;;  %v868_v35 = vpop.f32.mrb[3].mxu1 }
  0xfe   : > { %v503_v36 = vadd.f32 %v854_v30, %v768_v27  ;;  %v857_v37 = vadd.f32 %v856_v34, %v855_v31  ;;  %v519_v38 = vadd.f32 %v866_v32, %v768_v27  ;;  %v869_v39 = vadd.f32 %v868_v35, %v867_v33  ;;  %v595_v32 = vld [vmem:[%s1092_s17] sm:$0x1] }
 0x100   : > { %v506_v40 = vadd.f32 %v857_v37, %v768_v27  ;;  %v522_v41 = vadd.f32 %v869_v39, %v768_v27  ;;  %v596_v42 = vmul.f32 %v503_v36, %v503_v36  ;;  %v600_v7 = vmul.f32 %v519_v38, %v519_v38 }
 0x102   : > { %v816_v43 = vpack.c.bf16 %v506_v40, %v503_v36  ;;  %v580_v44 = vadd.f32 %v506_v40, %v503_v36  ;;  %v597_v45 = vmul.f32 %v506_v40, %v506_v40  ;;  %v858_v46 = vpop.f32.mrb[4].mxu0  ;;  %v826_v47 = vpack.c.bf16 %v522_v41, %v519_v38  ;;  %v870_v48 = vpop.f32.mrb[4].mxu1 }
 0x103   : > { %v859_v49 = vpop.f32.mrb[5].mxu0  ;;  %v871_v50 = vpop.f32.mrb[5].mxu1  ;;  %v601_v10 = vmul.f32 %v522_v41, %v522_v41 }
 0x104   : > { %817 = vst [vmem:[%s1103_s27] sm:$0xff] %v816_v43   ;;  %v604_v51 = vadd.f32 %v597_v45, %v596_v42  ;;  %834 = vst [vmem:[%s1103_s27 + $0x10] sm:$0xff] %v826_v47   ;;  %v860_v52 = vadd.f32 %v859_v49, %v858_v46  ;;  %v861_v53 = vpop.f32.mrb[6].mxu0  ;;  %v872_v54 = vadd.f32 %v871_v50, %v870_v48  ;;  %v873_v55 = vpop.f32.mrb[6].mxu1 }
 0x105   : > { %v862_v56 = vpop.f32.mrb[7].mxu0  ;;  %v874_v57 = vpop.f32.mrb[7].mxu1 }
 0x106   : > { %v511_v58 = vadd.f32 %v860_v52, %v768_v27  ;;  %v863_v59 = vadd.f32 %v862_v56, %v861_v53  ;;  %v875_v60 = vadd.f32 %v874_v57, %v873_v55  ;;  %v527_v61 = vadd.f32 %v872_v54, %v768_v27 }
 0x108   : > { %v581_v62 = vadd.f32 %v580_v44, %v511_v58  ;;  %v598_v63 = vmul.f32 %v511_v58, %v511_v58  ;;  %v514_v0 = vadd.f32 %v863_v59, %v768_v27  ;;  %v530_v1 = vadd.f32 %v875_v60, %v768_v27 }
 0x109   : > { %v602_v13 = vmul.f32 %v527_v61, %v527_v61 }
 0x10a   : > { %v605_v2 = vadd.f32 %v604_v51, %v598_v63  ;;  %v821_v3 = vpack.c.bf16 %v514_v0, %v511_v58  ;;  %v582_v4 = vadd.f32 %v581_v62, %v514_v0  ;;  %v599_v5 = vmul.f32 %v514_v0, %v514_v0 }
 0x10b   : > { %v831_v6 = vpack.c.bf16 %v530_v1, %v527_v61  ;;  %v603_v18 = vmul.f32 %v530_v1, %v530_v1 }
 0x10c   : > { %833 = vst [vmem:[%s1103_s27 + $0x8] sm:$0xff] %v821_v3   ;;  %v583_v8 = vadd.f32 %v582_v4, %v519_v38  ;;  %v606_v9 = vadd.f32 %v605_v2, %v599_v5 }
 0x10d   : > { %835 = vst [vmem:[%s1103_s27 + $0x18] sm:$0xff] %v831_v6  }
 0x10e   : > { %v607_v11 = vadd.f32 %v606_v9, %v600_v7  ;;  %v584_v12 = vadd.f32 %v583_v8, %v522_v41 }
 0x110   : > { %v585_v14 = vadd.f32 %v584_v12, %v527_v61  ;;  %v608_v15 = vadd.f32 %v607_v11, %v601_v10 }
 0x112   : > { %v609_v16 = vadd.f32 %v608_v15, %v602_v13  ;;  %v586_v17 = vadd.f32 %v585_v14, %v530_v1 }
 0x114   : > { %v587_v19 = vrot.slane %v586_v17, 4  ;;  %v610_v20 = vadd.f32 %v609_v16, %v603_v18 }
 0x116   : > { %v588_v21 = vadd.f32 %v587_v19, %v586_v17  ;;  %v611_v22 = vrot.slane %v610_v20, 4 }
 0x118   : > { %v589_v23 = vrot.slane %v588_v21, 2  ;;  %v612_v24 = vadd.f32 %v611_v22, %v610_v20 }
 0x11a   : > { %v590_v25 = vadd.f32 %v589_v23, %v588_v21  ;;  %v613_v26 = vrot.slane %v612_v24, 2 }
 0x11c   : > { %v591_v27 = vrot.slane %v590_v25, 1  ;;  %v614_v28 = vadd.f32 %v613_v26, %v612_v24 }
 0x11e   : > { %v592_v30 = vadd.f32 %v591_v27, %v590_v25  ;;  %v615_v31 = vrot.slane %v614_v28, 1 }
 0x120   : > { %v593_v33 = vadd.f32 %v592_v30, %v579_v29  ;;  %v616_v34 = vadd.f32 %v615_v31, %v614_v28 }
 0x122   : > { %594 = vst [vmem:[%s1086_s14] sm:$0x1] %v593_v33  ;;  %v617_v35 = vadd.f32 %v616_v34, %v595_v32 }
 0x124   : > { %618 = vst [vmem:[%s1092_s17] sm:$0x1] %v617_v35 }
 0x125 PF: > { %s16_s20 = sadd.s32 1, %s967_s20   ;;  %s1128_s18 = smov %s963_s19 }
 0x126   : > { %p13_p5 = scmp.ge.s32.totalorder %s16_s20, 4   ;;  %s1129_s19 = smov %s1131_s21 }
 0x128   :  { %15 = sbr.rel (!%p13_p5) target bundleno = 2 (0x2), region = 90 }

// kernel: _lambda_.74
= control target key start
LH: loop header
LB: loop body
LE: loop exit
PB: predicated region body
PF: predicated region fallthrough
CT: control target
= control target key end

     0   :  { %s882_s18 = smov 0   ;;  %s884_s19 = smov 0   ;;  %s973_s0 = inlined_call_operand.vmem [shape: bf16[2,64,128], index: 0, kind: input, shape index: {}]   ;;  %s974_s1 = inlined_call_operand.vmem [shape: bf16[128,128], index: 1, kind: input, shape index: {}]   ;;  %s975_s2 = inlined_call_operand.vmem [shape: f32[1,128], index: 2, kind: input, shape index: {}]   ;;  %s976_s3 = inlined_call_operand.vmem [shape: bf16[2,64,128], index: 3, kind: output, shape index: {0}]   ;;  %s977_s4 = inlined_call_operand.vmem [shape: f32[2,1,128], index: 4, kind: output, shape index: {1}]   ;;  %s978_s5 = inlined_call_operand.vmem [shape: f32[2,1,128], index: 5, kind: output, shape index: {2}]  }
   0x1   :  { %s886_s20 = smov 0  }
   0x2 LB: > { %s28_s21 = sadd.s32 1, %s845_s19  ;;  %p677_p0 = scmp.ge.s32.totalorder %s849_s20, 1  ;;  %s849_s20 = sphi %s886_s20, %s16_s20   ;;  %s845_s19 = sphi %s884_s19, %s980_s19   ;;  %s841_s18 = sphi %s882_s18, %s979_s18  }
   0x3   : > { %p30_p1 = scmp.ge.s32.totalorder %s28_s21, 2  ;;  %p213_p2 = scmp.lt.s32.totalorder %s849_s20, 3 }
   0x5   : > { %s982_s21 = smov (%p30_p1, %s28_s21), 0  ;;  %p214_p3 = pnand %p677_p0, %p213_p2 }
   0x6   : > { %v815_v0 = vld [vmem:[%s974_s1] sm:$0xff] (!%p214_p3)   ;;  %p256_p4 = scmp.lt.s32.totalorder (!%p214_p3), %s841_s18, 1  ;;  %v816_v1 = vld [vmem:[%s974_s1 + $0x8] sm:$0xff] (!%p214_p3)   ;;  %v817_v2 = vld [vmem:[%s974_s1 + $0x10] sm:$0xff] (!%p214_p3)   ;;  %v851_v12 = vmov (!%p214_p3), 0.0  }
   0x7   : > { %217 = sbr.rel (%p214_p3) target bundleno = 287 (0x11f), region = 32  ;;  %750 = vmatprep.subr.bf16.mxu0 (!%p214_p3), %v815_v0  ;;  %774 = vmatprep.subr.bf16.mxu1 (!%p214_p3), %v815_v0  ;;  %v818_v3 = vld [vmem:[%s974_s1 + $0x18] sm:$0xff] (!%p214_p3)   ;;  %v819_v6 = vld [vmem:[%s974_s1 + $0x20] sm:$0xff] (!%p214_p3)   ;;  %v820_v7 = vld [vmem:[%s974_s1 + $0x28] sm:$0xff] (!%p214_p3)  }
   0x8   : > { %751 = vmatpush3.bf16.msra.mxu0 (!%p214_p3), %v815_v0  ;;  %782 = vmatpush3.bf16.msra.mxu1 (!%p214_p3), %v815_v0  ;;  %v821_v8 = vld [vmem:[%s974_s1 + $0x30] sm:$0xff] (!%p214_p3)   ;;  %v822_v9 = vld [vmem:[%s974_s1 + $0x38] sm:$0xff] (!%p214_p3)   ;;  %v682_v13 = vld [vmem:[%s975_s2] ss:$0 sm:$0xff] (!%p214_p3) }
   0x9   : > { %752 = vmatprep.subr.bf16.mxu0 (!%p214_p3), %v816_v1  ;;  %775 = vmatprep.subr.bf16.mxu1 (!%p214_p3), %v816_v1 }
   0xc   : > { %753 = vmatpush3.bf16.msra.mxu0 (!%p214_p3), %v816_v1  ;;  %783 = vmatpush3.bf16.msra.mxu1 (!%p214_p3), %v816_v1 }
   0xd   : > { %754 = vmatprep.subr.bf16.mxu0 (!%p214_p3), %v817_v2  ;;  %776 = vmatprep.subr.bf16.mxu1 (!%p214_p3), %v817_v2 }
   0xe   : > { %s984_s18 = smov (!%p256_p4, %s841_s18), 1 }
   0xf   : > { %s705_s28 = sshll.u32 %s984_s18, 5  ;;  %s942_s23 = scalar_lea.vmem %s977_s4, %s984_s18 }
  0x10   : > { %s917_s6 = scalar_lea.vmem %s973_s0, %s705_s28  ;;  %755 = vmatpush3.bf16.msra.mxu0 %v817_v2  ;;  %784 = vmatpush3.bf16.msra.mxu1 %v817_v2  ;;  %s948_s26 = scalar_lea.vmem %s978_s5, %s984_s18  ;;  %494 = vst [vmem:[%s942_s23] sm:$0x1] %v851_v12 }
  0x11   : > { %v823_v4 = vld [vmem:[%s917_s6] sm:$0xff]   ;;  %v825_v5 = vld [vmem:[%s917_s6 + $0x10] sm:$0xff]   ;;  %756 = vmatprep.subr.bf16.mxu0 %v818_v3  ;;  %777 = vmatprep.subr.bf16.mxu1 %v818_v3  ;;  %v824_v10 = vld [vmem:[%s917_s6 + $0x8] sm:$0xff]   ;;  %495 = vst [vmem:[%s948_s26] sm:$0x1] %v851_v12  ;;  %s273_s7 = scalar_lea.vmem %s976_s3, %s705_s28 }
  0x12   : > { %766 = vmatprep.mubr.bf16.mxu0 %v823_v4  ;;  %770 = vmatprep.mubr.bf16.mxu1 %v825_v5  ;;  %v826_v11 = vld [vmem:[%s917_s6 + $0x18] sm:$0xff]  }
  0x14   : > { %757 = vmatpush3.bf16.msra.mxu0 %v818_v3  ;;  %785 = vmatpush3.bf16.msra.mxu1 %v818_v3 }
  0x15   : > { %758 = vmatprep.subr.bf16.mxu0 %v819_v6  ;;  %778 = vmatprep.subr.bf16.mxu1 %v819_v6 }
  0x17   : > { %v496_v1 = vld [vmem:[%s942_s23] sm:$0x1] }
  0x18   : > { %759 = vmatpush3.bf16.msra.mxu0 %v819_v6  ;;  %786 = vmatpush3.bf16.msra.mxu1 %v819_v6  ;;  %v512_v4 = vld [vmem:[%s948_s26] sm:$0x1] }
  0x19   : > { %760 = vmatprep.subr.bf16.mxu0 %v820_v7  ;;  %779 = vmatprep.subr.bf16.mxu1 %v820_v7 }
  0x1c   : > { %761 = vmatpush3.bf16.msra.mxu0 %v820_v7  ;;  %787 = vmatpush3.bf16.msra.mxu1 %v820_v7 }
  0x1d   : > { %762 = vmatprep.subr.bf16.mxu0 %v821_v8  ;;  %780 = vmatprep.subr.bf16.mxu1 %v821_v8 }
  0x20   : > { %763 = vmatpush3.bf16.msra.mxu0 %v821_v8  ;;  %788 = vmatpush3.bf16.msra.mxu1 %v821_v8 }
  0x21   : > { %764 = vmatprep.subr.bf16.mxu0 %v822_v9  ;;  %781 = vmatprep.subr.bf16.mxu1 %v822_v9 }
  0x24   : > { %765 = vmatpush3.bf16.msra.mxu0 %v822_v9  ;;  %789 = vmatpush3.bf16.msra.mxu1 %v822_v9 }
  0x27   : > { %767 = vmatmul.mubr.bf16.vlgmr.msra.gmra.mrb[0].mxu0 %v824_v10  ;;  %771 = vmatmul.mubr.bf16.vlgmr.msra.gmra.mrb[0].mxu1 %v826_v11 }
  0xfa   : > { %v768_v14 = vpop.f32.mrb[0].mxu0  ;;  %v772_v15 = vpop.f32.mrb[0].mxu1 }
  0xfb   : > { %v419_v16 = vpop.f32.mrb[1].mxu0  ;;  %v444_v17 = vadd.f32 %v772_v15, %v682_v13  ;;  %v435_v18 = vpop.f32.mrb[1].mxu1  ;;  %v428_v23 = vadd.f32 %v768_v14, %v682_v13 }
  0xfc   : > { %v420_v19 = vadd.f32 %v682_v13, %v419_v16  ;;  %v769_v20 = vpop.f32.mrb[2].mxu0  ;;  %v436_v21 = vadd.f32 %v682_v13, %v435_v18  ;;  %v773_v22 = vpop.f32.mrb[2].mxu1 }
  0xfd   : > { %v431_v24 = vadd.f32 %v769_v20, %v682_v13  ;;  %v422_v25 = vpop.f32.mrb[3].mxu0  ;;  %v447_v26 = vadd.f32 %v773_v22, %v682_v13  ;;  %v438_v27 = vpop.f32.mrb[3].mxu1  ;;  %v515_v37 = vmul.f32 %v428_v23, %v428_v23  ;;  %v519_v49 = vmul.f32 %v444_v17, %v444_v17 }
  0xfe   : > { %v423_v28 = vadd.f32 %v682_v13, %v422_v25  ;;  %v439_v29 = vadd.f32 %v682_v13, %v438_v27  ;;  %v513_v30 = vmul.f32 %v420_v19, %v420_v19  ;;  %v517_v43 = vmul.f32 %v436_v21, %v436_v21 }
  0xff   : > { %v723_v31 = vpack.c.bf16 %v431_v24, %v428_v23  ;;  %v733_v32 = vpack.c.bf16 %v447_v26, %v444_v17  ;;  %v516_v40 = vmul.f32 %v431_v24, %v431_v24  ;;  %v520_v52 = vmul.f32 %v447_v26, %v447_v26 }
 0x100   : > { %v718_v33 = vpack.c.bf16 %v423_v28, %v420_v19  ;;  %v497_v34 = vadd.f32 %v423_v28, %v420_v19  ;;  %v514_v35 = vmul.f32 %v423_v28, %v423_v28  ;;  %v728_v36 = vpack.c.bf16 %v439_v29, %v436_v21 }
 0x101   : > { %735 = vst [vmem:[%s273_s7 + $0x8] sm:$0xff] %v723_v31   ;;  %737 = vst [vmem:[%s273_s7 + $0x18] sm:$0xff] %v733_v32   ;;  %v518_v48 = vmul.f32 %v439_v29, %v439_v29 }
 0x102   : > { %719 = vst [vmem:[%s273_s7] sm:$0xff] %v718_v33   ;;  %v498_v38 = vadd.f32 %v497_v34, %v428_v23  ;;  %v521_v39 = vadd.f32 %v514_v35, %v513_v30  ;;  %736 = vst [vmem:[%s273_s7 + $0x10] sm:$0xff] %v728_v36  }
 0x104   : > { %v522_v41 = vadd.f32 %v521_v39, %v515_v37  ;;  %v499_v42 = vadd.f32 %v498_v38, %v431_v24 }
 0x106   : > { %v500_v44 = vadd.f32 %v499_v42, %v436_v21  ;;  %v523_v45 = vadd.f32 %v522_v41, %v516_v40 }
 0x108   : > { %v524_v46 = vadd.f32 %v523_v45, %v517_v43  ;;  %v501_v47 = vadd.f32 %v500_v44, %v439_v29 }
 0x10a   : > { %v502_v50 = vadd.f32 %v501_v47, %v444_v17  ;;  %v525_v51 = vadd.f32 %v524_v46, %v518_v48 }
 0x10c   : > { %v503_v53 = vadd.f32 %v502_v50, %v447_v26  ;;  %v526_v54 = vadd.f32 %v525_v51, %v519_v49 }
 0x10e   : > { %v504_v55 = vrot.slane %v503_v53, 4  ;;  %v527_v56 = vadd.f32 %v526_v54, %v520_v52 }
 0x110   : > { %v505_v57 = vadd.f32 %v504_v55, %v503_v53  ;;  %v528_v58 = vrot.slane %v527_v56, 4 }
 0x112   : > { %v506_v59 = vrot.slane %v505_v57, 2  ;;  %v529_v60 = vadd.f32 %v528_v58, %v527_v56 }
 0x114   : > { %v507_v61 = vadd.f32 %v506_v59, %v505_v57  ;;  %v530_v62 = vrot.slane %v529_v60, 2 }
 0x116   : > { %v508_v63 = vrot.slane %v507_v61, 1  ;;  %v531_v0 = vadd.f32 %v530_v62, %v529_v60 }
 0x118   : > { %v509_v2 = vadd.f32 %v508_v63, %v507_v61  ;;  %v532_v3 = vrot.slane %v531_v0, 1 }
 0x11a   : > { %v510_v5 = vadd.f32 %v509_v2, %v496_v1  ;;  %v533_v6 = vadd.f32 %v532_v3, %v531_v0 }
 0x11c   : > { %511 = vst [vmem:[%s942_s23] sm:$0x1] %v510_v5  ;;  %v534_v7 = vadd.f32 %v533_v6, %v512_v4 }
 0x11e   : > { %535 = vst [vmem:[%s948_s26] sm:$0x1] %v534_v7 }
 0x11f PF: > { %s16_s20 = sadd.s32 1, %s849_s20   ;;  %s979_s18 = smov %s845_s19 }
 0x120   : > { %p13_p5 = scmp.ge.s32.totalorder %s16_s20, 4   ;;  %s980_s19 = smov %s982_s21 }
 0x122   :  { %15 = sbr.rel (!%p13_p5) target bundleno = 2 (0x2), region = 90 }

// kernel: _lambda_.78
= control target key start
LH: loop header
LB: loop body
LE: loop exit
PB: predicated region body
PF: predicated region fallthrough
CT: control target
= control target key end

     0   :  { %s911_s12 = smov 0   ;;  %s913_s13 = smov 0   ;;  %s1193_s0 = inlined_call_operand.vmem [shape: bf16[2,256,64], index: 0, kind: input, shape index: {}]   ;;  %s1194_s1 = inlined_call_operand.vmem [shape: f32[2,1,64], index: 1, kind: input, shape index: {}]   ;;  %s1195_s2 = inlined_call_operand.vmem [shape: f32[2,1,64], index: 2, kind: input, shape index: {}]   ;;  %s1196_s3 = inlined_call_operand.vmem [shape: bf16[2,256,64], index: 3, kind: output, shape index: {}]  }
   0x1   :  { %s915_s14 = smov 0  }
   0x2 LB: > { %s25_s15 = sadd.s32 1, %s885_s13  ;;  %p689_p0 = scmp.ge.s32.totalorder %s889_s14, 1  ;;  %s889_s14 = sphi %s915_s14, %s13_s14   ;;  %s885_s13 = sphi %s913_s13, %s1198_s13   ;;  %s881_s12 = sphi %s911_s12, %s1197_s12  }
   0x3   : > { %p27_p1 = scmp.ge.s32.totalorder %s25_s15, 2  ;;  %p174_p2 = scmp.lt.s32.totalorder %s889_s14, 3 }
   0x5   : > { %s1200_s15 = smov (%p27_p1, %s25_s15), 0  ;;  %p175_p3 = pnand %p689_p0, %p174_p2 }
   0x6   : > { %p213_p4 = scmp.lt.s32.totalorder (!%p175_p3), %s881_s12, 1  ;;  %v310_v0 = vlaneseq (!%p175_p3)  ;;  %vm547_vm0 = vcmask (!%p175_p3), 519168  }
   0x7   : > { %178 = sbr.rel (%p175_p3) target bundleno = 69 (0x45), region = 32 }
   0x8   : > { %v931_v1 = vshrl.u32 (!%p175_p3), %v310_v0, 7 }
   0xa   : > { %v312_v5 = vsub.s32 (!%p175_p3), 0, %v931_v1 }
   0xe   : > { %s1202_s12 = smov (!%p213_p4, %s881_s12), 1 }
   0xf   : > { %s728_s16 = sshll.u32 %s1202_s12, 7  ;;  %s224_s19 = scalar_lea.vmem %s1194_s1, %s1202_s12 }
  0x10   : > { %s943_s22 = scalar_lea.vmem %s1193_s0, %s728_s16  ;;  %s227_s25 = scalar_lea.vmem %s1195_s2, %s1202_s12  ;;  %v302_v2 = vld [vmem:[%s224_s19] sm:$0x1] }
  0x11   : > { %v303_v3 = vmul.f32 0.00390625, %v302_v2  ;;  %v304_v4 = vld [vmem:[%s227_s25] sm:$0x1]  ;;  %v826_v9 = vld [vmem:[%s943_s22 + $0x8] sm:$0xff]   ;;  %v827_v13 = vld [vmem:[%s943_s22 + $0x10] sm:$0xff]   ;;  %s1070_s28 = scalar_lea.vmem %s1196_s3, %s728_s16 }
  0x12   : > { %v763_v6 = vld [vmem:[%s943_s22] sm:$0xff]   ;;  %v305_v7 = vmul.f32 0.00390625, %v304_v4  ;;  %v828_v14 = vld [vmem:[%s943_s22 + $0x18] sm:$0xff]   ;;  %v768_v18 = vunpack.c.l.bf16 %v826_v9  ;;  %v830_v19 = vld [vmem:[%s943_s22 + $0x28] sm:$0xff]   ;;  %v769_v21 = vunpack.c.h.bf16 %v826_v9  ;;  %v772_v22 = vunpack.c.l.bf16 %v827_v13 }
  0x13   : > { %v306_v8 = vmul.f32 %v303_v3, %v303_v3  ;;  %v764_v10 = vunpack.c.l.bf16 %v763_v6  ;;  %v954_v12 = vrot.slane %v303_v3, %v312_v5  ;;  %v829_v15 = vld [vmem:[%s943_s22 + $0x20] sm:$0xff]   ;;  %v765_v17 = vunpack.c.h.bf16 %v763_v6  ;;  %v831_v20 = vld [vmem:[%s943_s22 + $0x30] sm:$0xff]   ;;  %v832_v25 = vld [vmem:[%s943_s22 + $0x38] sm:$0xff]  }
  0x14   : > { %v773_v23 = vunpack.c.h.bf16 %v827_v13  ;;  %v776_v24 = vunpack.c.l.bf16 %v828_v14  ;;  %v777_v28 = vunpack.c.h.bf16 %v828_v14  ;;  %v780_v29 = vunpack.c.l.bf16 %v829_v15  ;;  %v833_v37 = vld [vmem:[%s943_s22 + $0x40] sm:$0xff]   ;;  %v834_v46 = vld [vmem:[%s943_s22 + $0x48] sm:$0xff]   ;;  %v835_v47 = vld [vmem:[%s943_s22 + $0x50] sm:$0xff]  }
  0x15   : > { %v307_v11 = vsub.f32 %v305_v7, %v306_v8  ;;  %v963_v26 = vsub.f32 %v764_v10, %v954_v12  ;;  %v781_v30 = vunpack.c.h.bf16 %v829_v15  ;;  %v784_v31 = vunpack.c.l.bf16 %v830_v19  ;;  %v836_v52 = vld [vmem:[%s943_s22 + $0x58] sm:$0xff]   ;;  %v837_v53 = vld [vmem:[%s943_s22 + $0x60] sm:$0xff]   ;;  %v838_v58 = vld [vmem:[%s943_s22 + $0x68] sm:$0xff]  }
  0x16   : > { %v785_v32 = vunpack.c.h.bf16 %v830_v19  ;;  %v788_v33 = vunpack.c.l.bf16 %v831_v20  ;;  %v789_v34 = vunpack.c.h.bf16 %v831_v20  ;;  %v792_v35 = vunpack.c.l.bf16 %v832_v25  ;;  %v839_v63 = vld [vmem:[%s943_s22 + $0x70] sm:$0xff]   ;;  %v840_v0 = vld [vmem:[%s943_s22 + $0x78] sm:$0xff]  }
  0x17   : > { %v308_v16 = vmax.f32 %v307_v11, 0.0  ;;  %v793_v36 = vunpack.c.h.bf16 %v832_v25  ;;  %v316_v38 = vsub.f32 %v765_v17, %v954_v12  ;;  %v317_v39 = vsub.f32 %v768_v18, %v954_v12 }
  0x18   : > { %v318_v40 = vsub.f32 %v769_v21, %v954_v12  ;;  %v319_v41 = vsub.f32 %v772_v22, %v954_v12  ;;  %v320_v42 = vsub.f32 %v773_v23, %v954_v12  ;;  %v321_v43 = vsub.f32 %v776_v24, %v954_v12 }
  0x19   : > { %v347_v27 = vadd.f32 1e-05, %v308_v16  ;;  %v322_v44 = vsub.f32 %v777_v28, %v954_v12  ;;  %v974_v45 = vsub.f32 %v780_v29, %v954_v12  ;;  %v979_v48 = vsub.f32 %v781_v30, %v954_v12 }
  0x1a   : > { %v982_v49 = vsub.f32 %v784_v31, %v954_v12  ;;  %v985_v50 = vsub.f32 %v785_v32, %v954_v12  ;;  %v796_v51 = vunpack.c.l.bf16 %v833_v37  ;;  %v990_v54 = vsub.f32 %v788_v33, %v954_v12 }
  0x1b   : > { %865 = vrsqrt.f32 %v347_v27  ;;  %v993_v55 = vsub.f32 %v789_v34, %v954_v12  ;;  %v996_v56 = vsub.f32 %v792_v35, %v954_v12  ;;  %v999_v57 = vsub.f32 %v793_v36, %v954_v12 }
  0x1c   : > { %v797_v59 = vunpack.c.h.bf16 %v833_v37  ;;  %v800_v60 = vunpack.c.l.bf16 %v834_v46  ;;  %v801_v61 = vunpack.c.h.bf16 %v834_v46  ;;  %v804_v62 = vunpack.c.l.bf16 %v835_v47 }
  0x1d   : > { %v805_v2 = vunpack.c.h.bf16 %v835_v47  ;;  %v808_v3 = vunpack.c.l.bf16 %v836_v52  ;;  %v809_v4 = vunpack.c.h.bf16 %v836_v52  ;;  %v812_v6 = vunpack.c.l.bf16 %v837_v53 }
  0x1e   : > { %v1005_v7 = vsub.f32 %v796_v51, %v954_v12  ;;  %v813_v8 = vunpack.c.h.bf16 %v837_v53  ;;  %v816_v9 = vunpack.c.l.bf16 %v838_v58  ;;  %v817_v10 = vunpack.c.h.bf16 %v838_v58 }
  0x1f   : > { %v820_v11 = vunpack.c.l.bf16 %v839_v63  ;;  %v821_v13 = vunpack.c.h.bf16 %v839_v63  ;;  %v824_v14 = vunpack.c.l.bf16 %v840_v0  ;;  %v825_v15 = vunpack.c.h.bf16 %v840_v0 }
  0x20   : > { %v1008_v16 = vsub.f32 %v797_v59, %v954_v12  ;;  %v1011_v17 = vsub.f32 %v800_v60, %v954_v12  ;;  %v1014_v18 = vsub.f32 %v801_v61, %v954_v12  ;;  %v1017_v19 = vsub.f32 %v804_v62, %v954_v12 }
  0x21   : > { %v1020_v21 = vsub.f32 %v805_v2, %v954_v12  ;;  %v1023_v22 = vsub.f32 %v808_v3, %v954_v12  ;;  %v1026_v23 = vsub.f32 %v809_v4, %v954_v12  ;;  %v1029_v24 = vsub.f32 %v812_v6, %v954_v12 }
  0x22   : > { %v1036_v27 = vsub.f32 %v813_v8, %v954_v12  ;;  %v1039_v28 = vsub.f32 %v816_v9, %v954_v12  ;;  %v1042_v29 = vsub.f32 %v817_v10, %v954_v12  ;;  %v1045_v30 = vsub.f32 %v820_v11, %v954_v12 }
  0x23   : > { %v1048_v31 = vsub.f32 %v821_v13, %v954_v12  ;;  %v1051_v1 = vsub.f32 %v824_v14, %v954_v12 }
  0x25   : > { %v866_v20 = vpop.eup %865 }
  0x26   : > { %v1033_v25 = vrot.slane %v866_v20, %v312_v5  ;;  %v1054_v5 = vsub.f32 %v825_v15, %v954_v12 }
  0x28   : > { %v355_v32 = vmul.f32 %v1033_v25, %v963_v26  ;;  %v356_v33 = vmul.f32 %v1033_v25, %v316_v38  ;;  %v357_v34 = vmul.f32 %v1033_v25, %v317_v39  ;;  %v358_v35 = vmul.f32 %v1033_v25, %v318_v40 }
  0x29   : > { %v359_v36 = vmul.f32 %v1033_v25, %v319_v41  ;;  %v360_v37 = vmul.f32 %v1033_v25, %v320_v42  ;;  %v361_v46 = vmul.f32 %v1033_v25, %v321_v43  ;;  %v362_v47 = vmul.f32 %v1033_v25, %v322_v44 }
  0x2a   : > { %v387_v51 = vmax.f32 %v355_v32, 0.0  ;;  %v388_v12 = vmax.f32 %v356_v33, 0.0  ;;  %v389_v52 = vmax.f32 %v357_v34, 0.0  ;;  %v390_v53 = vmax.f32 %v358_v35, 0.0 }
  0x2b   : > { %v391_v26 = vmax.f32 %v359_v36, 0.0  ;;  %v392_v38 = vmax.f32 %v360_v37, 0.0  ;;  %v393_v39 = vmax.f32 %v361_v46, 0.0  ;;  %v394_v40 = vmax.f32 %v362_v47, 0.0 }
  0x2c   : > { %v730_v41 = vpack.c.bf16 %v387_v51, %v387_v51  ;;  %v731_v42 = vpack.c.bf16 %v388_v12, %v388_v12  ;;  %v732_v43 = vpack.c.bf16 %v389_v52, %v389_v52  ;;  %v733_v44 = vpack.c.bf16 %v390_v53, %v390_v53 }
  0x2d   : > { %v734_v58 = vpack.c.bf16 %v391_v26, %v391_v26  ;;  %v735_v59 = vpack.c.bf16 %v392_v38, %v392_v38  ;;  %v736_v60 = vpack.c.bf16 %v393_v39, %v393_v39  ;;  %v737_v61 = vpack.c.bf16 %v394_v40, %v394_v40 }
  0x2e   : > { %548 = vst.msk [vmem:[%s1070_s28] sm:$0xf] %vm547_vm0, %v730_v41  ;;  %549 = vst.msk [vmem:[%s1070_s28 + $0x4] sm:$0xf] %vm547_vm0, %v731_v42  ;;  %v363_v62 = vmul.f32 %v1033_v25, %v974_v45  ;;  %v364_v63 = vmul.f32 %v1033_v25, %v979_v48  ;;  %v365_v0 = vmul.f32 %v1033_v25, %v982_v49 }
  0x2f   : > { %550 = vst.msk [vmem:[%s1070_s28 + $0x8] sm:$0xf] %vm547_vm0, %v732_v43  ;;  %551 = vst.msk [vmem:[%s1070_s28 + $0xc] sm:$0xf] %vm547_vm0, %v733_v44  ;;  %v366_v2 = vmul.f32 %v1033_v25, %v985_v50  ;;  %v367_v45 = vmul.f32 %v1033_v25, %v990_v54  ;;  %v368_v48 = vmul.f32 %v1033_v25, %v993_v55 }
  0x30   : > { %552 = vst.msk [vmem:[%s1070_s28 + $0x10] sm:$0xf] %vm547_vm0, %v734_v58  ;;  %553 = vst.msk [vmem:[%s1070_s28 + $0x14] sm:$0xf] %vm547_vm0, %v735_v59  ;;  %v369_v49 = vmul.f32 %v1033_v25, %v996_v56  ;;  %v370_v50 = vmul.f32 %v1033_v25, %v999_v57  ;;  %v395_v3 = vmax.f32 %v363_v62, 0.0  ;;  %v396_v4 = vmax.f32 %v364_v63, 0.0 }
  0x31   : > { %554 = vst.msk [vmem:[%s1070_s28 + $0x18] sm:$0xf] %vm547_vm0, %v736_v60  ;;  %555 = vst.msk [vmem:[%s1070_s28 + $0x1c] sm:$0xf] %vm547_vm0, %v737_v61  ;;  %v397_v6 = vmax.f32 %v365_v0, 0.0  ;;  %v398_v8 = vmax.f32 %v366_v2, 0.0  ;;  %v371_v33 = vmul.f32 %v1033_v25, %v1005_v7  ;;  %v372_v34 = vmul.f32 %v1033_v25, %v1008_v16 }
  0x32   : > { %v399_v9 = vmax.f32 %v367_v45, 0.0  ;;  %v400_v10 = vmax.f32 %v368_v48, 0.0  ;;  %v401_v54 = vmax.f32 %v369_v49, 0.0  ;;  %v402_v11 = vmax.f32 %v370_v50, 0.0 }
  0x33   : > { %v738_v13 = vpack.c.bf16 %v395_v3, %v395_v3  ;;  %v739_v55 = vpack.c.bf16 %v396_v4, %v396_v4  ;;  %v740_v56 = vpack.c.bf16 %v397_v6, %v397_v6  ;;  %v741_v14 = vpack.c.bf16 %v398_v8, %v398_v8 }
  0x34   : > { %v742_v57 = vpack.c.bf16 %v399_v9, %v399_v9  ;;  %v743_v15 = vpack.c.bf16 %v400_v10, %v400_v10  ;;  %v744_v20 = vpack.c.bf16 %v401_v54, %v401_v54  ;;  %v745_v32 = vpack.c.bf16 %v402_v11, %v402_v11 }
  0x35   : > { %556 = vst.msk [vmem:[%s1070_s28 + $0x20] sm:$0xf] %vm547_vm0, %v738_v13  ;;  %557 = vst.msk [vmem:[%s1070_s28 + $0x24] sm:$0xf] %vm547_vm0, %v739_v55  ;;  %v373_v35 = vmul.f32 %v1033_v25, %v1011_v17  ;;  %v374_v36 = vmul.f32 %v1033_v25, %v1014_v18  ;;  %v375_v7 = vmul.f32 %v1033_v25, %v1017_v19  ;;  %v403_v37 = vmax.f32 %v371_v33, 0.0 }
  0x36   : > { %558 = vst.msk [vmem:[%s1070_s28 + $0x28] sm:$0xf] %vm547_vm0, %v740_v56  ;;  %559 = vst.msk [vmem:[%s1070_s28 + $0x2c] sm:$0xf] %vm547_vm0, %v741_v14  ;;  %v376_v16 = vmul.f32 %v1033_v25, %v1020_v21  ;;  %v377_v17 = vmul.f32 %v1033_v25, %v1023_v22  ;;  %v378_v18 = vmul.f32 %v1033_v25, %v1026_v23  ;;  %v404_v46 = vmax.f32 %v372_v34, 0.0 }
  0x37   : > { %560 = vst.msk [vmem:[%s1070_s28 + $0x30] sm:$0xf] %vm547_vm0, %v742_v57  ;;  %561 = vst.msk [vmem:[%s1070_s28 + $0x34] sm:$0xf] %vm547_vm0, %v743_v15  ;;  %v405_v47 = vmax.f32 %v373_v35, 0.0  ;;  %v406_v51 = vmax.f32 %v374_v36, 0.0  ;;  %v746_v26 = vpack.c.bf16 %v403_v37, %v403_v37  ;;  %v379_v42 = vmul.f32 %v1033_v25, %v1029_v24 }
  0x38   : > { %562 = vst.msk [vmem:[%s1070_s28 + $0x38] sm:$0xf] %vm547_vm0, %v744_v20  ;;  %563 = vst.msk [vmem:[%s1070_s28 + $0x3c] sm:$0xf] %vm547_vm0, %v745_v32  ;;  %v407_v12 = vmax.f32 %v375_v7, 0.0  ;;  %v408_v52 = vmax.f32 %v376_v16, 0.0  ;;  %v747_v21 = vpack.c.bf16 %v404_v46, %v404_v46  ;;  %v380_v43 = vmul.f32 %v1033_v25, %v1036_v27 }
  0x39   : > { %v409_v19 = vmax.f32 %v377_v17, 0.0  ;;  %v410_v53 = vmax.f32 %v378_v18, 0.0  ;;  %v748_v22 = vpack.c.bf16 %v405_v47, %v405_v47  ;;  %v749_v38 = vpack.c.bf16 %v406_v51, %v406_v51  ;;  %564 = vst.msk [vmem:[%s1070_s28 + $0x40] sm:$0xf] %vm547_vm0, %v746_v26 }
  0x3a   : > { %v750_v23 = vpack.c.bf16 %v407_v12, %v407_v12  ;;  %v751_v39 = vpack.c.bf16 %v408_v52, %v408_v52  ;;  %565 = vst.msk [vmem:[%s1070_s28 + $0x44] sm:$0xf] %vm547_vm0, %v747_v21  ;;  %v381_v44 = vmul.f32 %v1033_v25, %v1039_v28  ;;  %v382_v58 = vmul.f32 %v1033_v25, %v1042_v29 }
  0x3b   : > { %v752_v40 = vpack.c.bf16 %v409_v19, %v409_v19  ;;  %v753_v41 = vpack.c.bf16 %v410_v53, %v410_v53  ;;  %566 = vst.msk [vmem:[%s1070_s28 + $0x48] sm:$0xf] %vm547_vm0, %v748_v22  ;;  %567 = vst.msk [vmem:[%s1070_s28 + $0x4c] sm:$0xf] %vm547_vm0, %v749_v38  ;;  %v383_v24 = vmul.f32 %v1033_v25, %v1045_v30  ;;  %v411_v59 = vmax.f32 %v379_v42, 0.0 }
  0x3c   : > { %568 = vst.msk [vmem:[%s1070_s28 + $0x50] sm:$0xf] %vm547_vm0, %v750_v23  ;;  %569 = vst.msk [vmem:[%s1070_s28 + $0x54] sm:$0xf] %vm547_vm0, %v751_v39  ;;  %v384_v27 = vmul.f32 %v1033_v25, %v1048_v31  ;;  %v385_v28 = vmul.f32 %v1033_v25, %v1051_v1  ;;  %v386_v29 = vmul.f32 %v1033_v25, %v1054_v5  ;;  %v412_v60 = vmax.f32 %v380_v43, 0.0 }
  0x3d   : > { %570 = vst.msk [vmem:[%s1070_s28 + $0x58] sm:$0xf] %vm547_vm0, %v752_v40  ;;  %571 = vst.msk [vmem:[%s1070_s28 + $0x5c] sm:$0xf] %vm547_vm0, %v753_v41  ;;  %v413_v61 = vmax.f32 %v381_v44, 0.0  ;;  %v414_v62 = vmax.f32 %v382_v58, 0.0  ;;  %v754_v1 = vpack.c.bf16 %v411_v59, %v411_v59 }
  0x3e   : > { %v415_v63 = vmax.f32 %v383_v24, 0.0  ;;  %v416_v30 = vmax.f32 %v384_v27, 0.0  ;;  %v417_v0 = vmax.f32 %v385_v28, 0.0  ;;  %v418_v31 = vmax.f32 %v386_v29, 0.0 }
  0x3f   : > { %v755_v2 = vpack.c.bf16 %v412_v60, %v412_v60  ;;  %v756_v45 = vpack.c.bf16 %v413_v61, %v413_v61  ;;  %v757_v25 = vpack.c.bf16 %v414_v62, %v414_v62  ;;  %572 = vst.msk [vmem:[%s1070_s28 + $0x60] sm:$0xf] %vm547_vm0, %v754_v1 }
  0x40   : > { %v758_v5 = vpack.c.bf16 %v415_v63, %v415_v63  ;;  %v759_v48 = vpack.c.bf16 %v416_v30, %v416_v30  ;;  %v760_v49 = vpack.c.bf16 %v417_v0, %v417_v0  ;;  %v761_v50 = vpack.c.bf16 %v418_v31, %v418_v31 }
  0x41   : > { %573 = vst.msk [vmem:[%s1070_s28 + $0x64] sm:$0xf] %vm547_vm0, %v755_v2  ;;  %574 = vst.msk [vmem:[%s1070_s28 + $0x68] sm:$0xf] %vm547_vm0, %v756_v45 }
  0x42   : > { %575 = vst.msk [vmem:[%s1070_s28 + $0x6c] sm:$0xf] %vm547_vm0, %v757_v25  ;;  %576 = vst.msk [vmem:[%s1070_s28 + $0x70] sm:$0xf] %vm547_vm0, %v758_v5 }
  0x43   : > { %577 = vst.msk [vmem:[%s1070_s28 + $0x74] sm:$0xf] %vm547_vm0, %v759_v48  ;;  %578 = vst.msk [vmem:[%s1070_s28 + $0x78] sm:$0xf] %vm547_vm0, %v760_v49 }
  0x44   : > { %579 = vst.msk [vmem:[%s1070_s28 + $0x7c] sm:$0xf] %vm547_vm0, %v761_v50 }
  0x45 PF: > { %s13_s14 = sadd.s32 1, %s889_s14   ;;  %s1197_s12 = smov %s885_s13 }
  0x46   : > { %p10_p5 = scmp.ge.s32.totalorder %s13_s14, 4   ;;  %s1198_s13 = smov %s1200_s15 }
  0x48   :  { %12 = sbr.rel (!%p10_p5) target bundleno = 2 (0x2), region = 68 }

// kernel: _lambda_.79
= control target key start
LH: loop header
LB: loop body
LE: loop exit
PB: predicated region body
PF: predicated region fallthrough
CT: control target
= control target key end

     0   :  { %s10716_s1 = inlined_call_operand.vmem [shape: bf16[3200,512], index: 1, kind: input, shape index: {}]   ;;  %s10717_s0 = inlined_call_operand.vmem [shape: bf16[8,3200], index: 0, kind: input, shape index: {}]   ;;  %s10718_s2 = inlined_call_operand.vmem [shape: f32[8,1], index: 2, kind: input, shape index: {}]   ;;  %s10719_s3 = inlined_call_operand.vmem [shape: bf16[8,512], index: 3, kind: output, shape index: {}]  }
   0x1   :  { %v6945_v0 = vld [vmem:[%s10716_s1 + $0x4] ss:$16 sps:$4 sm:$0xff]   ;;  %v6947_v1 = vld [vmem:[%s10716_s1 + $0xc] ss:$16 sps:$4 sm:$0xff]   ;;  %v6949_v2 = vld [vmem:[%s10716_s1] ss:$16 sps:$4 sm:$0xff]  }
   0x2   :  { %4922 = vmatprep.subr.bf16.mxu0 %v6945_v0  ;;  %v6950_v3 = vld [vmem:[%s10716_s1 + $0x8] ss:$16 sps:$4 sm:$0xff]   ;;  %5455 = vmatprep.subr.bf16.mxu1 %v6947_v1  ;;  %v6951_v4 = vld [vmem:[%s10716_s1 + $0x24] ss:$16 sps:$4 sm:$0xff]   ;;  %v6953_v5 = vld [vmem:[%s10716_s1 + $0x2c] ss:$16 sps:$4 sm:$0xff]  }
   0x3   :  { %4923 = vmatpush1.bf16.msra.mxu0 %v6949_v2  ;;  %5456 = vmatpush1.bf16.msra.mxu1 %v6950_v3  ;;  %v6955_v6 = vld [vmem:[%s10716_s1 + $0x20] ss:$16 sps:$4 sm:$0xff]   ;;  %v6956_v7 = vld [vmem:[%s10716_s1 + $0x28] ss:$16 sps:$4 sm:$0xff]   ;;  %v6957_v8 = vld [vmem:[%s10716_s1 + $0x44] ss:$16 sps:$4 sm:$0xff]  }
   0x4   :  { %4924 = vmatprep.subr.bf16.mxu0 %v6951_v4  ;;  %5457 = vmatprep.subr.bf16.mxu1 %v6953_v5  ;;  %v6959_v9 = vld [vmem:[%s10716_s1 + $0x4c] ss:$16 sps:$4 sm:$0xff]   ;;  %v6961_v10 = vld [vmem:[%s10716_s1 + $0x40] ss:$16 sps:$4 sm:$0xff]   ;;  %v6962_v11 = vld [vmem:[%s10716_s1 + $0x48] ss:$16 sps:$4 sm:$0xff]  }
   0x5   :  { %v6963_v12 = vld [vmem:[%s10716_s1 + $0x64] ss:$16 sps:$4 sm:$0xff]   ;;  %v6965_v13 = vld [vmem:[%s10716_s1 + $0x6c] ss:$16 sps:$4 sm:$0xff]   ;;  %v6967_v14 = vld [vmem:[%s10716_s1 + $0x60] ss:$16 sps:$4 sm:$0xff]  }
   0x6   :  { %v6968_v15 = vld [vmem:[%s10716_s1 + $0x68] ss:$16 sps:$4 sm:$0xff]   ;;  %v6969_v16 = vld [vmem:[%s10716_s1 + $0x84] ss:$16 sps:$4 sm:$0xff]   ;;  %v6971_v17 = vld [vmem:[%s10716_s1 + $0x8c] ss:$16 sps:$4 sm:$0xff]  }
   0x7   :  { %4925 = vmatpush1.bf16.msra.mxu0 %v6955_v6  ;;  %5458 = vmatpush1.bf16.msra.mxu1 %v6956_v7  ;;  %v6973_v18 = vld [vmem:[%s10716_s1 + $0x80] ss:$16 sps:$4 sm:$0xff]   ;;  %v6974_v19 = vld [vmem:[%s10716_s1 + $0x88] ss:$16 sps:$4 sm:$0xff]   ;;  %v6975_v20 = vld [vmem:[%s10716_s1 + $0xa4] ss:$16 sps:$4 sm:$0xff]  }
   0x8   :  { %4926 = vmatprep.subr.bf16.mxu0 %v6957_v8  ;;  %5459 = vmatprep.subr.bf16.mxu1 %v6959_v9  ;;  %v6977_v21 = vld [vmem:[%s10716_s1 + $0xac] ss:$16 sps:$4 sm:$0xff]   ;;  %v6979_v22 = vld [vmem:[%s10716_s1 + $0xa0] ss:$16 sps:$4 sm:$0xff]   ;;  %v6980_v23 = vld [vmem:[%s10716_s1 + $0xa8] ss:$16 sps:$4 sm:$0xff]  }
   0x9   :  { %v6981_v24 = vld [vmem:[%s10716_s1 + $0xc4] ss:$16 sps:$4 sm:$0xff]   ;;  %v6983_v25 = vld [vmem:[%s10716_s1 + $0xcc] ss:$16 sps:$4 sm:$0xff]   ;;  %v6985_v26 = vld [vmem:[%s10716_s1 + $0xc0] ss:$16 sps:$4 sm:$0xff]  }
   0xa   :  { %v6986_v27 = vld [vmem:[%s10716_s1 + $0xc8] ss:$16 sps:$4 sm:$0xff]   ;;  %v6987_v28 = vld [vmem:[%s10716_s1 + $0xe4] ss:$16 sps:$4 sm:$0xff]   ;;  %v6989_v29 = vld [vmem:[%s10716_s1 + $0xec] ss:$16 sps:$4 sm:$0xff]  }
   0xb   :  { %4927 = vmatpush1.bf16.msra.mxu0 %v6961_v10  ;;  %5460 = vmatpush1.bf16.msra.mxu1 %v6962_v11  ;;  %v6991_v30 = vld [vmem:[%s10716_s1 + $0xe0] ss:$16 sps:$4 sm:$0xff]   ;;  %v6992_v31 = vld [vmem:[%s10716_s1 + $0xe8] ss:$16 sps:$4 sm:$0xff]   ;;  %v6993_v32 = vld [vmem:[%s10716_s1 + $0x104] ss:$16 sps:$4 sm:$0xff]  }
   0xc   :  { %4928 = vmatprep.subr.bf16.mxu0 %v6963_v12  ;;  %5461 = vmatprep.subr.bf16.mxu1 %v6965_v13  ;;  %v6995_v33 = vld [vmem:[%s10716_s1 + $0x10c] ss:$16 sps:$4 sm:$0xff]   ;;  %v6997_v34 = vld [vmem:[%s10716_s1 + $0x100] ss:$16 sps:$4 sm:$0xff]   ;;  %v6998_v35 = vld [vmem:[%s10716_s1 + $0x108] ss:$16 sps:$4 sm:$0xff]  }
   0xd   :  { %v6999_v36 = vld [vmem:[%s10716_s1 + $0x124] ss:$16 sps:$4 sm:$0xff]   ;;  %v7001_v37 = vld [vmem:[%s10716_s1 + $0x12c] ss:$16 sps:$4 sm:$0xff]   ;;  %v7003_v38 = vld [vmem:[%s10716_s1 + $0x120] ss:$16 sps:$4 sm:$0xff]  }
   0xe   :  { %v7004_v39 = vld [vmem:[%s10716_s1 + $0x128] ss:$16 sps:$4 sm:$0xff]   ;;  %v7005_v40 = vld [vmem:[%s10716_s1 + $0x144] ss:$16 sps:$4 sm:$0xff]   ;;  %v7007_v41 = vld [vmem:[%s10716_s1 + $0x14c] ss:$16 sps:$4 sm:$0xff]  }
   0xf   :  { %4929 = vmatpush1.bf16.msra.mxu0 %v6967_v14  ;;  %5462 = vmatpush1.bf16.msra.mxu1 %v6968_v15  ;;  %v7009_v42 = vld [vmem:[%s10716_s1 + $0x140] ss:$16 sps:$4 sm:$0xff]   ;;  %v7010_v43 = vld [vmem:[%s10716_s1 + $0x148] ss:$16 sps:$4 sm:$0xff]   ;;  %v7011_v44 = vld [vmem:[%s10716_s1 + $0x164] ss:$16 sps:$4 sm:$0xff]  }
  0x10   :  { %4930 = vmatprep.subr.bf16.mxu0 %v6969_v16  ;;  %5463 = vmatprep.subr.bf16.mxu1 %v6971_v17  ;;  %v7013_v45 = vld [vmem:[%s10716_s1 + $0x16c] ss:$16 sps:$4 sm:$0xff]   ;;  %v15_v46 = vld [vmem:[%s10717_s0] sm:$0xff]  ;;  %v7016_v49 = vld [vmem:[%s10716_s1 + $0x168] ss:$16 sps:$4 sm:$0xff]  }
  0x11   :  { %v7015_v47 = vld [vmem:[%s10716_s1 + $0x160] ss:$16 sps:$4 sm:$0xff]   ;;  %v6015_v48 = vcombine.high %v15_v46, %v15_v46  ;;  %v7017_v50 = vld [vmem:[%s10716_s1 + $0x184] ss:$16 sps:$4 sm:$0xff]   ;;  %v7019_v51 = vld [vmem:[%s10716_s1 + $0x18c] ss:$16 sps:$4 sm:$0xff]   ;;  %v6014_v4 = vcombine.low %v15_v46, %v15_v46 }
  0x12   :  { %v7021_v52 = vld [vmem:[%s10716_s1 + $0x180] ss:$16 sps:$4 sm:$0xff]   ;;  %v7022_v53 = vld [vmem:[%s10716_s1 + $0x188] ss:$16 sps:$4 sm:$0xff]   ;;  %v7023_v54 = vld [vmem:[%s10716_s1 + $0x1a4] ss:$16 sps:$4 sm:$0xff]  }
  0x13   :  { %4931 = vmatpush1.bf16.msra.mxu0 %v6973_v18  ;;  %5464 = vmatpush1.bf16.msra.mxu1 %v6974_v19  ;;  %v7025_v55 = vld [vmem:[%s10716_s1 + $0x1ac] ss:$16 sps:$4 sm:$0xff]   ;;  %v7027_v56 = vld [vmem:[%s10716_s1 + $0x1a0] ss:$16 sps:$4 sm:$0xff]   ;;  %v7028_v57 = vld [vmem:[%s10716_s1 + $0x1a8] ss:$16 sps:$4 sm:$0xff]  }
  0x14   :  { %4932 = vmatprep.subr.bf16.mxu0 %v6975_v20  ;;  %5465 = vmatprep.subr.bf16.mxu1 %v6977_v21  ;;  %v7029_v58 = vld [vmem:[%s10716_s1 + $0x1c4] ss:$16 sps:$4 sm:$0xff]   ;;  %v7031_v59 = vld [vmem:[%s10716_s1 + $0x1cc] ss:$16 sps:$4 sm:$0xff]   ;;  %v7033_v60 = vld [vmem:[%s10716_s1 + $0x1c0] ss:$16 sps:$4 sm:$0xff]  }
  0x15   :  { %4954 = vmatprep.mubr.bf16.mxu0 %v6015_v48  ;;  %5487 = vmatprep.mubr.bf16.mxu1 %v6015_v48  ;;  %v7034_v61 = vld [vmem:[%s10716_s1 + $0x1c8] ss:$16 sps:$4 sm:$0xff]   ;;  %v7035_v62 = vld [vmem:[%s10716_s1 + $0x1e4] ss:$16 sps:$4 sm:$0xff]   ;;  %v7037_v63 = vld [vmem:[%s10716_s1 + $0x1ec] ss:$16 sps:$4 sm:$0xff]  }
  0x16   :  { %v7039_v0 = vld [vmem:[%s10716_s1 + $0x1e0] ss:$16 sps:$4 sm:$0xff]   ;;  %v7040_v1 = vld [vmem:[%s10716_s1 + $0x1e8] ss:$16 sps:$4 sm:$0xff]   ;;  %v7045_v2 = vld [vmem:[%s10716_s1 + $0x204] ss:$16 sps:$4 sm:$0xff]  }
  0x17   :  { %4933 = vmatpush1.bf16.msra.mxu0 %v6979_v22  ;;  %5466 = vmatpush1.bf16.msra.mxu1 %v6980_v23  ;;  %v7048_v3 = vld [vmem:[%s10716_s1 + $0x20c] ss:$16 sps:$4 sm:$0xff]   ;;  %v7043_v5 = vld [vmem:[%s10716_s1 + $0x200] ss:$16 sps:$4 sm:$0xff]   ;;  %v7046_v6 = vld [vmem:[%s10716_s1 + $0x208] ss:$16 sps:$4 sm:$0xff]  }
  0x18   :  { %4934 = vmatprep.subr.bf16.mxu0 %v6981_v24  ;;  %5467 = vmatprep.subr.bf16.mxu1 %v6983_v25  ;;  %v7051_v7 = vld [vmem:[%s10716_s1 + $0x224] ss:$16 sps:$4 sm:$0xff]   ;;  %v7054_v8 = vld [vmem:[%s10716_s1 + $0x22c] ss:$16 sps:$4 sm:$0xff]   ;;  %v7049_v9 = vld [vmem:[%s10716_s1 + $0x220] ss:$16 sps:$4 sm:$0xff]  }
  0x19   :  { %v7052_v10 = vld [vmem:[%s10716_s1 + $0x228] ss:$16 sps:$4 sm:$0xff]   ;;  %v7057_v11 = vld [vmem:[%s10716_s1 + $0x244] ss:$16 sps:$4 sm:$0xff]   ;;  %v7060_v12 = vld [vmem:[%s10716_s1 + $0x24c] ss:$16 sps:$4 sm:$0xff]  }
  0x1a   :  { %v7055_v13 = vld [vmem:[%s10716_s1 + $0x240] ss:$16 sps:$4 sm:$0xff]   ;;  %v7058_v14 = vld [vmem:[%s10716_s1 + $0x248] ss:$16 sps:$4 sm:$0xff]   ;;  %v7063_v15 = vld [vmem:[%s10716_s1 + $0x264] ss:$16 sps:$4 sm:$0xff]  }
  0x1b   :  { %4935 = vmatpush1.bf16.msra.mxu0 %v6985_v26  ;;  %5468 = vmatpush1.bf16.msra.mxu1 %v6986_v27  ;;  %v7066_v16 = vld [vmem:[%s10716_s1 + $0x26c] ss:$16 sps:$4 sm:$0xff]   ;;  %v7061_v17 = vld [vmem:[%s10716_s1 + $0x260] ss:$16 sps:$4 sm:$0xff]   ;;  %v7064_v18 = vld [vmem:[%s10716_s1 + $0x268] ss:$16 sps:$4 sm:$0xff]  }
  0x1c   :  { %4936 = vmatprep.subr.bf16.mxu0 %v6987_v28  ;;  %5469 = vmatprep.subr.bf16.mxu1 %v6989_v29  ;;  %v7069_v19 = vld [vmem:[%s10716_s1 + $0x284] ss:$16 sps:$4 sm:$0xff]   ;;  %v7072_v20 = vld [vmem:[%s10716_s1 + $0x28c] ss:$16 sps:$4 sm:$0xff]   ;;  %v7067_v21 = vld [vmem:[%s10716_s1 + $0x280] ss:$16 sps:$4 sm:$0xff]  }
  0x1d   :  { %v7070_v22 = vld [vmem:[%s10716_s1 + $0x288] ss:$16 sps:$4 sm:$0xff]   ;;  %v7075_v23 = vld [vmem:[%s10716_s1 + $0x2a4] ss:$16 sps:$4 sm:$0xff]   ;;  %v7078_v24 = vld [vmem:[%s10716_s1 + $0x2ac] ss:$16 sps:$4 sm:$0xff]  }
  0x1e   :  { %v7073_v25 = vld [vmem:[%s10716_s1 + $0x2a0] ss:$16 sps:$4 sm:$0xff]   ;;  %v7076_v26 = vld [vmem:[%s10716_s1 + $0x2a8] ss:$16 sps:$4 sm:$0xff]   ;;  %v7081_v27 = vld [vmem:[%s10716_s1 + $0x2c4] ss:$16 sps:$4 sm:$0xff]  }
  0x1f   :  { %4937 = vmatpush1.bf16.msra.mxu0 %v6991_v30  ;;  %5470 = vmatpush1.bf16.msra.mxu1 %v6992_v31  ;;  %v7084_v28 = vld [vmem:[%s10716_s1 + $0x2cc] ss:$16 sps:$4 sm:$0xff]   ;;  %v7079_v31 = vld [vmem:[%s10716_s1 + $0x2c0] ss:$16 sps:$4 sm:$0xff]   ;;  %v7106_v48 = vld [vmem:[%s10716_s1 + $0x348] ss:$16 sps:$4 sm:$0xff]  }
  0x20   :  { %4938 = vmatprep.subr.bf16.mxu0 %v6993_v32  ;;  %5471 = vmatprep.subr.bf16.mxu1 %v6995_v33  ;;  %v8475_v29 = vld [vmem:[%s10717_s0 + $0x8] sm:$0xff]  ;;  %v7087_v33 = vld [vmem:[%s10716_s1 + $0x2e4] ss:$16 sps:$4 sm:$0xff]  }
  0x21   :  { %v6017_v30 = vcombine.high %v8475_v29, %v8475_v29  ;;  %v7082_v32 = vld [vmem:[%s10716_s1 + $0x2c8] ss:$16 sps:$4 sm:$0xff]   ;;  %v7108_v46 = vld [vmem:[%s10716_s1 + $0x34c] ss:$16 sps:$4 sm:$0xff]  }
  0x23   :  { %4939 = vmatpush1.bf16.msra.mxu0 %v6997_v34  ;;  %5472 = vmatpush1.bf16.msra.mxu1 %v6998_v35  ;;  %v7090_v34 = vld [vmem:[%s10716_s1 + $0x2ec] ss:$16 sps:$4 sm:$0xff]   ;;  %v7085_v35 = vld [vmem:[%s10716_s1 + $0x2e0] ss:$16 sps:$4 sm:$0xff]  }
  0x24   :  { %4940 = vmatprep.subr.bf16.mxu0 %v6999_v36  ;;  %5473 = vmatprep.subr.bf16.mxu1 %v7001_v37  ;;  %v7088_v36 = vld [vmem:[%s10716_s1 + $0x2e8] ss:$16 sps:$4 sm:$0xff]   ;;  %v7093_v37 = vld [vmem:[%s10716_s1 + $0x304] ss:$16 sps:$4 sm:$0xff]  }
  0x27   :  { %4941 = vmatpush1.bf16.msra.mxu0 %v7003_v38  ;;  %5474 = vmatpush1.bf16.msra.mxu1 %v7004_v39  ;;  %v7096_v38 = vld [vmem:[%s10716_s1 + $0x30c] ss:$16 sps:$4 sm:$0xff]   ;;  %v7091_v39 = vld [vmem:[%s10716_s1 + $0x300] ss:$16 sps:$4 sm:$0xff]  }
  0x28   :  { %4942 = vmatprep.subr.bf16.mxu0 %v7005_v40  ;;  %5475 = vmatprep.subr.bf16.mxu1 %v7007_v41  ;;  %v7094_v40 = vld [vmem:[%s10716_s1 + $0x308] ss:$16 sps:$4 sm:$0xff]   ;;  %v7099_v41 = vld [vmem:[%s10716_s1 + $0x324] ss:$16 sps:$4 sm:$0xff]  }
  0x2b   :  { %4943 = vmatpush1.bf16.msra.mxu0 %v7009_v42  ;;  %5476 = vmatpush1.bf16.msra.mxu1 %v7010_v43  ;;  %v7102_v42 = vld [vmem:[%s10716_s1 + $0x32c] ss:$16 sps:$4 sm:$0xff]   ;;  %v7097_v43 = vld [vmem:[%s10716_s1 + $0x320] ss:$16 sps:$4 sm:$0xff]  }
  0x2c   :  { %4944 = vmatprep.subr.bf16.mxu0 %v7011_v44  ;;  %5477 = vmatprep.subr.bf16.mxu1 %v7013_v45  ;;  %v7100_v44 = vld [vmem:[%s10716_s1 + $0x328] ss:$16 sps:$4 sm:$0xff]   ;;  %v7105_v45 = vld [vmem:[%s10716_s1 + $0x344] ss:$16 sps:$4 sm:$0xff]  }
  0x2f   :  { %4945 = vmatpush1.bf16.msra.mxu0 %v7015_v47  ;;  %5478 = vmatpush1.bf16.msra.mxu1 %v7016_v49  ;;  %v7103_v47 = vld [vmem:[%s10716_s1 + $0x340] ss:$16 sps:$4 sm:$0xff]   ;;  %v7111_v49 = vld [vmem:[%s10716_s1 + $0x364] ss:$16 sps:$4 sm:$0xff]  }
  0x30   :  { %4946 = vmatprep.subr.bf16.mxu0 %v7017_v50  ;;  %5479 = vmatprep.subr.bf16.mxu1 %v7019_v51  ;;  %v7114_v50 = vld [vmem:[%s10716_s1 + $0x36c] ss:$16 sps:$4 sm:$0xff]   ;;  %v7109_v51 = vld [vmem:[%s10716_s1 + $0x360] ss:$16 sps:$4 sm:$0xff]  }
  0x33   :  { %4947 = vmatpush1.bf16.msra.mxu0 %v7021_v52  ;;  %5480 = vmatpush1.bf16.msra.mxu1 %v7022_v53  ;;  %v7112_v52 = vld [vmem:[%s10716_s1 + $0x368] ss:$16 sps:$4 sm:$0xff]   ;;  %v7117_v53 = vld [vmem:[%s10716_s1 + $0x384] ss:$16 sps:$4 sm:$0xff]  }
  0x34   :  { %4948 = vmatprep.subr.bf16.mxu0 %v7023_v54  ;;  %5481 = vmatprep.subr.bf16.mxu1 %v7025_v55  ;;  %v7120_v54 = vld [vmem:[%s10716_s1 + $0x38c] ss:$16 sps:$4 sm:$0xff]   ;;  %v7115_v55 = vld [vmem:[%s10716_s1 + $0x380] ss:$16 sps:$4 sm:$0xff]  }
  0x37   :  { %4949 = vmatpush1.bf16.msra.mxu0 %v7027_v56  ;;  %5482 = vmatpush1.bf16.msra.mxu1 %v7028_v57  ;;  %v7118_v56 = vld [vmem:[%s10716_s1 + $0x388] ss:$16 sps:$4 sm:$0xff]   ;;  %v7123_v57 = vld [vmem:[%s10716_s1 + $0x3a4] ss:$16 sps:$4 sm:$0xff]  }
  0x38   :  { %4950 = vmatprep.subr.bf16.mxu0 %v7029_v58  ;;  %5483 = vmatprep.subr.bf16.mxu1 %v7031_v59  ;;  %v7126_v58 = vld [vmem:[%s10716_s1 + $0x3ac] ss:$16 sps:$4 sm:$0xff]   ;;  %v7121_v59 = vld [vmem:[%s10716_s1 + $0x3a0] ss:$16 sps:$4 sm:$0xff]  }
  0x3b   :  { %4951 = vmatpush1.bf16.msra.mxu0 %v7033_v60  ;;  %5484 = vmatpush1.bf16.msra.mxu1 %v7034_v61  ;;  %v7124_v60 = vld [vmem:[%s10716_s1 + $0x3a8] ss:$16 sps:$4 sm:$0xff]   ;;  %v7129_v61 = vld [vmem:[%s10716_s1 + $0x3c4] ss:$16 sps:$4 sm:$0xff]  }
  0x3c   :  { %4952 = vmatprep.subr.bf16.mxu0 %v7035_v62  ;;  %5485 = vmatprep.subr.bf16.mxu1 %v7037_v63  ;;  %v7132_v62 = vld [vmem:[%s10716_s1 + $0x3cc] ss:$16 sps:$4 sm:$0xff]   ;;  %v7127_v63 = vld [vmem:[%s10716_s1 + $0x3c0] ss:$16 sps:$4 sm:$0xff]  }
  0x3f   :  { %4953 = vmatpush1.bf16.msra.mxu0 %v7039_v0  ;;  %5486 = vmatpush1.bf16.msra.mxu1 %v7040_v1  ;;  %v7130_v0 = vld [vmem:[%s10716_s1 + $0x3c8] ss:$16 sps:$4 sm:$0xff]   ;;  %v7135_v1 = vld [vmem:[%s10716_s1 + $0x3e4] ss:$16 sps:$4 sm:$0xff]  }
  0x40   :  { %4963 = vmatprep.subr.bf16.mxu0 %v7045_v2  ;;  %5496 = vmatprep.subr.bf16.mxu1 %v7048_v3  ;;  %v7138_v2 = vld [vmem:[%s10716_s1 + $0x3ec] ss:$16 sps:$4 sm:$0xff]   ;;  %v7133_v3 = vld [vmem:[%s10716_s1 + $0x3e0] ss:$16 sps:$4 sm:$0xff]  }
  0x42   :  { %4955 = vmatmul.mubr.bf16.vlgmr.msra.gmra.mrb[0].mxu0 %v6014_v4  ;;  %5488 = vmatmul.mubr.bf16.vlgmr.msra.gmra.mrb[0].mxu1 %v6014_v4  ;;  %v7136_v4 = vld [vmem:[%s10716_s1 + $0x3e8] ss:$16 sps:$4 sm:$0xff]  }
  0x43   :  { %4964 = vmatpush1.bf16.msra.mxu0 %v7043_v5  ;;  %5497 = vmatpush1.bf16.msra.mxu1 %v7046_v6  ;;  %v7143_v5 = vld [vmem:[%s10716_s1 + $0x404] ss:$16 sps:$4 sm:$0xff]   ;;  %v7146_v6 = vld [vmem:[%s10716_s1 + $0x40c] ss:$16 sps:$4 sm:$0xff]  }
  0x44   :  { %4965 = vmatprep.subr.bf16.mxu0 %v7051_v7  ;;  %5498 = vmatprep.subr.bf16.mxu1 %v7054_v8  ;;  %v6016_v7 = vcombine.low %v8475_v29, %v8475_v29  ;;  %v7141_v8 = vld [vmem:[%s10716_s1 + $0x400] ss:$16 sps:$4 sm:$0xff]   ;;  %v7176_v29 = vld [vmem:[%s10716_s1 + $0x4ac] ss:$16 sps:$4 sm:$0xff]  }
  0x45   :  { %4995 = vmatprep.mubr.bf16.mxu0 %v6017_v30  ;;  %5528 = vmatprep.mubr.bf16.mxu1 %v6017_v30  ;;  %v7171_v30 = vld [vmem:[%s10716_s1 + $0x4a0] ss:$16 sps:$4 sm:$0xff]  }
  0x47   :  { %4966 = vmatpush1.bf16.msra.mxu0 %v7049_v9  ;;  %5499 = vmatpush1.bf16.msra.mxu1 %v7052_v10  ;;  %v7144_v9 = vld [vmem:[%s10716_s1 + $0x408] ss:$16 sps:$4 sm:$0xff]   ;;  %v7149_v10 = vld [vmem:[%s10716_s1 + $0x424] ss:$16 sps:$4 sm:$0xff]  }
  0x48   :  { %4967 = vmatprep.subr.bf16.mxu0 %v7057_v11  ;;  %5500 = vmatprep.subr.bf16.mxu1 %v7060_v12  ;;  %v8613_v11 = vld [vmem:[%s10717_s0 + $0x10] sm:$0xff]  ;;  %v7152_v12 = vld [vmem:[%s10716_s1 + $0x42c] ss:$16 sps:$4 sm:$0xff]  }
  0x4b   :  { %4968 = vmatpush1.bf16.msra.mxu0 %v7055_v13  ;;  %5501 = vmatpush1.bf16.msra.mxu1 %v7058_v14  ;;  %v6019_v13 = vcombine.high %v8613_v11, %v8613_v11  ;;  %v7147_v14 = vld [vmem:[%s10716_s1 + $0x420] ss:$16 sps:$4 sm:$0xff]  }
  0x4c   :  { %4969 = vmatprep.subr.bf16.mxu0 %v7063_v15  ;;  %5502 = vmatprep.subr.bf16.mxu1 %v7066_v16  ;;  %v7150_v15 = vld [vmem:[%s10716_s1 + $0x428] ss:$16 sps:$4 sm:$0xff]   ;;  %v7155_v16 = vld [vmem:[%s10716_s1 + $0x444] ss:$16 sps:$4 sm:$0xff]  }
  0x4f   :  { %4970 = vmatpush1.bf16.msra.mxu0 %v7061_v17  ;;  %5503 = vmatpush1.bf16.msra.mxu1 %v7064_v18  ;;  %v7158_v17 = vld [vmem:[%s10716_s1 + $0x44c] ss:$16 sps:$4 sm:$0xff]   ;;  %v7153_v18 = vld [vmem:[%s10716_s1 + $0x440] ss:$16 sps:$4 sm:$0xff]  }
  0x50   :  { %4971 = vmatprep.subr.bf16.mxu0 %v7069_v19  ;;  %5504 = vmatprep.subr.bf16.mxu1 %v7072_v20  ;;  %v7156_v19 = vld [vmem:[%s10716_s1 + $0x448] ss:$16 sps:$4 sm:$0xff]   ;;  %v7161_v20 = vld [vmem:[%s10716_s1 + $0x464] ss:$16 sps:$4 sm:$0xff]  }
  0x53   :  { %4972 = vmatpush1.bf16.msra.mxu0 %v7067_v21  ;;  %5505 = vmatpush1.bf16.msra.mxu1 %v7070_v22  ;;  %v7164_v21 = vld [vmem:[%s10716_s1 + $0x46c] ss:$16 sps:$4 sm:$0xff]   ;;  %v7159_v22 = vld [vmem:[%s10716_s1 + $0x460] ss:$16 sps:$4 sm:$0xff]  }
  0x54   :  { %4973 = vmatprep.subr.bf16.mxu0 %v7075_v23  ;;  %5506 = vmatprep.subr.bf16.mxu1 %v7078_v24  ;;  %v7162_v23 = vld [vmem:[%s10716_s1 + $0x468] ss:$16 sps:$4 sm:$0xff]   ;;  %v7167_v24 = vld [vmem:[%s10716_s1 + $0x484] ss:$16 sps:$4 sm:$0xff]  }
  0x57   :  { %4974 = vmatpush1.bf16.msra.mxu0 %v7073_v25  ;;  %5507 = vmatpush1.bf16.msra.mxu1 %v7076_v26  ;;  %v7170_v25 = vld [vmem:[%s10716_s1 + $0x48c] ss:$16 sps:$4 sm:$0xff]   ;;  %v7165_v26 = vld [vmem:[%s10716_s1 + $0x480] ss:$16 sps:$4 sm:$0xff]  }
  0x58   :  { %4975 = vmatprep.subr.bf16.mxu0 %v7081_v27  ;;  %5508 = vmatprep.subr.bf16.mxu1 %v7084_v28  ;;  %v7168_v27 = vld [vmem:[%s10716_s1 + $0x488] ss:$16 sps:$4 sm:$0xff]   ;;  %v7173_v28 = vld [vmem:[%s10716_s1 + $0x4a4] ss:$16 sps:$4 sm:$0xff]  }
  0x5b   :  { %4976 = vmatpush1.bf16.msra.mxu0 %v7079_v31  ;;  %5509 = vmatpush1.bf16.msra.mxu1 %v7082_v32  ;;  %v7174_v31 = vld [vmem:[%s10716_s1 + $0x4a8] ss:$16 sps:$4 sm:$0xff]   ;;  %v7179_v32 = vld [vmem:[%s10716_s1 + $0x4c4] ss:$16 sps:$4 sm:$0xff]  }
  0x5c   :  { %4977 = vmatprep.subr.bf16.mxu0 %v7087_v33  ;;  %5510 = vmatprep.subr.bf16.mxu1 %v7090_v34  ;;  %v7182_v33 = vld [vmem:[%s10716_s1 + $0x4cc] ss:$16 sps:$4 sm:$0xff]   ;;  %v7177_v34 = vld [vmem:[%s10716_s1 + $0x4c0] ss:$16 sps:$4 sm:$0xff]  }
  0x5f   :  { %4978 = vmatpush1.bf16.msra.mxu0 %v7085_v35  ;;  %5511 = vmatpush1.bf16.msra.mxu1 %v7088_v36  ;;  %v7180_v35 = vld [vmem:[%s10716_s1 + $0x4c8] ss:$16 sps:$4 sm:$0xff]   ;;  %v7185_v36 = vld [vmem:[%s10716_s1 + $0x4e4] ss:$16 sps:$4 sm:$0xff]  }
  0x60   :  { %4979 = vmatprep.subr.bf16.mxu0 %v7093_v37  ;;  %5512 = vmatprep.subr.bf16.mxu1 %v7096_v38  ;;  %v7188_v37 = vld [vmem:[%s10716_s1 + $0x4ec] ss:$16 sps:$4 sm:$0xff]   ;;  %v7183_v38 = vld [vmem:[%s10716_s1 + $0x4e0] ss:$16 sps:$4 sm:$0xff]  }
  0x63   :  { %4980 = vmatpush1.bf16.msra.mxu0 %v7091_v39  ;;  %5513 = vmatpush1.bf16.msra.mxu1 %v7094_v40  ;;  %v7186_v39 = vld [vmem:[%s10716_s1 + $0x4e8] ss:$16 sps:$4 sm:$0xff]   ;;  %v7191_v40 = vld [vmem:[%s10716_s1 + $0x504] ss:$16 sps:$4 sm:$0xff]  }
  0x64   :  { %4981 = vmatprep.subr.bf16.mxu0 %v7099_v41  ;;  %5514 = vmatprep.subr.bf16.mxu1 %v7102_v42  ;;  %v7194_v41 = vld [vmem:[%s10716_s1 + $0x50c] ss:$16 sps:$4 sm:$0xff]   ;;  %v7189_v42 = vld [vmem:[%s10716_s1 + $0x500] ss:$16 sps:$4 sm:$0xff]  }
  0x67   :  { %4982 = vmatpush1.bf16.msra.mxu0 %v7097_v43  ;;  %5515 = vmatpush1.bf16.msra.mxu1 %v7100_v44  ;;  %v7192_v43 = vld [vmem:[%s10716_s1 + $0x508] ss:$16 sps:$4 sm:$0xff]   ;;  %v7197_v44 = vld [vmem:[%s10716_s1 + $0x524] ss:$16 sps:$4 sm:$0xff]  }
  0x68   :  { %4983 = vmatprep.subr.bf16.mxu0 %v7105_v45  ;;  %5516 = vmatprep.subr.bf16.mxu1 %v7108_v46  ;;  %v7200_v45 = vld [vmem:[%s10716_s1 + $0x52c] ss:$16 sps:$4 sm:$0xff]   ;;  %v7195_v46 = vld [vmem:[%s10716_s1 + $0x520] ss:$16 sps:$4 sm:$0xff]  }
  0x6b   :  { %4984 = vmatpush1.bf16.msra.mxu0 %v7103_v47  ;;  %5517 = vmatpush1.bf16.msra.mxu1 %v7106_v48  ;;  %v7198_v47 = vld [vmem:[%s10716_s1 + $0x528] ss:$16 sps:$4 sm:$0xff]   ;;  %v7203_v48 = vld [vmem:[%s10716_s1 + $0x544] ss:$16 sps:$4 sm:$0xff]  }
  0x6c   :  { %4985 = vmatprep.subr.bf16.mxu0 %v7111_v49  ;;  %5518 = vmatprep.subr.bf16.mxu1 %v7114_v50  ;;  %v7206_v49 = vld [vmem:[%s10716_s1 + $0x54c] ss:$16 sps:$4 sm:$0xff]   ;;  %v7201_v50 = vld [vmem:[%s10716_s1 + $0x540] ss:$16 sps:$4 sm:$0xff]  }
  0x6f   :  { %4986 = vmatpush1.bf16.msra.mxu0 %v7109_v51  ;;  %5519 = vmatpush1.bf16.msra.mxu1 %v7112_v52  ;;  %v7204_v51 = vld [vmem:[%s10716_s1 + $0x548] ss:$16 sps:$4 sm:$0xff]   ;;  %v7209_v52 = vld [vmem:[%s10716_s1 + $0x564] ss:$16 sps:$4 sm:$0xff]  }
  0x70   :  { %4987 = vmatprep.subr.bf16.mxu0 %v7117_v53  ;;  %5520 = vmatprep.subr.bf16.mxu1 %v7120_v54  ;;  %v7212_v53 = vld [vmem:[%s10716_s1 + $0x56c] ss:$16 sps:$4 sm:$0xff]   ;;  %v7207_v54 = vld [vmem:[%s10716_s1 + $0x560] ss:$16 sps:$4 sm:$0xff]  }
  0x73   :  { %4988 = vmatpush1.bf16.msra.mxu0 %v7115_v55  ;;  %5521 = vmatpush1.bf16.msra.mxu1 %v7118_v56  ;;  %v7210_v55 = vld [vmem:[%s10716_s1 + $0x568] ss:$16 sps:$4 sm:$0xff]   ;;  %v7215_v56 = vld [vmem:[%s10716_s1 + $0x584] ss:$16 sps:$4 sm:$0xff]  }
  0x74   :  { %4989 = vmatprep.subr.bf16.mxu0 %v7123_v57  ;;  %5522 = vmatprep.subr.bf16.mxu1 %v7126_v58  ;;  %v7218_v57 = vld [vmem:[%s10716_s1 + $0x58c] ss:$16 sps:$4 sm:$0xff]   ;;  %v7213_v58 = vld [vmem:[%s10716_s1 + $0x580] ss:$16 sps:$4 sm:$0xff]  }
  0x77   :  { %4990 = vmatpush1.bf16.msra.mxu0 %v7121_v59  ;;  %5523 = vmatpush1.bf16.msra.mxu1 %v7124_v60  ;;  %v7216_v59 = vld [vmem:[%s10716_s1 + $0x588] ss:$16 sps:$4 sm:$0xff]   ;;  %v7221_v60 = vld [vmem:[%s10716_s1 + $0x5a4] ss:$16 sps:$4 sm:$0xff]  }
  0x78   :  { %4991 = vmatprep.subr.bf16.mxu0 %v7129_v61  ;;  %5524 = vmatprep.subr.bf16.mxu1 %v7132_v62  ;;  %v7224_v61 = vld [vmem:[%s10716_s1 + $0x5ac] ss:$16 sps:$4 sm:$0xff]   ;;  %v7219_v62 = vld [vmem:[%s10716_s1 + $0x5a0] ss:$16 sps:$4 sm:$0xff]  }
  0x7b   :  { %4992 = vmatpush1.bf16.msra.mxu0 %v7127_v63  ;;  %5525 = vmatpush1.bf16.msra.mxu1 %v7130_v0  ;;  %v7222_v63 = vld [vmem:[%s10716_s1 + $0x5a8] ss:$16 sps:$4 sm:$0xff]   ;;  %v7227_v0 = vld [vmem:[%s10716_s1 + $0x5c4] ss:$16 sps:$4 sm:$0xff]  }
  0x7c   :  { %4993 = vmatprep.subr.bf16.mxu0 %v7135_v1  ;;  %5526 = vmatprep.subr.bf16.mxu1 %v7138_v2  ;;  %v7230_v1 = vld [vmem:[%s10716_s1 + $0x5cc] ss:$16 sps:$4 sm:$0xff]   ;;  %v7225_v2 = vld [vmem:[%s10716_s1 + $0x5c0] ss:$16 sps:$4 sm:$0xff]  }
  0x7f   :  { %4994 = vmatpush1.bf16.msra.mxu0 %v7133_v3  ;;  %5527 = vmatpush1.bf16.msra.mxu1 %v7136_v4  ;;  %v7228_v3 = vld [vmem:[%s10716_s1 + $0x5c8] ss:$16 sps:$4 sm:$0xff]   ;;  %v7233_v4 = vld [vmem:[%s10716_s1 + $0x5e4] ss:$16 sps:$4 sm:$0xff]  }
  0x80   :  { %5004 = vmatprep.subr.bf16.mxu0 %v7143_v5  ;;  %5537 = vmatprep.subr.bf16.mxu1 %v7146_v6  ;;  %v7236_v5 = vld [vmem:[%s10716_s1 + $0x5ec] ss:$16 sps:$4 sm:$0xff]   ;;  %v7231_v6 = vld [vmem:[%s10716_s1 + $0x5e0] ss:$16 sps:$4 sm:$0xff]  }
  0x82   :  { %4996 = vmatmul.mubr.bf16.vlgmr.msra.gmra.mrb[0].mxu0 %v6016_v7  ;;  %5529 = vmatmul.mubr.bf16.vlgmr.msra.gmra.mrb[0].mxu1 %v6016_v7  ;;  %v7234_v7 = vld [vmem:[%s10716_s1 + $0x5e8] ss:$16 sps:$4 sm:$0xff]  }
  0x83   :  { %5005 = vmatpush1.bf16.msra.mxu0 %v7141_v8  ;;  %5538 = vmatpush1.bf16.msra.mxu1 %v7144_v9  ;;  %v7241_v8 = vld [vmem:[%s10716_s1 + $0x604] ss:$16 sps:$4 sm:$0xff]   ;;  %v7244_v9 = vld [vmem:[%s10716_s1 + $0x60c] ss:$16 sps:$4 sm:$0xff]  }
  0x84   :  { %5006 = vmatprep.subr.bf16.mxu0 %v7149_v10  ;;  %5539 = vmatprep.subr.bf16.mxu1 %v7152_v12  ;;  %v7239_v10 = vld [vmem:[%s10716_s1 + $0x600] ss:$16 sps:$4 sm:$0xff]   ;;  %v6018_v12 = vcombine.low %v8613_v11, %v8613_v11  ;;  %v7250_v11 = vld [vmem:[%s10716_s1 + $0x62c] ss:$16 sps:$4 sm:$0xff]  }
  0x85   :  { %5036 = vmatprep.mubr.bf16.mxu0 %v6019_v13  ;;  %5569 = vmatprep.mubr.bf16.mxu1 %v6019_v13  ;;  %v7242_v13 = vld [vmem:[%s10716_s1 + $0x608] ss:$16 sps:$4 sm:$0xff]  }
  0x87   :  { %5007 = vmatpush1.bf16.msra.mxu0 %v7147_v14  ;;  %5540 = vmatpush1.bf16.msra.mxu1 %v7150_v15  ;;  %v8811_v14 = vld [vmem:[%s10717_s0 + $0x18] sm:$0xff]  ;;  %v7247_v15 = vld [vmem:[%s10716_s1 + $0x624] ss:$16 sps:$4 sm:$0xff]  }
  0x88   :  { %5008 = vmatprep.subr.bf16.mxu0 %v7155_v16  ;;  %5541 = vmatprep.subr.bf16.mxu1 %v7158_v17  ;;  %v6021_v16 = vcombine.high %v8811_v14, %v8811_v14  ;;  %v7245_v17 = vld [vmem:[%s10716_s1 + $0x620] ss:$16 sps:$4 sm:$0xff]  }
  0x8b   :  { %5009 = vmatpush1.bf16.msra.mxu0 %v7153_v18  ;;  %5542 = vmatpush1.bf16.msra.mxu1 %v7156_v19  ;;  %v7248_v18 = vld [vmem:[%s10716_s1 + $0x628] ss:$16 sps:$4 sm:$0xff]   ;;  %v7253_v19 = vld [vmem:[%s10716_s1 + $0x644] ss:$16 sps:$4 sm:$0xff]  }
  0x8c   :  { %5010 = vmatprep.subr.bf16.mxu0 %v7161_v20  ;;  %5543 = vmatprep.subr.bf16.mxu1 %v7164_v21  ;;  %v7256_v20 = vld [vmem:[%s10716_s1 + $0x64c] ss:$16 sps:$4 sm:$0xff]   ;;  %v7251_v21 = vld [vmem:[%s10716_s1 + $0x640] ss:$16 sps:$4 sm:$0xff]  }
  0x8f   :  { %5011 = vmatpush1.bf16.msra.mxu0 %v7159_v22  ;;  %5544 = vmatpush1.bf16.msra.mxu1 %v7162_v23  ;;  %v7254_v22 = vld [vmem:[%s10716_s1 + $0x648] ss:$16 sps:$4 sm:$0xff]   ;;  %v7259_v23 = vld [vmem:[%s10716_s1 + $0x664] ss:$16 sps:$4 sm:$0xff]  }
  0x90   :  { %5012 = vmatprep.subr.bf16.mxu0 %v7167_v24  ;;  %5545 = vmatprep.subr.bf16.mxu1 %v7170_v25  ;;  %v7262_v24 = vld [vmem:[%s10716_s1 + $0x66c] ss:$16 sps:$4 sm:$0xff]   ;;  %v7257_v25 = vld [vmem:[%s10716_s1 + $0x660] ss:$16 sps:$4 sm:$0xff]  }
  0x93   :  { %5013 = vmatpush1.bf16.msra.mxu0 %v7165_v26  ;;  %5546 = vmatpush1.bf16.msra.mxu1 %v7168_v27  ;;  %v7260_v26 = vld [vmem:[%s10716_s1 + $0x668] ss:$16 sps:$4 sm:$0xff]   ;;  %v7265_v27 = vld [vmem:[%s10716_s1 + $0x684] ss:$16 sps:$4 sm:$0xff]  }
  0x94   :  { %5014 = vmatprep.subr.bf16.mxu0 %v7173_v28  ;;  %5547 = vmatprep.subr.bf16.mxu1 %v7176_v29  ;;  %v7268_v28 = vld [vmem:[%s10716_s1 + $0x68c] ss:$16 sps:$4 sm:$0xff]   ;;  %v7263_v29 = vld [vmem:[%s10716_s1 + $0x680] ss:$16 sps:$4 sm:$0xff]  }
  0x97   :  { %5015 = vmatpush1.bf16.msra.mxu0 %v7171_v30  ;;  %5548 = vmatpush1.bf16.msra.mxu1 %v7174_v31  ;;  %v7266_v30 = vld [vmem:[%s10716_s1 + $0x688] ss:$16 sps:$4 sm:$0xff]   ;;  %v7271_v31 = vld [vmem:[%s10716_s1 + $0x6a4] ss:$16 sps:$4 sm:$0xff]  }
  0x98   :  { %5016 = vmatprep.subr.bf16.mxu0 %v7179_v32  ;;  %5549 = vmatprep.subr.bf16.mxu1 %v7182_v33  ;;  %v7274_v32 = vld [vmem:[%s10716_s1 + $0x6ac] ss:$16 sps:$4 sm:$0xff]   ;;  %v7269_v33 = vld [vmem:[%s10716_s1 + $0x6a0] ss:$16 sps:$4 sm:$0xff]  }
  0x9b   :  { %5017 = vmatpush1.bf16.msra.mxu0 %v7177_v34  ;;  %5550 = vmatpush1.bf16.msra.mxu1 %v7180_v35  ;;  %v7272_v34 = vld [vmem:[%s10716_s1 + $0x6a8] ss:$16 sps:$4 sm:$0xff]   ;;  %v7277_v35 = vld [vmem:[%s10716_s1 + $0x6c4] ss:$16 sps:$4 sm:$0xff]  }
  0x9c   :  { %5018 = vmatprep.subr.bf16.mxu0 %v7185_v36  ;;  %5551 = vmatprep.subr.bf16.mxu1 %v7188_v37  ;;  %v7280_v36 = vld [vmem:[%s10716_s1 + $0x6cc] ss:$16 sps:$4 sm:$0xff]   ;;  %v7275_v37 = vld [vmem:[%s10716_s1 + $0x6c0] ss:$16 sps:$4 sm:$0xff]  }
  0x9f   :  { %5019 = vmatpush1.bf16.msra.mxu0 %v7183_v38  ;;  %5552 = vmatpush1.bf16.msra.mxu1 %v7186_v39  ;;  %v7278_v38 = vld [vmem:[%s10716_s1 + $0x6c8] ss:$16 sps:$4 sm:$0xff]   ;;  %v7283_v39 = vld [vmem:[%s10716_s1 + $0x6e4] ss:$16 sps:$4 sm:$0xff]  }
  0xa0   :  { %5020 = vmatprep.subr.bf16.mxu0 %v7191_v40  ;;  %5553 = vmatprep.subr.bf16.mxu1 %v7194_v41  ;;  %v7286_v40 = vld [vmem:[%s10716_s1 + $0x6ec] ss:$16 sps:$4 sm:$0xff]   ;;  %v7281_v41 = vld [vmem:[%s10716_s1 + $0x6e0] ss:$16 sps:$4 sm:$0xff]  }
  0xa3   :  { %5021 = vmatpush1.bf16.msra.mxu0 %v7189_v42  ;;  %5554 = vmatpush1.bf16.msra.mxu1 %v7192_v43  ;;  %v7284_v42 = vld [vmem:[%s10716_s1 + $0x6e8] ss:$16 sps:$4 sm:$0xff]   ;;  %v7289_v43 = vld [vmem:[%s10716_s1 + $0x704] ss:$16 sps:$4 sm:$0xff]  }
  0xa4   :  { %5022 = vmatprep.subr.bf16.mxu0 %v7197_v44  ;;  %5555 = vmatprep.subr.bf16.mxu1 %v7200_v45  ;;  %v7292_v44 = vld [vmem:[%s10716_s1 + $0x70c] ss:$16 sps:$4 sm:$0xff]   ;;  %v7287_v45 = vld [vmem:[%s10716_s1 + $0x700] ss:$16 sps:$4 sm:$0xff]  }
  0xa7   :  { %5023 = vmatpush1.bf16.msra.mxu0 %v7195_v46  ;;  %5556 = vmatpush1.bf16.msra.mxu1 %v7198_v47  ;;  %v7290_v46 = vld [vmem:[%s10716_s1 + $0x708] ss:$16 sps:$4 sm:$0xff]   ;;  %v7295_v47 = vld [vmem:[%s10716_s1 + $0x724] ss:$16 sps:$4 sm:$0xff]  }
  0xa8   :  { %5024 = vmatprep.subr.bf16.mxu0 %v7203_v48  ;;  %5557 = vmatprep.subr.bf16.mxu1 %v7206_v49  ;;  %v7298_v48 = vld [vmem:[%s10716_s1 + $0x72c] ss:$16 sps:$4 sm:$0xff]   ;;  %v7293_v49 = vld [vmem:[%s10716_s1 + $0x720] ss:$16 sps:$4 sm:$0xff]  }
  0xab   :  { %5025 = vmatpush1.bf16.msra.mxu0 %v7201_v50  ;;  %5558 = vmatpush1.bf16.msra.mxu1 %v7204_v51  ;;  %v7296_v50 = vld [vmem:[%s10716_s1 + $0x728] ss:$16 sps:$4 sm:$0xff]   ;;  %v7301_v51 = vld [vmem:[%s10716_s1 + $0x744] ss:$16 sps:$4 sm:$0xff]  }
  0xac   :  { %5026 = vmatprep.subr.bf16.mxu0 %v7209_v52  ;;  %5559 = vmatprep.subr.bf16.mxu1 %v7212_v53  ;;  %v7304_v52 = vld [vmem:[%s10716_s1 + $0x74c] ss:$16 sps:$4 sm:$0xff]   ;;  %v7299_v53 = vld [vmem:[%s10716_s1 + $0x740] ss:$16 sps:$4 sm:$0xff]  }
  0xaf   :  { %5027 = vmatpush1.bf16.msra.mxu0 %v7207_v54  ;;  %5560 = vmatpush1.bf16.msra.mxu1 %v7210_v55  ;;  %v7302_v54 = vld [vmem:[%s10716_s1 + $0x748] ss:$16 sps:$4 sm:$0xff]   ;;  %v7307_v55 = vld [vmem:[%s10716_s1 + $0x764] ss:$16 sps:$4 sm:$0xff]  }
  0xb0   :  { %5028 = vmatprep.subr.bf16.mxu0 %v7215_v56  ;;  %5561 = vmatprep.subr.bf16.mxu1 %v7218_v57  ;;  %v7310_v56 = vld [vmem:[%s10716_s1 + $0x76c] ss:$16 sps:$4 sm:$0xff]   ;;  %v7305_v57 = vld [vmem:[%s10716_s1 + $0x760] ss:$16 sps:$4 sm:$0xff]  }
  0xb3   :  { %5029 = vmatpush1.bf16.msra.mxu0 %v7213_v58  ;;  %5562 = vmatpush1.bf16.msra.mxu1 %v7216_v59  ;;  %v7308_v58 = vld [vmem:[%s10716_s1 + $0x768] ss:$16 sps:$4 sm:$0xff]   ;;  %v7313_v59 = vld [vmem:[%s10716_s1 + $0x784] ss:$16 sps:$4 sm:$0xff]  }
  0xb4   :  { %5030 = vmatprep.subr.bf16.mxu0 %v7221_v60  ;;  %5563 = vmatprep.subr.bf16.mxu1 %v7224_v61  ;;  %v7316_v60 = vld [vmem:[%s10716_s1 + $0x78c] ss:$16 sps:$4 sm:$0xff]   ;;  %v7311_v61 = vld [vmem:[%s10716_s1 + $0x780] ss:$16 sps:$4 sm:$0xff]  }
  0xb7   :  { %5031 = vmatpush1.bf16.msra.mxu0 %v7219_v62  ;;  %5564 = vmatpush1.bf16.msra.mxu1 %v7222_v63  ;;  %v7314_v62 = vld [vmem:[%s10716_s1 + $0x788] ss:$16 sps:$4 sm:$0xff]   ;;  %v7319_v63 = vld [vmem:[%s10716_s1 + $0x7a4] ss:$16 sps:$4 sm:$0xff]  }
  0xb8   :  { %5032 = vmatprep.subr.bf16.mxu0 %v7227_v0  ;;  %5565 = vmatprep.subr.bf16.mxu1 %v7230_v1  ;;  %v7322_v0 = vld [vmem:[%s10716_s1 + $0x7ac] ss:$16 sps:$4 sm:$0xff]   ;;  %v7317_v1 = vld [vmem:[%s10716_s1 + $0x7a0] ss:$16 sps:$4 sm:$0xff]  }
  0xbb   :  { %5033 = vmatpush1.bf16.msra.mxu0 %v7225_v2  ;;  %5566 = vmatpush1.bf16.msra.mxu1 %v7228_v3  ;;  %v7320_v2 = vld [vmem:[%s10716_s1 + $0x7a8] ss:$16 sps:$4 sm:$0xff]   ;;  %v7325_v3 = vld [vmem:[%s10716_s1 + $0x7c4] ss:$16 sps:$4 sm:$0xff]  }
  0xbc   :  { %5034 = vmatprep.subr.bf16.mxu0 %v7233_v4  ;;  %5567 = vmatprep.subr.bf16.mxu1 %v7236_v5  ;;  %v7328_v4 = vld [vmem:[%s10716_s1 + $0x7cc] ss:$16 sps:$4 sm:$0xff]   ;;  %v7323_v5 = vld [vmem:[%s10716_s1 + $0x7c0] ss:$16 sps:$4 sm:$0xff]  }
  0xbf   :  { %5035 = vmatpush1.bf16.msra.mxu0 %v7231_v6  ;;  %5568 = vmatpush1.bf16.msra.mxu1 %v7234_v7  ;;  %v7326_v6 = vld [vmem:[%s10716_s1 + $0x7c8] ss:$16 sps:$4 sm:$0xff]   ;;  %v7331_v7 = vld [vmem:[%s10716_s1 + $0x7e4] ss:$16 sps:$4 sm:$0xff]  }
  0xc0   :  { %5045 = vmatprep.subr.bf16.mxu0 %v7241_v8  ;;  %5578 = vmatprep.subr.bf16.mxu1 %v7244_v9  ;;  %v7334_v8 = vld [vmem:[%s10716_s1 + $0x7ec] ss:$16 sps:$4 sm:$0xff]   ;;  %v7329_v9 = vld [vmem:[%s10716_s1 + $0x7e0] ss:$16 sps:$4 sm:$0xff]  }
  0xc2   :  { %5037 = vmatmul.mubr.bf16.vlgmr.msra.gmra.mrb[0].mxu0 %v6018_v12  ;;  %5570 = vmatmul.mubr.bf16.vlgmr.msra.gmra.mrb[0].mxu1 %v6018_v12  ;;  %v7339_v12 = vld [vmem:[%s10716_s1 + $0x804] ss:$16 sps:$4 sm:$0xff]  }
  0xc3   :  { %5046 = vmatpush1.bf16.msra.mxu0 %v7239_v10  ;;  %5579 = vmatpush1.bf16.msra.mxu1 %v7242_v13  ;;  %v7332_v10 = vld [vmem:[%s10716_s1 + $0x7e8] ss:$16 sps:$4 sm:$0xff]   ;;  %v7342_v13 = vld [vmem:[%s10716_s1 + $0x80c] ss:$16 sps:$4 sm:$0xff]  }
  0xc4   :  { %5047 = vmatprep.subr.bf16.mxu0 %v7247_v15  ;;  %5580 = vmatprep.subr.bf16.mxu1 %v7250_v11  ;;  %v7337_v15 = vld [vmem:[%s10716_s1 + $0x800] ss:$16 sps:$4 sm:$0xff]   ;;  %v6020_v11 = vcombine.low %v8811_v14, %v8811_v14  ;;  %v7348_v14 = vld [vmem:[%s10716_s1 + $0x82c] ss:$16 sps:$4 sm:$0xff]  }
  0xc5   :  { %5077 = vmatprep.mubr.bf16.mxu0 %v6021_v16  ;;  %5610 = vmatprep.mubr.bf16.mxu1 %v6021_v16  ;;  %v9009_v16 = vld [vmem:[%s10717_s0 + $0x20] sm:$0xff] }
  0xc7   :  { %5048 = vmatpush1.bf16.msra.mxu0 %v7245_v17  ;;  %5581 = vmatpush1.bf16.msra.mxu1 %v7248_v18  ;;  %v7340_v17 = vld [vmem:[%s10716_s1 + $0x808] ss:$16 sps:$4 sm:$0xff]   ;;  %v7345_v18 = vld [vmem:[%s10716_s1 + $0x824] ss:$16 sps:$4 sm:$0xff]  }
  0xc8   :  { %5049 = vmatprep.subr.bf16.mxu0 %v7253_v19  ;;  %5582 = vmatprep.subr.bf16.mxu1 %v7256_v20  ;;  %v6023_v19 = vcombine.high %v9009_v16, %v9009_v16  ;;  %v7343_v20 = vld [vmem:[%s10716_s1 + $0x820] ss:$16 sps:$4 sm:$0xff]  }
  0xcb   :  { %5050 = vmatpush1.bf16.msra.mxu0 %v7251_v21  ;;  %5583 = vmatpush1.bf16.msra.mxu1 %v7254_v22  ;;  %v7346_v21 = vld [vmem:[%s10716_s1 + $0x828] ss:$16 sps:$4 sm:$0xff]   ;;  %v7351_v22 = vld [vmem:[%s10716_s1 + $0x844] ss:$16 sps:$4 sm:$0xff]  }
  0xcc   :  { %5051 = vmatprep.subr.bf16.mxu0 %v7259_v23  ;;  %5584 = vmatprep.subr.bf16.mxu1 %v7262_v24  ;;  %v7354_v23 = vld [vmem:[%s10716_s1 + $0x84c] ss:$16 sps:$4 sm:$0xff]   ;;  %v7349_v24 = vld [vmem:[%s10716_s1 + $0x840] ss:$16 sps:$4 sm:$0xff]  }
  0xcf   :  { %5052 = vmatpush1.bf16.msra.mxu0 %v7257_v25  ;;  %5585 = vmatpush1.bf16.msra.mxu1 %v7260_v26  ;;  %v7352_v25 = vld [vmem:[%s10716_s1 + $0x848] ss:$16 sps:$4 sm:$0xff]   ;;  %v7357_v26 = vld [vmem:[%s10716_s1 + $0x864] ss:$16 sps:$4 sm:$0xff]  }
  0xd0   :  { %5053 = vmatprep.subr.bf16.mxu0 %v7265_v27  ;;  %5586 = vmatprep.subr.bf16.mxu1 %v7268_v28  ;;  %v7360_v27 = vld [vmem:[%s10716_s1 + $0x86c] ss:$16 sps:$4 sm:$0xff]   ;;  %v7355_v28 = vld [vmem:[%s10716_s1 + $0x860] ss:$16 sps:$4 sm:$0xff]  }
  0xd3   :  { %5054 = vmatpush1.bf16.msra.mxu0 %v7263_v29  ;;  %5587 = vmatpush1.bf16.msra.mxu1 %v7266_v30  ;;  %v7358_v29 = vld [vmem:[%s10716_s1 + $0x868] ss:$16 sps:$4 sm:$0xff]   ;;  %v7363_v30 = vld [vmem:[%s10716_s1 + $0x884] ss:$16 sps:$4 sm:$0xff]  }
  0xd4   :  { %5055 = vmatprep.subr.bf16.mxu0 %v7271_v31  ;;  %5588 = vmatprep.subr.bf16.mxu1 %v7274_v32  ;;  %v7366_v31 = vld [vmem:[%s10716_s1 + $0x88c] ss:$16 sps:$4 sm:$0xff]   ;;  %v7361_v32 = vld [vmem:[%s10716_s1 + $0x880] ss:$16 sps:$4 sm:$0xff]  }
  0xd7   :  { %5056 = vmatpush1.bf16.msra.mxu0 %v7269_v33  ;;  %5589 = vmatpush1.bf16.msra.mxu1 %v7272_v34  ;;  %v7364_v33 = vld [vmem:[%s10716_s1 + $0x888] ss:$16 sps:$4 sm:$0xff]   ;;  %v7369_v34 = vld [vmem:[%s10716_s1 + $0x8a4] ss:$16 sps:$4 sm:$0xff]  }
  0xd8   :  { %5057 = vmatprep.subr.bf16.mxu0 %v7277_v35  ;;  %5590 = vmatprep.subr.bf16.mxu1 %v7280_v36  ;;  %v7372_v35 = vld [vmem:[%s10716_s1 + $0x8ac] ss:$16 sps:$4 sm:$0xff]   ;;  %v7367_v36 = vld [vmem:[%s10716_s1 + $0x8a0] ss:$16 sps:$4 sm:$0xff]  }
  0xdb   :  { %5058 = vmatpush1.bf16.msra.mxu0 %v7275_v37  ;;  %5591 = vmatpush1.bf16.msra.mxu1 %v7278_v38  ;;  %v7370_v37 = vld [vmem:[%s10716_s1 + $0x8a8] ss:$16 sps:$4 sm:$0xff]   ;;  %v7375_v38 = vld [vmem:[%s10716_s1 + $0x8c4] ss:$16 sps:$4 sm:$0xff]  }
  0xdc   :  { %5059 = vmatprep.subr.bf16.mxu0 %v7283_v39  ;;  %5592 = vmatprep.subr.bf16.mxu1 %v7286_v40  ;;  %v7378_v39 = vld [vmem:[%s10716_s1 + $0x8cc] ss:$16 sps:$4 sm:$0xff]   ;;  %v7373_v40 = vld [vmem:[%s10716_s1 + $0x8c0] ss:$16 sps:$4 sm:$0xff]  }
  0xdf   :  { %5060 = vmatpush1.bf16.msra.mxu0 %v7281_v41  ;;  %5593 = vmatpush1.bf16.msra.mxu1 %v7284_v42  ;;  %v7376_v41 = vld [vmem:[%s10716_s1 + $0x8c8] ss:$16 sps:$4 sm:$0xff]   ;;  %v7381_v42 = vld [vmem:[%s10716_s1 + $0x8e4] ss:$16 sps:$4 sm:$0xff]  }
  0xe0   :  { %5061 = vmatprep.subr.bf16.mxu0 %v7289_v43  ;;  %5594 = vmatprep.subr.bf16.mxu1 %v7292_v44  ;;  %v7384_v43 = vld [vmem:[%s10716_s1 + $0x8ec] ss:$16 sps:$4 sm:$0xff]   ;;  %v7379_v44 = vld [vmem:[%s10716_s1 + $0x8e0] ss:$16 sps:$4 sm:$0xff]  }
  0xe3   :  { %5062 = vmatpush1.bf16.msra.mxu0 %v7287_v45  ;;  %5595 = vmatpush1.bf16.msra.mxu1 %v7290_v46  ;;  %v7382_v45 = vld [vmem:[%s10716_s1 + $0x8e8] ss:$16 sps:$4 sm:$0xff]   ;;  %v7387_v46 = vld [vmem:[%s10716_s1 + $0x904] ss:$16 sps:$4 sm:$0xff]  }
  0xe4   :  { %5063 = vmatprep.subr.bf16.mxu0 %v7295_v47  ;;  %5596 = vmatprep.subr.bf16.mxu1 %v7298_v48  ;;  %v7390_v47 = vld [vmem:[%s10716_s1 + $0x90c] ss:$16 sps:$4 sm:$0xff]   ;;  %v7385_v48 = vld [vmem:[%s10716_s1 + $0x900] ss:$16 sps:$4 sm:$0xff]  }
  0xe7   :  { %5064 = vmatpush1.bf16.msra.mxu0 %v7293_v49  ;;  %5597 = vmatpush1.bf16.msra.mxu1 %v7296_v50  ;;  %v7388_v49 = vld [vmem:[%s10716_s1 + $0x908] ss:$16 sps:$4 sm:$0xff]   ;;  %v7393_v50 = vld [vmem:[%s10716_s1 + $0x924] ss:$16 sps:$4 sm:$0xff]  }
  0xe8   :  { %5065 = vmatprep.subr.bf16.mxu0 %v7301_v51  ;;  %5598 = vmatprep.subr.bf16.mxu1 %v7304_v52  ;;  %v7396_v51 = vld [vmem:[%s10716_s1 + $0x92c] ss:$16 sps:$4 sm:$0xff]   ;;  %v7391_v52 = vld [vmem:[%s10716_s1 + $0x920] ss:$16 sps:$4 sm:$0xff]  }
  0xeb   :  { %5066 = vmatpush1.bf16.msra.mxu0 %v7299_v53  ;;  %5599 = vmatpush1.bf16.msra.mxu1 %v7302_v54  ;;  %v7394_v53 = vld [vmem:[%s10716_s1 + $0x928] ss:$16 sps:$4 sm:$0xff]   ;;  %v7399_v54 = vld [vmem:[%s10716_s1 + $0x944] ss:$16 sps:$4 sm:$0xff]  }
  0xec   :  { %5067 = vmatprep.subr.bf16.mxu0 %v7307_v55  ;;  %5600 = vmatprep.subr.bf16.mxu1 %v7310_v56  ;;  %v7402_v55 = vld [vmem:[%s10716_s1 + $0x94c] ss:$16 sps:$4 sm:$0xff]   ;;  %v7397_v56 = vld [vmem:[%s10716_s1 + $0x940] ss:$16 sps:$4 sm:$0xff]  }
  0xef   :  { %5068 = vmatpush1.bf16.msra.mxu0 %v7305_v57  ;;  %5601 = vmatpush1.bf16.msra.mxu1 %v7308_v58  ;;  %v7400_v57 = vld [vmem:[%s10716_s1 + $0x948] ss:$16 sps:$4 sm:$0xff]   ;;  %v7405_v58 = vld [vmem:[%s10716_s1 + $0x964] ss:$16 sps:$4 sm:$0xff]  }
  0xf0   :  { %5069 = vmatprep.subr.bf16.mxu0 %v7313_v59  ;;  %5602 = vmatprep.subr.bf16.mxu1 %v7316_v60  ;;  %v7408_v59 = vld [vmem:[%s10716_s1 + $0x96c] ss:$16 sps:$4 sm:$0xff]   ;;  %v7403_v60 = vld [vmem:[%s10716_s1 + $0x960] ss:$16 sps:$4 sm:$0xff]  }
  0xf3   :  { %5070 = vmatpush1.bf16.msra.mxu0 %v7311_v61  ;;  %5603 = vmatpush1.bf16.msra.mxu1 %v7314_v62  ;;  %v7406_v61 = vld [vmem:[%s10716_s1 + $0x968] ss:$16 sps:$4 sm:$0xff]   ;;  %v7411_v62 = vld [vmem:[%s10716_s1 + $0x984] ss:$16 sps:$4 sm:$0xff]  }
  0xf4   :  { %5071 = vmatprep.subr.bf16.mxu0 %v7319_v63  ;;  %5604 = vmatprep.subr.bf16.mxu1 %v7322_v0  ;;  %v7414_v63 = vld [vmem:[%s10716_s1 + $0x98c] ss:$16 sps:$4 sm:$0xff]   ;;  %v7409_v0 = vld [vmem:[%s10716_s1 + $0x980] ss:$16 sps:$4 sm:$0xff]  }
  0xf7   :  { %5072 = vmatpush1.bf16.msra.mxu0 %v7317_v1  ;;  %5605 = vmatpush1.bf16.msra.mxu1 %v7320_v2  ;;  %v7412_v1 = vld [vmem:[%s10716_s1 + $0x988] ss:$16 sps:$4 sm:$0xff]   ;;  %v7417_v2 = vld [vmem:[%s10716_s1 + $0x9a4] ss:$16 sps:$4 sm:$0xff]  }
  0xf8   :  { %5073 = vmatprep.subr.bf16.mxu0 %v7325_v3  ;;  %5606 = vmatprep.subr.bf16.mxu1 %v7328_v4  ;;  %v7420_v3 = vld [vmem:[%s10716_s1 + $0x9ac] ss:$16 sps:$4 sm:$0xff]   ;;  %v7415_v4 = vld [vmem:[%s10716_s1 + $0x9a0] ss:$16 sps:$4 sm:$0xff]  }
  0xfb   :  { %5074 = vmatpush1.bf16.msra.mxu0 %v7323_v5  ;;  %5607 = vmatpush1.bf16.msra.mxu1 %v7326_v6  ;;  %v7418_v5 = vld [vmem:[%s10716_s1 + $0x9a8] ss:$16 sps:$4 sm:$0xff]   ;;  %v7423_v6 = vld [vmem:[%s10716_s1 + $0x9c4] ss:$16 sps:$4 sm:$0xff]  }
  0xfc   :  { %5075 = vmatprep.subr.bf16.mxu0 %v7331_v7  ;;  %5608 = vmatprep.subr.bf16.mxu1 %v7334_v8  ;;  %v7426_v7 = vld [vmem:[%s10716_s1 + $0x9cc] ss:$16 sps:$4 sm:$0xff]   ;;  %v7421_v8 = vld [vmem:[%s10716_s1 + $0x9c0] ss:$16 sps:$4 sm:$0xff]  }
  0xff   :  { %5076 = vmatpush1.bf16.msra.mxu0 %v7329_v9  ;;  %5609 = vmatpush1.bf16.msra.mxu1 %v7332_v10  ;;  %v7424_v9 = vld [vmem:[%s10716_s1 + $0x9c8] ss:$16 sps:$4 sm:$0xff]   ;;  %v7429_v10 = vld [vmem:[%s10716_s1 + $0x9e4] ss:$16 sps:$4 sm:$0xff]  }
 0x100   :  { %5086 = vmatprep.subr.bf16.mxu0 %v7339_v12  ;;  %5619 = vmatprep.subr.bf16.mxu1 %v7342_v13  ;;  %v7432_v12 = vld [vmem:[%s10716_s1 + $0x9ec] ss:$16 sps:$4 sm:$0xff]   ;;  %v7427_v13 = vld [vmem:[%s10716_s1 + $0x9e0] ss:$16 sps:$4 sm:$0xff]  }
 0x102   :  { %5078 = vmatmul.mubr.bf16.vlgmr.msra.gmra.mrb[0].mxu0 %v6020_v11  ;;  %5611 = vmatmul.mubr.bf16.vlgmr.msra.gmra.mrb[0].mxu1 %v6020_v11  ;;  %v7437_v11 = vld [vmem:[%s10716_s1 + $0xa04] ss:$16 sps:$4 sm:$0xff]  }
 0x103   :  { %5087 = vmatpush1.bf16.msra.mxu0 %v7337_v15  ;;  %5620 = vmatpush1.bf16.msra.mxu1 %v7340_v17  ;;  %v7430_v15 = vld [vmem:[%s10716_s1 + $0x9e8] ss:$16 sps:$4 sm:$0xff]   ;;  %v7440_v17 = vld [vmem:[%s10716_s1 + $0xa0c] ss:$16 sps:$4 sm:$0xff]  }
 0x104   :  { %5088 = vmatprep.subr.bf16.mxu0 %v7345_v18  ;;  %5621 = vmatprep.subr.bf16.mxu1 %v7348_v14  ;;  %v9205_v18 = vld [vmem:[%s10717_s0 + $0x28] sm:$0xff]  ;;  %v6022_v14 = vcombine.low %v9009_v16, %v9009_v16 }
 0x105   :  { %5118 = vmatprep.mubr.bf16.mxu0 %v6023_v19  ;;  %5651 = vmatprep.mubr.bf16.mxu1 %v6023_v19  ;;  %v7435_v19 = vld [vmem:[%s10716_s1 + $0xa00] ss:$16 sps:$4 sm:$0xff]   ;;  %v7446_v16 = vld [vmem:[%s10716_s1 + $0xa2c] ss:$16 sps:$4 sm:$0xff]  }
 0x107   :  { %5089 = vmatpush1.bf16.msra.mxu0 %v7343_v20  ;;  %5622 = vmatpush1.bf16.msra.mxu1 %v7346_v21  ;;  %v7438_v20 = vld [vmem:[%s10716_s1 + $0xa08] ss:$16 sps:$4 sm:$0xff]   ;;  %v7443_v21 = vld [vmem:[%s10716_s1 + $0xa24] ss:$16 sps:$4 sm:$0xff]  }
 0x108   :  { %5090 = vmatprep.subr.bf16.mxu0 %v7351_v22  ;;  %5623 = vmatprep.subr.bf16.mxu1 %v7354_v23  ;;  %v6025_v22 = vcombine.high %v9205_v18, %v9205_v18  ;;  %v7441_v23 = vld [vmem:[%s10716_s1 + $0xa20] ss:$16 sps:$4 sm:$0xff]  }
 0x10b   :  { %5091 = vmatpush1.bf16.msra.mxu0 %v7349_v24  ;;  %5624 = vmatpush1.bf16.msra.mxu1 %v7352_v25  ;;  %v7444_v24 = vld [vmem:[%s10716_s1 + $0xa28] ss:$16 sps:$4 sm:$0xff]   ;;  %v7449_v25 = vld [vmem:[%s10716_s1 + $0xa44] ss:$16 sps:$4 sm:$0xff]  }
 0x10c   :  { %5092 = vmatprep.subr.bf16.mxu0 %v7357_v26  ;;  %5625 = vmatprep.subr.bf16.mxu1 %v7360_v27  ;;  %v7452_v26 = vld [vmem:[%s10716_s1 + $0xa4c] ss:$16 sps:$4 sm:$0xff]   ;;  %v7447_v27 = vld [vmem:[%s10716_s1 + $0xa40] ss:$16 sps:$4 sm:$0xff]  }
 0x10f   :  { %5093 = vmatpush1.bf16.msra.mxu0 %v7355_v28  ;;  %5626 = vmatpush1.bf16.msra.mxu1 %v7358_v29  ;;  %v7450_v28 = vld [vmem:[%s10716_s1 + $0xa48] ss:$16 sps:$4 sm:$0xff]   ;;  %v7455_v29 = vld [vmem:[%s10716_s1 + $0xa64] ss:$16 sps:$4 sm:$0xff]  }
 0x110   :  { %5094 = vmatprep.subr.bf16.mxu0 %v7363_v30  ;;  %5627 = vmatprep.subr.bf16.mxu1 %v7366_v31  ;;  %v7458_v30 = vld [vmem:[%s10716_s1 + $0xa6c] ss:$16 sps:$4 sm:$0xff]   ;;  %v7453_v31 = vld [vmem:[%s10716_s1 + $0xa60] ss:$16 sps:$4 sm:$0xff]  }
 0x113   :  { %5095 = vmatpush1.bf16.msra.mxu0 %v7361_v32  ;;  %5628 = vmatpush1.bf16.msra.mxu1 %v7364_v33  ;;  %v7456_v32 = vld [vmem:[%s10716_s1 + $0xa68] ss:$16 sps:$4 sm:$0xff]   ;;  %v7461_v33 = vld [vmem:[%s10716_s1 + $0xa84] ss:$16 sps:$4 sm:$0xff]  }
 0x114   :  { %5096 = vmatprep.subr.bf16.mxu0 %v7369_v34  ;;  %5629 = vmatprep.subr.bf16.mxu1 %v7372_v35  ;;  %v7464_v34 = vld [vmem:[%s10716_s1 + $0xa8c] ss:$16 sps:$4 sm:$0xff]   ;;  %v7459_v35 = vld [vmem:[%s10716_s1 + $0xa80] ss:$16 sps:$4 sm:$0xff]  }
 0x117   :  { %5097 = vmatpush1.bf16.msra.mxu0 %v7367_v36  ;;  %5630 = vmatpush1.bf16.msra.mxu1 %v7370_v37  ;;  %v7462_v36 = vld [vmem:[%s10716_s1 + $0xa88] ss:$16 sps:$4 sm:$0xff]   ;;  %v7467_v37 = vld [vmem:[%s10716_s1 + $0xaa4] ss:$16 sps:$4 sm:$0xff]  }
 0x118   :  { %5098 = vmatprep.subr.bf16.mxu0 %v7375_v38  ;;  %5631 = vmatprep.subr.bf16.mxu1 %v7378_v39  ;;  %v7470_v38 = vld [vmem:[%s10716_s1 + $0xaac] ss:$16 sps:$4 sm:$0xff]   ;;  %v7465_v39 = vld [vmem:[%s10716_s1 + $0xaa0] ss:$16 sps:$4 sm:$0xff]  }
 0x11b   :  { %5099 = vmatpush1.bf16.msra.mxu0 %v7373_v40  ;;  %5632 = vmatpush1.bf16.msra.mxu1 %v7376_v41  ;;  %v7468_v40 = vld [vmem:[%s10716_s1 + $0xaa8] ss:$16 sps:$4 sm:$0xff]   ;;  %v7473_v41 = vld [vmem:[%s10716_s1 + $0xac4] ss:$16 sps:$4 sm:$0xff]  }
 0x11c   :  { %5100 = vmatprep.subr.bf16.mxu0 %v7381_v42  ;;  %5633 = vmatprep.subr.bf16.mxu1 %v7384_v43  ;;  %v7476_v42 = vld [vmem:[%s10716_s1 + $0xacc] ss:$16 sps:$4 sm:$0xff]   ;;  %v7471_v43 = vld [vmem:[%s10716_s1 + $0xac0] ss:$16 sps:$4 sm:$0xff]  }
 0x11f   :  { %5101 = vmatpush1.bf16.msra.mxu0 %v7379_v44  ;;  %5634 = vmatpush1.bf16.msra.mxu1 %v7382_v45  ;;  %v7474_v44 = vld [vmem:[%s10716_s1 + $0xac8] ss:$16 sps:$4 sm:$0xff]   ;;  %v7479_v45 = vld [vmem:[%s10716_s1 + $0xae4] ss:$16 sps:$4 sm:$0xff]  }
 0x120   :  { %5102 = vmatprep.subr.bf16.mxu0 %v7387_v46  ;;  %5635 = vmatprep.subr.bf16.mxu1 %v7390_v47  ;;  %v7482_v46 = vld [vmem:[%s10716_s1 + $0xaec] ss:$16 sps:$4 sm:$0xff]   ;;  %v7477_v47 = vld [vmem:[%s10716_s1 + $0xae0] ss:$16 sps:$4 sm:$0xff]  }
 0x123   :  { %5103 = vmatpush1.bf16.msra.mxu0 %v7385_v48  ;;  %5636 = vmatpush1.bf16.msra.mxu1 %v7388_v49  ;;  %v7480_v48 = vld [vmem:[%s10716_s1 + $0xae8] ss:$16 sps:$4 sm:$0xff]   ;;  %v7485_v49 = vld [vmem:[%s10716_s1 + $0xb04] ss:$16 sps:$4 sm:$0xff]  }
 0x124   :  { %5104 = vmatprep.subr.bf16.mxu0 %v7393_v50  ;;  %5637 = vmatprep.subr.bf16.mxu1 %v7396_v51  ;;  %v7488_v50 = vld [vmem:[%s10716_s1 + $0xb0c] ss:$16 sps:$4 sm:$0xff]   ;;  %v7483_v51 = vld [vmem:[%s10716_s1 + $0xb00] ss:$16 sps:$4 sm:$0xff]  }
 0x127   :  { %5105 = vmatpush1.bf16.msra.mxu0 %v7391_v52  ;;  %5638 = vmatpush1.bf16.msra.mxu1 %v7394_v53  ;;  %v7486_v52 = vld [vmem:[%s10716_s1 + $0xb08] ss:$16 sps:$4 sm:$0xff]   ;;  %v7491_v53 = vld [vmem:[%s10716_s1 + $0xb24] ss:$16 sps:$4 sm:$0xff]  }
 0x128   :  { %5106 = vmatprep.subr.bf16.mxu0 %v7399_v54  ;;  %5639 = vmatprep.subr.bf16.mxu1 %v7402_v55  ;;  %v7494_v54 = vld [vmem:[%s10716_s1 + $0xb2c] ss:$16 sps:$4 sm:$0xff]   ;;  %v7489_v55 = vld [vmem:[%s10716_s1 + $0xb20] ss:$16 sps:$4 sm:$0xff]  }
 0x12b   :  { %5107 = vmatpush1.bf16.msra.mxu0 %v7397_v56  ;;  %5640 = vmatpush1.bf16.msra.mxu1 %v7400_v57  ;;  %v7492_v56 = vld [vmem:[%s10716_s1 + $0xb28] ss:$16 sps:$4 sm:$0xff]   ;;  %v7497_v57 = vld [vmem:[%s10716_s1 + $0xb44] ss:$16 sps:$4 sm:$0xff]  }
 0x12c   :  { %5108 = vmatprep.subr.bf16.mxu0 %v7405_v58  ;;  %5641 = vmatprep.subr.bf16.mxu1 %v7408_v59  ;;  %v7500_v58 = vld [vmem:[%s10716_s1 + $0xb4c] ss:$16 sps:$4 sm:$0xff]   ;;  %v7495_v59 = vld [vmem:[%s10716_s1 + $0xb40] ss:$16 sps:$4 sm:$0xff]  }
 0x12f   :  { %5109 = vmatpush1.bf16.msra.mxu0 %v7403_v60  ;;  %5642 = vmatpush1.bf16.msra.mxu1 %v7406_v61  ;;  %v7498_v60 = vld [vmem:[%s10716_s1 + $0xb48] ss:$16 sps:$4 sm:$0xff]   ;;  %v7503_v61 = vld [vmem:[%s10716_s1 + $0xb64] ss:$16 sps:$4 sm:$0xff]  }
 0x130   :  { %5110 = vmatprep.subr.bf16.mxu0 %v7411_v62  ;;  %5643 = vmatprep.subr.bf16.mxu1 %v7414_v63  ;;  %v7506_v62 = vld [vmem:[%s10716_s1 + $0xb6c] ss:$16 sps:$4 sm:$0xff]   ;;  %v7501_v63 = vld [vmem:[%s10716_s1 + $0xb60] ss:$16 sps:$4 sm:$0xff]  }
 0x133   :  { %5111 = vmatpush1.bf16.msra.mxu0 %v7409_v0  ;;  %5644 = vmatpush1.bf16.msra.mxu1 %v7412_v1  ;;  %v7504_v0 = vld [vmem:[%s10716_s1 + $0xb68] ss:$16 sps:$4 sm:$0xff]   ;;  %v7509_v1 = vld [vmem:[%s10716_s1 + $0xb84] ss:$16 sps:$4 sm:$0xff]  }
 0x134   :  { %5112 = vmatprep.subr.bf16.mxu0 %v7417_v2  ;;  %5645 = vmatprep.subr.bf16.mxu1 %v7420_v3  ;;  %v7512_v2 = vld [vmem:[%s10716_s1 + $0xb8c] ss:$16 sps:$4 sm:$0xff]   ;;  %v7507_v3 = vld [vmem:[%s10716_s1 + $0xb80] ss:$16 sps:$4 sm:$0xff]  }
 0x137   :  { %5113 = vmatpush1.bf16.msra.mxu0 %v7415_v4  ;;  %5646 = vmatpush1.bf16.msra.mxu1 %v7418_v5  ;;  %v7510_v4 = vld [vmem:[%s10716_s1 + $0xb88] ss:$16 sps:$4 sm:$0xff]   ;;  %v7515_v5 = vld [vmem:[%s10716_s1 + $0xba4] ss:$16 sps:$4 sm:$0xff]  }
 0x138   :  { %5114 = vmatprep.subr.bf16.mxu0 %v7423_v6  ;;  %5647 = vmatprep.subr.bf16.mxu1 %v7426_v7  ;;  %v7518_v6 = vld [vmem:[%s10716_s1 + $0xbac] ss:$16 sps:$4 sm:$0xff]   ;;  %v7513_v7 = vld [vmem:[%s10716_s1 + $0xba0] ss:$16 sps:$4 sm:$0xff]  }
 0x13b   :  { %5115 = vmatpush1.bf16.msra.mxu0 %v7421_v8  ;;  %5648 = vmatpush1.bf16.msra.mxu1 %v7424_v9  ;;  %v7516_v8 = vld [vmem:[%s10716_s1 + $0xba8] ss:$16 sps:$4 sm:$0xff]   ;;  %v7521_v9 = vld [vmem:[%s10716_s1 + $0xbc4] ss:$16 sps:$4 sm:$0xff]  }
 0x13c   :  { %5116 = vmatprep.subr.bf16.mxu0 %v7429_v10  ;;  %5649 = vmatprep.subr.bf16.mxu1 %v7432_v12  ;;  %v7524_v10 = vld [vmem:[%s10716_s1 + $0xbcc] ss:$16 sps:$4 sm:$0xff]   ;;  %v7519_v12 = vld [vmem:[%s10716_s1 + $0xbc0] ss:$16 sps:$4 sm:$0xff]  }
 0x13f   :  { %5117 = vmatpush1.bf16.msra.mxu0 %v7427_v13  ;;  %5650 = vmatpush1.bf16.msra.mxu1 %v7430_v15  ;;  %v7522_v13 = vld [vmem:[%s10716_s1 + $0xbc8] ss:$16 sps:$4 sm:$0xff]   ;;  %v7527_v15 = vld [vmem:[%s10716_s1 + $0xbe4] ss:$16 sps:$4 sm:$0xff]  }
 0x140   :  { %5127 = vmatprep.subr.bf16.mxu0 %v7437_v11  ;;  %5660 = vmatprep.subr.bf16.mxu1 %v7440_v17  ;;  %v7530_v11 = vld [vmem:[%s10716_s1 + $0xbec] ss:$16 sps:$4 sm:$0xff]   ;;  %v7525_v17 = vld [vmem:[%s10716_s1 + $0xbe0] ss:$16 sps:$4 sm:$0xff]  }
 0x142   :  { %5119 = vmatmul.mubr.bf16.vlgmr.msra.gmra.mrb[0].mxu0 %v6022_v14  ;;  %5652 = vmatmul.mubr.bf16.vlgmr.msra.gmra.mrb[0].mxu1 %v6022_v14  ;;  %v7528_v14 = vld [vmem:[%s10716_s1 + $0xbe8] ss:$16 sps:$4 sm:$0xff]  }
 0x143   :  { %5128 = vmatpush1.bf16.msra.mxu0 %v7435_v19  ;;  %5661 = vmatpush1.bf16.msra.mxu1 %v7438_v20  ;;  %v7535_v19 = vld [vmem:[%s10716_s1 + $0xc04] ss:$16 sps:$4 sm:$0xff]   ;;  %v7538_v20 = vld [vmem:[%s10716_s1 + $0xc0c] ss:$16 sps:$4 sm:$0xff]  }
 0x144   :  { %5129 = vmatprep.subr.bf16.mxu0 %v7443_v21  ;;  %5662 = vmatprep.subr.bf16.mxu1 %v7446_v16  ;;  %v9406_v21 = vld [vmem:[%s10717_s0 + $0x30] sm:$0xff]  ;;  %v6024_v16 = vcombine.low %v9205_v18, %v9205_v18  ;;  %v7544_v18 = vld [vmem:[%s10716_s1 + $0xc2c] ss:$16 sps:$4 sm:$0xff]  }
 0x145   :  { %5159 = vmatprep.mubr.bf16.mxu0 %v6025_v22  ;;  %5692 = vmatprep.mubr.bf16.mxu1 %v6025_v22  ;;  %v7533_v22 = vld [vmem:[%s10716_s1 + $0xc00] ss:$16 sps:$4 sm:$0xff]  }
 0x147   :  { %5130 = vmatpush1.bf16.msra.mxu0 %v7441_v23  ;;  %5663 = vmatpush1.bf16.msra.mxu1 %v7444_v24  ;;  %v7536_v23 = vld [vmem:[%s10716_s1 + $0xc08] ss:$16 sps:$4 sm:$0xff]   ;;  %v7541_v24 = vld [vmem:[%s10716_s1 + $0xc24] ss:$16 sps:$4 sm:$0xff]  }
 0x148   :  { %5131 = vmatprep.subr.bf16.mxu0 %v7449_v25  ;;  %5664 = vmatprep.subr.bf16.mxu1 %v7452_v26  ;;  %v6027_v25 = vcombine.high %v9406_v21, %v9406_v21  ;;  %v7539_v26 = vld [vmem:[%s10716_s1 + $0xc20] ss:$16 sps:$4 sm:$0xff]  }
 0x14b   :  { %5132 = vmatpush1.bf16.msra.mxu0 %v7447_v27  ;;  %5665 = vmatpush1.bf16.msra.mxu1 %v7450_v28  ;;  %v7542_v27 = vld [vmem:[%s10716_s1 + $0xc28] ss:$16 sps:$4 sm:$0xff]   ;;  %v7547_v28 = vld [vmem:[%s10716_s1 + $0xc44] ss:$16 sps:$4 sm:$0xff]  }
 0x14c   :  { %5133 = vmatprep.subr.bf16.mxu0 %v7455_v29  ;;  %5666 = vmatprep.subr.bf16.mxu1 %v7458_v30  ;;  %v7550_v29 = vld [vmem:[%s10716_s1 + $0xc4c] ss:$16 sps:$4 sm:$0xff]   ;;  %v7545_v30 = vld [vmem:[%s10716_s1 + $0xc40] ss:$16 sps:$4 sm:$0xff]  }
 0x14f   :  { %5134 = vmatpush1.bf16.msra.mxu0 %v7453_v31  ;;  %5667 = vmatpush1.bf16.msra.mxu1 %v7456_v32  ;;  %v7548_v31 = vld [vmem:[%s10716_s1 + $0xc48] ss:$16 sps:$4 sm:$0xff]   ;;  %v7553_v32 = vld [vmem:[%s10716_s1 + $0xc64] ss:$16 sps:$4 sm:$0xff]  }
 0x150   :  { %5135 = vmatprep.subr.bf16.mxu0 %v7461_v33  ;;  %5668 = vmatprep.subr.bf16.mxu1 %v7464_v34  ;;  %v7556_v33 = vld [vmem:[%s10716_s1 + $0xc6c] ss:$16 sps:$4 sm:$0xff]   ;;  %v7551_v34 = vld [vmem:[%s10716_s1 + $0xc60] ss:$16 sps:$4 sm:$0xff]  }
 0x153   :  { %5136 = vmatpush1.bf16.msra.mxu0 %v7459_v35  ;;  %5669 = vmatpush1.bf16.msra.mxu1 %v7462_v36  ;;  %v7554_v35 = vld [vmem:[%s10716_s1 + $0xc68] ss:$16 sps:$4 sm:$0xff]   ;;  %v7559_v36 = vld [vmem:[%s10716_s1 + $0xc84] ss:$16 sps:$4 sm:$0xff]  }
 0x154   :  { %5137 = vmatprep.subr.bf16.mxu0 %v7467_v37  ;;  %5670 = vmatprep.subr.bf16.mxu1 %v7470_v38  ;;  %v7562_v37 = vld [vmem:[%s10716_s1 + $0xc8c] ss:$16 sps:$4 sm:$0xff]   ;;  %v7557_v38 = vld [vmem:[%s10716_s1 + $0xc80] ss:$16 sps:$4 sm:$0xff]  }
 0x157   :  { %5138 = vmatpush1.bf16.msra.mxu0 %v7465_v39  ;;  %5671 = vmatpush1.bf16.msra.mxu1 %v7468_v40  ;;  %v7560_v39 = vld [vmem:[%s10716_s1 + $0xc88] ss:$16 sps:$4 sm:$0xff]   ;;  %v7565_v40 = vld [vmem:[%s10716_s1 + $0xca4] ss:$16 sps:$4 sm:$0xff]  }
 0x158   :  { %5139 = vmatprep.subr.bf16.mxu0 %v7473_v41  ;;  %5672 = vmatprep.subr.bf16.mxu1 %v7476_v42  ;;  %v7568_v41 = vld [vmem:[%s10716_s1 + $0xcac] ss:$16 sps:$4 sm:$0xff]   ;;  %v7563_v42 = vld [vmem:[%s10716_s1 + $0xca0] ss:$16 sps:$4 sm:$0xff]  }
 0x15b   :  { %5140 = vmatpush1.bf16.msra.mxu0 %v7471_v43  ;;  %5673 = vmatpush1.bf16.msra.mxu1 %v7474_v44  ;;  %v7566_v43 = vld [vmem:[%s10716_s1 + $0xca8] ss:$16 sps:$4 sm:$0xff]   ;;  %v7571_v44 = vld [vmem:[%s10716_s1 + $0xcc4] ss:$16 sps:$4 sm:$0xff]  }
 0x15c   :  { %5141 = vmatprep.subr.bf16.mxu0 %v7479_v45  ;;  %5674 = vmatprep.subr.bf16.mxu1 %v7482_v46  ;;  %v7574_v45 = vld [vmem:[%s10716_s1 + $0xccc] ss:$16 sps:$4 sm:$0xff]   ;;  %v7569_v46 = vld [vmem:[%s10716_s1 + $0xcc0] ss:$16 sps:$4 sm:$0xff]  }
 0x15f   :  { %5142 = vmatpush1.bf16.msra.mxu0 %v7477_v47  ;;  %5675 = vmatpush1.bf16.msra.mxu1 %v7480_v48  ;;  %v7572_v47 = vld [vmem:[%s10716_s1 + $0xcc8] ss:$16 sps:$4 sm:$0xff]   ;;  %v7577_v48 = vld [vmem:[%s10716_s1 + $0xce4] ss:$16 sps:$4 sm:$0xff]  }
 0x160   :  { %5143 = vmatprep.subr.bf16.mxu0 %v7485_v49  ;;  %5676 = vmatprep.subr.bf16.mxu1 %v7488_v50  ;;  %v7580_v49 = vld [vmem:[%s10716_s1 + $0xcec] ss:$16 sps:$4 sm:$0xff]   ;;  %v7575_v50 = vld [vmem:[%s10716_s1 + $0xce0] ss:$16 sps:$4 sm:$0xff]  }
 0x163   :  { %5144 = vmatpush1.bf16.msra.mxu0 %v7483_v51  ;;  %5677 = vmatpush1.bf16.msra.mxu1 %v7486_v52  ;;  %v7578_v51 = vld [vmem:[%s10716_s1 + $0xce8] ss:$16 sps:$4 sm:$0xff]   ;;  %v7583_v52 = vld [vmem:[%s10716_s1 + $0xd04] ss:$16 sps:$4 sm:$0xff]  }
 0x164   :  { %5145 = vmatprep.subr.bf16.mxu0 %v7491_v53  ;;  %5678 = vmatprep.subr.bf16.mxu1 %v7494_v54  ;;  %v7586_v53 = vld [vmem:[%s10716_s1 + $0xd0c] ss:$16 sps:$4 sm:$0xff]   ;;  %v7581_v54 = vld [vmem:[%s10716_s1 + $0xd00] ss:$16 sps:$4 sm:$0xff]  }
 0x167   :  { %5146 = vmatpush1.bf16.msra.mxu0 %v7489_v55  ;;  %5679 = vmatpush1.bf16.msra.mxu1 %v7492_v56  ;;  %v7584_v55 = vld [vmem:[%s10716_s1 + $0xd08] ss:$16 sps:$4 sm:$0xff]   ;;  %v7589_v56 = vld [vmem:[%s10716_s1 + $0xd24] ss:$16 sps:$4 sm:$0xff]  }
 0x168   :  { %5147 = vmatprep.subr.bf16.mxu0 %v7497_v57  ;;  %5680 = vmatprep.subr.bf16.mxu1 %v7500_v58  ;;  %v7592_v57 = vld [vmem:[%s10716_s1 + $0xd2c] ss:$16 sps:$4 sm:$0xff]   ;;  %v7587_v58 = vld [vmem:[%s10716_s1 + $0xd20] ss:$16 sps:$4 sm:$0xff]  }
 0x16b   :  { %5148 = vmatpush1.bf16.msra.mxu0 %v7495_v59  ;;  %5681 = vmatpush1.bf16.msra.mxu1 %v7498_v60  ;;  %v7590_v59 = vld [vmem:[%s10716_s1 + $0xd28] ss:$16 sps:$4 sm:$0xff]   ;;  %v7595_v60 = vld [vmem:[%s10716_s1 + $0xd44] ss:$16 sps:$4 sm:$0xff]  }
 0x16c   :  { %5149 = vmatprep.subr.bf16.mxu0 %v7503_v61  ;;  %5682 = vmatprep.subr.bf16.mxu1 %v7506_v62  ;;  %v7598_v61 = vld [vmem:[%s10716_s1 + $0xd4c] ss:$16 sps:$4 sm:$0xff]   ;;  %v7593_v62 = vld [vmem:[%s10716_s1 + $0xd40] ss:$16 sps:$4 sm:$0xff]  }
 0x16f   :  { %5150 = vmatpush1.bf16.msra.mxu0 %v7501_v63  ;;  %5683 = vmatpush1.bf16.msra.mxu1 %v7504_v0  ;;  %v7596_v63 = vld [vmem:[%s10716_s1 + $0xd48] ss:$16 sps:$4 sm:$0xff]   ;;  %v7601_v0 = vld [vmem:[%s10716_s1 + $0xd64] ss:$16 sps:$4 sm:$0xff]  }
 0x170   :  { %5151 = vmatprep.subr.bf16.mxu0 %v7509_v1  ;;  %5684 = vmatprep.subr.bf16.mxu1 %v7512_v2  ;;  %v7604_v1 = vld [vmem:[%s10716_s1 + $0xd6c] ss:$16 sps:$4 sm:$0xff]   ;;  %v7599_v2 = vld [vmem:[%s10716_s1 + $0xd60] ss:$16 sps:$4 sm:$0xff]  }
 0x173   :  { %5152 = vmatpush1.bf16.msra.mxu0 %v7507_v3  ;;  %5685 = vmatpush1.bf16.msra.mxu1 %v7510_v4  ;;  %v7602_v3 = vld [vmem:[%s10716_s1 + $0xd68] ss:$16 sps:$4 sm:$0xff]   ;;  %v7607_v4 = vld [vmem:[%s10716_s1 + $0xd84] ss:$16 sps:$4 sm:$0xff]  }
 0x174   :  { %5153 = vmatprep.subr.bf16.mxu0 %v7515_v5  ;;  %5686 = vmatprep.subr.bf16.mxu1 %v7518_v6  ;;  %v7610_v5 = vld [vmem:[%s10716_s1 + $0xd8c] ss:$16 sps:$4 sm:$0xff]   ;;  %v7605_v6 = vld [vmem:[%s10716_s1 + $0xd80] ss:$16 sps:$4 sm:$0xff]  }
 0x177   :  { %5154 = vmatpush1.bf16.msra.mxu0 %v7513_v7  ;;  %5687 = vmatpush1.bf16.msra.mxu1 %v7516_v8  ;;  %v7608_v7 = vld [vmem:[%s10716_s1 + $0xd88] ss:$16 sps:$4 sm:$0xff]   ;;  %v7613_v8 = vld [vmem:[%s10716_s1 + $0xda4] ss:$16 sps:$4 sm:$0xff]  }
 0x178   :  { %5155 = vmatprep.subr.bf16.mxu0 %v7521_v9  ;;  %5688 = vmatprep.subr.bf16.mxu1 %v7524_v10  ;;  %v7616_v9 = vld [vmem:[%s10716_s1 + $0xdac] ss:$16 sps:$4 sm:$0xff]   ;;  %v7611_v10 = vld [vmem:[%s10716_s1 + $0xda0] ss:$16 sps:$4 sm:$0xff]  }
 0x17b   :  { %5156 = vmatpush1.bf16.msra.mxu0 %v7519_v12  ;;  %5689 = vmatpush1.bf16.msra.mxu1 %v7522_v13  ;;  %v7614_v12 = vld [vmem:[%s10716_s1 + $0xda8] ss:$16 sps:$4 sm:$0xff]   ;;  %v7619_v13 = vld [vmem:[%s10716_s1 + $0xdc4] ss:$16 sps:$4 sm:$0xff]  }
 0x17c   :  { %5157 = vmatprep.subr.bf16.mxu0 %v7527_v15  ;;  %5690 = vmatprep.subr.bf16.mxu1 %v7530_v11  ;;  %v7622_v15 = vld [vmem:[%s10716_s1 + $0xdcc] ss:$16 sps:$4 sm:$0xff]   ;;  %v7617_v11 = vld [vmem:[%s10716_s1 + $0xdc0] ss:$16 sps:$4 sm:$0xff]  }
 0x17f   :  { %5158 = vmatpush1.bf16.msra.mxu0 %v7525_v17  ;;  %5691 = vmatpush1.bf16.msra.mxu1 %v7528_v14  ;;  %v7620_v17 = vld [vmem:[%s10716_s1 + $0xdc8] ss:$16 sps:$4 sm:$0xff]   ;;  %v7625_v14 = vld [vmem:[%s10716_s1 + $0xde4] ss:$16 sps:$4 sm:$0xff]  }
 0x180   :  { %5168 = vmatprep.subr.bf16.mxu0 %v7535_v19  ;;  %5701 = vmatprep.subr.bf16.mxu1 %v7538_v20  ;;  %v7628_v19 = vld [vmem:[%s10716_s1 + $0xdec] ss:$16 sps:$4 sm:$0xff]   ;;  %v7623_v20 = vld [vmem:[%s10716_s1 + $0xde0] ss:$16 sps:$4 sm:$0xff]  }
 0x182   :  { %5160 = vmatmul.mubr.bf16.vlgmr.msra.gmra.mrb[0].mxu0 %v6024_v16  ;;  %5693 = vmatmul.mubr.bf16.vlgmr.msra.gmra.mrb[0].mxu1 %v6024_v16  ;;  %v7626_v16 = vld [vmem:[%s10716_s1 + $0xde8] ss:$16 sps:$4 sm:$0xff]  }
 0x183   :  { %5169 = vmatpush1.bf16.msra.mxu0 %v7533_v22  ;;  %5702 = vmatpush1.bf16.msra.mxu1 %v7536_v23  ;;  %v7633_v22 = vld [vmem:[%s10716_s1 + $0xe04] ss:$16 sps:$4 sm:$0xff]   ;;  %v7636_v23 = vld [vmem:[%s10716_s1 + $0xe0c] ss:$16 sps:$4 sm:$0xff]  }
 0x184   :  { %5170 = vmatprep.subr.bf16.mxu0 %v7541_v24  ;;  %5703 = vmatprep.subr.bf16.mxu1 %v7544_v18  ;;  %v9607_v24 = vld [vmem:[%s10717_s0 + $0x38] sm:$0xff]  ;;  %v6026_v18 = vcombine.low %v9406_v21, %v9406_v21 }
 0x185   :  { %5200 = vmatprep.mubr.bf16.mxu0 %v6027_v25  ;;  %5733 = vmatprep.mubr.bf16.mxu1 %v6027_v25  ;;  %v7631_v25 = vld [vmem:[%s10716_s1 + $0xe00] ss:$16 sps:$4 sm:$0xff]   ;;  %v7642_v21 = vld [vmem:[%s10716_s1 + $0xe2c] ss:$16 sps:$4 sm:$0xff]  }
 0x187   :  { %5171 = vmatpush1.bf16.msra.mxu0 %v7539_v26  ;;  %5704 = vmatpush1.bf16.msra.mxu1 %v7542_v27  ;;  %v7634_v26 = vld [vmem:[%s10716_s1 + $0xe08] ss:$16 sps:$4 sm:$0xff]   ;;  %v7639_v27 = vld [vmem:[%s10716_s1 + $0xe24] ss:$16 sps:$4 sm:$0xff]  }
 0x188   :  { %5172 = vmatprep.subr.bf16.mxu0 %v7547_v28  ;;  %5705 = vmatprep.subr.bf16.mxu1 %v7550_v29  ;;  %v6029_v28 = vcombine.high %v9607_v24, %v9607_v24  ;;  %v7637_v29 = vld [vmem:[%s10716_s1 + $0xe20] ss:$16 sps:$4 sm:$0xff]  }
 0x18b   :  { %5173 = vmatpush1.bf16.msra.mxu0 %v7545_v30  ;;  %5706 = vmatpush1.bf16.msra.mxu1 %v7548_v31  ;;  %v7640_v30 = vld [vmem:[%s10716_s1 + $0xe28] ss:$16 sps:$4 sm:$0xff]   ;;  %v7645_v31 = vld [vmem:[%s10716_s1 + $0xe44] ss:$16 sps:$4 sm:$0xff]  }
 0x18c   :  { %5174 = vmatprep.subr.bf16.mxu0 %v7553_v32  ;;  %5707 = vmatprep.subr.bf16.mxu1 %v7556_v33  ;;  %v7648_v32 = vld [vmem:[%s10716_s1 + $0xe4c] ss:$16 sps:$4 sm:$0xff]   ;;  %v7643_v33 = vld [vmem:[%s10716_s1 + $0xe40] ss:$16 sps:$4 sm:$0xff]  }
 0x18f   :  { %5175 = vmatpush1.bf16.msra.mxu0 %v7551_v34  ;;  %5708 = vmatpush1.bf16.msra.mxu1 %v7554_v35  ;;  %v7646_v34 = vld [vmem:[%s10716_s1 + $0xe48] ss:$16 sps:$4 sm:$0xff]   ;;  %v7651_v35 = vld [vmem:[%s10716_s1 + $0xe64] ss:$16 sps:$4 sm:$0xff]  }
 0x190   :  { %5176 = vmatprep.subr.bf16.mxu0 %v7559_v36  ;;  %5709 = vmatprep.subr.bf16.mxu1 %v7562_v37  ;;  %v7654_v36 = vld [vmem:[%s10716_s1 + $0xe6c] ss:$16 sps:$4 sm:$0xff]   ;;  %v7649_v37 = vld [vmem:[%s10716_s1 + $0xe60] ss:$16 sps:$4 sm:$0xff]  }
 0x193   :  { %5177 = vmatpush1.bf16.msra.mxu0 %v7557_v38  ;;  %5710 = vmatpush1.bf16.msra.mxu1 %v7560_v39  ;;  %v7652_v38 = vld [vmem:[%s10716_s1 + $0xe68] ss:$16 sps:$4 sm:$0xff]   ;;  %v7657_v39 = vld [vmem:[%s10716_s1 + $0xe84] ss:$16 sps:$4 sm:$0xff]  }
 0x194   :  { %5178 = vmatprep.subr.bf16.mxu0 %v7565_v40  ;;  %5711 = vmatprep.subr.bf16.mxu1 %v7568_v41  ;;  %v7660_v40 = vld [vmem:[%s10716_s1 + $0xe8c] ss:$16 sps:$4 sm:$0xff]   ;;  %v7655_v41 = vld [vmem:[%s10716_s1 + $0xe80] ss:$16 sps:$4 sm:$0xff]  }
 0x197   :  { %5179 = vmatpush1.bf16.msra.mxu0 %v7563_v42  ;;  %5712 = vmatpush1.bf16.msra.mxu1 %v7566_v43  ;;  %v7658_v42 = vld [vmem:[%s10716_s1 + $0xe88] ss:$16 sps:$4 sm:$0xff]   ;;  %v7663_v43 = vld [vmem:[%s10716_s1 + $0xea4] ss:$16 sps:$4 sm:$0xff]  }
 0x198   :  { %5180 = vmatprep.subr.bf16.mxu0 %v7571_v44  ;;  %5713 = vmatprep.subr.bf16.mxu1 %v7574_v45  ;;  %v7666_v44 = vld [vmem:[%s10716_s1 + $0xeac] ss:$16 sps:$4 sm:$0xff]   ;;  %v7661_v45 = vld [vmem:[%s10716_s1 + $0xea0] ss:$16 sps:$4 sm:$0xff]  }
 0x19b   :  { %5181 = vmatpush1.bf16.msra.mxu0 %v7569_v46  ;;  %5714 = vmatpush1.bf16.msra.mxu1 %v7572_v47  ;;  %v7664_v46 = vld [vmem:[%s10716_s1 + $0xea8] ss:$16 sps:$4 sm:$0xff]   ;;  %v7669_v47 = vld [vmem:[%s10716_s1 + $0xec4] ss:$16 sps:$4 sm:$0xff]  }
 0x19c   :  { %5182 = vmatprep.subr.bf16.mxu0 %v7577_v48  ;;  %5715 = vmatprep.subr.bf16.mxu1 %v7580_v49  ;;  %v7672_v48 = vld [vmem:[%s10716_s1 + $0xecc] ss:$16 sps:$4 sm:$0xff]   ;;  %v7667_v49 = vld [vmem:[%s10716_s1 + $0xec0] ss:$16 sps:$4 sm:$0xff]  }
 0x19f   :  { %5183 = vmatpush1.bf16.msra.mxu0 %v7575_v50  ;;  %5716 = vmatpush1.bf16.msra.mxu1 %v7578_v51  ;;  %v7670_v50 = vld [vmem:[%s10716_s1 + $0xec8] ss:$16 sps:$4 sm:$0xff]   ;;  %v7675_v51 = vld [vmem:[%s10716_s1 + $0xee4] ss:$16 sps:$4 sm:$0xff]  }
 0x1a0   :  { %5184 = vmatprep.subr.bf16.mxu0 %v7583_v52  ;;  %5717 = vmatprep.subr.bf16.mxu1 %v7586_v53  ;;  %v7678_v52 = vld [vmem:[%s10716_s1 + $0xeec] ss:$16 sps:$4 sm:$0xff]   ;;  %v7673_v53 = vld [vmem:[%s10716_s1 + $0xee0] ss:$16 sps:$4 sm:$0xff]  }
 0x1a3   :  { %5185 = vmatpush1.bf16.msra.mxu0 %v7581_v54  ;;  %5718 = vmatpush1.bf16.msra.mxu1 %v7584_v55  ;;  %v7676_v54 = vld [vmem:[%s10716_s1 + $0xee8] ss:$16 sps:$4 sm:$0xff]   ;;  %v7681_v55 = vld [vmem:[%s10716_s1 + $0xf04] ss:$16 sps:$4 sm:$0xff]  }
 0x1a4   :  { %5186 = vmatprep.subr.bf16.mxu0 %v7589_v56  ;;  %5719 = vmatprep.subr.bf16.mxu1 %v7592_v57  ;;  %v7684_v56 = vld [vmem:[%s10716_s1 + $0xf0c] ss:$16 sps:$4 sm:$0xff]   ;;  %v7679_v57 = vld [vmem:[%s10716_s1 + $0xf00] ss:$16 sps:$4 sm:$0xff]  }
 0x1a7   :  { %5187 = vmatpush1.bf16.msra.mxu0 %v7587_v58  ;;  %5720 = vmatpush1.bf16.msra.mxu1 %v7590_v59  ;;  %v7682_v58 = vld [vmem:[%s10716_s1 + $0xf08] ss:$16 sps:$4 sm:$0xff]   ;;  %v7687_v59 = vld [vmem:[%s10716_s1 + $0xf24] ss:$16 sps:$4 sm:$0xff]  }
 0x1a8   :  { %5188 = vmatprep.subr.bf16.mxu0 %v7595_v60  ;;  %5721 = vmatprep.subr.bf16.mxu1 %v7598_v61  ;;  %v7690_v60 = vld [vmem:[%s10716_s1 + $0xf2c] ss:$16 sps:$4 sm:$0xff]   ;;  %v7685_v61 = vld [vmem:[%s10716_s1 + $0xf20] ss:$16 sps:$4 sm:$0xff]  }
 0x1ab   :  { %5189 = vmatpush1.bf16.msra.mxu0 %v7593_v62  ;;  %5722 = vmatpush1.bf16.msra.mxu1 %v7596_v63  ;;  %v7688_v62 = vld [vmem:[%s10716_s1 + $0xf28] ss:$16 sps:$4 sm:$0xff]   ;;  %v7693_v63 = vld [vmem:[%s10716_s1 + $0xf44] ss:$16 sps:$4 sm:$0xff]  }
 0x1ac   :  { %5190 = vmatprep.subr.bf16.mxu0 %v7601_v0  ;;  %5723 = vmatprep.subr.bf16.mxu1 %v7604_v1  ;;  %v7696_v0 = vld [vmem:[%s10716_s1 + $0xf4c] ss:$16 sps:$4 sm:$0xff]   ;;  %v7691_v1 = vld [vmem:[%s10716_s1 + $0xf40] ss:$16 sps:$4 sm:$0xff]  }
 0x1af   :  { %5191 = vmatpush1.bf16.msra.mxu0 %v7599_v2  ;;  %5724 = vmatpush1.bf16.msra.mxu1 %v7602_v3  ;;  %v7694_v2 = vld [vmem:[%s10716_s1 + $0xf48] ss:$16 sps:$4 sm:$0xff]   ;;  %v7699_v3 = vld [vmem:[%s10716_s1 + $0xf64] ss:$16 sps:$4 sm:$0xff]  }
 0x1b0   :  { %5192 = vmatprep.subr.bf16.mxu0 %v7607_v4  ;;  %5725 = vmatprep.subr.bf16.mxu1 %v7610_v5  ;;  %v7702_v4 = vld [vmem:[%s10716_s1 + $0xf6c] ss:$16 sps:$4 sm:$0xff]   ;;  %v7697_v5 = vld [vmem:[%s10716_s1 + $0xf60] ss:$16 sps:$4 sm:$0xff]  }
 0x1b3   :  { %5193 = vmatpush1.bf16.msra.mxu0 %v7605_v6  ;;  %5726 = vmatpush1.bf16.msra.mxu1 %v7608_v7  ;;  %v7700_v6 = vld [vmem:[%s10716_s1 + $0xf68] ss:$16 sps:$4 sm:$0xff]   ;;  %v7705_v7 = vld [vmem:[%s10716_s1 + $0xf84] ss:$16 sps:$4 sm:$0xff]  }
 0x1b4   :  { %5194 = vmatprep.subr.bf16.mxu0 %v7613_v8  ;;  %5727 = vmatprep.subr.bf16.mxu1 %v7616_v9  ;;  %v7708_v8 = vld [vmem:[%s10716_s1 + $0xf8c] ss:$16 sps:$4 sm:$0xff]   ;;  %v7703_v9 = vld [vmem:[%s10716_s1 + $0xf80] ss:$16 sps:$4 sm:$0xff]  }
 0x1b7   :  { %5195 = vmatpush1.bf16.msra.mxu0 %v7611_v10  ;;  %5728 = vmatpush1.bf16.msra.mxu1 %v7614_v12  ;;  %v7706_v10 = vld [vmem:[%s10716_s1 + $0xf88] ss:$16 sps:$4 sm:$0xff]   ;;  %v7711_v12 = vld [vmem:[%s10716_s1 + $0xfa4] ss:$16 sps:$4 sm:$0xff]  }
 0x1b8   :  { %5196 = vmatprep.subr.bf16.mxu0 %v7619_v13  ;;  %5729 = vmatprep.subr.bf16.mxu1 %v7622_v15  ;;  %v7714_v13 = vld [vmem:[%s10716_s1 + $0xfac] ss:$16 sps:$4 sm:$0xff]   ;;  %v7709_v15 = vld [vmem:[%s10716_s1 + $0xfa0] ss:$16 sps:$4 sm:$0xff]  }
 0x1bb   :  { %5197 = vmatpush1.bf16.msra.mxu0 %v7617_v11  ;;  %5730 = vmatpush1.bf16.msra.mxu1 %v7620_v17  ;;  %v7712_v11 = vld [vmem:[%s10716_s1 + $0xfa8] ss:$16 sps:$4 sm:$0xff]   ;;  %v7717_v17 = vld [vmem:[%s10716_s1 + $0xfc4] ss:$16 sps:$4 sm:$0xff]  }
 0x1bc   :  { %5198 = vmatprep.subr.bf16.mxu0 %v7625_v14  ;;  %5731 = vmatprep.subr.bf16.mxu1 %v7628_v19  ;;  %v7720_v14 = vld [vmem:[%s10716_s1 + $0xfcc] ss:$16 sps:$4 sm:$0xff]   ;;  %v7715_v19 = vld [vmem:[%s10716_s1 + $0xfc0] ss:$16 sps:$4 sm:$0xff]  }
 0x1bf   :  { %5199 = vmatpush1.bf16.msra.mxu0 %v7623_v20  ;;  %5732 = vmatpush1.bf16.msra.mxu1 %v7626_v16  ;;  %v7718_v20 = vld [vmem:[%s10716_s1 + $0xfc8] ss:$16 sps:$4 sm:$0xff]   ;;  %v7723_v16 = vld [vmem:[%s10716_s1 + $0xfe4] ss:$16 sps:$4 sm:$0xff]  }
 0x1c0   :  { %5209 = vmatprep.subr.bf16.mxu0 %v7633_v22  ;;  %5742 = vmatprep.subr.bf16.mxu1 %v7636_v23  ;;  %v7726_v22 = vld [vmem:[%s10716_s1 + $0xfec] ss:$16 sps:$4 sm:$0xff]   ;;  %v7721_v23 = vld [vmem:[%s10716_s1 + $0xfe0] ss:$16 sps:$4 sm:$0xff]  }
 0x1c2   :  { %5201 = vmatmul.mubr.bf16.vlgmr.msra.gmra.mrb[0].mxu0 %v6026_v18  ;;  %5734 = vmatmul.mubr.bf16.vlgmr.msra.gmra.mrb[0].mxu1 %v6026_v18  ;;  %v7724_v18 = vld [vmem:[%s10716_s1 + $0xfe8] ss:$16 sps:$4 sm:$0xff]  }
 0x1c3   :  { %5210 = vmatpush1.bf16.msra.mxu0 %v7631_v25  ;;  %5743 = vmatpush1.bf16.msra.mxu1 %v7634_v26  ;;  %v7731_v25 = vld [vmem:[%s10716_s1 + $0x1004] ss:$16 sps:$4 sm:$0xff]   ;;  %v7734_v26 = vld [vmem:[%s10716_s1 + $0x100c] ss:$16 sps:$4 sm:$0xff]  }
 0x1c4   :  { %5211 = vmatprep.subr.bf16.mxu0 %v7639_v27  ;;  %5744 = vmatprep.subr.bf16.mxu1 %v7642_v21  ;;  %v6028_v27 = vcombine.low %v9607_v24, %v9607_v24  ;;  %v9810_v21 = vld [vmem:[%s10717_s0 + $0x40] sm:$0xff] }
 0x1c5   :  { %5241 = vmatprep.mubr.bf16.mxu0 %v6029_v28  ;;  %5774 = vmatprep.mubr.bf16.mxu1 %v6029_v28  ;;  %v7729_v28 = vld [vmem:[%s10716_s1 + $0x1000] ss:$16 sps:$4 sm:$0xff]   ;;  %v7737_v24 = vld [vmem:[%s10716_s1 + $0x1024] ss:$16 sps:$4 sm:$0xff]  }
 0x1c7   :  { %5212 = vmatpush1.bf16.msra.mxu0 %v7637_v29  ;;  %5745 = vmatpush1.bf16.msra.mxu1 %v7640_v30  ;;  %v7732_v29 = vld [vmem:[%s10716_s1 + $0x1008] ss:$16 sps:$4 sm:$0xff]   ;;  %v7740_v30 = vld [vmem:[%s10716_s1 + $0x102c] ss:$16 sps:$4 sm:$0xff]  }
 0x1c8   :  { %5213 = vmatprep.subr.bf16.mxu0 %v7645_v31  ;;  %5746 = vmatprep.subr.bf16.mxu1 %v7648_v32  ;;  %v6031_v31 = vcombine.high %v9810_v21, %v9810_v21  ;;  %v7735_v32 = vld [vmem:[%s10716_s1 + $0x1020] ss:$16 sps:$4 sm:$0xff]  }
 0x1cb   :  { %5214 = vmatpush1.bf16.msra.mxu0 %v7643_v33  ;;  %5747 = vmatpush1.bf16.msra.mxu1 %v7646_v34  ;;  %v7738_v33 = vld [vmem:[%s10716_s1 + $0x1028] ss:$16 sps:$4 sm:$0xff]   ;;  %v7743_v34 = vld [vmem:[%s10716_s1 + $0x1044] ss:$16 sps:$4 sm:$0xff]  }
 0x1cc   :  { %5215 = vmatprep.subr.bf16.mxu0 %v7651_v35  ;;  %5748 = vmatprep.subr.bf16.mxu1 %v7654_v36  ;;  %v7746_v35 = vld [vmem:[%s10716_s1 + $0x104c] ss:$16 sps:$4 sm:$0xff]   ;;  %v7741_v36 = vld [vmem:[%s10716_s1 + $0x1040] ss:$16 sps:$4 sm:$0xff]  }
 0x1cf   :  { %5216 = vmatpush1.bf16.msra.mxu0 %v7649_v37  ;;  %5749 = vmatpush1.bf16.msra.mxu1 %v7652_v38  ;;  %v7744_v37 = vld [vmem:[%s10716_s1 + $0x1048] ss:$16 sps:$4 sm:$0xff]   ;;  %v7749_v38 = vld [vmem:[%s10716_s1 + $0x1064] ss:$16 sps:$4 sm:$0xff]  }
 0x1d0   :  { %5217 = vmatprep.subr.bf16.mxu0 %v7657_v39  ;;  %5750 = vmatprep.subr.bf16.mxu1 %v7660_v40  ;;  %v7752_v39 = vld [vmem:[%s10716_s1 + $0x106c] ss:$16 sps:$4 sm:$0xff]   ;;  %v7747_v40 = vld [vmem:[%s10716_s1 + $0x1060] ss:$16 sps:$4 sm:$0xff]  }
 0x1d3   :  { %5218 = vmatpush1.bf16.msra.mxu0 %v7655_v41  ;;  %5751 = vmatpush1.bf16.msra.mxu1 %v7658_v42  ;;  %v7750_v41 = vld [vmem:[%s10716_s1 + $0x1068] ss:$16 sps:$4 sm:$0xff]   ;;  %v7755_v42 = vld [vmem:[%s10716_s1 + $0x1084] ss:$16 sps:$4 sm:$0xff]  }
 0x1d4   :  { %5219 = vmatprep.subr.bf16.mxu0 %v7663_v43  ;;  %5752 = vmatprep.subr.bf16.mxu1 %v7666_v44  ;;  %v7758_v43 = vld [vmem:[%s10716_s1 + $0x108c] ss:$16 sps:$4 sm:$0xff]   ;;  %v7753_v44 = vld [vmem:[%s10716_s1 + $0x1080] ss:$16 sps:$4 sm:$0xff]  }
 0x1d7   :  { %5220 = vmatpush1.bf16.msra.mxu0 %v7661_v45  ;;  %5753 = vmatpush1.bf16.msra.mxu1 %v7664_v46  ;;  %v7756_v45 = vld [vmem:[%s10716_s1 + $0x1088] ss:$16 sps:$4 sm:$0xff]   ;;  %v7761_v46 = vld [vmem:[%s10716_s1 + $0x10a4] ss:$16 sps:$4 sm:$0xff]  }
 0x1d8   :  { %5221 = vmatprep.subr.bf16.mxu0 %v7669_v47  ;;  %5754 = vmatprep.subr.bf16.mxu1 %v7672_v48  ;;  %v7764_v47 = vld [vmem:[%s10716_s1 + $0x10ac] ss:$16 sps:$4 sm:$0xff]   ;;  %v7759_v48 = vld [vmem:[%s10716_s1 + $0x10a0] ss:$16 sps:$4 sm:$0xff]  }
 0x1db   :  { %5222 = vmatpush1.bf16.msra.mxu0 %v7667_v49  ;;  %5755 = vmatpush1.bf16.msra.mxu1 %v7670_v50  ;;  %v7762_v49 = vld [vmem:[%s10716_s1 + $0x10a8] ss:$16 sps:$4 sm:$0xff]   ;;  %v7767_v50 = vld [vmem:[%s10716_s1 + $0x10c4] ss:$16 sps:$4 sm:$0xff]  }
 0x1dc   :  { %5223 = vmatprep.subr.bf16.mxu0 %v7675_v51  ;;  %5756 = vmatprep.subr.bf16.mxu1 %v7678_v52  ;;  %v7770_v51 = vld [vmem:[%s10716_s1 + $0x10cc] ss:$16 sps:$4 sm:$0xff]   ;;  %v7765_v52 = vld [vmem:[%s10716_s1 + $0x10c0] ss:$16 sps:$4 sm:$0xff]  }
 0x1df   :  { %5224 = vmatpush1.bf16.msra.mxu0 %v7673_v53  ;;  %5757 = vmatpush1.bf16.msra.mxu1 %v7676_v54  ;;  %v7768_v53 = vld [vmem:[%s10716_s1 + $0x10c8] ss:$16 sps:$4 sm:$0xff]   ;;  %v7773_v54 = vld [vmem:[%s10716_s1 + $0x10e4] ss:$16 sps:$4 sm:$0xff]  }
 0x1e0   :  { %5225 = vmatprep.subr.bf16.mxu0 %v7681_v55  ;;  %5758 = vmatprep.subr.bf16.mxu1 %v7684_v56  ;;  %v7776_v55 = vld [vmem:[%s10716_s1 + $0x10ec] ss:$16 sps:$4 sm:$0xff]   ;;  %v7771_v56 = vld [vmem:[%s10716_s1 + $0x10e0] ss:$16 sps:$4 sm:$0xff]  }
 0x1e3   :  { %5226 = vmatpush1.bf16.msra.mxu0 %v7679_v57  ;;  %5759 = vmatpush1.bf16.msra.mxu1 %v7682_v58  ;;  %v7774_v57 = vld [vmem:[%s10716_s1 + $0x10e8] ss:$16 sps:$4 sm:$0xff]   ;;  %v7779_v58 = vld [vmem:[%s10716_s1 + $0x1104] ss:$16 sps:$4 sm:$0xff]  }
 0x1e4   :  { %5227 = vmatprep.subr.bf16.mxu0 %v7687_v59  ;;  %5760 = vmatprep.subr.bf16.mxu1 %v7690_v60  ;;  %v7782_v59 = vld [vmem:[%s10716_s1 + $0x110c] ss:$16 sps:$4 sm:$0xff]   ;;  %v7777_v60 = vld [vmem:[%s10716_s1 + $0x1100] ss:$16 sps:$4 sm:$0xff]  }
 0x1e7   :  { %5228 = vmatpush1.bf16.msra.mxu0 %v7685_v61  ;;  %5761 = vmatpush1.bf16.msra.mxu1 %v7688_v62  ;;  %v7780_v61 = vld [vmem:[%s10716_s1 + $0x1108] ss:$16 sps:$4 sm:$0xff]   ;;  %v7785_v62 = vld [vmem:[%s10716_s1 + $0x1124] ss:$16 sps:$4 sm:$0xff]  }
 0x1e8   :  { %5229 = vmatprep.subr.bf16.mxu0 %v7693_v63  ;;  %5762 = vmatprep.subr.bf16.mxu1 %v7696_v0  ;;  %v7788_v63 = vld [vmem:[%s10716_s1 + $0x112c] ss:$16 sps:$4 sm:$0xff]   ;;  %v7783_v0 = vld [vmem:[%s10716_s1 + $0x1120] ss:$16 sps:$4 sm:$0xff]  }
 0x1eb   :  { %5230 = vmatpush1.bf16.msra.mxu0 %v7691_v1  ;;  %5763 = vmatpush1.bf16.msra.mxu1 %v7694_v2  ;;  %v7786_v1 = vld [vmem:[%s10716_s1 + $0x1128] ss:$16 sps:$4 sm:$0xff]   ;;  %v7791_v2 = vld [vmem:[%s10716_s1 + $0x1144] ss:$16 sps:$4 sm:$0xff]  }
 0x1ec   :  { %5231 = vmatprep.subr.bf16.mxu0 %v7699_v3  ;;  %5764 = vmatprep.subr.bf16.mxu1 %v7702_v4  ;;  %v7794_v3 = vld [vmem:[%s10716_s1 + $0x114c] ss:$16 sps:$4 sm:$0xff]   ;;  %v7789_v4 = vld [vmem:[%s10716_s1 + $0x1140] ss:$16 sps:$4 sm:$0xff]  }
 0x1ef   :  { %5232 = vmatpush1.bf16.msra.mxu0 %v7697_v5  ;;  %5765 = vmatpush1.bf16.msra.mxu1 %v7700_v6  ;;  %v7792_v5 = vld [vmem:[%s10716_s1 + $0x1148] ss:$16 sps:$4 sm:$0xff]   ;;  %v7797_v6 = vld [vmem:[%s10716_s1 + $0x1164] ss:$16 sps:$4 sm:$0xff]  }
 0x1f0   :  { %5233 = vmatprep.subr.bf16.mxu0 %v7705_v7  ;;  %5766 = vmatprep.subr.bf16.mxu1 %v7708_v8  ;;  %v7800_v7 = vld [vmem:[%s10716_s1 + $0x116c] ss:$16 sps:$4 sm:$0xff]   ;;  %v7795_v8 = vld [vmem:[%s10716_s1 + $0x1160] ss:$16 sps:$4 sm:$0xff]  }
 0x1f3   :  { %5234 = vmatpush1.bf16.msra.mxu0 %v7703_v9  ;;  %5767 = vmatpush1.bf16.msra.mxu1 %v7706_v10  ;;  %v7798_v9 = vld [vmem:[%s10716_s1 + $0x1168] ss:$16 sps:$4 sm:$0xff]   ;;  %v7803_v10 = vld [vmem:[%s10716_s1 + $0x1184] ss:$16 sps:$4 sm:$0xff]  }
 0x1f4   :  { %5235 = vmatprep.subr.bf16.mxu0 %v7711_v12  ;;  %5768 = vmatprep.subr.bf16.mxu1 %v7714_v13  ;;  %v7806_v12 = vld [vmem:[%s10716_s1 + $0x118c] ss:$16 sps:$4 sm:$0xff]   ;;  %v7801_v13 = vld [vmem:[%s10716_s1 + $0x1180] ss:$16 sps:$4 sm:$0xff]  }
 0x1f7   :  { %5236 = vmatpush1.bf16.msra.mxu0 %v7709_v15  ;;  %5769 = vmatpush1.bf16.msra.mxu1 %v7712_v11  ;;  %v7804_v15 = vld [vmem:[%s10716_s1 + $0x1188] ss:$16 sps:$4 sm:$0xff]   ;;  %v7809_v11 = vld [vmem:[%s10716_s1 + $0x11a4] ss:$16 sps:$4 sm:$0xff]  }
 0x1f8   :  { %5237 = vmatprep.subr.bf16.mxu0 %v7717_v17  ;;  %5770 = vmatprep.subr.bf16.mxu1 %v7720_v14  ;;  %v7812_v17 = vld [vmem:[%s10716_s1 + $0x11ac] ss:$16 sps:$4 sm:$0xff]   ;;  %v7807_v14 = vld [vmem:[%s10716_s1 + $0x11a0] ss:$16 sps:$4 sm:$0xff]  }
 0x1fb   :  { %5238 = vmatpush1.bf16.msra.mxu0 %v7715_v19  ;;  %5771 = vmatpush1.bf16.msra.mxu1 %v7718_v20  ;;  %v7810_v19 = vld [vmem:[%s10716_s1 + $0x11a8] ss:$16 sps:$4 sm:$0xff]   ;;  %v7815_v20 = vld [vmem:[%s10716_s1 + $0x11c4] ss:$16 sps:$4 sm:$0xff]  }
 0x1fc   :  { %5239 = vmatprep.subr.bf16.mxu0 %v7723_v16  ;;  %5772 = vmatprep.subr.bf16.mxu1 %v7726_v22  ;;  %v7818_v16 = vld [vmem:[%s10716_s1 + $0x11cc] ss:$16 sps:$4 sm:$0xff]   ;;  %v7813_v22 = vld [vmem:[%s10716_s1 + $0x11c0] ss:$16 sps:$4 sm:$0xff]  }
 0x1ff   :  { %5240 = vmatpush1.bf16.msra.mxu0 %v7721_v23  ;;  %5773 = vmatpush1.bf16.msra.mxu1 %v7724_v18  ;;  %v7816_v23 = vld [vmem:[%s10716_s1 + $0x11c8] ss:$16 sps:$4 sm:$0xff]   ;;  %v7821_v18 = vld [vmem:[%s10716_s1 + $0x11e4] ss:$16 sps:$4 sm:$0xff]  }
 0x200   :  { %5250 = vmatprep.subr.bf16.mxu0 %v7731_v25  ;;  %5783 = vmatprep.subr.bf16.mxu1 %v7734_v26  ;;  %v7824_v25 = vld [vmem:[%s10716_s1 + $0x11ec] ss:$16 sps:$4 sm:$0xff]   ;;  %v7819_v26 = vld [vmem:[%s10716_s1 + $0x11e0] ss:$16 sps:$4 sm:$0xff]  }
 0x202   :  { %5242 = vmatmul.mubr.bf16.vlgmr.msra.gmra.mrb[0].mxu0 %v6028_v27  ;;  %5775 = vmatmul.mubr.bf16.vlgmr.msra.gmra.mrb[0].mxu1 %v6028_v27  ;;  %v7822_v27 = vld [vmem:[%s10716_s1 + $0x11e8] ss:$16 sps:$4 sm:$0xff]  }
 0x203   :  { %5251 = vmatpush1.bf16.msra.mxu0 %v7729_v28  ;;  %5784 = vmatpush1.bf16.msra.mxu1 %v7732_v29  ;;  %v7829_v28 = vld [vmem:[%s10716_s1 + $0x1204] ss:$16 sps:$4 sm:$0xff]   ;;  %v7832_v29 = vld [vmem:[%s10716_s1 + $0x120c] ss:$16 sps:$4 sm:$0xff]  }
 0x204   :  { %5252 = vmatprep.subr.bf16.mxu0 %v7737_v24  ;;  %5785 = vmatprep.subr.bf16.mxu1 %v7740_v30  ;;  %v6030_v24 = vcombine.low %v9810_v21, %v9810_v21  ;;  %v10011_v30 = vld [vmem:[%s10717_s0 + $0x48] sm:$0xff]  ;;  %v7835_v21 = vld [vmem:[%s10716_s1 + $0x1224] ss:$16 sps:$4 sm:$0xff]  }
 0x205   :  { %5282 = vmatprep.mubr.bf16.mxu0 %v6031_v31  ;;  %5815 = vmatprep.mubr.bf16.mxu1 %v6031_v31  ;;  %v7827_v31 = vld [vmem:[%s10716_s1 + $0x1200] ss:$16 sps:$4 sm:$0xff]  }
 0x207   :  { %5253 = vmatpush1.bf16.msra.mxu0 %v7735_v32  ;;  %5786 = vmatpush1.bf16.msra.mxu1 %v7738_v33  ;;  %v7830_v32 = vld [vmem:[%s10716_s1 + $0x1208] ss:$16 sps:$4 sm:$0xff]   ;;  %v7838_v33 = vld [vmem:[%s10716_s1 + $0x122c] ss:$16 sps:$4 sm:$0xff]  }
 0x208   :  { %5254 = vmatprep.subr.bf16.mxu0 %v7743_v34  ;;  %5787 = vmatprep.subr.bf16.mxu1 %v7746_v35  ;;  %v6033_v34 = vcombine.high %v10011_v30, %v10011_v30  ;;  %v7833_v35 = vld [vmem:[%s10716_s1 + $0x1220] ss:$16 sps:$4 sm:$0xff]  }
 0x20b   :  { %5255 = vmatpush1.bf16.msra.mxu0 %v7741_v36  ;;  %5788 = vmatpush1.bf16.msra.mxu1 %v7744_v37  ;;  %v7836_v36 = vld [vmem:[%s10716_s1 + $0x1228] ss:$16 sps:$4 sm:$0xff]   ;;  %v7841_v37 = vld [vmem:[%s10716_s1 + $0x1244] ss:$16 sps:$4 sm:$0xff]  }
 0x20c   :  { %5256 = vmatprep.subr.bf16.mxu0 %v7749_v38  ;;  %5789 = vmatprep.subr.bf16.mxu1 %v7752_v39  ;;  %v7844_v38 = vld [vmem:[%s10716_s1 + $0x124c] ss:$16 sps:$4 sm:$0xff]   ;;  %v7839_v39 = vld [vmem:[%s10716_s1 + $0x1240] ss:$16 sps:$4 sm:$0xff]  }
 0x20f   :  { %5257 = vmatpush1.bf16.msra.mxu0 %v7747_v40  ;;  %5790 = vmatpush1.bf16.msra.mxu1 %v7750_v41  ;;  %v7842_v40 = vld [vmem:[%s10716_s1 + $0x1248] ss:$16 sps:$4 sm:$0xff]   ;;  %v7847_v41 = vld [vmem:[%s10716_s1 + $0x1264] ss:$16 sps:$4 sm:$0xff]  }
 0x210   :  { %5258 = vmatprep.subr.bf16.mxu0 %v7755_v42  ;;  %5791 = vmatprep.subr.bf16.mxu1 %v7758_v43  ;;  %v7850_v42 = vld [vmem:[%s10716_s1 + $0x126c] ss:$16 sps:$4 sm:$0xff]   ;;  %v7845_v43 = vld [vmem:[%s10716_s1 + $0x1260] ss:$16 sps:$4 sm:$0xff]  }
 0x213   :  { %5259 = vmatpush1.bf16.msra.mxu0 %v7753_v44  ;;  %5792 = vmatpush1.bf16.msra.mxu1 %v7756_v45  ;;  %v7848_v44 = vld [vmem:[%s10716_s1 + $0x1268] ss:$16 sps:$4 sm:$0xff]   ;;  %v7853_v45 = vld [vmem:[%s10716_s1 + $0x1284] ss:$16 sps:$4 sm:$0xff]  }
 0x214   :  { %5260 = vmatprep.subr.bf16.mxu0 %v7761_v46  ;;  %5793 = vmatprep.subr.bf16.mxu1 %v7764_v47  ;;  %v7856_v46 = vld [vmem:[%s10716_s1 + $0x128c] ss:$16 sps:$4 sm:$0xff]   ;;  %v7851_v47 = vld [vmem:[%s10716_s1 + $0x1280] ss:$16 sps:$4 sm:$0xff]  }
 0x217   :  { %5261 = vmatpush1.bf16.msra.mxu0 %v7759_v48  ;;  %5794 = vmatpush1.bf16.msra.mxu1 %v7762_v49  ;;  %v7854_v48 = vld [vmem:[%s10716_s1 + $0x1288] ss:$16 sps:$4 sm:$0xff]   ;;  %v7859_v49 = vld [vmem:[%s10716_s1 + $0x12a4] ss:$16 sps:$4 sm:$0xff]  }
 0x218   :  { %5262 = vmatprep.subr.bf16.mxu0 %v7767_v50  ;;  %5795 = vmatprep.subr.bf16.mxu1 %v7770_v51  ;;  %v7862_v50 = vld [vmem:[%s10716_s1 + $0x12ac] ss:$16 sps:$4 sm:$0xff]   ;;  %v7857_v51 = vld [vmem:[%s10716_s1 + $0x12a0] ss:$16 sps:$4 sm:$0xff]  }
 0x21b   :  { %5263 = vmatpush1.bf16.msra.mxu0 %v7765_v52  ;;  %5796 = vmatpush1.bf16.msra.mxu1 %v7768_v53  ;;  %v7860_v52 = vld [vmem:[%s10716_s1 + $0x12a8] ss:$16 sps:$4 sm:$0xff]   ;;  %v7865_v53 = vld [vmem:[%s10716_s1 + $0x12c4] ss:$16 sps:$4 sm:$0xff]  }
 0x21c   :  { %5264 = vmatprep.subr.bf16.mxu0 %v7773_v54  ;;  %5797 = vmatprep.subr.bf16.mxu1 %v7776_v55  ;;  %v7868_v54 = vld [vmem:[%s10716_s1 + $0x12cc] ss:$16 sps:$4 sm:$0xff]   ;;  %v7863_v55 = vld [vmem:[%s10716_s1 + $0x12c0] ss:$16 sps:$4 sm:$0xff]  }
 0x21f   :  { %5265 = vmatpush1.bf16.msra.mxu0 %v7771_v56  ;;  %5798 = vmatpush1.bf16.msra.mxu1 %v7774_v57  ;;  %v7866_v56 = vld [vmem:[%s10716_s1 + $0x12c8] ss:$16 sps:$4 sm:$0xff]   ;;  %v7871_v57 = vld [vmem:[%s10716_s1 + $0x12e4] ss:$16 sps:$4 sm:$0xff]  }
 0x220   :  { %5266 = vmatprep.subr.bf16.mxu0 %v7779_v58  ;;  %5799 = vmatprep.subr.bf16.mxu1 %v7782_v59  ;;  %v7874_v58 = vld [vmem:[%s10716_s1 + $0x12ec] ss:$16 sps:$4 sm:$0xff]   ;;  %v7869_v59 = vld [vmem:[%s10716_s1 + $0x12e0] ss:$16 sps:$4 sm:$0xff]  }
 0x223   :  { %5267 = vmatpush1.bf16.msra.mxu0 %v7777_v60  ;;  %5800 = vmatpush1.bf16.msra.mxu1 %v7780_v61  ;;  %v7872_v60 = vld [vmem:[%s10716_s1 + $0x12e8] ss:$16 sps:$4 sm:$0xff]   ;;  %v7877_v61 = vld [vmem:[%s10716_s1 + $0x1304] ss:$16 sps:$4 sm:$0xff]  }
 0x224   :  { %5268 = vmatprep.subr.bf16.mxu0 %v7785_v62  ;;  %5801 = vmatprep.subr.bf16.mxu1 %v7788_v63  ;;  %v7880_v62 = vld [vmem:[%s10716_s1 + $0x130c] ss:$16 sps:$4 sm:$0xff]   ;;  %v7875_v63 = vld [vmem:[%s10716_s1 + $0x1300] ss:$16 sps:$4 sm:$0xff]  }
 0x227   :  { %5269 = vmatpush1.bf16.msra.mxu0 %v7783_v0  ;;  %5802 = vmatpush1.bf16.msra.mxu1 %v7786_v1  ;;  %v7878_v0 = vld [vmem:[%s10716_s1 + $0x1308] ss:$16 sps:$4 sm:$0xff]   ;;  %v7883_v1 = vld [vmem:[%s10716_s1 + $0x1324] ss:$16 sps:$4 sm:$0xff]  }
 0x228   :  { %5270 = vmatprep.subr.bf16.mxu0 %v7791_v2  ;;  %5803 = vmatprep.subr.bf16.mxu1 %v7794_v3  ;;  %v7886_v2 = vld [vmem:[%s10716_s1 + $0x132c] ss:$16 sps:$4 sm:$0xff]   ;;  %v7881_v3 = vld [vmem:[%s10716_s1 + $0x1320] ss:$16 sps:$4 sm:$0xff]  }
 0x22b   :  { %5271 = vmatpush1.bf16.msra.mxu0 %v7789_v4  ;;  %5804 = vmatpush1.bf16.msra.mxu1 %v7792_v5  ;;  %v7884_v4 = vld [vmem:[%s10716_s1 + $0x1328] ss:$16 sps:$4 sm:$0xff]   ;;  %v7889_v5 = vld [vmem:[%s10716_s1 + $0x1344] ss:$16 sps:$4 sm:$0xff]  }
 0x22c   :  { %5272 = vmatprep.subr.bf16.mxu0 %v7797_v6  ;;  %5805 = vmatprep.subr.bf16.mxu1 %v7800_v7  ;;  %v7892_v6 = vld [vmem:[%s10716_s1 + $0x134c] ss:$16 sps:$4 sm:$0xff]   ;;  %v7887_v7 = vld [vmem:[%s10716_s1 + $0x1340] ss:$16 sps:$4 sm:$0xff]  }
 0x22f   :  { %5273 = vmatpush1.bf16.msra.mxu0 %v7795_v8  ;;  %5806 = vmatpush1.bf16.msra.mxu1 %v7798_v9  ;;  %v7890_v8 = vld [vmem:[%s10716_s1 + $0x1348] ss:$16 sps:$4 sm:$0xff]   ;;  %v7895_v9 = vld [vmem:[%s10716_s1 + $0x1364] ss:$16 sps:$4 sm:$0xff]  }
 0x230   :  { %5274 = vmatprep.subr.bf16.mxu0 %v7803_v10  ;;  %5807 = vmatprep.subr.bf16.mxu1 %v7806_v12  ;;  %v7898_v10 = vld [vmem:[%s10716_s1 + $0x136c] ss:$16 sps:$4 sm:$0xff]   ;;  %v7893_v12 = vld [vmem:[%s10716_s1 + $0x1360] ss:$16 sps:$4 sm:$0xff]  }
 0x233   :  { %5275 = vmatpush1.bf16.msra.mxu0 %v7801_v13  ;;  %5808 = vmatpush1.bf16.msra.mxu1 %v7804_v15  ;;  %v7896_v13 = vld [vmem:[%s10716_s1 + $0x1368] ss:$16 sps:$4 sm:$0xff]   ;;  %v7901_v15 = vld [vmem:[%s10716_s1 + $0x1384] ss:$16 sps:$4 sm:$0xff]  }
 0x234   :  { %5276 = vmatprep.subr.bf16.mxu0 %v7809_v11  ;;  %5809 = vmatprep.subr.bf16.mxu1 %v7812_v17  ;;  %v7904_v11 = vld [vmem:[%s10716_s1 + $0x138c] ss:$16 sps:$4 sm:$0xff]   ;;  %v7899_v17 = vld [vmem:[%s10716_s1 + $0x1380] ss:$16 sps:$4 sm:$0xff]  }
 0x237   :  { %5277 = vmatpush1.bf16.msra.mxu0 %v7807_v14  ;;  %5810 = vmatpush1.bf16.msra.mxu1 %v7810_v19  ;;  %v7902_v14 = vld [vmem:[%s10716_s1 + $0x1388] ss:$16 sps:$4 sm:$0xff]   ;;  %v7907_v19 = vld [vmem:[%s10716_s1 + $0x13a4] ss:$16 sps:$4 sm:$0xff]  }
 0x238   :  { %5278 = vmatprep.subr.bf16.mxu0 %v7815_v20  ;;  %5811 = vmatprep.subr.bf16.mxu1 %v7818_v16  ;;  %v7910_v20 = vld [vmem:[%s10716_s1 + $0x13ac] ss:$16 sps:$4 sm:$0xff]   ;;  %v7905_v16 = vld [vmem:[%s10716_s1 + $0x13a0] ss:$16 sps:$4 sm:$0xff]  }
 0x23b   :  { %5279 = vmatpush1.bf16.msra.mxu0 %v7813_v22  ;;  %5812 = vmatpush1.bf16.msra.mxu1 %v7816_v23  ;;  %v7908_v22 = vld [vmem:[%s10716_s1 + $0x13a8] ss:$16 sps:$4 sm:$0xff]   ;;  %v7913_v23 = vld [vmem:[%s10716_s1 + $0x13c4] ss:$16 sps:$4 sm:$0xff]  }
 0x23c   :  { %5280 = vmatprep.subr.bf16.mxu0 %v7821_v18  ;;  %5813 = vmatprep.subr.bf16.mxu1 %v7824_v25  ;;  %v7916_v18 = vld [vmem:[%s10716_s1 + $0x13cc] ss:$16 sps:$4 sm:$0xff]   ;;  %v7911_v25 = vld [vmem:[%s10716_s1 + $0x13c0] ss:$16 sps:$4 sm:$0xff]  }
 0x23f   :  { %5281 = vmatpush1.bf16.msra.mxu0 %v7819_v26  ;;  %5814 = vmatpush1.bf16.msra.mxu1 %v7822_v27  ;;  %v7914_v26 = vld [vmem:[%s10716_s1 + $0x13c8] ss:$16 sps:$4 sm:$0xff]   ;;  %v7919_v27 = vld [vmem:[%s10716_s1 + $0x13e4] ss:$16 sps:$4 sm:$0xff]  }
 0x240   :  { %5291 = vmatprep.subr.bf16.mxu0 %v7829_v28  ;;  %5824 = vmatprep.subr.bf16.mxu1 %v7832_v29  ;;  %v7922_v28 = vld [vmem:[%s10716_s1 + $0x13ec] ss:$16 sps:$4 sm:$0xff]   ;;  %v7917_v29 = vld [vmem:[%s10716_s1 + $0x13e0] ss:$16 sps:$4 sm:$0xff]  }
 0x242   :  { %5283 = vmatmul.mubr.bf16.vlgmr.msra.gmra.mrb[0].mxu0 %v6030_v24  ;;  %5816 = vmatmul.mubr.bf16.vlgmr.msra.gmra.mrb[0].mxu1 %v6030_v24  ;;  %v7920_v24 = vld [vmem:[%s10716_s1 + $0x13e8] ss:$16 sps:$4 sm:$0xff]  }
 0x243   :  { %5292 = vmatpush1.bf16.msra.mxu0 %v7827_v31  ;;  %5825 = vmatpush1.bf16.msra.mxu1 %v7830_v32  ;;  %v7927_v31 = vld [vmem:[%s10716_s1 + $0x1404] ss:$16 sps:$4 sm:$0xff]   ;;  %v7930_v32 = vld [vmem:[%s10716_s1 + $0x140c] ss:$16 sps:$4 sm:$0xff]  }
 0x244   :  { %5293 = vmatprep.subr.bf16.mxu0 %v7835_v21  ;;  %5826 = vmatprep.subr.bf16.mxu1 %v7838_v33  ;;  %v6032_v21 = vcombine.low %v10011_v30, %v10011_v30  ;;  %v10212_v33 = vld [vmem:[%s10717_s0 + $0x50] sm:$0xff] }
 0x245   :  { %5323 = vmatprep.mubr.bf16.mxu0 %v6033_v34  ;;  %5856 = vmatprep.mubr.bf16.mxu1 %v6033_v34  ;;  %v7925_v34 = vld [vmem:[%s10716_s1 + $0x1400] ss:$16 sps:$4 sm:$0xff]   ;;  %v7933_v30 = vld [vmem:[%s10716_s1 + $0x1424] ss:$16 sps:$4 sm:$0xff]  }
 0x247   :  { %5294 = vmatpush1.bf16.msra.mxu0 %v7833_v35  ;;  %5827 = vmatpush1.bf16.msra.mxu1 %v7836_v36  ;;  %v7928_v35 = vld [vmem:[%s10716_s1 + $0x1408] ss:$16 sps:$4 sm:$0xff]   ;;  %v7936_v36 = vld [vmem:[%s10716_s1 + $0x142c] ss:$16 sps:$4 sm:$0xff]  }
 0x248   :  { %5295 = vmatprep.subr.bf16.mxu0 %v7841_v37  ;;  %5828 = vmatprep.subr.bf16.mxu1 %v7844_v38  ;;  %v6035_v37 = vcombine.high %v10212_v33, %v10212_v33  ;;  %v7931_v38 = vld [vmem:[%s10716_s1 + $0x1420] ss:$16 sps:$4 sm:$0xff]  }
 0x24b   :  { %5296 = vmatpush1.bf16.msra.mxu0 %v7839_v39  ;;  %5829 = vmatpush1.bf16.msra.mxu1 %v7842_v40  ;;  %v7934_v39 = vld [vmem:[%s10716_s1 + $0x1428] ss:$16 sps:$4 sm:$0xff]   ;;  %v7939_v40 = vld [vmem:[%s10716_s1 + $0x1444] ss:$16 sps:$4 sm:$0xff]  }
 0x24c   :  { %5297 = vmatprep.subr.bf16.mxu0 %v7847_v41  ;;  %5830 = vmatprep.subr.bf16.mxu1 %v7850_v42  ;;  %v7942_v41 = vld [vmem:[%s10716_s1 + $0x144c] ss:$16 sps:$4 sm:$0xff]   ;;  %v7937_v42 = vld [vmem:[%s10716_s1 + $0x1440] ss:$16 sps:$4 sm:$0xff]  }
 0x24f   :  { %5298 = vmatpush1.bf16.msra.mxu0 %v7845_v43  ;;  %5831 = vmatpush1.bf16.msra.mxu1 %v7848_v44  ;;  %v7940_v43 = vld [vmem:[%s10716_s1 + $0x1448] ss:$16 sps:$4 sm:$0xff]   ;;  %v7945_v44 = vld [vmem:[%s10716_s1 + $0x1464] ss:$16 sps:$4 sm:$0xff]  }
 0x250   :  { %5299 = vmatprep.subr.bf16.mxu0 %v7853_v45  ;;  %5832 = vmatprep.subr.bf16.mxu1 %v7856_v46  ;;  %v7948_v45 = vld [vmem:[%s10716_s1 + $0x146c] ss:$16 sps:$4 sm:$0xff]   ;;  %v7943_v46 = vld [vmem:[%s10716_s1 + $0x1460] ss:$16 sps:$4 sm:$0xff]  }
 0x253   :  { %5300 = vmatpush1.bf16.msra.mxu0 %v7851_v47  ;;  %5833 = vmatpush1.bf16.msra.mxu1 %v7854_v48  ;;  %v7946_v47 = vld [vmem:[%s10716_s1 + $0x1468] ss:$16 sps:$4 sm:$0xff]   ;;  %v7951_v48 = vld [vmem:[%s10716_s1 + $0x1484] ss:$16 sps:$4 sm:$0xff]  }
 0x254   :  { %5301 = vmatprep.subr.bf16.mxu0 %v7859_v49  ;;  %5834 = vmatprep.subr.bf16.mxu1 %v7862_v50  ;;  %v7954_v49 = vld [vmem:[%s10716_s1 + $0x148c] ss:$16 sps:$4 sm:$0xff]   ;;  %v7949_v50 = vld [vmem:[%s10716_s1 + $0x1480] ss:$16 sps:$4 sm:$0xff]  }
 0x257   :  { %5302 = vmatpush1.bf16.msra.mxu0 %v7857_v51  ;;  %5835 = vmatpush1.bf16.msra.mxu1 %v7860_v52  ;;  %v7952_v51 = vld [vmem:[%s10716_s1 + $0x1488] ss:$16 sps:$4 sm:$0xff]   ;;  %v7957_v52 = vld [vmem:[%s10716_s1 + $0x14a4] ss:$16 sps:$4 sm:$0xff]  }
 0x258   :  { %5303 = vmatprep.subr.bf16.mxu0 %v7865_v53  ;;  %5836 = vmatprep.subr.bf16.mxu1 %v7868_v54  ;;  %v7960_v53 = vld [vmem:[%s10716_s1 + $0x14ac] ss:$16 sps:$4 sm:$0xff]   ;;  %v7955_v54 = vld [vmem:[%s10716_s1 + $0x14a0] ss:$16 sps:$4 sm:$0xff]  }
 0x25b   :  { %5304 = vmatpush1.bf16.msra.mxu0 %v7863_v55  ;;  %5837 = vmatpush1.bf16.msra.mxu1 %v7866_v56  ;;  %v7958_v55 = vld [vmem:[%s10716_s1 + $0x14a8] ss:$16 sps:$4 sm:$0xff]   ;;  %v7963_v56 = vld [vmem:[%s10716_s1 + $0x14c4] ss:$16 sps:$4 sm:$0xff]  }
 0x25c   :  { %5305 = vmatprep.subr.bf16.mxu0 %v7871_v57  ;;  %5838 = vmatprep.subr.bf16.mxu1 %v7874_v58  ;;  %v7966_v57 = vld [vmem:[%s10716_s1 + $0x14cc] ss:$16 sps:$4 sm:$0xff]   ;;  %v7961_v58 = vld [vmem:[%s10716_s1 + $0x14c0] ss:$16 sps:$4 sm:$0xff]  }
 0x25f   :  { %5306 = vmatpush1.bf16.msra.mxu0 %v7869_v59  ;;  %5839 = vmatpush1.bf16.msra.mxu1 %v7872_v60  ;;  %v7964_v59 = vld [vmem:[%s10716_s1 + $0x14c8] ss:$16 sps:$4 sm:$0xff]   ;;  %v7969_v60 = vld [vmem:[%s10716_s1 + $0x14e4] ss:$16 sps:$4 sm:$0xff]  }
 0x260   :  { %5307 = vmatprep.subr.bf16.mxu0 %v7877_v61  ;;  %5840 = vmatprep.subr.bf16.mxu1 %v7880_v62  ;;  %v7972_v61 = vld [vmem:[%s10716_s1 + $0x14ec] ss:$16 sps:$4 sm:$0xff]   ;;  %v7967_v62 = vld [vmem:[%s10716_s1 + $0x14e0] ss:$16 sps:$4 sm:$0xff]  }
 0x263   :  { %5308 = vmatpush1.bf16.msra.mxu0 %v7875_v63  ;;  %5841 = vmatpush1.bf16.msra.mxu1 %v7878_v0  ;;  %v7970_v63 = vld [vmem:[%s10716_s1 + $0x14e8] ss:$16 sps:$4 sm:$0xff]   ;;  %v7975_v0 = vld [vmem:[%s10716_s1 + $0x1504] ss:$16 sps:$4 sm:$0xff]  }
 0x264   :  { %5309 = vmatprep.subr.bf16.mxu0 %v7883_v1  ;;  %5842 = vmatprep.subr.bf16.mxu1 %v7886_v2  ;;  %v7978_v1 = vld [vmem:[%s10716_s1 + $0x150c] ss:$16 sps:$4 sm:$0xff]   ;;  %v7973_v2 = vld [vmem:[%s10716_s1 + $0x1500] ss:$16 sps:$4 sm:$0xff]  }
 0x267   :  { %5310 = vmatpush1.bf16.msra.mxu0 %v7881_v3  ;;  %5843 = vmatpush1.bf16.msra.mxu1 %v7884_v4  ;;  %v7976_v3 = vld [vmem:[%s10716_s1 + $0x1508] ss:$16 sps:$4 sm:$0xff]   ;;  %v7981_v4 = vld [vmem:[%s10716_s1 + $0x1524] ss:$16 sps:$4 sm:$0xff]  }
 0x268   :  { %5311 = vmatprep.subr.bf16.mxu0 %v7889_v5  ;;  %5844 = vmatprep.subr.bf16.mxu1 %v7892_v6  ;;  %v7984_v5 = vld [vmem:[%s10716_s1 + $0x152c] ss:$16 sps:$4 sm:$0xff]   ;;  %v8178_v6 = vmov 0  }
 0x269   :  { %6944 = vset.pattern.permute.xlu0 %v8178_v6 }
 0x26b   :  { %5312 = vmatpush1.bf16.msra.mxu0 %v7887_v7  ;;  %5845 = vmatpush1.bf16.msra.mxu1 %v7890_v8  ;;  %v7979_v7 = vld [vmem:[%s10716_s1 + $0x1520] ss:$16 sps:$4 sm:$0xff]   ;;  %v7982_v8 = vld [vmem:[%s10716_s1 + $0x1528] ss:$16 sps:$4 sm:$0xff]  }
 0x26c   :  { %5313 = vmatprep.subr.bf16.mxu0 %v7895_v9  ;;  %5846 = vmatprep.subr.bf16.mxu1 %v7898_v10  ;;  %v828_v9 = vld [vmem:[%s10718_s2] sm:$0xff] }
 0x26d   :  { %v7987_v10 = vld [vmem:[%s10716_s1 + $0x1544] ss:$16 sps:$4 sm:$0xff]   ;;  %831 = vperm.xlu0 %6944, %v828_v9   ;;  %v8074_v9 = vld [vmem:[%s10716_s1 + $0x1708] ss:$16 sps:$4 sm:$0xff]  }
 0x26f   :  { %5314 = vmatpush1.bf16.msra.mxu0 %v7893_v12  ;;  %5847 = vmatpush1.bf16.msra.mxu1 %v7896_v13  ;;  %v7990_v12 = vld [vmem:[%s10716_s1 + $0x154c] ss:$16 sps:$4 sm:$0xff]   ;;  %v7985_v13 = vld [vmem:[%s10716_s1 + $0x1540] ss:$16 sps:$4 sm:$0xff]  }
 0x270   :  { %5315 = vmatprep.subr.bf16.mxu0 %v7901_v15  ;;  %5848 = vmatprep.subr.bf16.mxu1 %v7904_v11  ;;  %v7988_v15 = vld [vmem:[%s10716_s1 + $0x1548] ss:$16 sps:$4 sm:$0xff]   ;;  %v7993_v11 = vld [vmem:[%s10716_s1 + $0x1564] ss:$16 sps:$4 sm:$0xff]  }
 0x273   :  { %5316 = vmatpush1.bf16.msra.mxu0 %v7899_v17  ;;  %5849 = vmatpush1.bf16.msra.mxu1 %v7902_v14  ;;  %v7996_v17 = vld [vmem:[%s10716_s1 + $0x156c] ss:$16 sps:$4 sm:$0xff]   ;;  %v7991_v14 = vld [vmem:[%s10716_s1 + $0x1560] ss:$16 sps:$4 sm:$0xff]  }
 0x274   :  { %5317 = vmatprep.subr.bf16.mxu0 %v7907_v19  ;;  %5850 = vmatprep.subr.bf16.mxu1 %v7910_v20  ;;  %v7994_v19 = vld [vmem:[%s10716_s1 + $0x1568] ss:$16 sps:$4 sm:$0xff]   ;;  %v7999_v20 = vld [vmem:[%s10716_s1 + $0x1584] ss:$16 sps:$4 sm:$0xff]  }
 0x277   :  { %5318 = vmatpush1.bf16.msra.mxu0 %v7905_v16  ;;  %5851 = vmatpush1.bf16.msra.mxu1 %v7908_v22  ;;  %v8002_v16 = vld [vmem:[%s10716_s1 + $0x158c] ss:$16 sps:$4 sm:$0xff]   ;;  %v7997_v22 = vld [vmem:[%s10716_s1 + $0x1580] ss:$16 sps:$4 sm:$0xff]  }
 0x278   :  { %5319 = vmatprep.subr.bf16.mxu0 %v7913_v23  ;;  %5852 = vmatprep.subr.bf16.mxu1 %v7916_v18  ;;  %v8000_v23 = vld [vmem:[%s10716_s1 + $0x1588] ss:$16 sps:$4 sm:$0xff]   ;;  %v8005_v18 = vld [vmem:[%s10716_s1 + $0x15a4] ss:$16 sps:$4 sm:$0xff]  }
 0x27b   :  { %5320 = vmatpush1.bf16.msra.mxu0 %v7911_v25  ;;  %5853 = vmatpush1.bf16.msra.mxu1 %v7914_v26  ;;  %v8008_v25 = vld [vmem:[%s10716_s1 + $0x15ac] ss:$16 sps:$4 sm:$0xff]   ;;  %v8003_v26 = vld [vmem:[%s10716_s1 + $0x15a0] ss:$16 sps:$4 sm:$0xff]  }
 0x27c   :  { %5321 = vmatprep.subr.bf16.mxu0 %v7919_v27  ;;  %5854 = vmatprep.subr.bf16.mxu1 %v7922_v28  ;;  %v8006_v27 = vld [vmem:[%s10716_s1 + $0x15a8] ss:$16 sps:$4 sm:$0xff]   ;;  %v8011_v28 = vld [vmem:[%s10716_s1 + $0x15c4] ss:$16 sps:$4 sm:$0xff]  }
 0x27f   :  { %5322 = vmatpush1.bf16.msra.mxu0 %v7917_v29  ;;  %5855 = vmatpush1.bf16.msra.mxu1 %v7920_v24  ;;  %v8014_v29 = vld [vmem:[%s10716_s1 + $0x15cc] ss:$16 sps:$4 sm:$0xff]   ;;  %v8009_v24 = vld [vmem:[%s10716_s1 + $0x15c0] ss:$16 sps:$4 sm:$0xff]  }
 0x280   :  { %5332 = vmatprep.subr.bf16.mxu0 %v7927_v31  ;;  %5865 = vmatprep.subr.bf16.mxu1 %v7930_v32  ;;  %v8012_v31 = vld [vmem:[%s10716_s1 + $0x15c8] ss:$16 sps:$4 sm:$0xff]   ;;  %v8017_v32 = vld [vmem:[%s10716_s1 + $0x15e4] ss:$16 sps:$4 sm:$0xff]  }
 0x282   :  { %5324 = vmatmul.mubr.bf16.vlgmr.msra.gmra.mrb[0].mxu0 %v6032_v21  ;;  %5857 = vmatmul.mubr.bf16.vlgmr.msra.gmra.mrb[0].mxu1 %v6032_v21  ;;  %v8020_v21 = vld [vmem:[%s10716_s1 + $0x15ec] ss:$16 sps:$4 sm:$0xff]  }
 0x283   :  { %5333 = vmatpush1.bf16.msra.mxu0 %v7925_v34  ;;  %5866 = vmatpush1.bf16.msra.mxu1 %v7928_v35  ;;  %v8015_v34 = vld [vmem:[%s10716_s1 + $0x15e0] ss:$16 sps:$4 sm:$0xff]   ;;  %v8018_v35 = vld [vmem:[%s10716_s1 + $0x15e8] ss:$16 sps:$4 sm:$0xff]  }
 0x284   :  { %5334 = vmatprep.subr.bf16.mxu0 %v7933_v30  ;;  %5867 = vmatprep.subr.bf16.mxu1 %v7936_v36  ;;  %v8025_v30 = vld [vmem:[%s10716_s1 + $0x1604] ss:$16 sps:$4 sm:$0xff]   ;;  %v8028_v36 = vld [vmem:[%s10716_s1 + $0x160c] ss:$16 sps:$4 sm:$0xff]  }
 0x285   :  { %5364 = vmatprep.mubr.bf16.mxu0 %v6035_v37  ;;  %5897 = vmatprep.mubr.bf16.mxu1 %v6035_v37  ;;  %v6034_v37 = vcombine.low %v10212_v33, %v10212_v33  ;;  %v8031_v33 = vld [vmem:[%s10716_s1 + $0x1624] ss:$16 sps:$4 sm:$0xff]  }
 0x287   :  { %5335 = vmatpush1.bf16.msra.mxu0 %v7931_v38  ;;  %5868 = vmatpush1.bf16.msra.mxu1 %v7934_v39  ;;  %v10417_v38 = vld [vmem:[%s10717_s0 + $0x58] sm:$0xff]  ;;  %v8023_v39 = vld [vmem:[%s10716_s1 + $0x1600] ss:$16 sps:$4 sm:$0xff]  }
 0x288   :  { %5336 = vmatprep.subr.bf16.mxu0 %v7939_v40  ;;  %5869 = vmatprep.subr.bf16.mxu1 %v7942_v41  ;;  %v8026_v40 = vld [vmem:[%s10716_s1 + $0x1608] ss:$16 sps:$4 sm:$0xff]   ;;  %v8034_v41 = vld [vmem:[%s10716_s1 + $0x162c] ss:$16 sps:$4 sm:$0xff]  }
 0x28b   :  { %5337 = vmatpush1.bf16.msra.mxu0 %v7937_v42  ;;  %5870 = vmatpush1.bf16.msra.mxu1 %v7940_v43  ;;  %v6037_v42 = vcombine.high %v10417_v38, %v10417_v38  ;;  %v8029_v43 = vld [vmem:[%s10716_s1 + $0x1620] ss:$16 sps:$4 sm:$0xff]  }
 0x28c   :  { %5338 = vmatprep.subr.bf16.mxu0 %v7945_v44  ;;  %5871 = vmatprep.subr.bf16.mxu1 %v7948_v45  ;;  %v8032_v44 = vld [vmem:[%s10716_s1 + $0x1628] ss:$16 sps:$4 sm:$0xff]   ;;  %v8037_v45 = vld [vmem:[%s10716_s1 + $0x1644] ss:$16 sps:$4 sm:$0xff]  }
 0x28f   :  { %5339 = vmatpush1.bf16.msra.mxu0 %v7943_v46  ;;  %5872 = vmatpush1.bf16.msra.mxu1 %v7946_v47  ;;  %v8040_v46 = vld [vmem:[%s10716_s1 + $0x164c] ss:$16 sps:$4 sm:$0xff]   ;;  %v8035_v47 = vld [vmem:[%s10716_s1 + $0x1640] ss:$16 sps:$4 sm:$0xff]  }
 0x290   :  { %5340 = vmatprep.subr.bf16.mxu0 %v7951_v48  ;;  %5873 = vmatprep.subr.bf16.mxu1 %v7954_v49  ;;  %v8038_v48 = vld [vmem:[%s10716_s1 + $0x1648] ss:$16 sps:$4 sm:$0xff]   ;;  %v8043_v49 = vld [vmem:[%s10716_s1 + $0x1664] ss:$16 sps:$4 sm:$0xff]  }
 0x293   :  { %5341 = vmatpush1.bf16.msra.mxu0 %v7949_v50  ;;  %5874 = vmatpush1.bf16.msra.mxu1 %v7952_v51  ;;  %v8046_v50 = vld [vmem:[%s10716_s1 + $0x166c] ss:$16 sps:$4 sm:$0xff]   ;;  %v8041_v51 = vld [vmem:[%s10716_s1 + $0x1660] ss:$16 sps:$4 sm:$0xff]  }
 0x294   :  { %5342 = vmatprep.subr.bf16.mxu0 %v7957_v52  ;;  %5875 = vmatprep.subr.bf16.mxu1 %v7960_v53  ;;  %v8044_v52 = vld [vmem:[%s10716_s1 + $0x1668] ss:$16 sps:$4 sm:$0xff]   ;;  %v8049_v53 = vld [vmem:[%s10716_s1 + $0x1684] ss:$16 sps:$4 sm:$0xff]  }
 0x297   :  { %5343 = vmatpush1.bf16.msra.mxu0 %v7955_v54  ;;  %5876 = vmatpush1.bf16.msra.mxu1 %v7958_v55  ;;  %v8052_v54 = vld [vmem:[%s10716_s1 + $0x168c] ss:$16 sps:$4 sm:$0xff]   ;;  %v8047_v55 = vld [vmem:[%s10716_s1 + $0x1680] ss:$16 sps:$4 sm:$0xff]  }
 0x298   :  { %5344 = vmatprep.subr.bf16.mxu0 %v7963_v56  ;;  %5877 = vmatprep.subr.bf16.mxu1 %v7966_v57  ;;  %v8050_v56 = vld [vmem:[%s10716_s1 + $0x1688] ss:$16 sps:$4 sm:$0xff]   ;;  %v8055_v57 = vld [vmem:[%s10716_s1 + $0x16a4] ss:$16 sps:$4 sm:$0xff]  }
 0x29b   :  { %5345 = vmatpush1.bf16.msra.mxu0 %v7961_v58  ;;  %5878 = vmatpush1.bf16.msra.mxu1 %v7964_v59  ;;  %v8058_v58 = vld [vmem:[%s10716_s1 + $0x16ac] ss:$16 sps:$4 sm:$0xff]   ;;  %v8053_v59 = vld [vmem:[%s10716_s1 + $0x16a0] ss:$16 sps:$4 sm:$0xff]  }
 0x29c   :  { %5346 = vmatprep.subr.bf16.mxu0 %v7969_v60  ;;  %5879 = vmatprep.subr.bf16.mxu1 %v7972_v61  ;;  %v8056_v60 = vld [vmem:[%s10716_s1 + $0x16a8] ss:$16 sps:$4 sm:$0xff]   ;;  %v8061_v61 = vld [vmem:[%s10716_s1 + $0x16c4] ss:$16 sps:$4 sm:$0xff]  }
 0x29f   :  { %5347 = vmatpush1.bf16.msra.mxu0 %v7967_v62  ;;  %5880 = vmatpush1.bf16.msra.mxu1 %v7970_v63  ;;  %v8064_v62 = vld [vmem:[%s10716_s1 + $0x16cc] ss:$16 sps:$4 sm:$0xff]   ;;  %v8059_v63 = vld [vmem:[%s10716_s1 + $0x16c0] ss:$16 sps:$4 sm:$0xff]  }
 0x2a0   :  { %5348 = vmatprep.subr.bf16.mxu0 %v7975_v0  ;;  %5881 = vmatprep.subr.bf16.mxu1 %v7978_v1  ;;  %v8062_v0 = vld [vmem:[%s10716_s1 + $0x16c8] ss:$16 sps:$4 sm:$0xff]   ;;  %v8067_v1 = vld [vmem:[%s10716_s1 + $0x16e4] ss:$16 sps:$4 sm:$0xff]  }
 0x2a3   :  { %5349 = vmatpush1.bf16.msra.mxu0 %v7973_v2  ;;  %5882 = vmatpush1.bf16.msra.mxu1 %v7976_v3  ;;  %v8070_v2 = vld [vmem:[%s10716_s1 + $0x16ec] ss:$16 sps:$4 sm:$0xff]   ;;  %v8065_v3 = vld [vmem:[%s10716_s1 + $0x16e0] ss:$16 sps:$4 sm:$0xff]  }
 0x2a4   :  { %5350 = vmatprep.subr.bf16.mxu0 %v7981_v4  ;;  %5883 = vmatprep.subr.bf16.mxu1 %v7984_v5  ;;  %v8068_v4 = vld [vmem:[%s10716_s1 + $0x16e8] ss:$16 sps:$4 sm:$0xff]   ;;  %v8073_v5 = vld [vmem:[%s10716_s1 + $0x1704] ss:$16 sps:$4 sm:$0xff]  }
 0x2a7   :  { %5351 = vmatpush1.bf16.msra.mxu0 %v7979_v7  ;;  %5884 = vmatpush1.bf16.msra.mxu1 %v7982_v8  ;;  %v8076_v7 = vld [vmem:[%s10716_s1 + $0x170c] ss:$16 sps:$4 sm:$0xff]   ;;  %v8071_v8 = vld [vmem:[%s10716_s1 + $0x1700] ss:$16 sps:$4 sm:$0xff]  }
 0x2a8   :  { %5352 = vmatprep.subr.bf16.mxu0 %v7987_v10  ;;  %5885 = vmatprep.subr.bf16.mxu1 %v7990_v12  ;;  %v8079_v10 = vld [vmem:[%s10716_s1 + $0x1724] ss:$16 sps:$4 sm:$0xff]   ;;  %v8082_v12 = vld [vmem:[%s10716_s1 + $0x172c] ss:$16 sps:$4 sm:$0xff]  }
 0x2ab   :  { %5353 = vmatpush1.bf16.msra.mxu0 %v7985_v13  ;;  %5886 = vmatpush1.bf16.msra.mxu1 %v7988_v15  ;;  %v8077_v13 = vld [vmem:[%s10716_s1 + $0x1720] ss:$16 sps:$4 sm:$0xff]   ;;  %v8080_v15 = vld [vmem:[%s10716_s1 + $0x1728] ss:$16 sps:$4 sm:$0xff]  }
 0x2ac   :  { %5354 = vmatprep.subr.bf16.mxu0 %v7993_v11  ;;  %5887 = vmatprep.subr.bf16.mxu1 %v7996_v17  ;;  %v8085_v11 = vld [vmem:[%s10716_s1 + $0x1744] ss:$16 sps:$4 sm:$0xff]   ;;  %v8088_v17 = vld [vmem:[%s10716_s1 + $0x174c] ss:$16 sps:$4 sm:$0xff]  }
 0x2af   :  { %5355 = vmatpush1.bf16.msra.mxu0 %v7991_v14  ;;  %5888 = vmatpush1.bf16.msra.mxu1 %v7994_v19  ;;  %v8083_v14 = vld [vmem:[%s10716_s1 + $0x1740] ss:$16 sps:$4 sm:$0xff]   ;;  %v8086_v19 = vld [vmem:[%s10716_s1 + $0x1748] ss:$16 sps:$4 sm:$0xff]  }
 0x2b0   :  { %5356 = vmatprep.subr.bf16.mxu0 %v7999_v20  ;;  %5889 = vmatprep.subr.bf16.mxu1 %v8002_v16  ;;  %v8091_v20 = vld [vmem:[%s10716_s1 + $0x1764] ss:$16 sps:$4 sm:$0xff]   ;;  %v8094_v16 = vld [vmem:[%s10716_s1 + $0x176c] ss:$16 sps:$4 sm:$0xff]  }
 0x2b3   :  { %5357 = vmatpush1.bf16.msra.mxu0 %v7997_v22  ;;  %5890 = vmatpush1.bf16.msra.mxu1 %v8000_v23  ;;  %v8089_v22 = vld [vmem:[%s10716_s1 + $0x1760] ss:$16 sps:$4 sm:$0xff]   ;;  %v8092_v23 = vld [vmem:[%s10716_s1 + $0x1768] ss:$16 sps:$4 sm:$0xff]  }
 0x2b4   :  { %5358 = vmatprep.subr.bf16.mxu0 %v8005_v18  ;;  %5891 = vmatprep.subr.bf16.mxu1 %v8008_v25  ;;  %v8097_v18 = vld [vmem:[%s10716_s1 + $0x1784] ss:$16 sps:$4 sm:$0xff]   ;;  %v8100_v25 = vld [vmem:[%s10716_s1 + $0x178c] ss:$16 sps:$4 sm:$0xff]  }
 0x2b7   :  { %5359 = vmatpush1.bf16.msra.mxu0 %v8003_v26  ;;  %5892 = vmatpush1.bf16.msra.mxu1 %v8006_v27  ;;  %v8095_v26 = vld [vmem:[%s10716_s1 + $0x1780] ss:$16 sps:$4 sm:$0xff]   ;;  %v8098_v27 = vld [vmem:[%s10716_s1 + $0x1788] ss:$16 sps:$4 sm:$0xff]  }
 0x2b8   :  { %5360 = vmatprep.subr.bf16.mxu0 %v8011_v28  ;;  %5893 = vmatprep.subr.bf16.mxu1 %v8014_v29  ;;  %v8103_v28 = vld [vmem:[%s10716_s1 + $0x17a4] ss:$16 sps:$4 sm:$0xff]   ;;  %v8106_v29 = vld [vmem:[%s10716_s1 + $0x17ac] ss:$16 sps:$4 sm:$0xff]  }
 0x2bb   :  { %5361 = vmatpush1.bf16.msra.mxu0 %v8009_v24  ;;  %5894 = vmatpush1.bf16.msra.mxu1 %v8012_v31  ;;  %v8101_v24 = vld [vmem:[%s10716_s1 + $0x17a0] ss:$16 sps:$4 sm:$0xff]   ;;  %v8104_v31 = vld [vmem:[%s10716_s1 + $0x17a8] ss:$16 sps:$4 sm:$0xff]  }
 0x2bc   :  { %5362 = vmatprep.subr.bf16.mxu0 %v8017_v32  ;;  %5895 = vmatprep.subr.bf16.mxu1 %v8020_v21  ;;  %v8109_v32 = vld [vmem:[%s10716_s1 + $0x17c4] ss:$16 sps:$4 sm:$0xff]   ;;  %v8112_v21 = vld [vmem:[%s10716_s1 + $0x17cc] ss:$16 sps:$4 sm:$0xff]  }
 0x2bf   :  { %5363 = vmatpush1.bf16.msra.mxu0 %v8015_v34  ;;  %5896 = vmatpush1.bf16.msra.mxu1 %v8018_v35  ;;  %v8107_v34 = vld [vmem:[%s10716_s1 + $0x17c0] ss:$16 sps:$4 sm:$0xff]   ;;  %v8110_v35 = vld [vmem:[%s10716_s1 + $0x17c8] ss:$16 sps:$4 sm:$0xff]  }
 0x2c0   :  { %5373 = vmatprep.subr.bf16.mxu0 %v8025_v30  ;;  %5906 = vmatprep.subr.bf16.mxu1 %v8028_v36  ;;  %v8115_v30 = vld [vmem:[%s10716_s1 + $0x17e4] ss:$16 sps:$4 sm:$0xff]   ;;  %v8118_v36 = vld [vmem:[%s10716_s1 + $0x17ec] ss:$16 sps:$4 sm:$0xff]  }
 0x2c2   :  { %5365 = vmatmul.mubr.bf16.vlgmr.msra.gmra.mrb[0].mxu0 %v6034_v37  ;;  %5898 = vmatmul.mubr.bf16.vlgmr.msra.gmra.mrb[0].mxu1 %v6034_v37  ;;  %v8113_v37 = vld [vmem:[%s10716_s1 + $0x17e0] ss:$16 sps:$4 sm:$0xff]  }
 0x2c3   :  { %5374 = vmatpush1.bf16.msra.mxu0 %v8023_v39  ;;  %5907 = vmatpush1.bf16.msra.mxu1 %v8026_v40  ;;  %v8116_v39 = vld [vmem:[%s10716_s1 + $0x17e8] ss:$16 sps:$4 sm:$0xff]   ;;  %v8123_v40 = vld [vmem:[%s10716_s1 + $0x1804] ss:$16 sps:$4 sm:$0xff]  }
 0x2c4   :  { %5375 = vmatprep.subr.bf16.mxu0 %v8031_v33  ;;  %5908 = vmatprep.subr.bf16.mxu1 %v8034_v41  ;;  %v8126_v33 = vld [vmem:[%s10716_s1 + $0x180c] ss:$16 sps:$4 sm:$0xff]   ;;  %v6036_v41 = vcombine.low %v10417_v38, %v10417_v38 }
 0x2c5   :  { %5405 = vmatprep.mubr.bf16.mxu0 %v6037_v42  ;;  %5938 = vmatprep.mubr.bf16.mxu1 %v6037_v42  ;;  %v8121_v42 = vld [vmem:[%s10716_s1 + $0x1800] ss:$16 sps:$4 sm:$0xff]   ;;  %v8132_v38 = vld [vmem:[%s10716_s1 + $0x182c] ss:$16 sps:$4 sm:$0xff]  }
 0x2c7   :  { %5376 = vmatpush1.bf16.msra.mxu0 %v8029_v43  ;;  %5909 = vmatpush1.bf16.msra.mxu1 %v8032_v44  ;;  %v8124_v43 = vld [vmem:[%s10716_s1 + $0x1808] ss:$16 sps:$4 sm:$0xff]   ;;  %v8129_v44 = vld [vmem:[%s10716_s1 + $0x1824] ss:$16 sps:$4 sm:$0xff]  }
 0x2c8   :  { %5377 = vmatprep.subr.bf16.mxu0 %v8037_v45  ;;  %5910 = vmatprep.subr.bf16.mxu1 %v8040_v46  ;;  %v8127_v45 = vld [vmem:[%s10716_s1 + $0x1820] ss:$16 sps:$4 sm:$0xff]   ;;  %v8130_v46 = vld [vmem:[%s10716_s1 + $0x1828] ss:$16 sps:$4 sm:$0xff]  }
 0x2cb   :  { %5378 = vmatpush1.bf16.msra.mxu0 %v8035_v47  ;;  %5911 = vmatpush1.bf16.msra.mxu1 %v8038_v48  ;;  %v8135_v47 = vld [vmem:[%s10716_s1 + $0x1844] ss:$16 sps:$4 sm:$0xff]   ;;  %v8138_v48 = vld [vmem:[%s10716_s1 + $0x184c] ss:$16 sps:$4 sm:$0xff]  }
 0x2cc   :  { %5379 = vmatprep.subr.bf16.mxu0 %v8043_v49  ;;  %5912 = vmatprep.subr.bf16.mxu1 %v8046_v50  ;;  %v8133_v49 = vld [vmem:[%s10716_s1 + $0x1840] ss:$16 sps:$4 sm:$0xff]   ;;  %v8136_v50 = vld [vmem:[%s10716_s1 + $0x1848] ss:$16 sps:$4 sm:$0xff]  }
 0x2cf   :  { %5380 = vmatpush1.bf16.msra.mxu0 %v8041_v51  ;;  %5913 = vmatpush1.bf16.msra.mxu1 %v8044_v52  ;;  %v8141_v51 = vld [vmem:[%s10716_s1 + $0x1864] ss:$16 sps:$4 sm:$0xff]   ;;  %v8139_v52 = vld [vmem:[%s10716_s1 + $0x1860] ss:$16 sps:$4 sm:$0xff]  }
 0x2d0   :  { %5381 = vmatprep.subr.bf16.mxu0 %v8049_v53  ;;  %5914 = vmatprep.subr.bf16.mxu1 %v8052_v54  ;;  %v8142_v53 = vld [vmem:[%s10716_s1 + $0x1868] ss:$16 sps:$4 sm:$0xff]   ;;  %v8147_v54 = vld [vmem:[%s10716_s1 + $0x1884] ss:$16 sps:$4 sm:$0xff]  }
 0x2d3   :  { %5382 = vmatpush1.bf16.msra.mxu0 %v8047_v55  ;;  %5915 = vmatpush1.bf16.msra.mxu1 %v8050_v56  ;;  %v8150_v55 = vld [vmem:[%s10716_s1 + $0x188c] ss:$16 sps:$4 sm:$0xff]   ;;  %v8145_v56 = vld [vmem:[%s10716_s1 + $0x1880] ss:$16 sps:$4 sm:$0xff]  }
 0x2d4   :  { %5383 = vmatprep.subr.bf16.mxu0 %v8055_v57  ;;  %5916 = vmatprep.subr.bf16.mxu1 %v8058_v58  ;;  %v8148_v57 = vld [vmem:[%s10716_s1 + $0x1888] ss:$16 sps:$4 sm:$0xff]   ;;  %v8153_v58 = vld [vmem:[%s10716_s1 + $0x18a4] ss:$16 sps:$4 sm:$0xff]  }
 0x2d7   :  { %5384 = vmatpush1.bf16.msra.mxu0 %v8053_v59  ;;  %5917 = vmatpush1.bf16.msra.mxu1 %v8056_v60  ;;  %v8156_v59 = vld [vmem:[%s10716_s1 + $0x18ac] ss:$16 sps:$4 sm:$0xff]   ;;  %v8151_v60 = vld [vmem:[%s10716_s1 + $0x18a0] ss:$16 sps:$4 sm:$0xff]  }
 0x2d8   :  { %5385 = vmatprep.subr.bf16.mxu0 %v8061_v61  ;;  %5918 = vmatprep.subr.bf16.mxu1 %v8064_v62  ;;  %v8154_v61 = vld [vmem:[%s10716_s1 + $0x18a8] ss:$16 sps:$4 sm:$0xff]   ;;  %v8159_v62 = vld [vmem:[%s10716_s1 + $0x18c4] ss:$16 sps:$4 sm:$0xff]  }
 0x2db   :  { %5386 = vmatpush1.bf16.msra.mxu0 %v8059_v63  ;;  %5919 = vmatpush1.bf16.msra.mxu1 %v8062_v0  ;;  %v8162_v63 = vld [vmem:[%s10716_s1 + $0x18cc] ss:$16 sps:$4 sm:$0xff]   ;;  %v8157_v0 = vld [vmem:[%s10716_s1 + $0x18c0] ss:$16 sps:$4 sm:$0xff]  }
 0x2dc   :  { %5387 = vmatprep.subr.bf16.mxu0 %v8067_v1  ;;  %5920 = vmatprep.subr.bf16.mxu1 %v8070_v2  ;;  %v8160_v1 = vld [vmem:[%s10716_s1 + $0x18c8] ss:$16 sps:$4 sm:$0xff]   ;;  %v8165_v2 = vld [vmem:[%s10716_s1 + $0x18e4] ss:$16 sps:$4 sm:$0xff]  }
 0x2df   :  { %5388 = vmatpush1.bf16.msra.mxu0 %v8065_v3  ;;  %5921 = vmatpush1.bf16.msra.mxu1 %v8068_v4  ;;  %v8168_v3 = vld [vmem:[%s10716_s1 + $0x18ec] ss:$16 sps:$4 sm:$0xff]   ;;  %v8163_v4 = vld [vmem:[%s10716_s1 + $0x18e0] ss:$16 sps:$4 sm:$0xff]  }
 0x2e0   :  { %5389 = vmatprep.subr.bf16.mxu0 %v8073_v5  ;;  %5922 = vmatprep.subr.bf16.mxu1 %v8076_v7  ;;  %v8166_v5 = vld [vmem:[%s10716_s1 + $0x18e8] ss:$16 sps:$4 sm:$0xff]   ;;  %v8169_v7 = vld [vmem:[%s10717_s0 + $0x60] ss:$0 sps:$4 sm:$0xff]  }
 0x2e3   :  { %5390 = vmatpush1.bf16.msra.mxu0 %v8071_v8  ;;  %5923 = vmatpush1.bf16.msra.mxu1 %v8074_v9 }
 0x2e4   :  { %5391 = vmatprep.subr.bf16.mxu0 %v8079_v10  ;;  %5924 = vmatprep.subr.bf16.mxu1 %v8082_v12 }
 0x2e7   :  { %5392 = vmatpush1.bf16.msra.mxu0 %v8077_v13  ;;  %5925 = vmatpush1.bf16.msra.mxu1 %v8080_v15 }
 0x2e8   :  { %5393 = vmatprep.subr.bf16.mxu0 %v8085_v11  ;;  %5926 = vmatprep.subr.bf16.mxu1 %v8088_v17 }
 0x2eb   :  { %5394 = vmatpush1.bf16.msra.mxu0 %v8083_v14  ;;  %5927 = vmatpush1.bf16.msra.mxu1 %v8086_v19 }
 0x2ec   :  { %5395 = vmatprep.subr.bf16.mxu0 %v8091_v20  ;;  %5928 = vmatprep.subr.bf16.mxu1 %v8094_v16  ;;  %v832_v8 = vpop.permute.xlu0 %831 }
 0x2ef   :  { %5396 = vmatpush1.bf16.msra.mxu0 %v8089_v22  ;;  %5929 = vmatpush1.bf16.msra.mxu1 %v8092_v23 }
 0x2f0   :  { %5397 = vmatprep.subr.bf16.mxu0 %v8097_v18  ;;  %5930 = vmatprep.subr.bf16.mxu1 %v8100_v25 }
 0x2f3   :  { %5398 = vmatpush1.bf16.msra.mxu0 %v8095_v26  ;;  %5931 = vmatpush1.bf16.msra.mxu1 %v8098_v27 }
 0x2f4   :  { %5399 = vmatprep.subr.bf16.mxu0 %v8103_v28  ;;  %5932 = vmatprep.subr.bf16.mxu1 %v8106_v29 }
 0x2f7   :  { %5400 = vmatpush1.bf16.msra.mxu0 %v8101_v24  ;;  %5933 = vmatpush1.bf16.msra.mxu1 %v8104_v31 }
 0x2f8   :  { %5401 = vmatprep.subr.bf16.mxu0 %v8109_v32  ;;  %5934 = vmatprep.subr.bf16.mxu1 %v8112_v21 }
 0x2fb   :  { %5402 = vmatpush1.bf16.msra.mxu0 %v8107_v34  ;;  %5935 = vmatpush1.bf16.msra.mxu1 %v8110_v35 }
 0x2fc   :  { %5403 = vmatprep.subr.bf16.mxu0 %v8115_v30  ;;  %5936 = vmatprep.subr.bf16.mxu1 %v8118_v36 }
 0x2ff   :  { %5404 = vmatpush1.bf16.msra.mxu0 %v8113_v37  ;;  %5937 = vmatpush1.bf16.msra.mxu1 %v8116_v39 }
 0x300   :  { %5414 = vmatprep.subr.bf16.mxu0 %v8123_v40  ;;  %5947 = vmatprep.subr.bf16.mxu1 %v8126_v33 }
 0x302   :  { %5406 = vmatmul.mubr.bf16.vlgmr.msra.gmra.mrb[0].mxu0 %v6036_v41  ;;  %5939 = vmatmul.mubr.bf16.vlgmr.msra.gmra.mrb[0].mxu1 %v6036_v41 }
 0x303   :  { %5415 = vmatpush1.bf16.msra.mxu0 %v8121_v42  ;;  %5948 = vmatpush1.bf16.msra.mxu1 %v8124_v43 }
 0x304   :  { %5416 = vmatprep.subr.bf16.mxu0 %v8129_v44  ;;  %5949 = vmatprep.subr.bf16.mxu1 %v8132_v38 }
 0x305   :  { %5446 = vmatprep.mubr.bf16.mxu0 %v8178_v6  ;;  %5979 = vmatprep.mubr.bf16.mxu1 %v8178_v6  ;;  %v8144_v6 = vld [vmem:[%s10716_s1 + $0x186c] ss:$16 sps:$4 sm:$0xff]  }
 0x307   :  { %5417 = vmatpush1.bf16.msra.mxu0 %v8127_v45  ;;  %5950 = vmatpush1.bf16.msra.mxu1 %v8130_v46 }
 0x308   :  { %5418 = vmatprep.subr.bf16.mxu0 %v8135_v47  ;;  %5951 = vmatprep.subr.bf16.mxu1 %v8138_v48 }
 0x30b   :  { %5419 = vmatpush1.bf16.msra.mxu0 %v8133_v49  ;;  %5952 = vmatpush1.bf16.msra.mxu1 %v8136_v50 }
 0x30c   :  { %5420 = vmatprep.subr.bf16.mxu0 %v8141_v51  ;;  %5953 = vmatprep.subr.bf16.mxu1 %v8144_v6 }
 0x30f   :  { %5421 = vmatpush1.bf16.msra.mxu0 %v8139_v52  ;;  %5954 = vmatpush1.bf16.msra.mxu1 %v8142_v53 }
 0x310   :  { %5422 = vmatprep.subr.bf16.mxu0 %v8147_v54  ;;  %5955 = vmatprep.subr.bf16.mxu1 %v8150_v55 }
 0x313   :  { %5423 = vmatpush1.bf16.msra.mxu0 %v8145_v56  ;;  %5956 = vmatpush1.bf16.msra.mxu1 %v8148_v57 }
 0x314   :  { %5424 = vmatprep.subr.bf16.mxu0 %v8153_v58  ;;  %5957 = vmatprep.subr.bf16.mxu1 %v8156_v59 }
 0x317   :  { %5425 = vmatpush1.bf16.msra.mxu0 %v8151_v60  ;;  %5958 = vmatpush1.bf16.msra.mxu1 %v8154_v61 }
 0x318   :  { %5426 = vmatprep.subr.bf16.mxu0 %v8159_v62  ;;  %5959 = vmatprep.subr.bf16.mxu1 %v8162_v63 }
 0x31b   :  { %5427 = vmatpush1.bf16.msra.mxu0 %v8157_v0  ;;  %5960 = vmatpush1.bf16.msra.mxu1 %v8160_v1 }
 0x31c   :  { %5428 = vmatprep.subr.bf16.mxu0 %v8165_v2  ;;  %5961 = vmatprep.subr.bf16.mxu1 %v8168_v3 }
 0x31f   :  { %5429 = vmatpush1.bf16.msra.mxu0 %v8163_v4  ;;  %5962 = vmatpush1.bf16.msra.mxu1 %v8166_v5 }
 0x322   :  { %5447 = vmatmul.mubr.bf16.vlgmr.msra.gmra.mrb[0].mxu0 %v8169_v7  ;;  %5980 = vmatmul.mubr.bf16.vlgmr.msra.gmra.mrb[0].mxu1 %v8169_v7 }
 0x3f5   :  { %v5448_v9 = vpop.f32.mrb[0].mxu0  ;;  %v5981_v10 = vpop.f32.mrb[0].mxu1 }
 0x3f6   :  { %v6843_v12 = vadd.f32 %v5448_v9, %v832_v8  ;;  %v6845_v13 = vadd.f32 %v5981_v10, %v832_v8  ;;  %v5450_v15 = vpop.f32.mrb[1].mxu0  ;;  %v5983_v11 = vpop.f32.mrb[1].mxu1 }
 0x3f7   :  { %v6844_v17 = vadd.f32 %v5450_v15, %v832_v8  ;;  %v6846_v14 = vadd.f32 %v5983_v11, %v832_v8  ;;  %v5452_v19 = vpop.f32.mrb[2].mxu0  ;;  %v5985_v20 = vpop.f32.mrb[2].mxu1 }
 0x3f8   :  { %8170 = vtanh.f32 %v6843_v12  ;;  %v5453_v16 = vpop.f32.mrb[3].mxu0  ;;  %v5986_v22 = vpop.f32.mrb[3].mxu1 }
 0x3f9   :  { %8172 = vtanh.f32 %v6845_v13 }
 0x3fa   :  { %8174 = vtanh.f32 %v6844_v17 }
 0x3fb   :  { %8176 = vtanh.f32 %v6846_v14 }
 0x402   :  { %v8171_v23 = vpop.eup %8170 }
 0x403   :  { %v8173_v18 = vpop.eup %8172 }
 0x404   :  { %v8175_v25 = vpop.eup %8174 }
 0x405   :  { %v8177_v26 = vpop.eup %8176  ;;  %v6841_v27 = vpack.c.bf16 %v8175_v25, %v8171_v23 }
 0x406   :  { %v6842_v28 = vpack.c.bf16 %v8177_v26, %v8173_v18 }
 0x407   :  { %6008 = vst [vmem:[%s10719_s3] sm:$0xff] %v6841_v27 }
 0x408   :  { %6009 = vst [vmem:[%s10719_s3 + $0x8] sm:$0xff] %v6842_v28 }

</bundles_post_ra>
